<compile_context>
chip_gen: v6e
topology: v6e:2x2x1
jax: 0.10.0
libtpu: 0.0.40
codegen_flags: <defaults>
</compile_context>

<pallas_src>
import functools

import numpy as np
import jax
import jax.numpy as jnp
from jax.experimental import pallas as pl
from jax.experimental.pallas import tpu as pltpu


# ----------------------------------------------------------------------------- model structure

STEM_IN = 8                       # 3-channel image is zero-padded to 8 channels once in the wrapper
FPN_CH = 32
VMEM_LIMIT = 32 * 1024 * 1024     # safe scoped-VMEM budget on v5e/v6e/v7x

BOTTOM_UP = [
    # name, H_in, W_in, C_in, C_out   (all 3x3, stride 2, pad 1, ReLU)
    ("stem", 64, 64, STEM_IN, 8),
    ("c2",   32, 32, 8,  8),
    ("c3",   16, 16, 8,  16),
    ("c4",    8,  8, 16, 32),
    ("c5",    4,  4, 32, 64),
]
# FPN pyramid levels: (name, spatial size, channels) of the bottom-up feature feeding the lateral
LEVELS = [("c2", 16, 8), ("c3", 8, 16), ("c4", 4, 32), ("c5", 2, 64)]


# ----------------------------------------------------------------------------- weight expansion helpers
# All expansions are done ONCE at init time (numpy); they turn every conv into plain 2-D matmuls on a
# row-flattened (H, W*C) activation, which is what keeps the fused kernel free of reshapes/strided ops.

def _row_gather_mats(h_in, h_out, stride):
    """S[i]: (h_out, h_in) 0/1 matrix selecting input row stride*r + i - 1 (zero row when OOB)."""
    S = np.zeros((3, h_out, h_in), np.float32)
    for i in range(3):
        for r in range(h_out):
            src = stride * r + i - 1
            if 0 <= src < h_in:
                S[i, r, src] = 1.0
    return S


def _col_expand_weights(w, w_in, w_out, stride):
    """w: (3,3,Cin,Cout) -> M[i]: (w_in*Cin, w_out*Cout), folding column taps + channel contraction."""
    cin, cout = w.shape[2], w.shape[3]
    M = np.zeros((3, w_in * cin, w_out * cout), np.float32)
    for i in range(3):
        for oc in range(w_out):
            for j in range(3):
                src = stride * oc + j - 1
                if 0 <= src < w_in:
                    M[i, src * cin:(src + 1) * cin, oc * cout:(oc + 1) * cout] = w[i, j]
    return M


def _block_diag(w, reps):
    """1x1 conv on the flattened layout: w (Cin, Cout) -> block-diagonal (reps*Cin, reps*Cout)."""
    cin, cout = w.shape
    L = np.zeros((reps * cin, reps * cout), np.float32)
    for r in range(reps):
        L[r * cin:(r + 1) * cin, r * cout:(r + 1) * cout] = w
    return L


def _upsample_mats(h, w, c):
    """Nearest x2 upsample of x:(h, w*c) expressed as  R @ x @ U."""
    R = np.zeros((2 * h, h), np.float32)
    for r in range(2 * h):
        R[r, r // 2] = 1.0
    U = np.zeros((w * c, 2 * w * c), np.float32)
    for ow in range(2 * w):
        sw = ow // 2
        for ch in range(c):
            U[sw * c + ch, ow * c + ch] = 1.0
    return R, U


# ----------------------------------------------------------------------------- parameters

def init_params(key):
    keys = jax.random.split(key, 16)
    ki = 0

    def conv_wb(k, cin, cout):
        k1, k2 = jax.random.split(k)
        w = jax.random.normal(k1, (3, 3, cin, cout), jnp.float32) * 0.1
        b = jax.random.normal(k2, (cout,), jnp.float32) * 0.05
        return w, b

    raw = {"bottom_up": [], "lateral": [], "output": []}
    for _, _, _, cin, cout in BOTTOM_UP:
        raw["bottom_up"].append(conv_wb(keys[ki], cin, cout)); ki += 1
    for _, _, c in LEVELS:
        k1, k2 = jax.random.split(keys[ki]); ki += 1
        w = jax.random.normal(k1, (c, FPN_CH), jnp.float32) * 0.1
        b = jax.random.normal(k2, (FPN_CH,), jnp.float32) * 0.05
        raw["lateral"].append((w, b))
    for _ in LEVELS:
        raw["output"].append(conv_wb(keys[ki], FPN_CH, FPN_CH)); ki += 1
    return raw


def pack_params(raw):
    """Flat ordered list of bf16 expanded weights / f32 bias rows consumed positionally by the kernel."""
    bf = lambda a: jnp.asarray(a, jnp.bfloat16)
    f32 = lambda a: jnp.asarray(a, jnp.float32)
    flat = []
    # 1) bottom-up 3x3 stride-2 convs
    for (_, hi, wi, _, cout), (w, b) in zip(BOTTOM_UP, raw["bottom_up"]):
        ho, wo = hi // 2, wi // 2
        w_np, b_np = np.asarray(w), np.asarray(b)
        flat += [bf(_row_gather_mats(hi, ho, 2)),
                 bf(_col_expand_weights(w_np, wi, wo, 2)),
                 f32(np.tile(b_np, wo)[None, :])]
    # 2) laterals (1x1 convs)
    for (_, hw, c), (w, b) in zip(LEVELS, raw["lateral"]):
        flat += [bf(_block_diag(np.asarray(w), hw)),
                 f32(np.tile(np.asarray(b), hw)[None, :])]
    # 3) top-down nearest x2 upsamples: t5 (2x2) -> t4, t4 (4x4) -> t3, t3 (8x8) -> t2
    for src_hw in (2, 4, 8):
        R, U = _upsample_mats(src_hw, src_hw, FPN_CH)
        flat += [bf(R), bf(U)]
    # 4) output 3x3 stride-1 convs
    for (_, hw, _), (w, b) in zip(LEVELS, raw["output"]):
        w_np, b_np = np.asarray(w), np.asarray(b)
        flat += [bf(_row_gather_mats(hw, hw, 1)),
                 bf(_col_expand_weights(w_np, hw, hw, 1)),
                 f32(np.tile(b_np, hw)[None, :])]
    assert len(flat) == 5 * 3 + 4 * 2 + 3 * 2 + 4 * 3
    return flat


# ----------------------------------------------------------------------------- fused Pallas kernel

def _conv_flat(x, s_ref, m_ref, b_ref, relu):
    """3x3 conv on a row-flattened activation x:(H, W*Cin) -> (Ho, Wo*Cout).

    Per kernel row i: a 0/1 row-gather matmul (stride + zero padding), then ONE matmul whose K folds
    the 3 column taps and the input channels (K = W*Cin = 128..512). f32 accumulation, bias, ReLU.
    """
    ho = s_ref.shape[1]
    n_out = m_ref.shape[2]
    acc = jnp.zeros((ho, n_out), jnp.float32)
    for i in range(3):
        g = jnp.dot(s_ref[i], x, preferred_element_type=jnp.float32).astype(jnp.bfloat16)
        acc = acc + jnp.dot(g, m_ref[i], preferred_element_type=jnp.float32)
    acc = acc + b_ref[...]
    if relu:
        acc = jnp.maximum(acc, 0.0)
    return acc.astype(jnp.bfloat16)


def _upsample2x(x, r_ref, u_ref):
    """Nearest x2 upsample of x:(h, w*32) via two 0/1 matmuls (exact)."""
    y = jnp.dot(x, u_ref[...], preferred_element_type=jnp.float32).astype(jnp.bfloat16)
    return jnp.dot(r_ref[...], y, preferred_element_type=jnp.float32).astype(jnp.bfloat16)


def _fused_fpn_kernel(n_params, *refs):
    x_ref = refs[0]
    params = refs[1:1 + n_params]
    p2_ref, p3_ref, p4_ref, p5_ref = refs[1 + n_params:]

    it = iter(params)
    nxt = lambda: next(it)

    # ---- bottom-up chain: stem -> c2 -> c3 -> c4 -> c5, all activations stay on-chip
    x = x_ref[...]                                   # (64, 512) bf16, row-flattened image
    feats = []
    for li in range(len(BOTTOM_UP)):
        s_ref, m_ref, b_ref = nxt(), nxt(), nxt()
        x = _conv_flat(x, s_ref, m_ref, b_ref, relu=True)
        if li > 0:
            feats.append(x)
    c2, c3, c4, c5 = feats

    # ---- FPN laterals: 1x1 convs as block-diagonal matmuls on the flattened layout
    lats = []
    for f in (c2, c3, c4, c5):
        l_ref, bl_ref = nxt(), nxt()
        l = jnp.dot(f, l_ref[...], preferred_element_type=jnp.float32) + bl_ref[...]
        lats.append(l.astype(jnp.bfloat16))
    l2, l3, l4, l5 = lats

    # ---- top-down pathway: nearest x2 upsample + add
    t5 = l5
    r_ref, u_ref = nxt(), nxt(); t4 = l4 + _upsample2x(t5, r_ref, u_ref)
    r_ref, u_ref = nxt(), nxt(); t3 = l3 + _upsample2x(t4, r_ref, u_ref)
    r_ref, u_ref = nxt(), nxt(); t2 = l2 + _upsample2x(t3, r_ref, u_ref)

    # ---- per-level 3x3 output convs, lane-dense bf16 stores
    outs = []
    for t in (t2, t3, t4, t5):
        s_ref, m_ref, b_ref = nxt(), nxt(), nxt()
        outs.append(_conv_flat(t, s_ref, m_ref, b_ref, relu=False))
    p2_ref[...] = outs[0]
    p3_ref[...] = outs[1]
    p4_ref[...] = outs[2]
    p5_ref[...] = outs[3]


# ----------------------------------------------------------------------------- wrapper (forward pass)

def model_forward_pallas(flat_params, images_nchw):
    """images (N, 3, 64, 64) f32 -> (p2, p3, p4, p5, p6) NCHW f32 with FPN_CH channels."""
    n = images_nchw.shape[0]
    # NCHW f32 -> NHWC bf16 -> pad 3->8 channels -> row-flattened (H, W*C)
    x = jnp.transpose(images_nchw, (0, 2, 3, 1)).astype(jnp.bfloat16)
    x = jnp.pad(x, ((0, 0), (0, 0), (0, 0), (0, STEM_IN - x.shape[-1])))
    x = x.reshape(n, 64, 64 * STEM_IN)

    def full_spec(a):
        return pl.BlockSpec(a.shape, lambda g, _nd=a.ndim: (0,) * _nd)

    in_specs = [pl.BlockSpec((None, 64, 64 * STEM_IN), lambda g: (g, 0, 0))]
    in_specs += [full_spec(p) for p in flat_params]
    out_shapes = tuple(jax.ShapeDtypeStruct((n, hw, hw * FPN_CH), jnp.bfloat16)
                       for (_, hw, _) in LEVELS)
    out_specs = [pl.BlockSpec((None, hw, hw * FPN_CH), lambda g: (g, 0, 0))
                 for (_, hw, _) in LEVELS]

    kernel = functools.partial(_fused_fpn_kernel, len(flat_params))
    p2, p3, p4, p5 = pl.pallas_call(
        kernel,
        out_shape=out_shapes,
        grid_spec=pltpu.PrefetchScalarGridSpec(
            num_scalar_prefetch=0,
            grid=(n,),                                    # one image per grid step / per TensorCore
            in_specs=in_specs,
            out_specs=out_specs),
        compiler_params=pltpu.CompilerParams(
            dimension_semantics=("parallel",),
            vmem_limit_bytes=VMEM_LIMIT),
    )(x, *flat_params)

    def to_nchw(y, hw):
        y = y.astype(jnp.float32).reshape(n, hw, hw, FPN_CH)
        return jnp.transpose(y, (0, 3, 1, 2))

    outs = [to_nchw(y, hw) for y, (_, hw, _) in zip((p2, p3, p4, p5), LEVELS)]
    p2, p3, p4, p5 = outs
    p6 = p5[:, :, ::2, ::2]          # LastLevelMaxPool(kernel=1, stride=2) == stride-2 subsample
    return p2, p3, p4, p5, p6


# ----------------------------------------------------------------------------- plain-JAX reference

def model_forward_reference(raw, images_nchw):
    x = jnp.transpose(images_nchw, (0, 2, 3, 1)).astype(jnp.bfloat16)
    x = jnp.pad(x, ((0, 0), (0, 0), (0, 0), (0, STEM_IN - x.shape[-1])))
    feats = []
    for (name, _, _, _, _), (w, b) in zip(BOTTOM_UP, raw["bottom_up"]):
        y = jax.lax.conv_general_dilated(
            x, w.astype(jnp.bfloat16), window_strides=(2, 2), padding=[(1, 1), (1, 1)],
            dimension_numbers=("NHWC", "HWIO", "NHWC"), preferred_element_type=jnp.float32)
        x = jnp.maximum(y + b[None, None, None, :], 0.0).astype(jnp.bfloat16)
        if name != "stem":
            feats.append(x)
    c2, c3, c4, c5 = feats

    lats = []
    for f, (w, b) in zip((c2, c3, c4, c5), raw["lateral"]):
        l = jnp.einsum("nhwc,co->nhwo", f, w.astype(jnp.bfloat16),
                       preferred_element_type=jnp.float32) + b
        lats.append(l.astype(jnp.bfloat16))
    l2, l3, l4, l5 = lats

    up = lambda t: jnp.repeat(jnp.repeat(t, 2, axis=1), 2, axis=2)
    t5 = l5
    t4 = l4 + up(t5)
    t3 = l3 + up(t4)
    t2 = l2 + up(t3)

    outs = []
    for t, (w, b) in zip((t2, t3, t4, t5), raw["output"]):
        y = jax.lax.conv_general_dilated(
            t, w.astype(jnp.bfloat16), window_strides=(1, 1), padding=[(1, 1), (1, 1)],
            dimension_numbers=("NHWC", "HWIO", "NHWC"), preferred_element_type=jnp.float32)
        outs.append((y + b).astype(jnp.bfloat16))

    to_nchw = lambda t: jnp.transpose(t.astype(jnp.float32), (0, 3, 1, 2))
    p2, p3, p4, p5 = (to_nchw(t) for t in outs)
    p6 = p5[:, :, ::2, ::2]
    return p2, p3, p4, p5, p6


# ----------------------------------------------------------------------------- main

if __name__ == "__main__":
    key = jax.random.PRNGKey(0)
    k_params, k_img = jax.random.split(key)

    raw = init_params(k_params)
    flat = pack_params(raw)
    images = jax.random.normal(k_img, (2, 3, 64, 64), jnp.float32)

    fwd_pallas = jax.jit(model_forward_pallas)
    fwd_ref = jax.jit(model_forward_reference)

    outputs = jax.block_until_ready(fwd_pallas(flat, images))
    reference = jax.block_until_ready(fwd_ref(raw, images))

    expected = [(2, FPN_CH, 16, 16), (2, FPN_CH, 8, 8),
                (2, FPN_CH, 4, 4), (2, FPN_CH, 2, 2), (2, FPN_CH, 1, 1)]
    for o, r, s in zip(outputs, reference, expected):
        assert o.shape == s, (o.shape, s)
        assert bool(jnp.all(jnp.isfinite(o)))
        err = float(jnp.max(jnp.abs(o - r)))
        assert err <= 3e-2, ("mismatch vs reference", err)

    print("KERNEL_OK")
</pallas_src>

<mosaic_0001>
module attributes {stable_mosaic.version = 11 : i64} {
  func.func @_fused_fpn_kernel(%arg0: i32, %arg1: memref<1x64x512xbf16, #tpu.memory_space<vmem>>, %arg2: memref<3x32x64xbf16, #tpu.memory_space<vmem>>, %arg3: memref<3x512x256xbf16, #tpu.memory_space<vmem>>, %arg4: memref<1x256xf32, #tpu.memory_space<vmem>>, %arg5: memref<3x16x32xbf16, #tpu.memory_space<vmem>>, %arg6: memref<3x256x128xbf16, #tpu.memory_space<vmem>>, %arg7: memref<1x128xf32, #tpu.memory_space<vmem>>, %arg8: memref<3x8x16xbf16, #tpu.memory_space<vmem>>, %arg9: memref<3x128x128xbf16, #tpu.memory_space<vmem>>, %arg10: memref<1x128xf32, #tpu.memory_space<vmem>>, %arg11: memref<3x4x8xbf16, #tpu.memory_space<vmem>>, %arg12: memref<3x128x128xbf16, #tpu.memory_space<vmem>>, %arg13: memref<1x128xf32, #tpu.memory_space<vmem>>, %arg14: memref<3x2x4xbf16, #tpu.memory_space<vmem>>, %arg15: memref<3x128x128xbf16, #tpu.memory_space<vmem>>, %arg16: memref<1x128xf32, #tpu.memory_space<vmem>>, %arg17: memref<128x512xbf16, #tpu.memory_space<vmem>>, %arg18: memref<1x512xf32, #tpu.memory_space<vmem>>, %arg19: memref<128x256xbf16, #tpu.memory_space<vmem>>, %arg20: memref<1x256xf32, #tpu.memory_space<vmem>>, %arg21: memref<128x128xbf16, #tpu.memory_space<vmem>>, %arg22: memref<1x128xf32, #tpu.memory_space<vmem>>, %arg23: memref<128x64xbf16, #tpu.memory_space<vmem>>, %arg24: memref<1x64xf32, #tpu.memory_space<vmem>>, %arg25: memref<4x2xbf16, #tpu.memory_space<vmem>>, %arg26: memref<64x128xbf16, #tpu.memory_space<vmem>>, %arg27: memref<8x4xbf16, #tpu.memory_space<vmem>>, %arg28: memref<128x256xbf16, #tpu.memory_space<vmem>>, %arg29: memref<16x8xbf16, #tpu.memory_space<vmem>>, %arg30: memref<256x512xbf16, #tpu.memory_space<vmem>>, %arg31: memref<3x16x16xbf16, #tpu.memory_space<vmem>>, %arg32: memref<3x512x512xbf16, #tpu.memory_space<vmem>>, %arg33: memref<1x512xf32, #tpu.memory_space<vmem>>, %arg34: memref<3x8x8xbf16, #tpu.memory_space<vmem>>, %arg35: memref<3x256x256xbf16, #tpu.memory_space<vmem>>, %arg36: memref<1x256xf32, #tpu.memory_space<vmem>>, %arg37: memref<3x4x4xbf16, #tpu.memory_space<vmem>>, %arg38: memref<3x128x128xbf16, #tpu.memory_space<vmem>>, %arg39: memref<1x128xf32, #tpu.memory_space<vmem>>, %arg40: memref<3x2x2xbf16, #tpu.memory_space<vmem>>, %arg41: memref<3x64x64xbf16, #tpu.memory_space<vmem>>, %arg42: memref<1x64xf32, #tpu.memory_space<vmem>>, %arg43: memref<1x16x512xbf16, #tpu.memory_space<vmem>>, %arg44: memref<1x8x256xbf16, #tpu.memory_space<vmem>>, %arg45: memref<1x4x128xbf16, #tpu.memory_space<vmem>>, %arg46: memref<1x2x64xbf16, #tpu.memory_space<vmem>>) attributes {dimension_semantics = [#tpu.dimension_semantics<parallel>], iteration_bounds = array<i64: 2>, scalar_prefetch = 0 : i64, scratch_operands = 0 : i64, tpu.core_type = #tpu.core_type<tc>, window_params = [{transform_indices = @transform_0, window_bounds = array<i64: 1, 64, 512>}, {pipeline_mode = #tpu.pipeline_mode<synchronous>, transform_indices = @transform_1, window_bounds = array<i64: 3, 32, 64>}, {pipeline_mode = #tpu.pipeline_mode<synchronous>, transform_indices = @transform_2, window_bounds = array<i64: 3, 512, 256>}, {pipeline_mode = #tpu.pipeline_mode<synchronous>, transform_indices = @transform_3, window_bounds = array<i64: 1, 256>}, {pipeline_mode = #tpu.pipeline_mode<synchronous>, transform_indices = @transform_4, window_bounds = array<i64: 3, 16, 32>}, {pipeline_mode = #tpu.pipeline_mode<synchronous>, transform_indices = @transform_5, window_bounds = array<i64: 3, 256, 128>}, {pipeline_mode = #tpu.pipeline_mode<synchronous>, transform_indices = @transform_6, window_bounds = array<i64: 1, 128>}, {pipeline_mode = #tpu.pipeline_mode<synchronous>, transform_indices = @transform_7, window_bounds = array<i64: 3, 8, 16>}, {pipeline_mode = #tpu.pipeline_mode<synchronous>, transform_indices = @transform_8, window_bounds = array<i64: 3, 128, 128>}, {pipeline_mode = #tpu.pipeline_mode<synchronous>, transform_indices = @transform_9, window_bounds = array<i64: 1, 128>}, {pipeline_mode = #tpu.pipeline_mode<synchronous>, transform_indices = @transform_10, window_bounds = array<i64: 3, 4, 8>}, {pipeline_mode = #tpu.pipeline_mode<synchronous>, transform_indices = @transform_11, window_bounds = array<i64: 3, 128, 128>}, {pipeline_mode = #tpu.pipeline_mode<synchronous>, transform_indices = @transform_12, window_bounds = array<i64: 1, 128>}, {pipeline_mode = #tpu.pipeline_mode<synchronous>, transform_indices = @transform_13, window_bounds = array<i64: 3, 2, 4>}, {pipeline_mode = #tpu.pipeline_mode<synchronous>, transform_indices = @transform_14, window_bounds = array<i64: 3, 128, 128>}, {pipeline_mode = #tpu.pipeline_mode<synchronous>, transform_indices = @transform_15, window_bounds = array<i64: 1, 128>}, {pipeline_mode = #tpu.pipeline_mode<synchronous>, transform_indices = @transform_16, window_bounds = array<i64: 128, 512>}, {pipeline_mode = #tpu.pipeline_mode<synchronous>, transform_indices = @transform_17, window_bounds = array<i64: 1, 512>}, {pipeline_mode = #tpu.pipeline_mode<synchronous>, transform_indices = @transform_18, window_bounds = array<i64: 128, 256>}, {pipeline_mode = #tpu.pipeline_mode<synchronous>, transform_indices = @transform_19, window_bounds = array<i64: 1, 256>}, {pipeline_mode = #tpu.pipeline_mode<synchronous>, transform_indices = @transform_20, window_bounds = array<i64: 128, 128>}, {pipeline_mode = #tpu.pipeline_mode<synchronous>, transform_indices = @transform_21, window_bounds = array<i64: 1, 128>}, {pipeline_mode = #tpu.pipeline_mode<synchronous>, transform_indices = @transform_22, window_bounds = array<i64: 128, 64>}, {pipeline_mode = #tpu.pipeline_mode<synchronous>, transform_indices = @transform_23, window_bounds = array<i64: 1, 64>}, {pipeline_mode = #tpu.pipeline_mode<synchronous>, transform_indices = @transform_24, window_bounds = array<i64: 4, 2>}, {pipeline_mode = #tpu.pipeline_mode<synchronous>, transform_indices = @transform_25, window_bounds = array<i64: 64, 128>}, {pipeline_mode = #tpu.pipeline_mode<synchronous>, transform_indices = @transform_26, window_bounds = array<i64: 8, 4>}, {pipeline_mode = #tpu.pipeline_mode<synchronous>, transform_indices = @transform_27, window_bounds = array<i64: 128, 256>}, {pipeline_mode = #tpu.pipeline_mode<synchronous>, transform_indices = @transform_28, window_bounds = array<i64: 16, 8>}, {pipeline_mode = #tpu.pipeline_mode<synchronous>, transform_indices = @transform_29, window_bounds = array<i64: 256, 512>}, {pipeline_mode = #tpu.pipeline_mode<synchronous>, transform_indices = @transform_30, window_bounds = array<i64: 3, 16, 16>}, {pipeline_mode = #tpu.pipeline_mode<synchronous>, transform_indices = @transform_31, window_bounds = array<i64: 3, 512, 512>}, {pipeline_mode = #tpu.pipeline_mode<synchronous>, transform_indices = @transform_32, window_bounds = array<i64: 1, 512>}, {pipeline_mode = #tpu.pipeline_mode<synchronous>, transform_indices = @transform_33, window_bounds = array<i64: 3, 8, 8>}, {pipeline_mode = #tpu.pipeline_mode<synchronous>, transform_indices = @transform_34, window_bounds = array<i64: 3, 256, 256>}, {pipeline_mode = #tpu.pipeline_mode<synchronous>, transform_indices = @transform_35, window_bounds = array<i64: 1, 256>}, {pipeline_mode = #tpu.pipeline_mode<synchronous>, transform_indices = @transform_36, window_bounds = array<i64: 3, 4, 4>}, {pipeline_mode = #tpu.pipeline_mode<synchronous>, transform_indices = @transform_37, window_bounds = array<i64: 3, 128, 128>}, {pipeline_mode = #tpu.pipeline_mode<synchronous>, transform_indices = @transform_38, window_bounds = array<i64: 1, 128>}, {pipeline_mode = #tpu.pipeline_mode<synchronous>, transform_indices = @transform_39, window_bounds = array<i64: 3, 2, 2>}, {pipeline_mode = #tpu.pipeline_mode<synchronous>, transform_indices = @transform_40, window_bounds = array<i64: 3, 64, 64>}, {pipeline_mode = #tpu.pipeline_mode<synchronous>, transform_indices = @transform_41, window_bounds = array<i64: 1, 64>}, {transform_indices = @transform_42, window_bounds = array<i64: 1, 16, 512>}, {transform_indices = @transform_43, window_bounds = array<i64: 1, 8, 256>}, {transform_indices = @transform_44, window_bounds = array<i64: 1, 4, 128>}, {transform_indices = @transform_45, window_bounds = array<i64: 1, 2, 64>}]} {
    %c0 = arith.constant 0 : index
    %c0_0 = arith.constant 0 : index
    %c0_1 = arith.constant 0 : index
    %0 = vector.load %arg1[%c0, %c0_0, %c0_1] : memref<1x64x512xbf16, #tpu.memory_space<vmem>>, vector<1x64x512xbf16>
    %1 = vector.shape_cast %0 : vector<1x64x512xbf16> to vector<64x512xbf16>
    %cst = arith.constant 0.000000e+00 : f32
    %2 = vector.broadcast %cst : f32 to vector<32x256xf32>
    %c0_2 = arith.constant 0 : index
    %c0_3 = arith.constant 0 : index
    %c0_4 = arith.constant 0 : index
    %3 = vector.load %arg2[%c0_2, %c0_3, %c0_4] : memref<3x32x64xbf16, #tpu.memory_space<vmem>>, vector<1x32x64xbf16>
    %4 = vector.shape_cast %3 : vector<1x32x64xbf16> to vector<32x64xbf16>
    %cst_5 = arith.constant dense<0.000000e+00> : vector<32x512xf32>
    %5 = tpu.matmul %4, %1, %cst_5 {dimension_numbers = #tpu.dot_dimension_numbers<[1], [0], [0], [1], [0, 0, 1, 1], [], []>} : vector<32x64xbf16>, vector<64x512xbf16>, vector<32x512xf32> -> vector<32x512xf32>
    %6 = arith.truncf %5 : vector<32x512xf32> to vector<32x512xbf16>
    %c0_6 = arith.constant 0 : index
    %c0_7 = arith.constant 0 : index
    %c0_8 = arith.constant 0 : index
    %7 = vector.load %arg3[%c0_6, %c0_7, %c0_8] : memref<3x512x256xbf16, #tpu.memory_space<vmem>>, vector<1x512x256xbf16>
    %8 = vector.shape_cast %7 : vector<1x512x256xbf16> to vector<512x256xbf16>
    %cst_9 = arith.constant dense<0.000000e+00> : vector<32x256xf32>
    %9 = tpu.matmul %6, %8, %cst_9 {dimension_numbers = #tpu.dot_dimension_numbers<[1], [0], [0], [1], [0, 0, 1, 1], [], []>} : vector<32x512xbf16>, vector<512x256xbf16>, vector<32x256xf32> -> vector<32x256xf32>
    %10 = arith.addf %2, %9 : vector<32x256xf32>
    %c1 = arith.constant 1 : index
    %c0_10 = arith.constant 0 : index
    %c0_11 = arith.constant 0 : index
    %11 = vector.load %arg2[%c1, %c0_10, %c0_11] : memref<3x32x64xbf16, #tpu.memory_space<vmem>>, vector<1x32x64xbf16>
    %12 = vector.shape_cast %11 : vector<1x32x64xbf16> to vector<32x64xbf16>
    %cst_12 = arith.constant dense<0.000000e+00> : vector<32x512xf32>
    %13 = tpu.matmul %12, %1, %cst_12 {dimension_numbers = #tpu.dot_dimension_numbers<[1], [0], [0], [1], [0, 0, 1, 1], [], []>} : vector<32x64xbf16>, vector<64x512xbf16>, vector<32x512xf32> -> vector<32x512xf32>
    %14 = arith.truncf %13 : vector<32x512xf32> to vector<32x512xbf16>
    %c1_13 = arith.constant 1 : index
    %c0_14 = arith.constant 0 : index
    %c0_15 = arith.constant 0 : index
    %15 = vector.load %arg3[%c1_13, %c0_14, %c0_15] : memref<3x512x256xbf16, #tpu.memory_space<vmem>>, vector<1x512x256xbf16>
    %16 = vector.shape_cast %15 : vector<1x512x256xbf16> to vector<512x256xbf16>
    %cst_16 = arith.constant dense<0.000000e+00> : vector<32x256xf32>
    %17 = tpu.matmul %14, %16, %cst_16 {dimension_numbers = #tpu.dot_dimension_numbers<[1], [0], [0], [1], [0, 0, 1, 1], [], []>} : vector<32x512xbf16>, vector<512x256xbf16>, vector<32x256xf32> -> vector<32x256xf32>
    %18 = arith.addf %10, %17 : vector<32x256xf32>
    %c2 = arith.constant 2 : index
    %c0_17 = arith.constant 0 : index
    %c0_18 = arith.constant 0 : index
    %19 = vector.load %arg2[%c2, %c0_17, %c0_18] : memref<3x32x64xbf16, #tpu.memory_space<vmem>>, vector<1x32x64xbf16>
    %20 = vector.shape_cast %19 : vector<1x32x64xbf16> to vector<32x64xbf16>
    %cst_19 = arith.constant dense<0.000000e+00> : vector<32x512xf32>
    %21 = tpu.matmul %20, %1, %cst_19 {dimension_numbers = #tpu.dot_dimension_numbers<[1], [0], [0], [1], [0, 0, 1, 1], [], []>} : vector<32x64xbf16>, vector<64x512xbf16>, vector<32x512xf32> -> vector<32x512xf32>
    %22 = arith.truncf %21 : vector<32x512xf32> to vector<32x512xbf16>
    %c2_20 = arith.constant 2 : index
    %c0_21 = arith.constant 0 : index
    %c0_22 = arith.constant 0 : index
    %23 = vector.load %arg3[%c2_20, %c0_21, %c0_22] : memref<3x512x256xbf16, #tpu.memory_space<vmem>>, vector<1x512x256xbf16>
    %24 = vector.shape_cast %23 : vector<1x512x256xbf16> to vector<512x256xbf16>
    %cst_23 = arith.constant dense<0.000000e+00> : vector<32x256xf32>
    %25 = tpu.matmul %22, %24, %cst_23 {dimension_numbers = #tpu.dot_dimension_numbers<[1], [0], [0], [1], [0, 0, 1, 1], [], []>} : vector<32x512xbf16>, vector<512x256xbf16>, vector<32x256xf32> -> vector<32x256xf32>
    %26 = arith.addf %18, %25 : vector<32x256xf32>
    %c0_24 = arith.constant 0 : index
    %c0_25 = arith.constant 0 : index
    %27 = vector.load %arg4[%c0_24, %c0_25] : memref<1x256xf32, #tpu.memory_space<vmem>>, vector<1x256xf32>
    %28 = vector.broadcast %27 : vector<1x256xf32> to vector<32x256xf32>
    %29 = arith.addf %26, %28 : vector<32x256xf32>
    %cst_26 = arith.constant 0.000000e+00 : f32
    %30 = vector.broadcast %cst_26 : f32 to vector<32x256xf32>
    %31 = arith.maximumf %29, %30 : vector<32x256xf32>
    %32 = arith.truncf %31 : vector<32x256xf32> to vector<32x256xbf16>
    %cst_27 = arith.constant 0.000000e+00 : f32
    %33 = vector.broadcast %cst_27 : f32 to vector<16x128xf32>
    %c0_28 = arith.constant 0 : index
    %c0_29 = arith.constant 0 : index
    %c0_30 = arith.constant 0 : index
    %34 = vector.load %arg5[%c0_28, %c0_29, %c0_30] : memref<3x16x32xbf16, #tpu.memory_space<vmem>>, vector<1x16x32xbf16>
    %35 = vector.shape_cast %34 : vector<1x16x32xbf16> to vector<16x32xbf16>
    %cst_31 = arith.constant dense<0.000000e+00> : vector<16x256xf32>
    %36 = tpu.matmul %35, %32, %cst_31 {dimension_numbers = #tpu.dot_dimension_numbers<[1], [0], [0], [1], [0, 0, 1, 1], [], []>} : vector<16x32xbf16>, vector<32x256xbf16>, vector<16x256xf32> -> vector<16x256xf32>
    %37 = arith.truncf %36 : vector<16x256xf32> to vector<16x256xbf16>
    %c0_32 = arith.constant 0 : index
    %c0_33 = arith.constant 0 : index
    %c0_34 = arith.constant 0 : index
    %38 = vector.load %arg6[%c0_32, %c0_33, %c0_34] : memref<3x256x128xbf16, #tpu.memory_space<vmem>>, vector<1x256x128xbf16>
    %39 = vector.shape_cast %38 : vector<1x256x128xbf16> to vector<256x128xbf16>
    %cst_35 = arith.constant dense<0.000000e+00> : vector<16x128xf32>
    %40 = tpu.matmul %37, %39, %cst_35 {dimension_numbers = #tpu.dot_dimension_numbers<[1], [0], [0], [1], [0, 0, 1, 1], [], []>} : vector<16x256xbf16>, vector<256x128xbf16>, vector<16x128xf32> -> vector<16x128xf32>
    %41 = arith.addf %33, %40 : vector<16x128xf32>
    %c1_36 = arith.constant 1 : index
    %c0_37 = arith.constant 0 : index
    %c0_38 = arith.constant 0 : index
    %42 = vector.load %arg5[%c1_36, %c0_37, %c0_38] : memref<3x16x32xbf16, #tpu.memory_space<vmem>>, vector<1x16x32xbf16>
    %43 = vector.shape_cast %42 : vector<1x16x32xbf16> to vector<16x32xbf16>
    %cst_39 = arith.constant dense<0.000000e+00> : vector<16x256xf32>
    %44 = tpu.matmul %43, %32, %cst_39 {dimension_numbers = #tpu.dot_dimension_numbers<[1], [0], [0], [1], [0, 0, 1, 1], [], []>} : vector<16x32xbf16>, vector<32x256xbf16>, vector<16x256xf32> -> vector<16x256xf32>
    %45 = arith.truncf %44 : vector<16x256xf32> to vector<16x256xbf16>
    %c1_40 = arith.constant 1 : index
    %c0_41 = arith.constant 0 : index
    %c0_42 = arith.constant 0 : index
    %46 = vector.load %arg6[%c1_40, %c0_41, %c0_42] : memref<3x256x128xbf16, #tpu.memory_space<vmem>>, vector<1x256x128xbf16>
    %47 = vector.shape_cast %46 : vector<1x256x128xbf16> to vector<256x128xbf16>
    %cst_43 = arith.constant dense<0.000000e+00> : vector<16x128xf32>
    %48 = tpu.matmul %45, %47, %cst_43 {dimension_numbers = #tpu.dot_dimension_numbers<[1], [0], [0], [1], [0, 0, 1, 1], [], []>} : vector<16x256xbf16>, vector<256x128xbf16>, vector<16x128xf32> -> vector<16x128xf32>
    %49 = arith.addf %41, %48 : vector<16x128xf32>
    %c2_44 = arith.constant 2 : index
    %c0_45 = arith.constant 0 : index
    %c0_46 = arith.constant 0 : index
    %50 = vector.load %arg5[%c2_44, %c0_45, %c0_46] : memref<3x16x32xbf16, #tpu.memory_space<vmem>>, vector<1x16x32xbf16>
    %51 = vector.shape_cast %50 : vector<1x16x32xbf16> to vector<16x32xbf16>
    %cst_47 = arith.constant dense<0.000000e+00> : vector<16x256xf32>
    %52 = tpu.matmul %51, %32, %cst_47 {dimension_numbers = #tpu.dot_dimension_numbers<[1], [0], [0], [1], [0, 0, 1, 1], [], []>} : vector<16x32xbf16>, vector<32x256xbf16>, vector<16x256xf32> -> vector<16x256xf32>
    %53 = arith.truncf %52 : vector<16x256xf32> to vector<16x256xbf16>
    %c2_48 = arith.constant 2 : index
    %c0_49 = arith.constant 0 : index
    %c0_50 = arith.constant 0 : index
    %54 = vector.load %arg6[%c2_48, %c0_49, %c0_50] : memref<3x256x128xbf16, #tpu.memory_space<vmem>>, vector<1x256x128xbf16>
    %55 = vector.shape_cast %54 : vector<1x256x128xbf16> to vector<256x128xbf16>
    %cst_51 = arith.constant dense<0.000000e+00> : vector<16x128xf32>
    %56 = tpu.matmul %53, %55, %cst_51 {dimension_numbers = #tpu.dot_dimension_numbers<[1], [0], [0], [1], [0, 0, 1, 1], [], []>} : vector<16x256xbf16>, vector<256x128xbf16>, vector<16x128xf32> -> vector<16x128xf32>
    %57 = arith.addf %49, %56 : vector<16x128xf32>
    %c0_52 = arith.constant 0 : index
    %c0_53 = arith.constant 0 : index
    %58 = vector.load %arg7[%c0_52, %c0_53] : memref<1x128xf32, #tpu.memory_space<vmem>>, vector<1x128xf32>
    %59 = vector.broadcast %58 : vector<1x128xf32> to vector<16x128xf32>
    %60 = arith.addf %57, %59 : vector<16x128xf32>
    %cst_54 = arith.constant 0.000000e+00 : f32
    %61 = vector.broadcast %cst_54 : f32 to vector<16x128xf32>
    %62 = arith.maximumf %60, %61 : vector<16x128xf32>
    %63 = arith.truncf %62 : vector<16x128xf32> to vector<16x128xbf16>
    %cst_55 = arith.constant 0.000000e+00 : f32
    %64 = vector.broadcast %cst_55 : f32 to vector<8x128xf32>
    %c0_56 = arith.constant 0 : index
    %c0_57 = arith.constant 0 : index
    %c0_58 = arith.constant 0 : index
    %65 = vector.load %arg8[%c0_56, %c0_57, %c0_58] : memref<3x8x16xbf16, #tpu.memory_space<vmem>>, vector<1x8x16xbf16>
    %66 = vector.shape_cast %65 : vector<1x8x16xbf16> to vector<8x16xbf16>
    %cst_59 = arith.constant dense<0.000000e+00> : vector<8x128xf32>
    %67 = tpu.matmul %66, %63, %cst_59 {dimension_numbers = #tpu.dot_dimension_numbers<[1], [0], [0], [1], [0, 0, 1, 1], [], []>} : vector<8x16xbf16>, vector<16x128xbf16>, vector<8x128xf32> -> vector<8x128xf32>
    %68 = arith.truncf %67 : vector<8x128xf32> to vector<8x128xbf16>
    %c0_60 = arith.constant 0 : index
    %c0_61 = arith.constant 0 : index
    %c0_62 = arith.constant 0 : index
    %69 = vector.load %arg9[%c0_60, %c0_61, %c0_62] : memref<3x128x128xbf16, #tpu.memory_space<vmem>>, vector<1x128x128xbf16>
    %70 = vector.shape_cast %69 : vector<1x128x128xbf16> to vector<128x128xbf16>
    %cst_63 = arith.constant dense<0.000000e+00> : vector<8x128xf32>
    %71 = tpu.matmul %68, %70, %cst_63 {dimension_numbers = #tpu.dot_dimension_numbers<[1], [0], [0], [1], [0, 0, 1, 1], [], []>} : vector<8x128xbf16>, vector<128x128xbf16>, vector<8x128xf32> -> vector<8x128xf32>
    %72 = arith.addf %64, %71 : vector<8x128xf32>
    %c1_64 = arith.constant 1 : index
    %c0_65 = arith.constant 0 : index
    %c0_66 = arith.constant 0 : index
    %73 = vector.load %arg8[%c1_64, %c0_65, %c0_66] : memref<3x8x16xbf16, #tpu.memory_space<vmem>>, vector<1x8x16xbf16>
    %74 = vector.shape_cast %73 : vector<1x8x16xbf16> to vector<8x16xbf16>
    %cst_67 = arith.constant dense<0.000000e+00> : vector<8x128xf32>
    %75 = tpu.matmul %74, %63, %cst_67 {dimension_numbers = #tpu.dot_dimension_numbers<[1], [0], [0], [1], [0, 0, 1, 1], [], []>} : vector<8x16xbf16>, vector<16x128xbf16>, vector<8x128xf32> -> vector<8x128xf32>
    %76 = arith.truncf %75 : vector<8x128xf32> to vector<8x128xbf16>
    %c1_68 = arith.constant 1 : index
    %c0_69 = arith.constant 0 : index
    %c0_70 = arith.constant 0 : index
    %77 = vector.load %arg9[%c1_68, %c0_69, %c0_70] : memref<3x128x128xbf16, #tpu.memory_space<vmem>>, vector<1x128x128xbf16>
    %78 = vector.shape_cast %77 : vector<1x128x128xbf16> to vector<128x128xbf16>
    %cst_71 = arith.constant dense<0.000000e+00> : vector<8x128xf32>
    %79 = tpu.matmul %76, %78, %cst_71 {dimension_numbers = #tpu.dot_dimension_numbers<[1], [0], [0], [1], [0, 0, 1, 1], [], []>} : vector<8x128xbf16>, vector<128x128xbf16>, vector<8x128xf32> -> vector<8x128xf32>
    %80 = arith.addf %72, %79 : vector<8x128xf32>
    %c2_72 = arith.constant 2 : index
    %c0_73 = arith.constant 0 : index
    %c0_74 = arith.constant 0 : index
    %81 = vector.load %arg8[%c2_72, %c0_73, %c0_74] : memref<3x8x16xbf16, #tpu.memory_space<vmem>>, vector<1x8x16xbf16>
    %82 = vector.shape_cast %81 : vector<1x8x16xbf16> to vector<8x16xbf16>
    %cst_75 = arith.constant dense<0.000000e+00> : vector<8x128xf32>
    %83 = tpu.matmul %82, %63, %cst_75 {dimension_numbers = #tpu.dot_dimension_numbers<[1], [0], [0], [1], [0, 0, 1, 1], [], []>} : vector<8x16xbf16>, vector<16x128xbf16>, vector<8x128xf32> -> vector<8x128xf32>
    %84 = arith.truncf %83 : vector<8x128xf32> to vector<8x128xbf16>
    %c2_76 = arith.constant 2 : index
    %c0_77 = arith.constant 0 : index
    %c0_78 = arith.constant 0 : index
    %85 = vector.load %arg9[%c2_76, %c0_77, %c0_78] : memref<3x128x128xbf16, #tpu.memory_space<vmem>>, vector<1x128x128xbf16>
    %86 = vector.shape_cast %85 : vector<1x128x128xbf16> to vector<128x128xbf16>
    %cst_79 = arith.constant dense<0.000000e+00> : vector<8x128xf32>
    %87 = tpu.matmul %84, %86, %cst_79 {dimension_numbers = #tpu.dot_dimension_numbers<[1], [0], [0], [1], [0, 0, 1, 1], [], []>} : vector<8x128xbf16>, vector<128x128xbf16>, vector<8x128xf32> -> vector<8x128xf32>
    %88 = arith.addf %80, %87 : vector<8x128xf32>
    %c0_80 = arith.constant 0 : index
    %c0_81 = arith.constant 0 : index
    %89 = vector.load %arg10[%c0_80, %c0_81] : memref<1x128xf32, #tpu.memory_space<vmem>>, vector<1x128xf32>
    %90 = vector.broadcast %89 : vector<1x128xf32> to vector<8x128xf32>
    %91 = arith.addf %88, %90 : vector<8x128xf32>
    %cst_82 = arith.constant 0.000000e+00 : f32
    %92 = vector.broadcast %cst_82 : f32 to vector<8x128xf32>
    %93 = arith.maximumf %91, %92 : vector<8x128xf32>
    %94 = arith.truncf %93 : vector<8x128xf32> to vector<8x128xbf16>
    %cst_83 = arith.constant 0.000000e+00 : f32
    %95 = vector.broadcast %cst_83 : f32 to vector<4x128xf32>
    %c0_84 = arith.constant 0 : index
    %c0_85 = arith.constant 0 : index
    %c0_86 = arith.constant 0 : index
    %96 = vector.load %arg11[%c0_84, %c0_85, %c0_86] : memref<3x4x8xbf16, #tpu.memory_space<vmem>>, vector<1x4x8xbf16>
    %97 = vector.shape_cast %96 : vector<1x4x8xbf16> to vector<4x8xbf16>
    %cst_87 = arith.constant dense<0.000000e+00> : vector<4x128xf32>
    %98 = tpu.matmul %97, %94, %cst_87 {dimension_numbers = #tpu.dot_dimension_numbers<[1], [0], [0], [1], [0, 0, 1, 1], [], []>} : vector<4x8xbf16>, vector<8x128xbf16>, vector<4x128xf32> -> vector<4x128xf32>
    %99 = arith.truncf %98 : vector<4x128xf32> to vector<4x128xbf16>
    %c0_88 = arith.constant 0 : index
    %c0_89 = arith.constant 0 : index
    %c0_90 = arith.constant 0 : index
    %100 = vector.load %arg12[%c0_88, %c0_89, %c0_90] : memref<3x128x128xbf16, #tpu.memory_space<vmem>>, vector<1x128x128xbf16>
    %101 = vector.shape_cast %100 : vector<1x128x128xbf16> to vector<128x128xbf16>
    %cst_91 = arith.constant dense<0.000000e+00> : vector<4x128xf32>
    %102 = tpu.matmul %99, %101, %cst_91 {dimension_numbers = #tpu.dot_dimension_numbers<[1], [0], [0], [1], [0, 0, 1, 1], [], []>} : vector<4x128xbf16>, vector<128x128xbf16>, vector<4x128xf32> -> vector<4x128xf32>
    %103 = arith.addf %95, %102 : vector<4x128xf32>
    %c1_92 = arith.constant 1 : index
    %c0_93 = arith.constant 0 : index
    %c0_94 = arith.constant 0 : index
    %104 = vector.load %arg11[%c1_92, %c0_93, %c0_94] : memref<3x4x8xbf16, #tpu.memory_space<vmem>>, vector<1x4x8xbf16>
    %105 = vector.shape_cast %104 : vector<1x4x8xbf16> to vector<4x8xbf16>
    %cst_95 = arith.constant dense<0.000000e+00> : vector<4x128xf32>
    %106 = tpu.matmul %105, %94, %cst_95 {dimension_numbers = #tpu.dot_dimension_numbers<[1], [0], [0], [1], [0, 0, 1, 1], [], []>} : vector<4x8xbf16>, vector<8x128xbf16>, vector<4x128xf32> -> vector<4x128xf32>
    %107 = arith.truncf %106 : vector<4x128xf32> to vector<4x128xbf16>
    %c1_96 = arith.constant 1 : index
    %c0_97 = arith.constant 0 : index
    %c0_98 = arith.constant 0 : index
    %108 = vector.load %arg12[%c1_96, %c0_97, %c0_98] : memref<3x128x128xbf16, #tpu.memory_space<vmem>>, vector<1x128x128xbf16>
    %109 = vector.shape_cast %108 : vector<1x128x128xbf16> to vector<128x128xbf16>
    %cst_99 = arith.constant dense<0.000000e+00> : vector<4x128xf32>
    %110 = tpu.matmul %107, %109, %cst_99 {dimension_numbers = #tpu.dot_dimension_numbers<[1], [0], [0], [1], [0, 0, 1, 1], [], []>} : vector<4x128xbf16>, vector<128x128xbf16>, vector<4x128xf32> -> vector<4x128xf32>
    %111 = arith.addf %103, %110 : vector<4x128xf32>
    %c2_100 = arith.constant 2 : index
    %c0_101 = arith.constant 0 : index
    %c0_102 = arith.constant 0 : index
    %112 = vector.load %arg11[%c2_100, %c0_101, %c0_102] : memref<3x4x8xbf16, #tpu.memory_space<vmem>>, vector<1x4x8xbf16>
    %113 = vector.shape_cast %112 : vector<1x4x8xbf16> to vector<4x8xbf16>
    %cst_103 = arith.constant dense<0.000000e+00> : vector<4x128xf32>
    %114 = tpu.matmul %113, %94, %cst_103 {dimension_numbers = #tpu.dot_dimension_numbers<[1], [0], [0], [1], [0, 0, 1, 1], [], []>} : vector<4x8xbf16>, vector<8x128xbf16>, vector<4x128xf32> -> vector<4x128xf32>
    %115 = arith.truncf %114 : vector<4x128xf32> to vector<4x128xbf16>
    %c2_104 = arith.constant 2 : index
    %c0_105 = arith.constant 0 : index
    %c0_106 = arith.constant 0 : index
    %116 = vector.load %arg12[%c2_104, %c0_105, %c0_106] : memref<3x128x128xbf16, #tpu.memory_space<vmem>>, vector<1x128x128xbf16>
    %117 = vector.shape_cast %116 : vector<1x128x128xbf16> to vector<128x128xbf16>
    %cst_107 = arith.constant dense<0.000000e+00> : vector<4x128xf32>
    %118 = tpu.matmul %115, %117, %cst_107 {dimension_numbers = #tpu.dot_dimension_numbers<[1], [0], [0], [1], [0, 0, 1, 1], [], []>} : vector<4x128xbf16>, vector<128x128xbf16>, vector<4x128xf32> -> vector<4x128xf32>
    %119 = arith.addf %111, %118 : vector<4x128xf32>
    %c0_108 = arith.constant 0 : index
    %c0_109 = arith.constant 0 : index
    %120 = vector.load %arg13[%c0_108, %c0_109] : memref<1x128xf32, #tpu.memory_space<vmem>>, vector<1x128xf32>
    %121 = vector.broadcast %120 : vector<1x128xf32> to vector<4x128xf32>
    %122 = arith.addf %119, %121 : vector<4x128xf32>
    %cst_110 = arith.constant 0.000000e+00 : f32
    %123 = vector.broadcast %cst_110 : f32 to vector<4x128xf32>
    %124 = arith.maximumf %122, %123 : vector<4x128xf32>
    %125 = arith.truncf %124 : vector<4x128xf32> to vector<4x128xbf16>
    %cst_111 = arith.constant 0.000000e+00 : f32
    %126 = vector.broadcast %cst_111 : f32 to vector<2x128xf32>
    %c0_112 = arith.constant 0 : index
    %c0_113 = arith.constant 0 : index
    %c0_114 = arith.constant 0 : index
    %127 = vector.load %arg14[%c0_112, %c0_113, %c0_114] : memref<3x2x4xbf16, #tpu.memory_space<vmem>>, vector<1x2x4xbf16>
    %128 = vector.shape_cast %127 : vector<1x2x4xbf16> to vector<2x4xbf16>
    %cst_115 = arith.constant dense<0.000000e+00> : vector<2x128xf32>
    %129 = tpu.matmul %128, %125, %cst_115 {dimension_numbers = #tpu.dot_dimension_numbers<[1], [0], [0], [1], [0, 0, 1, 1], [], []>} : vector<2x4xbf16>, vector<4x128xbf16>, vector<2x128xf32> -> vector<2x128xf32>
    %130 = arith.truncf %129 : vector<2x128xf32> to vector<2x128xbf16>
    %c0_116 = arith.constant 0 : index
    %c0_117 = arith.constant 0 : index
    %c0_118 = arith.constant 0 : index
    %131 = vector.load %arg15[%c0_116, %c0_117, %c0_118] : memref<3x128x128xbf16, #tpu.memory_space<vmem>>, vector<1x128x128xbf16>
    %132 = vector.shape_cast %131 : vector<1x128x128xbf16> to vector<128x128xbf16>
    %cst_119 = arith.constant dense<0.000000e+00> : vector<2x128xf32>
    %133 = tpu.matmul %130, %132, %cst_119 {dimension_numbers = #tpu.dot_dimension_numbers<[1], [0], [0], [1], [0, 0, 1, 1], [], []>} : vector<2x128xbf16>, vector<128x128xbf16>, vector<2x128xf32> -> vector<2x128xf32>
    %134 = arith.addf %126, %133 : vector<2x128xf32>
    %c1_120 = arith.constant 1 : index
    %c0_121 = arith.constant 0 : index
    %c0_122 = arith.constant 0 : index
    %135 = vector.load %arg14[%c1_120, %c0_121, %c0_122] : memref<3x2x4xbf16, #tpu.memory_space<vmem>>, vector<1x2x4xbf16>
    %136 = vector.shape_cast %135 : vector<1x2x4xbf16> to vector<2x4xbf16>
    %cst_123 = arith.constant dense<0.000000e+00> : vector<2x128xf32>
    %137 = tpu.matmul %136, %125, %cst_123 {dimension_numbers = #tpu.dot_dimension_numbers<[1], [0], [0], [1], [0, 0, 1, 1], [], []>} : vector<2x4xbf16>, vector<4x128xbf16>, vector<2x128xf32> -> vector<2x128xf32>
    %138 = arith.truncf %137 : vector<2x128xf32> to vector<2x128xbf16>
    %c1_124 = arith.constant 1 : index
    %c0_125 = arith.constant 0 : index
    %c0_126 = arith.constant 0 : index
    %139 = vector.load %arg15[%c1_124, %c0_125, %c0_126] : memref<3x128x128xbf16, #tpu.memory_space<vmem>>, vector<1x128x128xbf16>
    %140 = vector.shape_cast %139 : vector<1x128x128xbf16> to vector<128x128xbf16>
    %cst_127 = arith.constant dense<0.000000e+00> : vector<2x128xf32>
    %141 = tpu.matmul %138, %140, %cst_127 {dimension_numbers = #tpu.dot_dimension_numbers<[1], [0], [0], [1], [0, 0, 1, 1], [], []>} : vector<2x128xbf16>, vector<128x128xbf16>, vector<2x128xf32> -> vector<2x128xf32>
    %142 = arith.addf %134, %141 : vector<2x128xf32>
    %c2_128 = arith.constant 2 : index
    %c0_129 = arith.constant 0 : index
    %c0_130 = arith.constant 0 : index
    %143 = vector.load %arg14[%c2_128, %c0_129, %c0_130] : memref<3x2x4xbf16, #tpu.memory_space<vmem>>, vector<1x2x4xbf16>
    %144 = vector.shape_cast %143 : vector<1x2x4xbf16> to vector<2x4xbf16>
    %cst_131 = arith.constant dense<0.000000e+00> : vector<2x128xf32>
    %145 = tpu.matmul %144, %125, %cst_131 {dimension_numbers = #tpu.dot_dimension_numbers<[1], [0], [0], [1], [0, 0, 1, 1], [], []>} : vector<2x4xbf16>, vector<4x128xbf16>, vector<2x128xf32> -> vector<2x128xf32>
    %146 = arith.truncf %145 : vector<2x128xf32> to vector<2x128xbf16>
    %c2_132 = arith.constant 2 : index
    %c0_133 = arith.constant 0 : index
    %c0_134 = arith.constant 0 : index
    %147 = vector.load %arg15[%c2_132, %c0_133, %c0_134] : memref<3x128x128xbf16, #tpu.memory_space<vmem>>, vector<1x128x128xbf16>
    %148 = vector.shape_cast %147 : vector<1x128x128xbf16> to vector<128x128xbf16>
    %cst_135 = arith.constant dense<0.000000e+00> : vector<2x128xf32>
    %149 = tpu.matmul %146, %148, %cst_135 {dimension_numbers = #tpu.dot_dimension_numbers<[1], [0], [0], [1], [0, 0, 1, 1], [], []>} : vector<2x128xbf16>, vector<128x128xbf16>, vector<2x128xf32> -> vector<2x128xf32>
    %150 = arith.addf %142, %149 : vector<2x128xf32>
    %c0_136 = arith.constant 0 : index
    %c0_137 = arith.constant 0 : index
    %151 = vector.load %arg16[%c0_136, %c0_137] : memref<1x128xf32, #tpu.memory_space<vmem>>, vector<1x128xf32>
    %152 = vector.broadcast %151 : vector<1x128xf32> to vector<2x128xf32>
    %153 = arith.addf %150, %152 : vector<2x128xf32>
    %cst_138 = arith.constant 0.000000e+00 : f32
    %154 = vector.broadcast %cst_138 : f32 to vector<2x128xf32>
    %155 = arith.maximumf %153, %154 : vector<2x128xf32>
    %156 = arith.truncf %155 : vector<2x128xf32> to vector<2x128xbf16>
    %c0_139 = arith.constant 0 : index
    %c0_140 = arith.constant 0 : index
    %157 = vector.load %arg17[%c0_139, %c0_140] : memref<128x512xbf16, #tpu.memory_space<vmem>>, vector<128x512xbf16>
    %cst_141 = arith.constant dense<0.000000e+00> : vector<16x512xf32>
    %158 = tpu.matmul %63, %157, %cst_141 {dimension_numbers = #tpu.dot_dimension_numbers<[1], [0], [0], [1], [0, 0, 1, 1], [], []>} : vector<16x128xbf16>, vector<128x512xbf16>, vector<16x512xf32> -> vector<16x512xf32>
    %c0_142 = arith.constant 0 : index
    %c0_143 = arith.constant 0 : index
    %159 = vector.load %arg18[%c0_142, %c0_143] : memref<1x512xf32, #tpu.memory_space<vmem>>, vector<1x512xf32>
    %160 = vector.broadcast %159 : vector<1x512xf32> to vector<16x512xf32>
    %161 = arith.addf %158, %160 : vector<16x512xf32>
    %162 = arith.truncf %161 : vector<16x512xf32> to vector<16x512xbf16>
    %c0_144 = arith.constant 0 : index
    %c0_145 = arith.constant 0 : index
    %163 = vector.load %arg19[%c0_144, %c0_145] : memref<128x256xbf16, #tpu.memory_space<vmem>>, vector<128x256xbf16>
    %cst_146 = arith.constant dense<0.000000e+00> : vector<8x256xf32>
    %164 = tpu.matmul %94, %163, %cst_146 {dimension_numbers = #tpu.dot_dimension_numbers<[1], [0], [0], [1], [0, 0, 1, 1], [], []>} : vector<8x128xbf16>, vector<128x256xbf16>, vector<8x256xf32> -> vector<8x256xf32>
    %c0_147 = arith.constant 0 : index
    %c0_148 = arith.constant 0 : index
    %165 = vector.load %arg20[%c0_147, %c0_148] : memref<1x256xf32, #tpu.memory_space<vmem>>, vector<1x256xf32>
    %166 = vector.broadcast %165 : vector<1x256xf32> to vector<8x256xf32>
    %167 = arith.addf %164, %166 : vector<8x256xf32>
    %168 = arith.truncf %167 : vector<8x256xf32> to vector<8x256xbf16>
    %c0_149 = arith.constant 0 : index
    %c0_150 = arith.constant 0 : index
    %169 = vector.load %arg21[%c0_149, %c0_150] : memref<128x128xbf16, #tpu.memory_space<vmem>>, vector<128x128xbf16>
    %cst_151 = arith.constant dense<0.000000e+00> : vector<4x128xf32>
    %170 = tpu.matmul %125, %169, %cst_151 {dimension_numbers = #tpu.dot_dimension_numbers<[1], [0], [0], [1], [0, 0, 1, 1], [], []>} : vector<4x128xbf16>, vector<128x128xbf16>, vector<4x128xf32> -> vector<4x128xf32>
    %c0_152 = arith.constant 0 : index
    %c0_153 = arith.constant 0 : index
    %171 = vector.load %arg22[%c0_152, %c0_153] : memref<1x128xf32, #tpu.memory_space<vmem>>, vector<1x128xf32>
    %172 = vector.broadcast %171 : vector<1x128xf32> to vector<4x128xf32>
    %173 = arith.addf %170, %172 : vector<4x128xf32>
    %174 = arith.truncf %173 : vector<4x128xf32> to vector<4x128xbf16>
    %c0_154 = arith.constant 0 : index
    %c0_155 = arith.constant 0 : index
    %175 = vector.load %arg23[%c0_154, %c0_155] : memref<128x64xbf16, #tpu.memory_space<vmem>>, vector<128x64xbf16>
    %cst_156 = arith.constant dense<0.000000e+00> : vector<2x64xf32>
    %176 = tpu.matmul %156, %175, %cst_156 {dimension_numbers = #tpu.dot_dimension_numbers<[1], [0], [0], [1], [0, 0, 1, 1], [], []>} : vector<2x128xbf16>, vector<128x64xbf16>, vector<2x64xf32> -> vector<2x64xf32>
    %c0_157 = arith.constant 0 : index
    %c0_158 = arith.constant 0 : index
    %177 = vector.load %arg24[%c0_157, %c0_158] : memref<1x64xf32, #tpu.memory_space<vmem>>, vector<1x64xf32>
    %178 = vector.broadcast %177 : vector<1x64xf32> to vector<2x64xf32>
    %179 = arith.addf %176, %178 : vector<2x64xf32>
    %180 = arith.truncf %179 : vector<2x64xf32> to vector<2x64xbf16>
    %c0_159 = arith.constant 0 : index
    %c0_160 = arith.constant 0 : index
    %181 = vector.load %arg26[%c0_159, %c0_160] : memref<64x128xbf16, #tpu.memory_space<vmem>>, vector<64x128xbf16>
    %cst_161 = arith.constant dense<0.000000e+00> : vector<2x128xf32>
    %182 = tpu.matmul %180, %181, %cst_161 {dimension_numbers = #tpu.dot_dimension_numbers<[1], [0], [0], [1], [0, 0, 1, 1], [], []>} : vector<2x64xbf16>, vector<64x128xbf16>, vector<2x128xf32> -> vector<2x128xf32>
    %183 = arith.truncf %182 : vector<2x128xf32> to vector<2x128xbf16>
    %c0_162 = arith.constant 0 : index
    %c0_163 = arith.constant 0 : index
    %184 = vector.load %arg25[%c0_162, %c0_163] : memref<4x2xbf16, #tpu.memory_space<vmem>>, vector<4x2xbf16>
    %cst_164 = arith.constant dense<0.000000e+00> : vector<4x128xf32>
    %185 = tpu.matmul %184, %183, %cst_164 {dimension_numbers = #tpu.dot_dimension_numbers<[1], [0], [0], [1], [0, 0, 1, 1], [], []>} : vector<4x2xbf16>, vector<2x128xbf16>, vector<4x128xf32> -> vector<4x128xf32>
    %186 = arith.truncf %185 : vector<4x128xf32> to vector<4x128xbf16>
    %187 = arith.addf %174, %186 : vector<4x128xbf16>
    %c0_165 = arith.constant 0 : index
    %c0_166 = arith.constant 0 : index
    %188 = vector.load %arg28[%c0_165, %c0_166] : memref<128x256xbf16, #tpu.memory_space<vmem>>, vector<128x256xbf16>
    %cst_167 = arith.constant dense<0.000000e+00> : vector<4x256xf32>
    %189 = tpu.matmul %187, %188, %cst_167 {dimension_numbers = #tpu.dot_dimension_numbers<[1], [0], [0], [1], [0, 0, 1, 1], [], []>} : vector<4x128xbf16>, vector<128x256xbf16>, vector<4x256xf32> -> vector<4x256xf32>
    %190 = arith.truncf %189 : vector<4x256xf32> to vector<4x256xbf16>
    %c0_168 = arith.constant 0 : index
    %c0_169 = arith.constant 0 : index
    %191 = vector.load %arg27[%c0_168, %c0_169] : memref<8x4xbf16, #tpu.memory_space<vmem>>, vector<8x4xbf16>
    %cst_170 = arith.constant dense<0.000000e+00> : vector<8x256xf32>
    %192 = tpu.matmul %191, %190, %cst_170 {dimension_numbers = #tpu.dot_dimension_numbers<[1], [0], [0], [1], [0, 0, 1, 1], [], []>} : vector<8x4xbf16>, vector<4x256xbf16>, vector<8x256xf32> -> vector<8x256xf32>
    %193 = arith.truncf %192 : vector<8x256xf32> to vector<8x256xbf16>
    %194 = arith.addf %168, %193 : vector<8x256xbf16>
    %c0_171 = arith.constant 0 : index
    %c0_172 = arith.constant 0 : index
    %195 = vector.load %arg30[%c0_171, %c0_172] : memref<256x512xbf16, #tpu.memory_space<vmem>>, vector<256x512xbf16>
    %cst_173 = arith.constant dense<0.000000e+00> : vector<8x512xf32>
    %196 = tpu.matmul %194, %195, %cst_173 {dimension_numbers = #tpu.dot_dimension_numbers<[1], [0], [0], [1], [0, 0, 1, 1], [], []>} : vector<8x256xbf16>, vector<256x512xbf16>, vector<8x512xf32> -> vector<8x512xf32>
    %197 = arith.truncf %196 : vector<8x512xf32> to vector<8x512xbf16>
    %c0_174 = arith.constant 0 : index
    %c0_175 = arith.constant 0 : index
    %198 = vector.load %arg29[%c0_174, %c0_175] : memref<16x8xbf16, #tpu.memory_space<vmem>>, vector<16x8xbf16>
    %cst_176 = arith.constant dense<0.000000e+00> : vector<16x512xf32>
    %199 = tpu.matmul %198, %197, %cst_176 {dimension_numbers = #tpu.dot_dimension_numbers<[1], [0], [0], [1], [0, 0, 1, 1], [], []>} : vector<16x8xbf16>, vector<8x512xbf16>, vector<16x512xf32> -> vector<16x512xf32>
    %200 = arith.truncf %199 : vector<16x512xf32> to vector<16x512xbf16>
    %201 = arith.addf %162, %200 : vector<16x512xbf16>
    %cst_177 = arith.constant 0.000000e+00 : f32
    %202 = vector.broadcast %cst_177 : f32 to vector<16x512xf32>
    %c0_178 = arith.constant 0 : index
    %c0_179 = arith.constant 0 : index
    %c0_180 = arith.constant 0 : index
    %203 = vector.load %arg31[%c0_178, %c0_179, %c0_180] : memref<3x16x16xbf16, #tpu.memory_space<vmem>>, vector<1x16x16xbf16>
    %204 = vector.shape_cast %203 : vector<1x16x16xbf16> to vector<16x16xbf16>
    %cst_181 = arith.constant dense<0.000000e+00> : vector<16x512xf32>
    %205 = tpu.matmul %204, %201, %cst_181 {dimension_numbers = #tpu.dot_dimension_numbers<[1], [0], [0], [1], [0, 0, 1, 1], [], []>} : vector<16x16xbf16>, vector<16x512xbf16>, vector<16x512xf32> -> vector<16x512xf32>
    %206 = arith.truncf %205 : vector<16x512xf32> to vector<16x512xbf16>
    %c0_182 = arith.constant 0 : index
    %c0_183 = arith.constant 0 : index
    %c0_184 = arith.constant 0 : index
    %207 = vector.load %arg32[%c0_182, %c0_183, %c0_184] : memref<3x512x512xbf16, #tpu.memory_space<vmem>>, vector<1x512x512xbf16>
    %208 = vector.shape_cast %207 : vector<1x512x512xbf16> to vector<512x512xbf16>
    %cst_185 = arith.constant dense<0.000000e+00> : vector<16x512xf32>
    %209 = tpu.matmul %206, %208, %cst_185 {dimension_numbers = #tpu.dot_dimension_numbers<[1], [0], [0], [1], [0, 0, 1, 1], [], []>} : vector<16x512xbf16>, vector<512x512xbf16>, vector<16x512xf32> -> vector<16x512xf32>
    %210 = arith.addf %202, %209 : vector<16x512xf32>
    %c1_186 = arith.constant 1 : index
    %c0_187 = arith.constant 0 : index
    %c0_188 = arith.constant 0 : index
    %211 = vector.load %arg31[%c1_186, %c0_187, %c0_188] : memref<3x16x16xbf16, #tpu.memory_space<vmem>>, vector<1x16x16xbf16>
    %212 = vector.shape_cast %211 : vector<1x16x16xbf16> to vector<16x16xbf16>
    %cst_189 = arith.constant dense<0.000000e+00> : vector<16x512xf32>
    %213 = tpu.matmul %212, %201, %cst_189 {dimension_numbers = #tpu.dot_dimension_numbers<[1], [0], [0], [1], [0, 0, 1, 1], [], []>} : vector<16x16xbf16>, vector<16x512xbf16>, vector<16x512xf32> -> vector<16x512xf32>
    %214 = arith.truncf %213 : vector<16x512xf32> to vector<16x512xbf16>
    %c1_190 = arith.constant 1 : index
    %c0_191 = arith.constant 0 : index
    %c0_192 = arith.constant 0 : index
    %215 = vector.load %arg32[%c1_190, %c0_191, %c0_192] : memref<3x512x512xbf16, #tpu.memory_space<vmem>>, vector<1x512x512xbf16>
    %216 = vector.shape_cast %215 : vector<1x512x512xbf16> to vector<512x512xbf16>
    %cst_193 = arith.constant dense<0.000000e+00> : vector<16x512xf32>
    %217 = tpu.matmul %214, %216, %cst_193 {dimension_numbers = #tpu.dot_dimension_numbers<[1], [0], [0], [1], [0, 0, 1, 1], [], []>} : vector<16x512xbf16>, vector<512x512xbf16>, vector<16x512xf32> -> vector<16x512xf32>
    %218 = arith.addf %210, %217 : vector<16x512xf32>
    %c2_194 = arith.constant 2 : index
    %c0_195 = arith.constant 0 : index
    %c0_196 = arith.constant 0 : index
    %219 = vector.load %arg31[%c2_194, %c0_195, %c0_196] : memref<3x16x16xbf16, #tpu.memory_space<vmem>>, vector<1x16x16xbf16>
    %220 = vector.shape_cast %219 : vector<1x16x16xbf16> to vector<16x16xbf16>
    %cst_197 = arith.constant dense<0.000000e+00> : vector<16x512xf32>
    %221 = tpu.matmul %220, %201, %cst_197 {dimension_numbers = #tpu.dot_dimension_numbers<[1], [0], [0], [1], [0, 0, 1, 1], [], []>} : vector<16x16xbf16>, vector<16x512xbf16>, vector<16x512xf32> -> vector<16x512xf32>
    %222 = arith.truncf %221 : vector<16x512xf32> to vector<16x512xbf16>
    %c2_198 = arith.constant 2 : index
    %c0_199 = arith.constant 0 : index
    %c0_200 = arith.constant 0 : index
    %223 = vector.load %arg32[%c2_198, %c0_199, %c0_200] : memref<3x512x512xbf16, #tpu.memory_space<vmem>>, vector<1x512x512xbf16>
    %224 = vector.shape_cast %223 : vector<1x512x512xbf16> to vector<512x512xbf16>
    %cst_201 = arith.constant dense<0.000000e+00> : vector<16x512xf32>
    %225 = tpu.matmul %222, %224, %cst_201 {dimension_numbers = #tpu.dot_dimension_numbers<[1], [0], [0], [1], [0, 0, 1, 1], [], []>} : vector<16x512xbf16>, vector<512x512xbf16>, vector<16x512xf32> -> vector<16x512xf32>
    %226 = arith.addf %218, %225 : vector<16x512xf32>
    %c0_202 = arith.constant 0 : index
    %c0_203 = arith.constant 0 : index
    %227 = vector.load %arg33[%c0_202, %c0_203] : memref<1x512xf32, #tpu.memory_space<vmem>>, vector<1x512xf32>
    %228 = vector.broadcast %227 : vector<1x512xf32> to vector<16x512xf32>
    %229 = arith.addf %226, %228 : vector<16x512xf32>
    %230 = arith.truncf %229 : vector<16x512xf32> to vector<16x512xbf16>
    %cst_204 = arith.constant 0.000000e+00 : f32
    %231 = vector.broadcast %cst_204 : f32 to vector<8x256xf32>
    %c0_205 = arith.constant 0 : index
    %c0_206 = arith.constant 0 : index
    %c0_207 = arith.constant 0 : index
    %232 = vector.load %arg34[%c0_205, %c0_206, %c0_207] : memref<3x8x8xbf16, #tpu.memory_space<vmem>>, vector<1x8x8xbf16>
    %233 = vector.shape_cast %232 : vector<1x8x8xbf16> to vector<8x8xbf16>
    %cst_208 = arith.constant dense<0.000000e+00> : vector<8x256xf32>
    %234 = tpu.matmul %233, %194, %cst_208 {dimension_numbers = #tpu.dot_dimension_numbers<[1], [0], [0], [1], [0, 0, 1, 1], [], []>} : vector<8x8xbf16>, vector<8x256xbf16>, vector<8x256xf32> -> vector<8x256xf32>
    %235 = arith.truncf %234 : vector<8x256xf32> to vector<8x256xbf16>
    %c0_209 = arith.constant 0 : index
    %c0_210 = arith.constant 0 : index
    %c0_211 = arith.constant 0 : index
    %236 = vector.load %arg35[%c0_209, %c0_210, %c0_211] : memref<3x256x256xbf16, #tpu.memory_space<vmem>>, vector<1x256x256xbf16>
    %237 = vector.shape_cast %236 : vector<1x256x256xbf16> to vector<256x256xbf16>
    %cst_212 = arith.constant dense<0.000000e+00> : vector<8x256xf32>
    %238 = tpu.matmul %235, %237, %cst_212 {dimension_numbers = #tpu.dot_dimension_numbers<[1], [0], [0], [1], [0, 0, 1, 1], [], []>} : vector<8x256xbf16>, vector<256x256xbf16>, vector<8x256xf32> -> vector<8x256xf32>
    %239 = arith.addf %231, %238 : vector<8x256xf32>
    %c1_213 = arith.constant 1 : index
    %c0_214 = arith.constant 0 : index
    %c0_215 = arith.constant 0 : index
    %240 = vector.load %arg34[%c1_213, %c0_214, %c0_215] : memref<3x8x8xbf16, #tpu.memory_space<vmem>>, vector<1x8x8xbf16>
    %241 = vector.shape_cast %240 : vector<1x8x8xbf16> to vector<8x8xbf16>
    %cst_216 = arith.constant dense<0.000000e+00> : vector<8x256xf32>
    %242 = tpu.matmul %241, %194, %cst_216 {dimension_numbers = #tpu.dot_dimension_numbers<[1], [0], [0], [1], [0, 0, 1, 1], [], []>} : vector<8x8xbf16>, vector<8x256xbf16>, vector<8x256xf32> -> vector<8x256xf32>
    %243 = arith.truncf %242 : vector<8x256xf32> to vector<8x256xbf16>
    %c1_217 = arith.constant 1 : index
    %c0_218 = arith.constant 0 : index
    %c0_219 = arith.constant 0 : index
    %244 = vector.load %arg35[%c1_217, %c0_218, %c0_219] : memref<3x256x256xbf16, #tpu.memory_space<vmem>>, vector<1x256x256xbf16>
    %245 = vector.shape_cast %244 : vector<1x256x256xbf16> to vector<256x256xbf16>
    %cst_220 = arith.constant dense<0.000000e+00> : vector<8x256xf32>
    %246 = tpu.matmul %243, %245, %cst_220 {dimension_numbers = #tpu.dot_dimension_numbers<[1], [0], [0], [1], [0, 0, 1, 1], [], []>} : vector<8x256xbf16>, vector<256x256xbf16>, vector<8x256xf32> -> vector<8x256xf32>
    %247 = arith.addf %239, %246 : vector<8x256xf32>
    %c2_221 = arith.constant 2 : index
    %c0_222 = arith.constant 0 : index
    %c0_223 = arith.constant 0 : index
    %248 = vector.load %arg34[%c2_221, %c0_222, %c0_223] : memref<3x8x8xbf16, #tpu.memory_space<vmem>>, vector<1x8x8xbf16>
    %249 = vector.shape_cast %248 : vector<1x8x8xbf16> to vector<8x8xbf16>
    %cst_224 = arith.constant dense<0.000000e+00> : vector<8x256xf32>
    %250 = tpu.matmul %249, %194, %cst_224 {dimension_numbers = #tpu.dot_dimension_numbers<[1], [0], [0], [1], [0, 0, 1, 1], [], []>} : vector<8x8xbf16>, vector<8x256xbf16>, vector<8x256xf32> -> vector<8x256xf32>
    %251 = arith.truncf %250 : vector<8x256xf32> to vector<8x256xbf16>
    %c2_225 = arith.constant 2 : index
    %c0_226 = arith.constant 0 : index
    %c0_227 = arith.constant 0 : index
    %252 = vector.load %arg35[%c2_225, %c0_226, %c0_227] : memref<3x256x256xbf16, #tpu.memory_space<vmem>>, vector<1x256x256xbf16>
    %253 = vector.shape_cast %252 : vector<1x256x256xbf16> to vector<256x256xbf16>
    %cst_228 = arith.constant dense<0.000000e+00> : vector<8x256xf32>
    %254 = tpu.matmul %251, %253, %cst_228 {dimension_numbers = #tpu.dot_dimension_numbers<[1], [0], [0], [1], [0, 0, 1, 1], [], []>} : vector<8x256xbf16>, vector<256x256xbf16>, vector<8x256xf32> -> vector<8x256xf32>
    %255 = arith.addf %247, %254 : vector<8x256xf32>
    %c0_229 = arith.constant 0 : index
    %c0_230 = arith.constant 0 : index
    %256 = vector.load %arg36[%c0_229, %c0_230] : memref<1x256xf32, #tpu.memory_space<vmem>>, vector<1x256xf32>
    %257 = vector.broadcast %256 : vector<1x256xf32> to vector<8x256xf32>
    %258 = arith.addf %255, %257 : vector<8x256xf32>
    %259 = arith.truncf %258 : vector<8x256xf32> to vector<8x256xbf16>
    %cst_231 = arith.constant 0.000000e+00 : f32
    %260 = vector.broadcast %cst_231 : f32 to vector<4x128xf32>
    %c0_232 = arith.constant 0 : index
    %c0_233 = arith.constant 0 : index
    %c0_234 = arith.constant 0 : index
    %261 = vector.load %arg37[%c0_232, %c0_233, %c0_234] : memref<3x4x4xbf16, #tpu.memory_space<vmem>>, vector<1x4x4xbf16>
    %262 = vector.shape_cast %261 : vector<1x4x4xbf16> to vector<4x4xbf16>
    %cst_235 = arith.constant dense<0.000000e+00> : vector<4x128xf32>
    %263 = tpu.matmul %262, %187, %cst_235 {dimension_numbers = #tpu.dot_dimension_numbers<[1], [0], [0], [1], [0, 0, 1, 1], [], []>} : vector<4x4xbf16>, vector<4x128xbf16>, vector<4x128xf32> -> vector<4x128xf32>
    %264 = arith.truncf %263 : vector<4x128xf32> to vector<4x128xbf16>
    %c0_236 = arith.constant 0 : index
    %c0_237 = arith.constant 0 : index
    %c0_238 = arith.constant 0 : index
    %265 = vector.load %arg38[%c0_236, %c0_237, %c0_238] : memref<3x128x128xbf16, #tpu.memory_space<vmem>>, vector<1x128x128xbf16>
    %266 = vector.shape_cast %265 : vector<1x128x128xbf16> to vector<128x128xbf16>
    %cst_239 = arith.constant dense<0.000000e+00> : vector<4x128xf32>
    %267 = tpu.matmul %264, %266, %cst_239 {dimension_numbers = #tpu.dot_dimension_numbers<[1], [0], [0], [1], [0, 0, 1, 1], [], []>} : vector<4x128xbf16>, vector<128x128xbf16>, vector<4x128xf32> -> vector<4x128xf32>
    %268 = arith.addf %260, %267 : vector<4x128xf32>
    %c1_240 = arith.constant 1 : index
    %c0_241 = arith.constant 0 : index
    %c0_242 = arith.constant 0 : index
    %269 = vector.load %arg37[%c1_240, %c0_241, %c0_242] : memref<3x4x4xbf16, #tpu.memory_space<vmem>>, vector<1x4x4xbf16>
    %270 = vector.shape_cast %269 : vector<1x4x4xbf16> to vector<4x4xbf16>
    %cst_243 = arith.constant dense<0.000000e+00> : vector<4x128xf32>
    %271 = tpu.matmul %270, %187, %cst_243 {dimension_numbers = #tpu.dot_dimension_numbers<[1], [0], [0], [1], [0, 0, 1, 1], [], []>} : vector<4x4xbf16>, vector<4x128xbf16>, vector<4x128xf32> -> vector<4x128xf32>
    %272 = arith.truncf %271 : vector<4x128xf32> to vector<4x128xbf16>
    %c1_244 = arith.constant 1 : index
    %c0_245 = arith.constant 0 : index
    %c0_246 = arith.constant 0 : index
    %273 = vector.load %arg38[%c1_244, %c0_245, %c0_246] : memref<3x128x128xbf16, #tpu.memory_space<vmem>>, vector<1x128x128xbf16>
    %274 = vector.shape_cast %273 : vector<1x128x128xbf16> to vector<128x128xbf16>
    %cst_247 = arith.constant dense<0.000000e+00> : vector<4x128xf32>
    %275 = tpu.matmul %272, %274, %cst_247 {dimension_numbers = #tpu.dot_dimension_numbers<[1], [0], [0], [1], [0, 0, 1, 1], [], []>} : vector<4x128xbf16>, vector<128x128xbf16>, vector<4x128xf32> -> vector<4x128xf32>
    %276 = arith.addf %268, %275 : vector<4x128xf32>
    %c2_248 = arith.constant 2 : index
    %c0_249 = arith.constant 0 : index
    %c0_250 = arith.constant 0 : index
    %277 = vector.load %arg37[%c2_248, %c0_249, %c0_250] : memref<3x4x4xbf16, #tpu.memory_space<vmem>>, vector<1x4x4xbf16>
    %278 = vector.shape_cast %277 : vector<1x4x4xbf16> to vector<4x4xbf16>
    %cst_251 = arith.constant dense<0.000000e+00> : vector<4x128xf32>
    %279 = tpu.matmul %278, %187, %cst_251 {dimension_numbers = #tpu.dot_dimension_numbers<[1], [0], [0], [1], [0, 0, 1, 1], [], []>} : vector<4x4xbf16>, vector<4x128xbf16>, vector<4x128xf32> -> vector<4x128xf32>
    %280 = arith.truncf %279 : vector<4x128xf32> to vector<4x128xbf16>
    %c2_252 = arith.constant 2 : index
    %c0_253 = arith.constant 0 : index
    %c0_254 = arith.constant 0 : index
    %281 = vector.load %arg38[%c2_252, %c0_253, %c0_254] : memref<3x128x128xbf16, #tpu.memory_space<vmem>>, vector<1x128x128xbf16>
    %282 = vector.shape_cast %281 : vector<1x128x128xbf16> to vector<128x128xbf16>
    %cst_255 = arith.constant dense<0.000000e+00> : vector<4x128xf32>
    %283 = tpu.matmul %280, %282, %cst_255 {dimension_numbers = #tpu.dot_dimension_numbers<[1], [0], [0], [1], [0, 0, 1, 1], [], []>} : vector<4x128xbf16>, vector<128x128xbf16>, vector<4x128xf32> -> vector<4x128xf32>
    %284 = arith.addf %276, %283 : vector<4x128xf32>
    %c0_256 = arith.constant 0 : index
    %c0_257 = arith.constant 0 : index
    %285 = vector.load %arg39[%c0_256, %c0_257] : memref<1x128xf32, #tpu.memory_space<vmem>>, vector<1x128xf32>
    %286 = vector.broadcast %285 : vector<1x128xf32> to vector<4x128xf32>
    %287 = arith.addf %284, %286 : vector<4x128xf32>
    %288 = arith.truncf %287 : vector<4x128xf32> to vector<4x128xbf16>
    %cst_258 = arith.constant 0.000000e+00 : f32
    %289 = vector.broadcast %cst_258 : f32 to vector<2x64xf32>
    %c0_259 = arith.constant 0 : index
    %c0_260 = arith.constant 0 : index
    %c0_261 = arith.constant 0 : index
    %290 = vector.load %arg40[%c0_259, %c0_260, %c0_261] : memref<3x2x2xbf16, #tpu.memory_space<vmem>>, vector<1x2x2xbf16>
    %291 = vector.shape_cast %290 : vector<1x2x2xbf16> to vector<2x2xbf16>
    %cst_262 = arith.constant dense<0.000000e+00> : vector<2x64xf32>
    %292 = tpu.matmul %291, %180, %cst_262 {dimension_numbers = #tpu.dot_dimension_numbers<[1], [0], [0], [1], [0, 0, 1, 1], [], []>} : vector<2x2xbf16>, vector<2x64xbf16>, vector<2x64xf32> -> vector<2x64xf32>
    %293 = arith.truncf %292 : vector<2x64xf32> to vector<2x64xbf16>
    %c0_263 = arith.constant 0 : index
    %c0_264 = arith.constant 0 : index
    %c0_265 = arith.constant 0 : index
    %294 = vector.load %arg41[%c0_263, %c0_264, %c0_265] : memref<3x64x64xbf16, #tpu.memory_space<vmem>>, vector<1x64x64xbf16>
    %295 = vector.shape_cast %294 : vector<1x64x64xbf16> to vector<64x64xbf16>
    %cst_266 = arith.constant dense<0.000000e+00> : vector<2x64xf32>
    %296 = tpu.matmul %293, %295, %cst_266 {dimension_numbers = #tpu.dot_dimension_numbers<[1], [0], [0], [1], [0, 0, 1, 1], [], []>} : vector<2x64xbf16>, vector<64x64xbf16>, vector<2x64xf32> -> vector<2x64xf32>
    %297 = arith.addf %289, %296 : vector<2x64xf32>
    %c1_267 = arith.constant 1 : index
    %c0_268 = arith.constant 0 : index
    %c0_269 = arith.constant 0 : index
    %298 = vector.load %arg40[%c1_267, %c0_268, %c0_269] : memref<3x2x2xbf16, #tpu.memory_space<vmem>>, vector<1x2x2xbf16>
    %299 = vector.shape_cast %298 : vector<1x2x2xbf16> to vector<2x2xbf16>
    %cst_270 = arith.constant dense<0.000000e+00> : vector<2x64xf32>
    %300 = tpu.matmul %299, %180, %cst_270 {dimension_numbers = #tpu.dot_dimension_numbers<[1], [0], [0], [1], [0, 0, 1, 1], [], []>} : vector<2x2xbf16>, vector<2x64xbf16>, vector<2x64xf32> -> vector<2x64xf32>
    %301 = arith.truncf %300 : vector<2x64xf32> to vector<2x64xbf16>
    %c1_271 = arith.constant 1 : index
    %c0_272 = arith.constant 0 : index
    %c0_273 = arith.constant 0 : index
    %302 = vector.load %arg41[%c1_271, %c0_272, %c0_273] : memref<3x64x64xbf16, #tpu.memory_space<vmem>>, vector<1x64x64xbf16>
    %303 = vector.shape_cast %302 : vector<1x64x64xbf16> to vector<64x64xbf16>
    %cst_274 = arith.constant dense<0.000000e+00> : vector<2x64xf32>
    %304 = tpu.matmul %301, %303, %cst_274 {dimension_numbers = #tpu.dot_dimension_numbers<[1], [0], [0], [1], [0, 0, 1, 1], [], []>} : vector<2x64xbf16>, vector<64x64xbf16>, vector<2x64xf32> -> vector<2x64xf32>
    %305 = arith.addf %297, %304 : vector<2x64xf32>
    %c2_275 = arith.constant 2 : index
    %c0_276 = arith.constant 0 : index
    %c0_277 = arith.constant 0 : index
    %306 = vector.load %arg40[%c2_275, %c0_276, %c0_277] : memref<3x2x2xbf16, #tpu.memory_space<vmem>>, vector<1x2x2xbf16>
    %307 = vector.shape_cast %306 : vector<1x2x2xbf16> to vector<2x2xbf16>
    %cst_278 = arith.constant dense<0.000000e+00> : vector<2x64xf32>
    %308 = tpu.matmul %307, %180, %cst_278 {dimension_numbers = #tpu.dot_dimension_numbers<[1], [0], [0], [1], [0, 0, 1, 1], [], []>} : vector<2x2xbf16>, vector<2x64xbf16>, vector<2x64xf32> -> vector<2x64xf32>
    %309 = arith.truncf %308 : vector<2x64xf32> to vector<2x64xbf16>
    %c2_279 = arith.constant 2 : index
    %c0_280 = arith.constant 0 : index
    %c0_281 = arith.constant 0 : index
    %310 = vector.load %arg41[%c2_279, %c0_280, %c0_281] : memref<3x64x64xbf16, #tpu.memory_space<vmem>>, vector<1x64x64xbf16>
    %311 = vector.shape_cast %310 : vector<1x64x64xbf16> to vector<64x64xbf16>
    %cst_282 = arith.constant dense<0.000000e+00> : vector<2x64xf32>
    %312 = tpu.matmul %309, %311, %cst_282 {dimension_numbers = #tpu.dot_dimension_numbers<[1], [0], [0], [1], [0, 0, 1, 1], [], []>} : vector<2x64xbf16>, vector<64x64xbf16>, vector<2x64xf32> -> vector<2x64xf32>
    %313 = arith.addf %305, %312 : vector<2x64xf32>
    %c0_283 = arith.constant 0 : index
    %c0_284 = arith.constant 0 : index
    %314 = vector.load %arg42[%c0_283, %c0_284] : memref<1x64xf32, #tpu.memory_space<vmem>>, vector<1x64xf32>
    %315 = vector.broadcast %314 : vector<1x64xf32> to vector<2x64xf32>
    %316 = arith.addf %313, %315 : vector<2x64xf32>
    %317 = arith.truncf %316 : vector<2x64xf32> to vector<2x64xbf16>
    %c0_285 = arith.constant 0 : index
    %c0_286 = arith.constant 0 : index
    %c0_287 = arith.constant 0 : index
    %318 = vector.load %arg43[%c0_285, %c0_286, %c0_287] : memref<1x16x512xbf16, #tpu.memory_space<vmem>>, vector<1x16x512xbf16>
    %319 = vector.shape_cast %318 : vector<1x16x512xbf16> to vector<16x512xbf16>
    %320 = vector.shape_cast %230 : vector<16x512xbf16> to vector<1x16x512xbf16>
    tpu.vector_store %arg43[%c0_285, %c0_286, %c0_287], %320 {strides = array<i32>} : memref<1x16x512xbf16, #tpu.memory_space<vmem>>, vector<1x16x512xbf16>,
    %c0_288 = arith.constant 0 : index
    %c0_289 = arith.constant 0 : index
    %c0_290 = arith.constant 0 : index
    %321 = vector.load %arg44[%c0_288, %c0_289, %c0_290] : memref<1x8x256xbf16, #tpu.memory_space<vmem>>, vector<1x8x256xbf16>
    %322 = vector.shape_cast %321 : vector<1x8x256xbf16> to vector<8x256xbf16>
    %323 = vector.shape_cast %259 : vector<8x256xbf16> to vector<1x8x256xbf16>
    tpu.vector_store %arg44[%c0_288, %c0_289, %c0_290], %323 {strides = array<i32>} : memref<1x8x256xbf16, #tpu.memory_space<vmem>>, vector<1x8x256xbf16>,
    %c0_291 = arith.constant 0 : index
    %c0_292 = arith.constant 0 : index
    %c0_293 = arith.constant 0 : index
    %324 = vector.load %arg45[%c0_291, %c0_292, %c0_293] : memref<1x4x128xbf16, #tpu.memory_space<vmem>>, vector<1x4x128xbf16>
    %325 = vector.shape_cast %324 : vector<1x4x128xbf16> to vector<4x128xbf16>
    %326 = vector.shape_cast %288 : vector<4x128xbf16> to vector<1x4x128xbf16>
    tpu.vector_store %arg45[%c0_291, %c0_292, %c0_293], %326 {strides = array<i32>} : memref<1x4x128xbf16, #tpu.memory_space<vmem>>, vector<1x4x128xbf16>,
    %c0_294 = arith.constant 0 : index
    %c0_295 = arith.constant 0 : index
    %c0_296 = arith.constant 0 : index
    %327 = vector.load %arg46[%c0_294, %c0_295, %c0_296] : memref<1x2x64xbf16, #tpu.memory_space<vmem>>, vector<1x2x64xbf16>
    %328 = vector.shape_cast %327 : vector<1x2x64xbf16> to vector<2x64xbf16>
    %329 = vector.shape_cast %317 : vector<2x64xbf16> to vector<1x2x64xbf16>
    tpu.vector_store %arg46[%c0_294, %c0_295, %c0_296], %329 {strides = array<i32>} : memref<1x2x64xbf16, #tpu.memory_space<vmem>>, vector<1x2x64xbf16>,
    return
  }
  func.func @transform_0(%arg0: i32) -> (i32, i32, i32) {
    %c0_i32 = arith.constant 0 : i32
    %c0_i32_0 = arith.constant 0 : i32
    %c0_i32_1 = arith.constant 0 : i32
    return %arg0, %c0_i32, %c0_i32_0 : i32, i32, i32
  }
  func.func @transform_1(%arg0: i32) -> (i32, i32, i32) {
    %c0_i32 = arith.constant 0 : i32
    %c0_i32_0 = arith.constant 0 : i32
    %c0_i32_1 = arith.constant 0 : i32
    %c0_i32_2 = arith.constant 0 : i32
    return %c0_i32, %c0_i32_0, %c0_i32_1 : i32, i32, i32
  }
  func.func @transform_2(%arg0: i32) -> (i32, i32, i32) {
    %c0_i32 = arith.constant 0 : i32
    %c0_i32_0 = arith.constant 0 : i32
    %c0_i32_1 = arith.constant 0 : i32
    %c0_i32_2 = arith.constant 0 : i32
    return %c0_i32, %c0_i32_0, %c0_i32_1 : i32, i32, i32
  }
  func.func @transform_3(%arg0: i32) -> (i32, i32) {
    %c0_i32 = arith.constant 0 : i32
    %c0_i32_0 = arith.constant 0 : i32
    %c0_i32_1 = arith.constant 0 : i32
    return %c0_i32, %c0_i32_0 : i32, i32
  }
  func.func @transform_4(%arg0: i32) -> (i32, i32, i32) {
    %c0_i32 = arith.constant 0 : i32
    %c0_i32_0 = arith.constant 0 : i32
    %c0_i32_1 = arith.constant 0 : i32
    %c0_i32_2 = arith.constant 0 : i32
    return %c0_i32, %c0_i32_0, %c0_i32_1 : i32, i32, i32
  }
  func.func @transform_5(%arg0: i32) -> (i32, i32, i32) {
    %c0_i32 = arith.constant 0 : i32
    %c0_i32_0 = arith.constant 0 : i32
    %c0_i32_1 = arith.constant 0 : i32
    %c0_i32_2 = arith.constant 0 : i32
    return %c0_i32, %c0_i32_0, %c0_i32_1 : i32, i32, i32
  }
  func.func @transform_6(%arg0: i32) -> (i32, i32) {
    %c0_i32 = arith.constant 0 : i32
    %c0_i32_0 = arith.constant 0 : i32
    %c0_i32_1 = arith.constant 0 : i32
    return %c0_i32, %c0_i32_0 : i32, i32
  }
  func.func @transform_7(%arg0: i32) -> (i32, i32, i32) {
    %c0_i32 = arith.constant 0 : i32
    %c0_i32_0 = arith.constant 0 : i32
    %c0_i32_1 = arith.constant 0 : i32
    %c0_i32_2 = arith.constant 0 : i32
    return %c0_i32, %c0_i32_0, %c0_i32_1 : i32, i32, i32
  }
  func.func @transform_8(%arg0: i32) -> (i32, i32, i32) {
    %c0_i32 = arith.constant 0 : i32
    %c0_i32_0 = arith.constant 0 : i32
    %c0_i32_1 = arith.constant 0 : i32
    %c0_i32_2 = arith.constant 0 : i32
    return %c0_i32, %c0_i32_0, %c0_i32_1 : i32, i32, i32
  }
  func.func @transform_9(%arg0: i32) -> (i32, i32) {
    %c0_i32 = arith.constant 0 : i32
    %c0_i32_0 = arith.constant 0 : i32
    %c0_i32_1 = arith.constant 0 : i32
    return %c0_i32, %c0_i32_0 : i32, i32
  }
  func.func @transform_10(%arg0: i32) -> (i32, i32, i32) {
    %c0_i32 = arith.constant 0 : i32
    %c0_i32_0 = arith.constant 0 : i32
    %c0_i32_1 = arith.constant 0 : i32
    %c0_i32_2 = arith.constant 0 : i32
    return %c0_i32, %c0_i32_0, %c0_i32_1 : i32, i32, i32
  }
  func.func @transform_11(%arg0: i32) -> (i32, i32, i32) {
    %c0_i32 = arith.constant 0 : i32
    %c0_i32_0 = arith.constant 0 : i32
    %c0_i32_1 = arith.constant 0 : i32
    %c0_i32_2 = arith.constant 0 : i32
    return %c0_i32, %c0_i32_0, %c0_i32_1 : i32, i32, i32
  }
  func.func @transform_12(%arg0: i32) -> (i32, i32) {
    %c0_i32 = arith.constant 0 : i32
    %c0_i32_0 = arith.constant 0 : i32
    %c0_i32_1 = arith.constant 0 : i32
    return %c0_i32, %c0_i32_0 : i32, i32
  }
  func.func @transform_13(%arg0: i32) -> (i32, i32, i32) {
    %c0_i32 = arith.constant 0 : i32
    %c0_i32_0 = arith.constant 0 : i32
    %c0_i32_1 = arith.constant 0 : i32
    %c0_i32_2 = arith.constant 0 : i32
    return %c0_i32, %c0_i32_0, %c0_i32_1 : i32, i32, i32
  }
  func.func @transform_14(%arg0: i32) -> (i32, i32, i32) {
    %c0_i32 = arith.constant 0 : i32
    %c0_i32_0 = arith.constant 0 : i32
    %c0_i32_1 = arith.constant 0 : i32
    %c0_i32_2 = arith.constant 0 : i32
    return %c0_i32, %c0_i32_0, %c0_i32_1 : i32, i32, i32
  }
  func.func @transform_15(%arg0: i32) -> (i32, i32) {
    %c0_i32 = arith.constant 0 : i32
    %c0_i32_0 = arith.constant 0 : i32
    %c0_i32_1 = arith.constant 0 : i32
    return %c0_i32, %c0_i32_0 : i32, i32
  }
  func.func @transform_16(%arg0: i32) -> (i32, i32) {
    %c0_i32 = arith.constant 0 : i32
    %c0_i32_0 = arith.constant 0 : i32
    %c0_i32_1 = arith.constant 0 : i32
    return %c0_i32, %c0_i32_0 : i32, i32
  }
  func.func @transform_17(%arg0: i32) -> (i32, i32) {
    %c0_i32 = arith.constant 0 : i32
    %c0_i32_0 = arith.constant 0 : i32
    %c0_i32_1 = arith.constant 0 : i32
    return %c0_i32, %c0_i32_0 : i32, i32
  }
  func.func @transform_18(%arg0: i32) -> (i32, i32) {
    %c0_i32 = arith.constant 0 : i32
    %c0_i32_0 = arith.constant 0 : i32
    %c0_i32_1 = arith.constant 0 : i32
    return %c0_i32, %c0_i32_0 : i32, i32
  }
  func.func @transform_19(%arg0: i32) -> (i32, i32) {
    %c0_i32 = arith.constant 0 : i32
    %c0_i32_0 = arith.constant 0 : i32
    %c0_i32_1 = arith.constant 0 : i32
    return %c0_i32, %c0_i32_0 : i32, i32
  }
  func.func @transform_20(%arg0: i32) -> (i32, i32) {
    %c0_i32 = arith.constant 0 : i32
    %c0_i32_0 = arith.constant 0 : i32
    %c0_i32_1 = arith.constant 0 : i32
    return %c0_i32, %c0_i32_0 : i32, i32
  }
  func.func @transform_21(%arg0: i32) -> (i32, i32) {
    %c0_i32 = arith.constant 0 : i32
    %c0_i32_0 = arith.constant 0 : i32
    %c0_i32_1 = arith.constant 0 : i32
    return %c0_i32, %c0_i32_0 : i32, i32
  }
  func.func @transform_22(%arg0: i32) -> (i32, i32) {
    %c0_i32 = arith.constant 0 : i32
    %c0_i32_0 = arith.constant 0 : i32
    %c0_i32_1 = arith.constant 0 : i32
    return %c0_i32, %c0_i32_0 : i32, i32
  }
  func.func @transform_23(%arg0: i32) -> (i32, i32) {
    %c0_i32 = arith.constant 0 : i32
    %c0_i32_0 = arith.constant 0 : i32
    %c0_i32_1 = arith.constant 0 : i32
    return %c0_i32, %c0_i32_0 : i32, i32
  }
  func.func @transform_24(%arg0: i32) -> (i32, i32) {
    %c0_i32 = arith.constant 0 : i32
    %c0_i32_0 = arith.constant 0 : i32
    %c0_i32_1 = arith.constant 0 : i32
    return %c0_i32, %c0_i32_0 : i32, i32
  }
  func.func @transform_25(%arg0: i32) -> (i32, i32) {
    %c0_i32 = arith.constant 0 : i32
    %c0_i32_0 = arith.constant 0 : i32
    %c0_i32_1 = arith.constant 0 : i32
    return %c0_i32, %c0_i32_0 : i32, i32
  }
  func.func @transform_26(%arg0: i32) -> (i32, i32) {
    %c0_i32 = arith.constant 0 : i32
    %c0_i32_0 = arith.constant 0 : i32
    %c0_i32_1 = arith.constant 0 : i32
    return %c0_i32, %c0_i32_0 : i32, i32
  }
  func.func @transform_27(%arg0: i32) -> (i32, i32) {
    %c0_i32 = arith.constant 0 : i32
    %c0_i32_0 = arith.constant 0 : i32
    %c0_i32_1 = arith.constant 0 : i32
    return %c0_i32, %c0_i32_0 : i32, i32
  }
  func.func @transform_28(%arg0: i32) -> (i32, i32) {
    %c0_i32 = arith.constant 0 : i32
    %c0_i32_0 = arith.constant 0 : i32
    %c0_i32_1 = arith.constant 0 : i32
    return %c0_i32, %c0_i32_0 : i32, i32
  }
  func.func @transform_29(%arg0: i32) -> (i32, i32) {
    %c0_i32 = arith.constant 0 : i32
    %c0_i32_0 = arith.constant 0 : i32
    %c0_i32_1 = arith.constant 0 : i32
    return %c0_i32, %c0_i32_0 : i32, i32
  }
  func.func @transform_30(%arg0: i32) -> (i32, i32, i32) {
    %c0_i32 = arith.constant 0 : i32
    %c0_i32_0 = arith.constant 0 : i32
    %c0_i32_1 = arith.constant 0 : i32
    %c0_i32_2 = arith.constant 0 : i32
    return %c0_i32, %c0_i32_0, %c0_i32_1 : i32, i32, i32
  }
  func.func @transform_31(%arg0: i32) -> (i32, i32, i32) {
    %c0_i32 = arith.constant 0 : i32
    %c0_i32_0 = arith.constant 0 : i32
    %c0_i32_1 = arith.constant 0 : i32
    %c0_i32_2 = arith.constant 0 : i32
    return %c0_i32, %c0_i32_0, %c0_i32_1 : i32, i32, i32
  }
  func.func @transform_32(%arg0: i32) -> (i32, i32) {
    %c0_i32 = arith.constant 0 : i32
    %c0_i32_0 = arith.constant 0 : i32
    %c0_i32_1 = arith.constant 0 : i32
    return %c0_i32, %c0_i32_0 : i32, i32
  }
  func.func @transform_33(%arg0: i32) -> (i32, i32, i32) {
    %c0_i32 = arith.constant 0 : i32
    %c0_i32_0 = arith.constant 0 : i32
    %c0_i32_1 = arith.constant 0 : i32
    %c0_i32_2 = arith.constant 0 : i32
    return %c0_i32, %c0_i32_0, %c0_i32_1 : i32, i32, i32
  }
  func.func @transform_34(%arg0: i32) -> (i32, i32, i32) {
    %c0_i32 = arith.constant 0 : i32
    %c0_i32_0 = arith.constant 0 : i32
    %c0_i32_1 = arith.constant 0 : i32
    %c0_i32_2 = arith.constant 0 : i32
    return %c0_i32, %c0_i32_0, %c0_i32_1 : i32, i32, i32
  }
  func.func @transform_35(%arg0: i32) -> (i32, i32) {
    %c0_i32 = arith.constant 0 : i32
    %c0_i32_0 = arith.constant 0 : i32
    %c0_i32_1 = arith.constant 0 : i32
    return %c0_i32, %c0_i32_0 : i32, i32
  }
  func.func @transform_36(%arg0: i32) -> (i32, i32, i32) {
    %c0_i32 = arith.constant 0 : i32
    %c0_i32_0 = arith.constant 0 : i32
    %c0_i32_1 = arith.constant 0 : i32
    %c0_i32_2 = arith.constant 0 : i32
    return %c0_i32, %c0_i32_0, %c0_i32_1 : i32, i32, i32
  }
  func.func @transform_37(%arg0: i32) -> (i32, i32, i32) {
    %c0_i32 = arith.constant 0 : i32
    %c0_i32_0 = arith.constant 0 : i32
    %c0_i32_1 = arith.constant 0 : i32
    %c0_i32_2 = arith.constant 0 : i32
    return %c0_i32, %c0_i32_0, %c0_i32_1 : i32, i32, i32
  }
  func.func @transform_38(%arg0: i32) -> (i32, i32) {
    %c0_i32 = arith.constant 0 : i32
    %c0_i32_0 = arith.constant 0 : i32
    %c0_i32_1 = arith.constant 0 : i32
    return %c0_i32, %c0_i32_0 : i32, i32
  }
  func.func @transform_39(%arg0: i32) -> (i32, i32, i32) {
    %c0_i32 = arith.constant 0 : i32
    %c0_i32_0 = arith.constant 0 : i32
    %c0_i32_1 = arith.constant 0 : i32
    %c0_i32_2 = arith.constant 0 : i32
    return %c0_i32, %c0_i32_0, %c0_i32_1 : i32, i32, i32
  }
  func.func @transform_40(%arg0: i32) -> (i32, i32, i32) {
    %c0_i32 = arith.constant 0 : i32
    %c0_i32_0 = arith.constant 0 : i32
    %c0_i32_1 = arith.constant 0 : i32
    %c0_i32_2 = arith.constant 0 : i32
    return %c0_i32, %c0_i32_0, %c0_i32_1 : i32, i32, i32
  }
  func.func @transform_41(%arg0: i32) -> (i32, i32) {
    %c0_i32 = arith.constant 0 : i32
    %c0_i32_0 = arith.constant 0 : i32
    %c0_i32_1 = arith.constant 0 : i32
    return %c0_i32, %c0_i32_0 : i32, i32
  }
  func.func @transform_42(%arg0: i32) -> (i32, i32, i32) {
    %c0_i32 = arith.constant 0 : i32
    %c0_i32_0 = arith.constant 0 : i32
    %c0_i32_1 = arith.constant 0 : i32
    return %arg0, %c0_i32, %c0_i32_0 : i32, i32, i32
  }
  func.func @transform_43(%arg0: i32) -> (i32, i32, i32) {
    %c0_i32 = arith.constant 0 : i32
    %c0_i32_0 = arith.constant 0 : i32
    %c0_i32_1 = arith.constant 0 : i32
    return %arg0, %c0_i32, %c0_i32_0 : i32, i32, i32
  }
  func.func @transform_44(%arg0: i32) -> (i32, i32, i32) {
    %c0_i32 = arith.constant 0 : i32
    %c0_i32_0 = arith.constant 0 : i32
    %c0_i32_1 = arith.constant 0 : i32
    return %arg0, %c0_i32, %c0_i32_0 : i32, i32, i32
  }
  func.func @transform_45(%arg0: i32) -> (i32, i32, i32) {
    %c0_i32 = arith.constant 0 : i32
    %c0_i32_0 = arith.constant 0 : i32
    %c0_i32_1 = arith.constant 0 : i32
    return %arg0, %c0_i32, %c0_i32_0 : i32, i32, i32
  }
}

</mosaic_0001>

<bundles_post_ra>
// kernel: model_forward_pallas.1
= control target key start
LH: loop header
LB: loop body
LE: loop exit
PB: predicated region body
PF: predicated region fallthrough
CT: control target
= control target key end

     0   :  { %s17612_s6 = smov 1   ;;  %s17613_s10 = smov 2   ;;  %s19271_s0 = inlined_call_operand.smem [shape: u32[46], index: -1, kind: input, shape index: {}] }
   0x1   :  { %s17711_s5 = sld [smem:[%s19271_s0]]   ;;  %s17614_s14 = smov 3  }
   0x2   :  { %s17716_s9 = sld [smem:[%s19271_s0 + %s17612_s6]]   ;;  %s17615_s18 = smov 4  }
   0x3   :  { %s17721_s13 = sld [smem:[%s19271_s0 + %s17613_s10]]   ;;  %s17616_s22 = smov 5  }
   0x4   :  { %s17726_s17 = sld [smem:[%s19271_s0 + %s17614_s14]]   ;;  %s17617_s26 = smov 6  }
   0x5   :  { %s17731_s21 = sld [smem:[%s19271_s0 + %s17615_s18]]   ;;  %s17618_s30 = smov 7  }
   0x6   :  { %s17736_s25 = sld [smem:[%s19271_s0 + %s17616_s22]]   ;;  %s17619_s4 = smov 8  }
   0x7   :  { %19285 = sst [smem:[#allocation72_spill]] %s17711_s5  ;;  %s17620_s10 = smov 9  }
   0x8   :  { %19286 = sst [smem:[#allocation73_spill]] %s17716_s9  ;;  %s17621_s15 = smov 10  }
   0x9   :  { %19287 = sst [smem:[#allocation74_spill]] %s17721_s13  ;;  %s17622_s20 = smov 11  }
   0xa   :  { %s17741_s29 = sld [smem:[%s19271_s0 + %s17617_s26]]   ;;  %s17623_s26 = smov 12  }
   0xb   :  { %19288 = sst [smem:[#allocation75_spill]] %s17731_s21  ;;  %s17624_s1 = smov 13  }
   0xc   :  { %s17746_s3 = sld [smem:[%s19271_s0 + %s17618_s30]]   ;;  %s17625_s7 = smov 14  }
   0xd   :  { %s17751_s8 = sld [smem:[%s19271_s0 + %s17619_s4]]   ;;  %s17627_s22 = smov 16  }
   0xe   :  { %s17756_s14 = sld [smem:[%s19271_s0 + %s17620_s10]]   ;;  %s17628_s28 = smov 17  }
   0xf   :  { %s17761_s19 = sld [smem:[%s19271_s0 + %s17621_s15]]   ;;  %s17626_s15 = smov 15  }
  0x10   :  { %19289 = sst [smem:[#allocation76_spill]] %s17741_s29 }
  0x11   :  { %s17766_s24 = sld [smem:[%s19271_s0 + %s17622_s20]]  }
  0x12   :  { %19290 = sst [smem:[#allocation77_spill]] %s17746_s3 }
  0x13   :  { %19291 = sst [smem:[#allocation78_spill]] %s17751_s8 }
  0x14   :  { %s17771_s30 = sld [smem:[%s19271_s0 + %s17623_s26]]  }
  0x15   :  { %19292 = sst [smem:[#allocation79_spill]] %s17761_s19 }
  0x16   :  { %s17776_s6 = sld [smem:[%s19271_s0 + %s17624_s1]]  }
  0x17   :  { %s17781_s12 = sld [smem:[%s19271_s0 + %s17625_s7]]   ;;  %s17629_s7 = smov 18  }
  0x18   :  { %s17786_s20 = sld [smem:[%s19271_s0 + %s17626_s15]]   ;;  %s17630_s15 = smov 19  }
  0x19   :  { %s17791_s27 = sld [smem:[%s19271_s0 + %s17627_s22]]   ;;  %s17631_s22 = smov 20  }
  0x1a   :  { %19293 = sst [smem:[#allocation80_spill]] %s17771_s30 }
  0x1b   :  { %s17796_s4 = sld [smem:[%s19271_s0 + %s17628_s28]]   ;;  %s17632_s28 = smov 21  }
  0x1c   :  { %s17801_s13 = sld [smem:[%s19271_s0 + %s17629_s7]]   ;;  %s17633_s7 = smov 22  }
  0x1d   :  { %19294 = sst [smem:[#allocation81_spill]] %s17781_s12 }
  0x1e   :  { %s17806_s5 = sld [smem:[%s19271_s0 + %s17630_s15]]   ;;  %s17634_s15 = smov 23  }
  0x1f   :  { %19295 = sst [smem:[#allocation82_spill]] %s17791_s27 }
  0x20   :  { %s17811_s27 = sld [smem:[%s19271_s0 + %s17631_s22]]   ;;  %s17635_s22 = smov 24  }
  0x21   :  { %19296 = sst [smem:[#allocation83_spill]] %s17796_s4 }
  0x22   :  { %19297 = sst [smem:[#allocation84_spill]] %s17801_s13 }
  0x23   :  { %s17816_s12 = sld [smem:[%s19271_s0 + %s17632_s28]]   ;;  %s17636_s28 = smov 25  }
  0x24   :  { %s17821_s13 = sld [smem:[%s19271_s0 + %s17633_s7]]   ;;  %s17637_s7 = smov 26  }
  0x25   :  { %s17826_s30 = sld [smem:[%s19271_s0 + %s17634_s15]]   ;;  %s17638_s15 = smov 27  }
  0x26   :  { %19298 = sst [smem:[#allocation85_spill]] %s17811_s27 }
  0x27   :  { %s17831_s27 = sld [smem:[%s19271_s0 + %s17635_s22]]   ;;  %s17639_s22 = smov 28  }
  0x28   :  { %s17836_s19 = sld [smem:[%s19271_s0 + %s17636_s28]]   ;;  %s17640_s28 = smov 29  }
  0x29   :  { %s17856_s8 = sld [smem:[%s19271_s0 + %s17640_s28]]   ;;  %s17644_s28 = smov 33  }
  0x2a   :  { %19299 = sst [smem:[#allocation86_spill]] %s17821_s13 }
  0x2b   :  { %19300 = sst [smem:[#allocation87_spill]] %s17826_s30 }
  0x2c   :  { %s17841_s13 = sld [smem:[%s19271_s0 + %s17637_s7]]   ;;  %s17641_s7 = smov 30  }
  0x2d   :  { %19301 = sst [smem:[#allocation88_spill]] %s17831_s27 }
  0x2e   :  { %s17846_s30 = sld [smem:[%s19271_s0 + %s17638_s15]]   ;;  %s17642_s15 = smov 31  }
  0x2f   :  { %s17851_s27 = sld [smem:[%s19271_s0 + %s17639_s22]]   ;;  %s17643_s22 = smov 32  }
  0x30   :  { %s17876_s29 = sld [smem:[%s19271_s0 + %s17644_s28]]   ;;  %s17648_s28 = smov 37  }
  0x31   :  { %s17896_s9 = sld [smem:[%s19271_s0 + %s17648_s28]]   ;;  %s17652_s28 = smov 41  }
  0x32   :  { %19302 = sst [smem:[#allocation89_spill]] %s17841_s13 }
  0x33   :  { %s17861_s13 = sld [smem:[%s19271_s0 + %s17641_s7]]   ;;  %s17645_s7 = smov 34  }
  0x34   :  { %19303 = sst [smem:[#allocation90_spill]] %s17846_s30 }
  0x35   :  { %19304 = sst [smem:[#allocation91_spill]] %s17851_s27 }
  0x36   :  { %s17866_s30 = sld [smem:[%s19271_s0 + %s17642_s15]]   ;;  %s17646_s15 = smov 35  }
  0x37   :  { %s17871_s27 = sld [smem:[%s19271_s0 + %s17643_s22]]   ;;  %s17647_s22 = smov 36  }
  0x38   :  { %s17886_s21 = sld [smem:[%s19271_s0 + %s17646_s15]]   ;;  %s17650_s15 = smov 39  }
  0x39   :  { %19305 = sst [smem:[#allocation92_spill]] %s17861_s13 }
  0x3a   :  { %s17881_s13 = sld [smem:[%s19271_s0 + %s17645_s7]]   ;;  %s17649_s7 = smov 38  }
  0x3b   :  { %19310 = sst [smem:[#allocation97_spill]] %s17896_s9 }
  0x3c   :  { %s17916_s9 = sld [smem:[%s19271_s0 + %s17652_s28]]   ;;  %s17656_s28 = smov 45  }
  0x3d   :  { %19306 = sst [smem:[#allocation93_spill]] %s17871_s27 }
  0x3e   :  { %19308 = sst [smem:[#allocation95_spill]] %s17886_s21 }
  0x3f   :  { %s17891_s27 = sld [smem:[%s19271_s0 + %s17647_s22]]   ;;  %s17651_s22 = smov 40  }
  0x40   :  { %19307 = sst [smem:[#allocation94_spill]] %s17881_s13 }
  0x41   :  { %s17901_s13 = sld [smem:[%s19271_s0 + %s17649_s7]]   ;;  %s17653_s7 = smov 42  }
  0x42   :  { %s17906_s21 = sld [smem:[%s19271_s0 + %s17650_s15]]   ;;  %s17654_s15 = smov 43  }
  0x43   :  { %19314 = sst [smem:[#allocation101_spill]] %s17916_s9 }
  0x44   :  { %s17936_s9 = sld [smem:[%s19271_s0 + %s17656_s28]]  }
  0x45   :  { %19309 = sst [smem:[#allocation96_spill]] %s17891_s27 }
  0x46   :  { %s17911_s27 = sld [smem:[%s19271_s0 + %s17651_s22]]   ;;  %s17655_s22 = smov 44  }
  0x47   :  { %19311 = sst [smem:[#allocation98_spill]] %s17901_s13 }
  0x48   :  { %19312 = sst [smem:[#allocation99_spill]] %s17906_s21 }
  0x49   :  { %s17921_s13 = sld [smem:[%s19271_s0 + %s17653_s7]]  }
  0x4a   :  { %s17926_s21 = sld [smem:[%s19271_s0 + %s17654_s15]]  }
  0x4c   :  { %19313 = sst [smem:[#allocation100_spill]] %s17911_s27 }
  0x4d   :  { %s17931_s27 = sld [smem:[%s19271_s0 + %s17655_s22]]  }
  0x4e   :  { %97 = vsyncpa [#allocation3], 0 }
  0x4f   :  { %98 = vsyncpa [#allocation5], 0 }
  0x50   :  { %99 = vsyncpa [#allocation8], 0 }
  0x51   :  { %100 = vsyncpa [#allocation11], 0 }
  0x52   :  { %101 = vsyncpa [#allocation14], 0 }
  0x53   :  { %102 = vsyncpa [#allocation17], 0 }
  0x54   :  { %103 = vsyncpa [#allocation20], 0 }
  0x55   :  { %104 = vsyncpa [#allocation23], 0 }
  0x56   :  { %105 = vsyncpa [#allocation26], 0 }
  0x57   :  { %106 = vsyncpa [#allocation29], 0 }
  0x58   :  { %107 = vsyncpa [#allocation32], 0 }
  0x59   :  { %108 = vsyncpa [#allocation35], 0 }
  0x5a   :  { %109 = vsyncpa [#allocation38], 0 }
  0x5b   :  { %110 = vsyncpa [#allocation41], 0 }
  0x5c   :  { %111 = vsyncpa [#allocation44], 0 }
  0x5d   :  { %112 = vsyncpa [#allocation47], 0 }
  0x5e   :  { %113 = vsyncpa [#allocation50], 0 }
  0x5f   :  { %114 = vsyncpa [#allocation53], 0  ;;  %s17938_s0 = smov 0  }
  0x60 LB: > { %s17944_s7 = sadd.s32 4294967295, %s17610_s0   ;;  %p12963_p0 = scmp.ge.s32.totalorder %s17610_s0, 1  ;;  %s17610_s0 = sphi %s17938_s0, %s120_s0  }
  0x61   : > { %p1116_p1 = scmp.lt.s32.totalorder %s17610_s0, 3 }
  0x63   : > { %p17948_p2 = pnand %p12963_p0, %p1116_p1 }
  0x64   : > { %p15120_p3 = scmp.eq.s32.totalorder (!%p17948_p2), %s17944_s7, 0  ;;  %s17657_s11 = smov (!%p17948_p2), [#allocation4]  }
  0x65   : > { %s19315_s10 = scalar_select %p17948_p2, 1, 0 }
  0x66   : > { %1120 = sbr.rel (%p17948_p2) target bundleno = 512 (0x200), region = 12  ;;  %s1145_s15 = sshll.u32 (!%p17948_p2), %s17657_s11, 4  ;;  %s1146_s15 = int_to_ptr.vmem [resolvable:$true] %s1145_s15 }
  0x67   : > { %s16726_s16 = scalar_lea.vmem (!%p17948_p2), %s1146_s15, 32  ;;  %p16733_p7 = scmp.lt.s32.totalorder (!%p17948_p2), %s1146_s15, %s1146_s15 }
  0x68   : > { %p16727_p4 = scmp.ne.s32.totalorder (!%p17948_p2), %s1146_s15, %s16726_s16  ;;  %p16734_p8 = scmp.lt.s32.totalorder (!%p17948_p2), %s16726_s16, %s16726_s16 }
  0x6a   : > { %p16728_p5 = pnand (!%p17948_p2), %p16727_p4, %p15120_p3  ;;  %p16735_p9 = por (!%p17948_p2), %p16734_p8, %p16733_p7 }
  0x6c   : > { %p16729_p6 = pneg %p16728_p5 }
  0x6e   : > { %p16736_p10 = pnand %p16735_p9, %p16729_p6 }
  0x70   : > { %16739 = shalt.err (!%p16736_p10)
}
  0x71   : > { %14987 = dma.hbm_to_vmem [thread:$0]  (%p15120_p3), %s17726_s17, 32, %s1146_s15, [#allocation5]  }
  0x72   : > { %s17658_s18 = smov [#allocation7]   ;;  %s17659_s23 = smov [#allocation10]  }
  0x73   : > { %s1168_s22 = sshll.u32 %s17658_s18, 4  ;;  %s1192_s26 = sshll.u32 %s17659_s23, 4  ;;  %s1169_s22 = int_to_ptr.vmem [resolvable:$true] %s1168_s22  ;;  %s1193_s26 = int_to_ptr.vmem [resolvable:$true] %s1192_s26 }
  0x74   : > { %s16750_s28 = scalar_lea.vmem %s1169_s22, 6144  ;;  %p16757_p0 = scmp.lt.s32.totalorder %s1169_s22, %s1169_s22 }
  0x75   : > { %p16751_p11 = scmp.ne.s32.totalorder %s1169_s22, %s16750_s28  ;;  %p16758_p1 = scmp.lt.s32.totalorder %s16750_s28, %s16750_s28 }
  0x77   : > { %p16752_p12 = pnand %p16751_p11, %p15120_p3  ;;  %p16759_p4 = por %p16758_p1, %p16757_p0 }
  0x79   : > { %p16753_p13 = pneg %p16752_p12 }
  0x7b   : > { %p16760_p5 = pnand %p16759_p4, %p16753_p13 }
  0x7d   : > { %16763 = shalt.err (!%p16760_p5)
}
  0x7e   : > { %s19276_s1 = smov 64   ;;  %s19278_s2 = smov 4  }
  0x7f   : > { %14991 = dma.hbm_to_vmem [thread:$0]  (%p15120_p3), %s17736_s25, 6144, %s1169_s22, [#allocation8], %s19276_s1, %s19276_s1, %s19278_s2  }
  0x80   : > { %s16774_s11 = scalar_lea.vmem %s1193_s26, 192  ;;  %p16781_p9 = scmp.lt.s32.totalorder %s1193_s26, %s1193_s26 }
  0x81   : > { %p16775_p6 = scmp.ne.s32.totalorder %s1193_s26, %s16774_s11  ;;  %p16782_p10 = scmp.lt.s32.totalorder %s16774_s11, %s16774_s11 }
  0x83   : > { %p16776_p7 = pnand %p16775_p6, %p15120_p3  ;;  %p16783_p11 = por %p16782_p10, %p16781_p9 }
  0x85   : > { %p16777_p8 = pneg %p16776_p7 }
  0x87   : > { %p16784_p12 = pnand %p16783_p11, %p16777_p8 }
  0x89   : > { %16787 = shalt.err (!%p16784_p12)
}
  0x8a   : > { %s19316_s3 = sld [smem:[#allocation77_spill]]  ;;  %s17662_s15 = smov [#allocation13]  }
  0x8b   : > { %s1219_s16 = sshll.u32 %s17662_s15, 4  ;;  %s17663_s18 = smov [#allocation16]   ;;  %s1220_s16 = int_to_ptr.vmem [resolvable:$true] %s1219_s16 }
  0x8c   : > { %s1242_s22 = sshll.u32 %s17663_s18, 4  ;;  %s16798_s23 = scalar_lea.vmem %s1220_s16, 16  ;;  %s1243_s22 = int_to_ptr.vmem [resolvable:$true] %s1242_s22 }
  0x8d   : > { %p16799_p13 = scmp.ne.s32.totalorder %s1220_s16, %s16798_s23  ;;  %s16804_s28 = scalar_lea.vmem %s1220_s16, 32 }
  0x8e   : > { %p16805_p4 = scmp.lt.s32.totalorder %s1220_s16, %s1220_s16  ;;  %p16806_p5 = scmp.lt.s32.totalorder %s16804_s28, %s16798_s23 }
  0x8f   : > { %p16800_p0 = pnand %p16799_p13, %p15120_p3 }
  0x90   : > { %14995 = dma.hbm_to_vmem [thread:$0]  (%p15120_p3), %s19316_s3, 192, %s1193_s26, [#allocation11], %s19276_s1, %s19276_s1, %s19278_s2  }
  0x91   : > { %p16801_p1 = pneg %p16800_p0  ;;  %p16807_p6 = por %p16806_p5, %p16805_p4 }
  0x93   : > { %p16808_p7 = pnand %p16807_p6, %p16801_p1 }
  0x95   : > { %16811 = shalt.err (!%p16808_p7)
}
  0x96   : > { %14999 = dma.hbm_to_vmem [thread:$0]  (%p15120_p3), %s17756_s14, 16, %s1220_s16, [#allocation14]  }
  0x97   : > { %s16822_s26 = scalar_lea.vmem %s1243_s22, 3072  ;;  %p16829_p11 = scmp.lt.s32.totalorder %s1243_s22, %s1243_s22 }
  0x98   : > { %p16823_p8 = scmp.ne.s32.totalorder %s1243_s22, %s16822_s26  ;;  %p16830_p12 = scmp.lt.s32.totalorder %s16822_s26, %s16822_s26 }
  0x9a   : > { %p16824_p9 = pnand %p16823_p8, %p15120_p3  ;;  %p16831_p13 = por %p16830_p12, %p16829_p11 }
  0x9c   : > { %p16825_p10 = pneg %p16824_p9 }
  0x9e   : > { %p16832_p0 = pnand %p16831_p13, %p16825_p10 }
  0xa0   : > { %16835 = shalt.err (!%p16832_p0)
}
  0xa1   : > { %15003 = dma.hbm_to_vmem [thread:$0]  (%p15120_p3), %s17766_s24, 3072, %s1243_s22, [#allocation17], %s19276_s1, %s19276_s1, %s19278_s2  }
  0xa2   : > { %s17664_s11 = smov [#allocation19]  }
  0xa3   : > { %s1266_s15 = sshll.u32 %s17664_s11, 4  ;;  %s1267_s15 = int_to_ptr.vmem [resolvable:$true] %s1266_s15 }
  0xa4   : > { %s16846_s16 = scalar_lea.vmem %s1267_s15, 48  ;;  %s16852_s18 = scalar_lea.vmem %s1267_s15, 64 }
  0xa5   : > { %p16847_p1 = scmp.ne.s32.totalorder %s1267_s15, %s16846_s16  ;;  %p16853_p6 = scmp.lt.s32.totalorder %s1267_s15, %s1267_s15 }
  0xa6   : > { %p16854_p7 = scmp.lt.s32.totalorder %s16852_s18, %s16846_s16 }
  0xa7   : > { %p16848_p4 = pnand %p16847_p1, %p15120_p3 }
  0xa8   : > { %p16855_p8 = por %p16854_p7, %p16853_p6 }
  0xa9   : > { %p16849_p5 = pneg %p16848_p4 }
  0xab   : > { %p16856_p9 = pnand %p16855_p8, %p16849_p5 }
  0xad   : > { %16859 = shalt.err (!%p16856_p9)
}
  0xae   : > { %s19281_s23 = smov 16   ;;  %s17666_s28 = smov 1  }
  0xaf   : > { %15007 = dma.hbm_to_vmem [thread:$0]  (%p15120_p3), %s17776_s6, 48, %s1267_s15, [#allocation20], %s19281_s23, %s19281_s23, %s17666_s28  }
  0xb0   : > { %s17667_s22 = smov [#allocation22]   ;;  %s17668_s11 = smov [#allocation25]  }
  0xb1   : > { %s1293_s26 = sshll.u32 %s17667_s22, 4  ;;  %s1317_s1 = sshll.u32 %s17668_s11, 4  ;;  %s1294_s26 = int_to_ptr.vmem [resolvable:$true] %s1293_s26  ;;  %s1318_s1 = int_to_ptr.vmem [resolvable:$true] %s1317_s1 }
  0xb2   : > { %s16870_s2 = scalar_lea.vmem %s1294_s26, 16  ;;  %s16876_s16 = scalar_lea.vmem %s1294_s26, 32 }
  0xb3   : > { %p16871_p10 = scmp.ne.s32.totalorder %s1294_s26, %s16870_s2  ;;  %p16877_p13 = scmp.lt.s32.totalorder %s1294_s26, %s1294_s26 }
  0xb4   : > { %p16878_p0 = scmp.lt.s32.totalorder %s16876_s16, %s16870_s2 }
  0xb5   : > { %p16872_p11 = pnand %p16871_p10, %p15120_p3 }
  0xb6   : > { %p16879_p1 = por %p16878_p0, %p16877_p13 }
  0xb7   : > { %p16873_p12 = pneg %p16872_p11 }
  0xb9   : > { %p16880_p4 = pnand %p16879_p1, %p16873_p12 }
  0xbb   : > { %16883 = shalt.err (!%p16880_p4)
}
  0xbc   : > { %15011 = dma.hbm_to_vmem [thread:$0]  (%p15120_p3), %s17786_s20, 16, %s1294_s26, [#allocation23]  }
  0xbd   : > { %s16894_s15 = scalar_lea.vmem %s1318_s1, 64  ;;  %p16901_p8 = scmp.lt.s32.totalorder %s1318_s1, %s1318_s1 }
  0xbe   : > { %p16895_p5 = scmp.ne.s32.totalorder %s1318_s1, %s16894_s15  ;;  %p16902_p9 = scmp.lt.s32.totalorder %s16894_s15, %s16894_s15 }
  0xc0   : > { %p16896_p6 = pnand %p16895_p5, %p15120_p3  ;;  %p16903_p10 = por %p16902_p9, %p16901_p8 }
  0xc2   : > { %p16897_p7 = pneg %p16896_p6 }
  0xc4   : > { %p16904_p11 = pnand %p16903_p10, %p16897_p7 }
  0xc6   : > { %16907 = shalt.err (!%p16904_p11)
}
  0xc7   : > { %s19317_s4 = sld [smem:[#allocation83_spill]]  ;;  %s17669_s2 = smov [#allocation28]  }
  0xc8   : > { %s1341_s18 = sshll.u32 %s17669_s2, 4  ;;  %s17670_s28 = smov [#allocation31]   ;;  %s1342_s18 = int_to_ptr.vmem [resolvable:$true] %s1341_s18 }
  0xc9   : > { %s1365_s22 = sshll.u32 %s17670_s28, 4  ;;  %s16918_s26 = scalar_lea.vmem %s1342_s18, 32  ;;  %s1366_s22 = int_to_ptr.vmem [resolvable:$true] %s1365_s22 }
  0xca   : > { %p16919_p12 = scmp.ne.s32.totalorder %s1342_s18, %s16918_s26  ;;  %p16925_p1 = scmp.lt.s32.totalorder %s1342_s18, %s1342_s18 }
  0xcb   : > { %p16926_p4 = scmp.lt.s32.totalorder %s16918_s26, %s16918_s26 }
  0xcc   : > { %p16920_p13 = pnand %p16919_p12, %p15120_p3 }
  0xcd   : > { %15015 = dma.hbm_to_vmem [thread:$0]  (%p15120_p3), %s19317_s4, 64, %s1318_s1, [#allocation26]  }
  0xce   : > { %p16921_p0 = pneg %p16920_p13  ;;  %p16927_p5 = por %p16926_p4, %p16925_p1 }
  0xd0   : > { %p16928_p6 = pnand %p16927_p5, %p16921_p0 }
  0xd2   : > { %16931 = shalt.err (!%p16928_p6)
}
  0xd3   : > { %15019 = dma.hbm_to_vmem [thread:$0]  (%p15120_p3), %s17806_s5, 32, %s1342_s18, [#allocation29]  }
  0xd4   : > { %s16942_s1 = scalar_lea.vmem %s1366_s22, 16  ;;  %s16948_s11 = scalar_lea.vmem %s1366_s22, 32 }
  0xd5   : > { %p16943_p7 = scmp.ne.s32.totalorder %s1366_s22, %s16942_s1  ;;  %p16949_p10 = scmp.lt.s32.totalorder %s1366_s22, %s1366_s22 }
  0xd6   : > { %p16950_p11 = scmp.lt.s32.totalorder %s16948_s11, %s16942_s1 }
  0xd7   : > { %p16944_p8 = pnand %p16943_p7, %p15120_p3 }
  0xd8   : > { %p16951_p12 = por %p16950_p11, %p16949_p10 }
  0xd9   : > { %p16945_p9 = pneg %p16944_p8 }
  0xdb   : > { %p16952_p13 = pnand %p16951_p12, %p16945_p9 }
  0xdd   : > { %16955 = shalt.err (!%p16952_p13)
}
  0xde   : > { %15023 = dma.hbm_to_vmem [thread:$0]  (%p15120_p3), %s17816_s12, 16, %s1366_s22, [#allocation32]  }
  0xdf   : > { %s17671_s16 = smov [#allocation34]  }
  0xe0   : > { %s1392_s15 = sshll.u32 %s17671_s16, 4  ;;  %s1393_s15 = int_to_ptr.vmem [resolvable:$true] %s1392_s15 }
  0xe1   : > { %s16966_s2 = scalar_lea.vmem %s1393_s15, 512  ;;  %p16973_p5 = scmp.lt.s32.totalorder %s1393_s15, %s1393_s15 }
  0xe2   : > { %p16967_p0 = scmp.ne.s32.totalorder %s1393_s15, %s16966_s2  ;;  %p16974_p6 = scmp.lt.s32.totalorder %s16966_s2, %s16966_s2 }
  0xe4   : > { %p16968_p1 = pnand %p16967_p0, %p15120_p3  ;;  %p16975_p7 = por %p16974_p6, %p16973_p5 }
  0xe6   : > { %p16969_p4 = pneg %p16968_p1 }
  0xe8   : > { %p16976_p8 = pnand %p16975_p7, %p16969_p4 }
  0xea   : > { %16979 = shalt.err (!%p16976_p8)
}
  0xeb   : > { %s19318_s18 = smov 4   ;;  %s19319_s28 = smov 64  }
  0xec   : > { %15027 = dma.hbm_to_vmem [thread:$0]  (%p15120_p3), %s17836_s19, 512, %s1393_s15, [#allocation35], %s19319_s28, %s19319_s28, %s19318_s18  }
  0xed   : > { %s17672_s22 = smov [#allocation37]   ;;  %s17673_s1 = smov [#allocation40]  }
  0xee   : > { %s1424_s26 = sshll.u32 %s17672_s22, 4  ;;  %s1450_s11 = sshll.u32 %s17673_s1, 4  ;;  %s1425_s26 = int_to_ptr.vmem [resolvable:$true] %s1424_s26  ;;  %s1451_s11 = int_to_ptr.vmem [resolvable:$true] %s1450_s11 }
  0xef   : > { %s16990_s16 = scalar_lea.vmem %s1425_s26, 8192  ;;  %p16997_p12 = scmp.lt.s32.totalorder %s1425_s26, %s1425_s26 }
  0xf0   : > { %p16991_p9 = scmp.ne.s32.totalorder %s1425_s26, %s16990_s16  ;;  %p16998_p13 = scmp.lt.s32.totalorder %s16990_s16, %s16990_s16 }
  0xf2   : > { %p16992_p10 = pnand %p16991_p9, %p15120_p3  ;;  %p16999_p0 = por %p16998_p13, %p16997_p12 }
  0xf4   : > { %p16993_p11 = pneg %p16992_p10 }
  0xf6   : > { %p17000_p1 = pnand %p16999_p0, %p16993_p11 }
  0xf8   : > { %17003 = shalt.err (!%p17000_p1)
}
  0xf9   : > { %s19280_s2 = smov 256   ;;  %s17014_s15 = scalar_lea.vmem %s1451_s11, 49152 }
  0xfa   : > { %15031 = dma.hbm_to_vmem [thread:$0]  (%p15120_p3), %s17856_s8, 8192, %s1425_s26, [#allocation38], %s19280_s2, %s19280_s2, %s19281_s23  }
  0xfb   : > { %p17015_p4 = scmp.ne.s32.totalorder %s1451_s11, %s17014_s15  ;;  %p17021_p7 = scmp.lt.s32.totalorder %s1451_s11, %s1451_s11 }
  0xfc   : > { %p17022_p8 = scmp.lt.s32.totalorder %s17014_s15, %s17014_s15 }
  0xfd   : > { %p17016_p5 = pnand %p17015_p4, %p15120_p3 }
  0xfe   : > { %p17023_p9 = por %p17022_p8, %p17021_p7 }
  0xff   : > { %p17017_p6 = pneg %p17016_p5 }
 0x101   : > { %p17024_p10 = pnand %p17023_p9, %p17017_p6 }
 0x103   : > { %17027 = shalt.err (!%p17024_p10)
}
 0x104   : > { %15035 = dma.hbm_to_vmem [thread:$0]  (%p15120_p3), %s17866_s30, 49152, %s1451_s11, [#allocation41], %s19280_s2, %s19280_s2, %s19281_s23  }
 0x105   : > { %s17675_s22 = smov [#allocation43]  }
 0x106   : > { %s1474_s26 = sshll.u32 %s17675_s22, 4  ;;  %s1475_s26 = int_to_ptr.vmem [resolvable:$true] %s1474_s26 }
 0x107   : > { %s17038_s1 = scalar_lea.vmem %s1475_s26, 192  ;;  %p17045_p0 = scmp.lt.s32.totalorder %s1475_s26, %s1475_s26 }
 0x108   : > { %p17039_p11 = scmp.ne.s32.totalorder %s1475_s26, %s17038_s1  ;;  %p17046_p1 = scmp.lt.s32.totalorder %s17038_s1, %s17038_s1 }
 0x10a   : > { %p17040_p12 = pnand %p17039_p11, %p15120_p3  ;;  %p17047_p4 = por %p17046_p1, %p17045_p0 }
 0x10c   : > { %p17041_p13 = pneg %p17040_p12 }
 0x10e   : > { %p17048_p5 = pnand %p17047_p4, %p17041_p13 }
 0x110   : > { %17051 = shalt.err (!%p17048_p5)
}
 0x111   : > { %15039 = dma.hbm_to_vmem [thread:$0]  (%p15120_p3), %s17876_s29, 192, %s1475_s26, [#allocation44], %s19319_s28, %s19319_s28, %s19318_s18  }
 0x112   : > { %s17676_s11 = smov [#allocation46]   ;;  %s17677_s15 = smov [#allocation49]  }
 0x113   : > { %s1501_s16 = sshll.u32 %s17676_s11, 4  ;;  %s1528_s22 = sshll.u32 %s17677_s15, 4  ;;  %s1502_s16 = int_to_ptr.vmem [resolvable:$true] %s1501_s16  ;;  %s1529_s22 = int_to_ptr.vmem [resolvable:$true] %s1528_s22 }
 0x114   : > { %s17062_s2 = scalar_lea.vmem %s1502_s16, 96  ;;  %p17069_p9 = scmp.lt.s32.totalorder %s1502_s16, %s1502_s16 }
 0x115   : > { %p17063_p6 = scmp.ne.s32.totalorder %s1502_s16, %s17062_s2  ;;  %p17070_p10 = scmp.lt.s32.totalorder %s17062_s2, %s17062_s2 }
 0x117   : > { %p17064_p7 = pnand %p17063_p6, %p15120_p3  ;;  %p17071_p11 = por %p17070_p10, %p17069_p9 }
 0x119   : > { %p17065_p8 = pneg %p17064_p7 }
 0x11b   : > { %p17072_p12 = pnand %p17071_p11, %p17065_p8 }
 0x11d   : > { %17075 = shalt.err (!%p17072_p12)
}
 0x11e   : > { %s19282_s1 = smov 32   ;;  %s19320_s23 = sld [smem:[#allocation96_spill]] }
 0x11f   : > { %s17679_s26 = smov 2   ;;  %s17086_s11 = scalar_lea.vmem %s1529_s22, 16 }
 0x120   : > { %p17087_p13 = scmp.ne.s32.totalorder %s1529_s22, %s17086_s11  ;;  %s17092_s15 = scalar_lea.vmem %s1529_s22, 32 }
 0x121   : > { %p17093_p4 = scmp.lt.s32.totalorder %s1529_s22, %s1529_s22  ;;  %p17094_p5 = scmp.lt.s32.totalorder %s17092_s15, %s17086_s11 }
 0x122   : > { %p17088_p0 = pnand %p17087_p13, %p15120_p3 }
 0x123   : > { %p17095_p6 = por %p17094_p5, %p17093_p4 }
 0x124   : > { %15043 = dma.hbm_to_vmem [thread:$0]  (%p15120_p3), %s19320_s23, 96, %s1502_s16, [#allocation47], %s19282_s1, %s19282_s1, %s17679_s26  }
 0x125   : > { %p17089_p1 = pneg %p17088_p0 }
 0x127   : > { %p17096_p7 = pnand %p17095_p6, %p17089_p1 }
 0x129   : > { %17099 = shalt.err (!%p17096_p7)
}
 0x12a   : > { %s19321_s2 = sld [smem:[#allocation98_spill]]  ;;  %s17680_s3 = smov [#allocation2]  }
 0x12b   : > { %s1128_s4 = sshll.u32 %s17680_s3, 4  ;;  %s17681_s23 = smov [#allocation6]   ;;  %s1129_s4 = int_to_ptr.vmem [resolvable:$true] %s1128_s4 }
 0x12c   : > { %s1155_s16 = sshll.u32 %s17681_s23, 4  ;;  %s17110_s1 = scalar_lea.vmem %s1129_s4, 768  ;;  %s1156_s16 = int_to_ptr.vmem [resolvable:$true] %s1155_s16 }
 0x12d   : > { %p17111_p8 = scmp.ne.s32.totalorder %s1129_s4, %s17110_s1  ;;  %p17117_p11 = scmp.lt.s32.totalorder %s1129_s4, %s1129_s4 }
 0x12e   : > { %p17118_p12 = scmp.lt.s32.totalorder %s17110_s1, %s17110_s1 }
 0x12f   : > { %p17112_p9 = pnand %p17111_p8, %p15120_p3 }
 0x130   : > { %15047 = dma.hbm_to_vmem [thread:$0]  (%p15120_p3), %s19321_s2, 16, %s1529_s22, [#allocation50]  }
 0x131   : > { %p17113_p10 = pneg %p17112_p9  ;;  %p17119_p13 = por %p17118_p12, %p17117_p11 }
 0x133   : > { %p17120_p0 = pnand %p17119_p13, %p17113_p10 }
 0x135   : > { %17123 = shalt.err (!%p17120_p0)
}
 0x136   : > { %s19322_s22 = sld [smem:[#allocation73_spill]]  ;;  %s17134_s3 = scalar_lea.vmem %s1156_s16, 384 }
 0x137   : > { %p17135_p1 = scmp.ne.s32.totalorder %s1156_s16, %s17134_s3  ;;  %p17141_p6 = scmp.lt.s32.totalorder %s1156_s16, %s1156_s16 }
 0x138   : > { %p17142_p7 = scmp.lt.s32.totalorder %s17134_s3, %s17134_s3 }
 0x139   : > { %p17136_p4 = pnand %p17135_p1, %p15120_p3 }
 0x13a   : > { %p17143_p8 = por %p17142_p7, %p17141_p6 }
 0x13b   : > { %p17137_p5 = pneg %p17136_p4 }
 0x13c   : > { %14985 = dma.hbm_to_vmem [thread:$0]  (%p15120_p3), %s19322_s22, 768, %s1129_s4, [#allocation3], %s19319_s28, %s19319_s28, %s19318_s18  }
 0x13d   : > { %p17144_p9 = pnand %p17143_p8, %p17137_p5 }
 0x13f   : > { %17147 = shalt.err (!%p17144_p9)
}
 0x140   : > { %s19323_s1 = sld [smem:[#allocation75_spill]]  ;;  %s17682_s4 = smov [#allocation9]  }
 0x141   : > { %s1182_s11 = sshll.u32 %s17682_s4, 4  ;;  %s17683_s15 = smov [#allocation12]   ;;  %s1183_s11 = int_to_ptr.vmem [resolvable:$true] %s1182_s11 }
 0x142   : > { %s1205_s2 = sshll.u32 %s17683_s15, 4  ;;  %s17158_s23 = scalar_lea.vmem %s1183_s11, 16  ;;  %s1206_s2 = int_to_ptr.vmem [resolvable:$true] %s1205_s2 }
 0x143   : > { %p17159_p10 = scmp.ne.s32.totalorder %s1183_s11, %s17158_s23  ;;  %s17164_s22 = scalar_lea.vmem %s1183_s11, 32 }
 0x144   : > { %p17165_p13 = scmp.lt.s32.totalorder %s1183_s11, %s1183_s11  ;;  %p17166_p0 = scmp.lt.s32.totalorder %s17164_s22, %s17158_s23 }
 0x145   : > { %p17160_p11 = pnand %p17159_p10, %p15120_p3 }
 0x146   : > { %14989 = dma.hbm_to_vmem [thread:$0]  (%p15120_p3), %s19323_s1, 384, %s1156_s16, [#allocation5], %s19319_s28, %s19319_s28, %s19318_s18  }
 0x147   : > { %p17161_p12 = pneg %p17160_p11  ;;  %p17167_p1 = por %p17166_p0, %p17165_p13 }
 0x149   : > { %p17168_p4 = pnand %p17167_p1, %p17161_p12 }
 0x14b   : > { %17171 = shalt.err (!%p17168_p4)
}
 0x14c   : > { %s19324_s3 = sld [smem:[#allocation76_spill]]  ;;  %s17182_s16 = scalar_lea.vmem %s1206_s2, 3072 }
 0x14d   : > { %p17183_p5 = scmp.ne.s32.totalorder %s1206_s2, %s17182_s16  ;;  %p17189_p8 = scmp.lt.s32.totalorder %s1206_s2, %s1206_s2 }
 0x14e   : > { %p17190_p9 = scmp.lt.s32.totalorder %s17182_s16, %s17182_s16 }
 0x14f   : > { %p17184_p6 = pnand %p17183_p5, %p15120_p3 }
 0x150   : > { %p17191_p10 = por %p17190_p9, %p17189_p8 }
 0x151   : > { %p17185_p7 = pneg %p17184_p6 }
 0x152   : > { %14993 = dma.hbm_to_vmem [thread:$0]  (%p15120_p3), %s19324_s3, 16, %s1183_s11, [#allocation8]  }
 0x153   : > { %p17192_p11 = pnand %p17191_p10, %p17185_p7 }
 0x155   : > { %17195 = shalt.err (!%p17192_p11)
}
 0x156   : > { %s19325_s1 = sld [smem:[#allocation78_spill]]  ;;  %s17684_s4 = smov [#allocation15]  }
 0x157   : > { %s1229_s11 = sshll.u32 %s17684_s4, 4  ;;  %s17685_s15 = smov [#allocation18]   ;;  %s1230_s11 = int_to_ptr.vmem [resolvable:$true] %s1229_s11 }
 0x158   : > { %s1256_s23 = sshll.u32 %s17685_s15, 4  ;;  %s17206_s22 = scalar_lea.vmem %s1230_s11, 96  ;;  %s1257_s23 = int_to_ptr.vmem [resolvable:$true] %s1256_s23 }
 0x159   : > { %p17207_p12 = scmp.ne.s32.totalorder %s1230_s11, %s17206_s22  ;;  %p17213_p1 = scmp.lt.s32.totalorder %s1230_s11, %s1230_s11 }
 0x15a   : > { %p17214_p4 = scmp.lt.s32.totalorder %s17206_s22, %s17206_s22 }
 0x15b   : > { %p17208_p13 = pnand %p17207_p12, %p15120_p3 }
 0x15c   : > { %14997 = dma.hbm_to_vmem [thread:$0]  (%p15120_p3), %s19325_s1, 3072, %s1206_s2, [#allocation11], %s19319_s28, %s19319_s28, %s19318_s18  }
 0x15d   : > { %p17209_p0 = pneg %p17208_p13  ;;  %p17215_p5 = por %p17214_p4, %p17213_p1 }
 0x15f   : > { %p17216_p6 = pnand %p17215_p5, %p17209_p0 }
 0x161   : > { %17219 = shalt.err (!%p17216_p6)
}
 0x162   : > { %s19326_s3 = smov 32   ;;  %s19327_s2 = sld [smem:[#allocation79_spill]] }
 0x163   : > { %s17230_s16 = scalar_lea.vmem %s1257_s23, 16  ;;  %s17236_s1 = scalar_lea.vmem %s1257_s23, 32 }
 0x164   : > { %p17231_p7 = scmp.ne.s32.totalorder %s1257_s23, %s17230_s16  ;;  %p17237_p10 = scmp.lt.s32.totalorder %s1257_s23, %s1257_s23 }
 0x165   : > { %p17238_p11 = scmp.lt.s32.totalorder %s17236_s1, %s17230_s16 }
 0x166   : > { %p17232_p8 = pnand %p17231_p7, %p15120_p3 }
 0x167   : > { %p17239_p12 = por %p17238_p11, %p17237_p10 }
 0x168   : > { %15001 = dma.hbm_to_vmem [thread:$0]  (%p15120_p3), %s19327_s2, 96, %s1230_s11, [#allocation14], %s19326_s3, %s19326_s3, %s17679_s26  }
 0x169   : > { %p17233_p9 = pneg %p17232_p8 }
 0x16b   : > { %p17240_p13 = pnand %p17239_p12, %p17233_p9 }
 0x16d   : > { %17243 = shalt.err (!%p17240_p13)
}
 0x16e   : > { %s19328_s4 = sld [smem:[#allocation80_spill]]  ;;  %s17686_s15 = smov [#allocation21]  }
 0x16f   : > { %s1279_s22 = sshll.u32 %s17686_s15, 4  ;;  %s17687_s26 = smov [#allocation24]   ;;  %s1280_s22 = int_to_ptr.vmem [resolvable:$true] %s1279_s22 }
 0x170   : > { %s1303_s11 = sshll.u32 %s17687_s26, 4  ;;  %s17254_s3 = scalar_lea.vmem %s1280_s22, 3072  ;;  %s1304_s11 = int_to_ptr.vmem [resolvable:$true] %s1303_s11 }
 0x171   : > { %p17255_p0 = scmp.ne.s32.totalorder %s1280_s22, %s17254_s3  ;;  %p17261_p5 = scmp.lt.s32.totalorder %s1280_s22, %s1280_s22 }
 0x172   : > { %p17262_p6 = scmp.lt.s32.totalorder %s17254_s3, %s17254_s3 }
 0x173   : > { %p17256_p1 = pnand %p17255_p0, %p15120_p3 }
 0x174   : > { %15005 = dma.hbm_to_vmem [thread:$0]  (%p15120_p3), %s19328_s4, 16, %s1257_s23, [#allocation17]  }
 0x175   : > { %p17257_p4 = pneg %p17256_p1  ;;  %p17263_p7 = por %p17262_p6, %p17261_p5 }
 0x177   : > { %p17264_p8 = pnand %p17263_p7, %p17257_p4 }
 0x179   : > { %17267 = shalt.err (!%p17264_p8)
}
 0x17a   : > { %s19329_s23 = sld [smem:[#allocation81_spill]]  ;;  %s17278_s2 = scalar_lea.vmem %s1304_s11, 4096 }
 0x17b   : > { %p17279_p9 = scmp.ne.s32.totalorder %s1304_s11, %s17278_s2  ;;  %p17285_p12 = scmp.lt.s32.totalorder %s1304_s11, %s1304_s11 }
 0x17c   : > { %p17286_p13 = scmp.lt.s32.totalorder %s17278_s2, %s17278_s2 }
 0x17d   : > { %p17280_p10 = pnand %p17279_p9, %p15120_p3 }
 0x17e   : > { %p17287_p0 = por %p17286_p13, %p17285_p12 }
 0x17f   : > { %p17281_p11 = pneg %p17280_p10 }
 0x180   : > { %15009 = dma.hbm_to_vmem [thread:$0]  (%p15120_p3), %s19329_s23, 3072, %s1280_s22, [#allocation20], %s19319_s28, %s19319_s28, %s19318_s18  }
 0x181   : > { %p17288_p1 = pnand %p17287_p0, %p17281_p11 }
 0x183   : > { %17291 = shalt.err (!%p17288_p1)
}
 0x184   : > { %s19330_s16 = smov 16   ;;  %s19331_s1 = smov 256  }
 0x185   : > { %s19332_s4 = sld [smem:[#allocation82_spill]]  ;;  %s17688_s15 = smov [#allocation27]  }
 0x186   : > { %s1327_s22 = sshll.u32 %s17688_s15, 4  ;;  %s1328_s22 = int_to_ptr.vmem [resolvable:$true] %s1327_s22 }
 0x187   : > { %s17302_s26 = scalar_lea.vmem %s1328_s22, 2048  ;;  %p17309_p7 = scmp.lt.s32.totalorder %s1328_s22, %s1328_s22 }
 0x188   : > { %p17303_p4 = scmp.ne.s32.totalorder %s1328_s22, %s17302_s26  ;;  %p17310_p8 = scmp.lt.s32.totalorder %s17302_s26, %s17302_s26 }
 0x18a   : > { %p17304_p5 = pnand %p17303_p4, %p15120_p3  ;;  %p17311_p9 = por %p17310_p8, %p17309_p7 }
 0x18b   : > { %15013 = dma.hbm_to_vmem [thread:$0]  (%p15120_p3), %s19332_s4, 4096, %s1304_s11, [#allocation23], %s19331_s1, %s19331_s1, %s19330_s16  }
 0x18c   : > { %p17305_p6 = pneg %p17304_p5 }
 0x18e   : > { %p17312_p10 = pnand %p17311_p9, %p17305_p6 }
 0x190   : > { %17315 = shalt.err (!%p17312_p10)
}
 0x191   : > { %s19283_s3 = smov 128   ;;  %s19333_s23 = sld [smem:[#allocation84_spill]] }
 0x192   : > { %s17690_s2 = smov 8   ;;  %s17691_s11 = smov [#allocation30]  }
 0x193   : > { %s1351_s16 = sshll.u32 %s17691_s11, 4  ;;  %s17692_s1 = smov [#allocation33]   ;;  %s1352_s16 = int_to_ptr.vmem [resolvable:$true] %s1351_s16 }
 0x194   : > { %s1379_s4 = sshll.u32 %s17692_s1, 4  ;;  %s17326_s15 = scalar_lea.vmem %s1352_s16, 1024  ;;  %s1380_s4 = int_to_ptr.vmem [resolvable:$true] %s1379_s4 }
 0x195   : > { %p17327_p11 = scmp.ne.s32.totalorder %s1352_s16, %s17326_s15  ;;  %p17333_p0 = scmp.lt.s32.totalorder %s1352_s16, %s1352_s16 }
 0x196   : > { %p17334_p1 = scmp.lt.s32.totalorder %s17326_s15, %s17326_s15 }
 0x197   : > { %15017 = dma.hbm_to_vmem [thread:$0]  (%p15120_p3), %s19333_s23, 2048, %s1328_s22, [#allocation26], %s19283_s3, %s19283_s3, %s17690_s2  }
 0x198   : > { %p17328_p12 = pnand %p17327_p11, %p15120_p3  ;;  %p17335_p4 = por %p17334_p1, %p17333_p0 }
 0x19a   : > { %p17329_p13 = pneg %p17328_p12 }
 0x19c   : > { %p17336_p5 = pnand %p17335_p4, %p17329_p13 }
 0x19e   : > { %17339 = shalt.err (!%p17336_p5)
}
 0x19f   : > { %s19334_s22 = sld [smem:[#allocation85_spill]]  ;;  %s17350_s26 = scalar_lea.vmem %s1380_s4, 16 }
 0x1a0   : > { %p17351_p6 = scmp.ne.s32.totalorder %s1380_s4, %s17350_s26  ;;  %s17356_s23 = scalar_lea.vmem %s1380_s4, 32 }
 0x1a1   : > { %p17357_p9 = scmp.lt.s32.totalorder %s1380_s4, %s1380_s4  ;;  %p17358_p10 = scmp.lt.s32.totalorder %s17356_s23, %s17350_s26 }
 0x1a2   : > { %p17352_p7 = pnand %p17351_p6, %p15120_p3 }
 0x1a3   : > { %p17359_p11 = por %p17358_p10, %p17357_p9 }
 0x1a4   : > { %p17353_p8 = pneg %p17352_p7 }
 0x1a5   : > { %15021 = dma.hbm_to_vmem [thread:$0]  (%p15120_p3), %s19334_s22, 1024, %s1352_s16, [#allocation29], %s19319_s28, %s19319_s28, %s19318_s18  }
 0x1a6   : > { %p17360_p12 = pnand %p17359_p11, %p17353_p8 }
 0x1a8   : > { %17363 = shalt.err (!%p17360_p12)
}
 0x1a9   : > { %s19335_s11 = sld [smem:[#allocation87_spill]]  ;;  %s17693_s1 = smov [#allocation36]  }
 0x1aa   : > { %s1408_s15 = sshll.u32 %s17693_s1, 4  ;;  %s17694_s3 = smov [#allocation39]   ;;  %s1409_s15 = int_to_ptr.vmem [resolvable:$true] %s1408_s15 }
 0x1ab   : > { %s1437_s16 = sshll.u32 %s17694_s3, 4  ;;  %s17374_s22 = scalar_lea.vmem %s1409_s15, 2048  ;;  %s1438_s16 = int_to_ptr.vmem [resolvable:$true] %s1437_s16 }
 0x1ac   : > { %p17375_p13 = scmp.ne.s32.totalorder %s1409_s15, %s17374_s22  ;;  %p17381_p4 = scmp.lt.s32.totalorder %s1409_s15, %s1409_s15 }
 0x1ad   : > { %p17382_p5 = scmp.lt.s32.totalorder %s17374_s22, %s17374_s22 }
 0x1ae   : > { %p17376_p0 = pnand %p17375_p13, %p15120_p3 }
 0x1af   : > { %15025 = dma.hbm_to_vmem [thread:$0]  (%p15120_p3), %s19335_s11, 16, %s1380_s4, [#allocation32]  }
 0x1b0   : > { %p17377_p1 = pneg %p17376_p0  ;;  %p17383_p6 = por %p17382_p5, %p17381_p4 }
 0x1b2   : > { %p17384_p7 = pnand %p17383_p6, %p17377_p1 }
 0x1b4   : > { %17387 = shalt.err (!%p17384_p7)
}
 0x1b5   : > { %s19336_s4 = smov 128   ;;  %s19337_s26 = sld [smem:[#allocation90_spill]] }
 0x1b6   : > { %s17398_s3 = scalar_lea.vmem %s1438_s16, 384  ;;  %p17405_p11 = scmp.lt.s32.totalorder %s1438_s16, %s1438_s16 }
 0x1b7   : > { %p17399_p8 = scmp.ne.s32.totalorder %s1438_s16, %s17398_s3  ;;  %p17406_p12 = scmp.lt.s32.totalorder %s17398_s3, %s17398_s3 }
 0x1b9   : > { %p17400_p9 = pnand %p17399_p8, %p15120_p3  ;;  %p17407_p13 = por %p17406_p12, %p17405_p11 }
 0x1bb   : > { %15029 = dma.hbm_to_vmem [thread:$0]  (%p15120_p3), %s19337_s26, 2048, %s1409_s15, [#allocation35], %s19336_s4, %s19336_s4, %s17690_s2  }
 0x1bc   : > { %p17401_p10 = pneg %p17400_p9 }
 0x1be   : > { %p17408_p0 = pnand %p17407_p13, %p17401_p10 }
 0x1c0   : > { %17411 = shalt.err (!%p17408_p0)
}
 0x1c1   : > { %s19338_s23 = sld [smem:[#allocation92_spill]]  ;;  %s17695_s11 = smov [#allocation42]  }
 0x1c2   : > { %s1464_s2 = sshll.u32 %s17695_s11, 4  ;;  %s17696_s1 = smov [#allocation45]   ;;  %s1465_s2 = int_to_ptr.vmem [resolvable:$true] %s1464_s2 }
 0x1c3   : > { %s1491_s15 = sshll.u32 %s17696_s1, 4  ;;  %s17422_s22 = scalar_lea.vmem %s1465_s2, 64  ;;  %s1492_s15 = int_to_ptr.vmem [resolvable:$true] %s1491_s15 }
 0x1c4   : > { %p17423_p1 = scmp.ne.s32.totalorder %s1465_s2, %s17422_s22  ;;  %p17429_p6 = scmp.lt.s32.totalorder %s1465_s2, %s1465_s2 }
 0x1c5   : > { %p17430_p7 = scmp.lt.s32.totalorder %s17422_s22, %s17422_s22 }
 0x1c6   : > { %p17424_p4 = pnand %p17423_p1, %p15120_p3 }
 0x1c7   : > { %15033 = dma.hbm_to_vmem [thread:$0]  (%p15120_p3), %s19338_s23, 384, %s1438_s16, [#allocation38], %s19319_s28, %s19319_s28, %s19318_s18  }
 0x1c8   : > { %p17425_p5 = pneg %p17424_p4  ;;  %p17431_p8 = por %p17430_p7, %p17429_p6 }
 0x1ca   : > { %p17432_p9 = pnand %p17431_p8, %p17425_p5 }
 0x1cc   : > { %17435 = shalt.err (!%p17432_p9)
}
 0x1cd   : > { %s19339_s4 = sld [smem:[#allocation93_spill]]  ;;  %s17446_s16 = scalar_lea.vmem %s1492_s15, 32 }
 0x1ce   : > { %p17447_p10 = scmp.ne.s32.totalorder %s1492_s15, %s17446_s16  ;;  %p17453_p13 = scmp.lt.s32.totalorder %s1492_s15, %s1492_s15 }
 0x1cf   : > { %p17454_p0 = scmp.lt.s32.totalorder %s17446_s16, %s17446_s16 }
 0x1d0   : > { %p17448_p11 = pnand %p17447_p10, %p15120_p3 }
 0x1d1   : > { %p17455_p2 = por %p17454_p0, %p17453_p13 }
 0x1d2   : > { %p17449_p12 = pneg %p17448_p11 }
 0x1d3   : > { %15037 = dma.hbm_to_vmem [thread:$0]  (%p15120_p3), %s19339_s4, 64, %s1465_s2, [#allocation41]  }
 0x1d4   : > { %p17456_p1 = pnand %p17455_p2, %p17449_p12 }
 0x1d6   : > { %17459 = shalt.err (!%p17456_p1)
}
 0x1d7   : > { %s19340_s26 = sld [smem:[#allocation95_spill]]  ;;  %s17697_s3 = smov [#allocation48]  }
 0x1d8   : > { %s1514_s23 = sshll.u32 %s17697_s3, 4  ;;  %s17698_s11 = smov [#allocation51]   ;;  %s1515_s23 = int_to_ptr.vmem [resolvable:$true] %s1514_s23 }
 0x1d9   : > { %s1541_s1 = sshll.u32 %s17698_s11, 4  ;;  %s17470_s2 = scalar_lea.vmem %s1515_s23, 3072  ;;  %s1542_s1 = int_to_ptr.vmem [resolvable:$true] %s1541_s1 }
 0x1da   : > { %p17471_p4 = scmp.ne.s32.totalorder %s1515_s23, %s17470_s2  ;;  %p17477_p7 = scmp.lt.s32.totalorder %s1515_s23, %s1515_s23 }
 0x1db   : > { %p17478_p8 = scmp.lt.s32.totalorder %s17470_s2, %s17470_s2 }
 0x1dc   : > { %p17472_p5 = pnand %p17471_p4, %p15120_p3 }
 0x1dd   : > { %15041 = dma.hbm_to_vmem [thread:$0]  (%p15120_p3), %s19340_s26, 32, %s1492_s15, [#allocation44]  }
 0x1de   : > { %p17473_p6 = pneg %p17472_p5  ;;  %p17479_p2 = por %p17478_p8, %p17477_p7 }
 0x1e0   : > { %p17480_p9 = pnand %p17479_p2, %p17473_p6 }
 0x1e2   : > { %17483 = shalt.err (!%p17480_p9)
}
 0x1e3   : > { %s19341_s15 = sld [smem:[#allocation97_spill]]  ;;  %s17494_s22 = scalar_lea.vmem %s1542_s1, 1536 }
 0x1e4   : > { %p17495_p10 = scmp.ne.s32.totalorder %s1542_s1, %s17494_s22  ;;  %p17501_p13 = scmp.lt.s32.totalorder %s1542_s1, %s1542_s1 }
 0x1e5   : > { %p17502_p0 = scmp.lt.s32.totalorder %s17494_s22, %s17494_s22 }
 0x1e6   : > { %p17496_p11 = pnand %p17495_p10, %p15120_p3 }
 0x1e7   : > { %p17503_p1 = por %p17502_p0, %p17501_p13 }
 0x1e8   : > { %p17497_p12 = pneg %p17496_p11 }
 0x1e9   : > { %15045 = dma.hbm_to_vmem [thread:$0]  (%p15120_p3), %s19341_s15, 3072, %s1515_s23, [#allocation47], %s19319_s28, %s19319_s28, %s19318_s18  }
 0x1ea   : > { %p17504_p4 = pnand %p17503_p1, %p17497_p12 }
 0x1ec   : > { %17507 = shalt.err (!%p17504_p4)
}
 0x1ed   : > { %s19342_s4 = sld [smem:[#allocation100_spill]]  ;;  %s17699_s16 = smov [#allocation52]  }
 0x1ee   : > { %s1555_s26 = sshll.u32 %s17699_s16, 4  ;;  %s1556_s26 = int_to_ptr.vmem [resolvable:$true] %s1555_s26 }
 0x1ef   : > { %s17518_s3 = scalar_lea.vmem %s1556_s26, 16  ;;  %s17524_s23 = scalar_lea.vmem %s1556_s26, 32 }
 0x1f0   : > { %p17519_p5 = scmp.ne.s32.totalorder %s1556_s26, %s17518_s3  ;;  %p17525_p8 = scmp.lt.s32.totalorder %s1556_s26, %s1556_s26 }
 0x1f1   : > { %p17526_p2 = scmp.lt.s32.totalorder %s17524_s23, %s17518_s3 }
 0x1f2   : > { %p17520_p6 = pnand %p17519_p5, %p15120_p3 }
 0x1f3   : > { %15049 = dma.hbm_to_vmem [thread:$0]  (%p15120_p3), %s19342_s4, 1536, %s1542_s1, [#allocation50], %s19319_s28, %s19319_s28, %s19318_s18  }
 0x1f4   : > { %p17521_p7 = pneg %p17520_p6  ;;  %p17527_p9 = por %p17526_p2, %p17525_p8 }
 0x1f6   : > { %p17528_p10 = pnand %p17527_p9, %p17521_p7 }
 0x1f8   : > { %17531 = shalt.err (!%p17528_p10)
}
 0x1f9   : > { %s19343_s11 = sld [smem:[#allocation101_spill]] }
 0x1ff   : > { %15051 = dma.hbm_to_vmem [thread:$0]  (%p15120_p3), %s19343_s11, 16, %s1556_s26, [#allocation53]  }
 0x200 PF: > { %p19344_p11 = scmp.ne.s32.totalorder %s19315_s10, 0 }
 0x201   : > { %p15154_p12 = scmp.eq.s32.totalorder (!%p19344_p11), %s17944_s7, 0 }
 0x202   : > { %1576 = sbr.rel (%p19344_p11) target bundleno = 6914 (0x1b02), region = 188 }
 0x207   : > { %17537 = dma.done.wait (%p15154_p12), [#allocation3], 768  }
 0x208   : > { %17539 = vsyncadd (%p15154_p12), [#allocation3], 4294966528 }
 0x209   : > { %17541 = dma.done.wait (%p15154_p12), [#allocation5], 416  }
 0x20a   : > { %17543 = vsyncadd (%p15154_p12), [#allocation5], 4294966880 }
 0x20b   : > { %17545 = dma.done.wait (%p15154_p12), [#allocation8], 6160  }
 0x20c   : > { %17547 = vsyncadd (%p15154_p12), [#allocation8], 4294961136 }
 0x20d   : > { %17549 = dma.done.wait (%p15154_p12), [#allocation11], 3264  }
 0x20e   : > { %17551 = vsyncadd (%p15154_p12), [#allocation11], 4294964032 }
 0x20f   : > { %17553 = dma.done.wait (%p15154_p12), [#allocation14], 112  }
 0x210   : > { %17555 = vsyncadd (%p15154_p12), [#allocation14], 4294967184 }
 0x211   : > { %17557 = dma.done.wait (%p15154_p12), [#allocation17], 3088  }
 0x212   : > { %17559 = vsyncadd (%p15154_p12), [#allocation17], 4294964208 }
 0x213   : > { %17561 = dma.done.wait (%p15154_p12), [#allocation20], 3120  }
 0x214   : > { %17563 = vsyncadd (%p15154_p12), [#allocation20], 4294964176 }
 0x215   : > { %17565 = dma.done.wait (%p15154_p12), [#allocation23], 4112  }
 0x216   : > { %17567 = vsyncadd (%p15154_p12), [#allocation23], 4294963184 }
 0x217   : > { %17569 = dma.done.wait (%p15154_p12), [#allocation26], 2112  }
 0x218   : > { %17571 = vsyncadd (%p15154_p12), [#allocation26], 4294965184 }
 0x219   : > { %17573 = dma.done.wait (%p15154_p12), [#allocation29], 1056  }
 0x21a   : > { %17575 = vsyncadd (%p15154_p12), [#allocation29], 4294966240 }
 0x21b   : > { %17577 = dma.done.wait (%p15154_p12), [#allocation32], 32  }
 0x21c   : > { %17579 = vsyncadd (%p15154_p12), [#allocation32], 4294967264 }
 0x21d   : > { %17581 = dma.done.wait (%p15154_p12), [#allocation35], 2560  }
 0x21e   : > { %17583 = vsyncadd (%p15154_p12), [#allocation35], 4294964736 }
 0x21f   : > { %17585 = dma.done.wait (%p15154_p12), [#allocation38], 8576  }
 0x220   : > { %17587 = vsyncadd (%p15154_p12), [#allocation38], 4294958720 }
 0x221   : > { %17589 = dma.done.wait (%p15154_p12), [#allocation41], 49216  }
 0x222   : > { %17591 = vsyncadd (%p15154_p12), [#allocation41], 4294918080 }
 0x223   : > { %17593 = dma.done.wait (%p15154_p12), [#allocation44], 224  }
 0x224   : > { %17595 = vsyncadd (%p15154_p12), [#allocation44], 4294967072 }
 0x225   : > { %17597 = dma.done.wait (%p15154_p12), [#allocation47], 3168  }
 0x226   : > { %17599 = vsyncadd (%p15154_p12), [#allocation47], 4294964128 }
 0x227   : > { %17601 = dma.done.wait (%p15154_p12), [#allocation50], 1552  }
 0x228   : > { %17603 = vsyncadd (%p15154_p12), [#allocation50], 4294965744 }
 0x229   : > { %17605 = dma.done.wait (%p15154_p12), [#allocation53], 16  }
 0x22a   : > { %17607 = vsyncadd (%p15154_p12), [#allocation53], 4294967280  ;;  %s19345_s10 = sld [smem:[#allocation72_spill]]  ;;  %p1828_p3 = scmp.lt.s32.totalorder %s17944_s7, 1  ;;  %v17700_v0 = vmov 0   ;;  %v15311_v17 = vld [vmem:[#allocation2] sm:$0xff]  }
 0x22b   : > { %2000 = vmatprep.mubr.bf16.mxu0 %v17700_v0  ;;  %2053 = vmatprep.mubr.bf16.mxu1 %v17700_v0  ;;  %vm1961_vm0 = vcmask 523264   ;;  %s19346_s1 = sld [smem:[#allocation74_spill]]  ;;  %v15312_v18 = vld [vmem:[#allocation2 + $0x8] sm:$0xff]   ;;  %v15313_v21 = vld [vmem:[#allocation2 + $0x10] sm:$0xff]   ;;  %v15314_v27 = vld [vmem:[#allocation2 + $0x18] sm:$0xff]   ;;  %vm3871_vm1 = vcmask 261120  }
 0x22c   : > { %s19354_s7 = smov (!%p1828_p3, %s17944_s7), 1  ;;  %vm17702_vm2 = vmmov 0   ;;  %vm4556_vm3 = vcmask 130048   ;;  %vm5023_vm4 = vcmask 1043456   ;;  %vm5019_vm5 = vcmask 64512   ;;  %s19347_s2 = sld [smem:[#allocation86_spill]] }
 0x22d   : > { %s14308_s18 = sshll.u32 %s19354_s7, 7  ;;  %vm5490_vm6 = vcmask 1041408   ;;  %vm5486_vm7 = vcmask 31744   ;;  %s19348_s15 = sld [smem:[#allocation88_spill]]  ;;  %vm6712_vm8 = vcmask 1040384   ;;  %vm6708_vm9 = vcmask 15360  }
 0x22e   : > { %s19349_s22 = sld [smem:[#allocation89_spill]]  ;;  %s14309_s26 = sshll.u32 %s19354_s7, 5  ;;  %vm12444_vm10 = vcmask 516096  }
 0x22f   : > { %s19350_s4 = sld [smem:[#allocation91_spill]]  ;;  %s19113_s3 = scalar_lea.vmem %s17921_s13, %s14309_s26 }
 0x230   : > { %s18270_s28 = scalar_lea.vmem %s19345_s10, %s14308_s18  ;;  %s19351_s16 = sld [smem:[#allocation94_spill]] }
 0x231   : > { %v15287_v1 = vld [vmem:[%s18270_s28 + $0x64] ss:$16 sps:$4 sm:$0xff]   ;;  %v15289_v2 = vld [vmem:[%s18270_s28 + $0x6c] ss:$16 sps:$4 sm:$0xff]   ;;  %v15291_v3 = vld [vmem:[%s18270_s28 + $0x60] ss:$16 sps:$4 sm:$0xff]  }
 0x232   : > { %1976 = vmatprep.subr.bf16.mxu0 %v15287_v1  ;;  %v15292_v4 = vld [vmem:[%s18270_s28 + $0x68] ss:$16 sps:$4 sm:$0xff]   ;;  %2029 = vmatprep.subr.bf16.mxu1 %v15289_v2  ;;  %v15293_v5 = vld [vmem:[%s18270_s28 + $0x44] ss:$16 sps:$4 sm:$0xff]   ;;  %v15295_v6 = vld [vmem:[%s18270_s28 + $0x4c] ss:$16 sps:$4 sm:$0xff]  }
 0x233   : > { %1977 = vmatpush1.bf16.msra.mxu0 %v15291_v3  ;;  %2030 = vmatpush1.bf16.msra.mxu1 %v15292_v4  ;;  %v15297_v7 = vld [vmem:[%s18270_s28 + $0x40] ss:$16 sps:$4 sm:$0xff]   ;;  %v15298_v8 = vld [vmem:[%s18270_s28 + $0x48] ss:$16 sps:$4 sm:$0xff]   ;;  %v15299_v9 = vld [vmem:[%s18270_s28 + $0x24] ss:$16 sps:$4 sm:$0xff]  }
 0x234   : > { %1978 = vmatprep.subr.bf16.mxu0 %v15293_v5  ;;  %2031 = vmatprep.subr.bf16.mxu1 %v15295_v6  ;;  %v15301_v10 = vld [vmem:[%s18270_s28 + $0x2c] ss:$16 sps:$4 sm:$0xff]   ;;  %v15303_v11 = vld [vmem:[%s18270_s28 + $0x20] ss:$16 sps:$4 sm:$0xff]   ;;  %v15304_v12 = vld [vmem:[%s18270_s28 + $0x28] ss:$16 sps:$4 sm:$0xff]  }
 0x235   : > { %v15305_v13 = vld [vmem:[%s18270_s28 + $0x4] ss:$16 sps:$4 sm:$0xff]   ;;  %v15307_v14 = vld [vmem:[%s18270_s28 + $0xc] ss:$16 sps:$4 sm:$0xff]   ;;  %v15309_v15 = vld [vmem:[%s18270_s28] ss:$16 sps:$4 sm:$0xff]  }
 0x236   : > { %v15310_v16 = vld [vmem:[%s18270_s28 + $0x8] ss:$16 sps:$4 sm:$0xff]   ;;  %v15317_v19 = vld [vmem:[%s19346_s1 + $0x274] ss:$8 sps:$4 sm:$0xff]   ;;  %v15323_v24 = vld [vmem:[%s19346_s1 + $0x264] ss:$8 sps:$4 sm:$0xff]  }
 0x237   : > { %1979 = vmatpush1.bf16.msra.mxu0 %v15297_v7  ;;  %2032 = vmatpush1.bf16.msra.mxu1 %v15298_v8  ;;  %v15320_v20 = vld [vmem:[%s19346_s1 + $0x374] ss:$8 sps:$4 sm:$0xff]   ;;  %v15315_v22 = vld [vmem:[%s19346_s1 + $0x270] ss:$8 sps:$4 sm:$0xff]   ;;  %v15326_v25 = vld [vmem:[%s19346_s1 + $0x364] ss:$8 sps:$4 sm:$0xff]  }
 0x238   : > { %1980 = vmatprep.subr.bf16.mxu0 %v15299_v9  ;;  %2033 = vmatprep.subr.bf16.mxu1 %v15301_v10  ;;  %v15318_v23 = vld [vmem:[%s19346_s1 + $0x370] ss:$8 sps:$4 sm:$0xff]   ;;  %v15321_v26 = vld [vmem:[%s19346_s1 + $0x260] ss:$8 sps:$4 sm:$0xff]   ;;  %v15329_v29 = vld [vmem:[%s19346_s1 + $0x254] ss:$8 sps:$4 sm:$0xff]  }
 0x239   : > { %v15324_v28 = vld [vmem:[%s19346_s1 + $0x360] ss:$8 sps:$4 sm:$0xff]   ;;  %v15332_v30 = vld [vmem:[%s19346_s1 + $0x354] ss:$8 sps:$4 sm:$0xff]   ;;  %v15327_v31 = vld [vmem:[%s19346_s1 + $0x250] ss:$8 sps:$4 sm:$0xff]  }
 0x23a   : > { %v15330_v32 = vld [vmem:[%s19346_s1 + $0x350] ss:$8 sps:$4 sm:$0xff]   ;;  %v15335_v33 = vld [vmem:[%s19346_s1 + $0x244] ss:$8 sps:$4 sm:$0xff]   ;;  %v15333_v35 = vld [vmem:[%s19346_s1 + $0x240] ss:$8 sps:$4 sm:$0xff]  }
 0x23b   : > { %1981 = vmatpush1.bf16.msra.mxu0 %v15303_v11  ;;  %2034 = vmatpush1.bf16.msra.mxu1 %v15304_v12  ;;  %v15338_v34 = vld [vmem:[%s19346_s1 + $0x344] ss:$8 sps:$4 sm:$0xff]   ;;  %v15336_v36 = vld [vmem:[%s19346_s1 + $0x340] ss:$8 sps:$4 sm:$0xff]   ;;  %v15341_v37 = vld [vmem:[%s19346_s1 + $0x234] ss:$8 sps:$4 sm:$0xff]  }
 0x23c   : > { %1982 = vmatprep.subr.bf16.mxu0 %v15305_v13  ;;  %2035 = vmatprep.subr.bf16.mxu1 %v15307_v14  ;;  %v15344_v38 = vld [vmem:[%s19346_s1 + $0x334] ss:$8 sps:$4 sm:$0xff]   ;;  %v15339_v39 = vld [vmem:[%s19346_s1 + $0x230] ss:$8 sps:$4 sm:$0xff]   ;;  %v15347_v41 = vld [vmem:[%s19346_s1 + $0x224] ss:$8 sps:$4 sm:$0xff]  }
 0x23d   : > { %v15342_v40 = vld [vmem:[%s19346_s1 + $0x330] ss:$8 sps:$4 sm:$0xff]   ;;  %v15350_v42 = vld [vmem:[%s19346_s1 + $0x324] ss:$8 sps:$4 sm:$0xff]   ;;  %v15345_v43 = vld [vmem:[%s19346_s1 + $0x220] ss:$8 sps:$4 sm:$0xff]  }
 0x23e   : > { %v15348_v44 = vld [vmem:[%s19346_s1 + $0x320] ss:$8 sps:$4 sm:$0xff]   ;;  %v15353_v45 = vld [vmem:[%s19346_s1 + $0x214] ss:$8 sps:$4 sm:$0xff]   ;;  %v15351_v47 = vld [vmem:[%s19346_s1 + $0x210] ss:$8 sps:$4 sm:$0xff]  }
 0x23f   : > { %1983 = vmatpush1.bf16.msra.mxu0 %v15309_v15  ;;  %2036 = vmatpush1.bf16.msra.mxu1 %v15310_v16  ;;  %v15356_v46 = vld [vmem:[%s19346_s1 + $0x314] ss:$8 sps:$4 sm:$0xff]   ;;  %v15354_v48 = vld [vmem:[%s19346_s1 + $0x310] ss:$8 sps:$4 sm:$0xff]   ;;  %v15359_v49 = vld [vmem:[%s19346_s1 + $0x204] ss:$8 sps:$4 sm:$0xff]  }
 0x240   : > { %2175 = vmatprep.subr.bf16.mxu0 %v15287_v1  ;;  %2228 = vmatprep.subr.bf16.mxu1 %v15289_v2  ;;  %v15362_v50 = vld [vmem:[%s19346_s1 + $0x304] ss:$8 sps:$4 sm:$0xff]   ;;  %v15357_v51 = vld [vmem:[%s19346_s1 + $0x200] ss:$8 sps:$4 sm:$0xff]   ;;  %v15365_v53 = vld [vmem:[%s19346_s1 + $0x2f4] ss:$8 sps:$4 sm:$0xff]  }
 0x241   : > { %v15360_v52 = vld [vmem:[%s19346_s1 + $0x300] ss:$8 sps:$4 sm:$0xff]   ;;  %v15368_v54 = vld [vmem:[%s19346_s1 + $0x3f4] ss:$8 sps:$4 sm:$0xff]   ;;  %v15363_v55 = vld [vmem:[%s19346_s1 + $0x2f0] ss:$8 sps:$4 sm:$0xff]  }
 0x242   : > { %13059 = vmatmul.mubr.msk.bf16.vlgmr.msra.gmra.mxu0 %vm1961_vm0, %v15311_v17  ;;  %13061 = vmatmul.mubr.msk.bf16.vlgmr.msra.gmra.mxu1 %vm1961_vm0, %v15311_v17  ;;  %v15366_v56 = vld [vmem:[%s19346_s1 + $0x3f0] ss:$8 sps:$4 sm:$0xff]   ;;  %v15371_v57 = vld [vmem:[%s19346_s1 + $0x2e4] ss:$8 sps:$4 sm:$0xff]   ;;  %v15369_v59 = vld [vmem:[%s19346_s1 + $0x2e0] ss:$8 sps:$4 sm:$0xff]  }
 0x243   : > { %2176 = vmatpush1.bf16.msra.mxu0 %v15291_v3  ;;  %2229 = vmatpush1.bf16.msra.mxu1 %v15292_v4  ;;  %v15374_v58 = vld [vmem:[%s19346_s1 + $0x3e4] ss:$8 sps:$4 sm:$0xff]   ;;  %v15372_v60 = vld [vmem:[%s19346_s1 + $0x3e0] ss:$8 sps:$4 sm:$0xff]   ;;  %v15377_v61 = vld [vmem:[%s19346_s1 + $0x2d4] ss:$8 sps:$4 sm:$0xff]  }
 0x244   : > { %2177 = vmatprep.subr.bf16.mxu0 %v15293_v5  ;;  %2230 = vmatprep.subr.bf16.mxu1 %v15295_v6  ;;  %v15380_v62 = vld [vmem:[%s19346_s1 + $0x3d4] ss:$8 sps:$4 sm:$0xff]   ;;  %v15375_v63 = vld [vmem:[%s19346_s1 + $0x2d0] ss:$8 sps:$4 sm:$0xff]   ;;  %v15383_v2 = vld [vmem:[%s19346_s1 + $0x2c4] ss:$8 sps:$4 sm:$0xff]  }
 0x245   : > { %2010 = vmatprep.mubr.bf16.mxu0 %v17700_v0  ;;  %2063 = vmatprep.mubr.bf16.mxu1 %v17700_v0  ;;  %v15378_v1 = vld [vmem:[%s19346_s1 + $0x3d0] ss:$8 sps:$4 sm:$0xff]   ;;  %v15386_v3 = vld [vmem:[%s19346_s1 + $0x3c4] ss:$8 sps:$4 sm:$0xff]   ;;  %v15381_v4 = vld [vmem:[%s19346_s1 + $0x2c0] ss:$8 sps:$4 sm:$0xff]  }
 0x246   : > { %v15384_v5 = vld [vmem:[%s19346_s1 + $0x3c0] ss:$8 sps:$4 sm:$0xff]   ;;  %v15389_v6 = vld [vmem:[%s19346_s1 + $0x2b4] ss:$8 sps:$4 sm:$0xff]   ;;  %v15402_v17 = vld [vmem:[%s19346_s1 + $0x390] ss:$8 sps:$4 sm:$0xff]  }
 0x247   : > { %2178 = vmatpush1.bf16.msra.mxu0 %v15297_v7  ;;  %2231 = vmatpush1.bf16.msra.mxu1 %v15298_v8  ;;  %v15392_v7 = vld [vmem:[%s19346_s1 + $0x3b4] ss:$8 sps:$4 sm:$0xff]   ;;  %v15387_v8 = vld [vmem:[%s19346_s1 + $0x2b0] ss:$8 sps:$4 sm:$0xff]   ;;  %s19352_s23 = sld [smem:[#allocation99_spill]]  ;;  %s14310_s11 = sshll.u32 %s19354_s7, 3 }
 0x248   : > { %2179 = vmatprep.subr.bf16.mxu0 %v15299_v9  ;;  %2232 = vmatprep.subr.bf16.mxu1 %v15301_v10  ;;  %v15390_v9 = vld [vmem:[%s19346_s1 + $0x3b0] ss:$8 sps:$4 sm:$0xff]   ;;  %v15395_v10 = vld [vmem:[%s19346_s1 + $0x2a4] ss:$8 sps:$4 sm:$0xff]   ;;  %s1842_s10 = scalar_lea.vmem %s17926_s21, %s14310_s11  ;;  %s13040_s18 = sshll.u32 %s19354_s7, 1 }
 0x24a   : > { %13060 = vmatmul.mubr.msk.bf16.gmra.mxu0 %vm1961_vm0, %v15312_v18  ;;  %13062 = vmatmul.mubr.msk.bf16.gmra.mxu1 %vm1961_vm0, %v15312_v18  ;;  %v15407_v18 = vld [vmem:[%s19346_s1 + $0x284] ss:$8 sps:$4 sm:$0xff]  }
 0x24b   : > { %2180 = vmatpush1.bf16.msra.mxu0 %v15303_v11  ;;  %2233 = vmatpush1.bf16.msra.mxu1 %v15304_v12  ;;  %v15398_v11 = vld [vmem:[%s19346_s1 + $0x3a4] ss:$8 sps:$4 sm:$0xff]   ;;  %v15393_v12 = vld [vmem:[%s19346_s1 + $0x2a0] ss:$8 sps:$4 sm:$0xff]  }
 0x24c   : > { %2181 = vmatprep.subr.bf16.mxu0 %v15305_v13  ;;  %2234 = vmatprep.subr.bf16.mxu1 %v15307_v14  ;;  %v15396_v13 = vld [vmem:[%s19346_s1 + $0x3a0] ss:$8 sps:$4 sm:$0xff]   ;;  %v15401_v14 = vld [vmem:[%s19346_s1 + $0x294] ss:$8 sps:$4 sm:$0xff]  }
 0x24d   : > { %2199 = vmatprep.mubr.bf16.mxu0 %v17700_v0  ;;  %2252 = vmatprep.mubr.bf16.mxu1 %v17700_v0 }
 0x24f   : > { %2182 = vmatpush1.bf16.msra.mxu0 %v15309_v15  ;;  %2235 = vmatpush1.bf16.msra.mxu1 %v15310_v16  ;;  %v15404_v15 = vld [vmem:[%s19346_s1 + $0x394] ss:$8 sps:$4 sm:$0xff]   ;;  %v15399_v16 = vld [vmem:[%s19346_s1 + $0x290] ss:$8 sps:$4 sm:$0xff]  }
 0x250   : > { %2666 = vmatprep.subr.bf16.mxu0 %v15317_v19  ;;  %2719 = vmatprep.subr.bf16.mxu1 %v15320_v20  ;;  %v15410_v19 = vld [vmem:[%s19346_s1 + $0x384] ss:$8 sps:$4 sm:$0xff]   ;;  %v15405_v20 = vld [vmem:[%s19346_s1 + $0x280] ss:$8 sps:$4 sm:$0xff]  }
 0x252   : > { %13065 = vmatmul.mubr.msk.bf16.vlgmr.msra.gmra.mxu0 %vm1961_vm0, %v15313_v21  ;;  %13067 = vmatmul.mubr.msk.bf16.vlgmr.msra.gmra.mxu1 %vm1961_vm0, %v15313_v21  ;;  %v15408_v21 = vld [vmem:[%s19346_s1 + $0x380] ss:$8 sps:$4 sm:$0xff]  }
 0x253   : > { %2209 = vmatprep.mubr.bf16.mxu0 %v17700_v0  ;;  %2262 = vmatprep.mubr.bf16.mxu1 %v17700_v0 }
 0x254   : > { %2667 = vmatpush1.bf16.msra.mxu0 %v15315_v22  ;;  %2720 = vmatpush1.bf16.msra.mxu1 %v15318_v23  ;;  %v15413_v22 = vld [vmem:[%s19346_s1 + $0x74] ss:$8 sps:$4 sm:$0xff]  }
 0x255   : > { %2668 = vmatprep.subr.bf16.mxu0 %v15323_v24  ;;  %2721 = vmatprep.subr.bf16.mxu1 %v15326_v25  ;;  %v15416_v23 = vld [vmem:[%s19346_s1 + $0x174] ss:$8 sps:$4 sm:$0xff]  }
 0x258   : > { %2669 = vmatpush1.bf16.msra.mxu0 %v15321_v26  ;;  %2722 = vmatpush1.bf16.msra.mxu1 %v15324_v28 }
 0x259   : > { %2670 = vmatprep.subr.bf16.mxu0 %v15329_v29  ;;  %2723 = vmatprep.subr.bf16.mxu1 %v15332_v30 }
 0x25a   : > { %13066 = vmatmul.mubr.msk.bf16.gmra.mxu0 %vm1961_vm0, %v15314_v27  ;;  %13068 = vmatmul.mubr.msk.bf16.gmra.mxu1 %vm1961_vm0, %v15314_v27 }
 0x25c   : > { %2671 = vmatpush1.bf16.msra.mxu0 %v15327_v31  ;;  %2724 = vmatpush1.bf16.msra.mxu1 %v15330_v32 }
 0x25d   : > { %2672 = vmatprep.subr.bf16.mxu0 %v15335_v33  ;;  %2725 = vmatprep.subr.bf16.mxu1 %v15338_v34 }
 0x260   : > { %2673 = vmatpush1.bf16.msra.mxu0 %v15333_v35  ;;  %2726 = vmatpush1.bf16.msra.mxu1 %v15336_v36 }
 0x261   : > { %2674 = vmatprep.subr.bf16.mxu0 %v15341_v37  ;;  %2727 = vmatprep.subr.bf16.mxu1 %v15344_v38 }
 0x264   : > { %2675 = vmatpush1.bf16.msra.mxu0 %v15339_v39  ;;  %2728 = vmatpush1.bf16.msra.mxu1 %v15342_v40 }
 0x265   : > { %2676 = vmatprep.subr.bf16.mxu0 %v15347_v41  ;;  %2729 = vmatprep.subr.bf16.mxu1 %v15350_v42 }
 0x268   : > { %2677 = vmatpush1.bf16.msra.mxu0 %v15345_v43  ;;  %2730 = vmatpush1.bf16.msra.mxu1 %v15348_v44 }
 0x269   : > { %2678 = vmatprep.subr.bf16.mxu0 %v15353_v45  ;;  %2731 = vmatprep.subr.bf16.mxu1 %v15356_v46 }
 0x26c   : > { %2679 = vmatpush1.bf16.msra.mxu0 %v15351_v47  ;;  %2732 = vmatpush1.bf16.msra.mxu1 %v15354_v48 }
 0x26d   : > { %2680 = vmatprep.subr.bf16.mxu0 %v15359_v49  ;;  %2733 = vmatprep.subr.bf16.mxu1 %v15362_v50  ;;  %v15411_v50 = vld [vmem:[%s19346_s1 + $0x70] ss:$8 sps:$4 sm:$0xff]  }
 0x270   : > { %2681 = vmatpush1.bf16.msra.mxu0 %v15357_v51  ;;  %2734 = vmatpush1.bf16.msra.mxu1 %v15360_v52  ;;  %v15414_v51 = vld [vmem:[%s19346_s1 + $0x170] ss:$8 sps:$4 sm:$0xff]  }
 0x271   : > { %2682 = vmatprep.subr.bf16.mxu0 %v15365_v53  ;;  %2735 = vmatprep.subr.bf16.mxu1 %v15368_v54  ;;  %v15419_v54 = vld [vmem:[%s19346_s1 + $0x64] ss:$8 sps:$4 sm:$0xff]  }
 0x274   : > { %2683 = vmatpush2.bf16.msra.mxu0 %v15363_v55  ;;  %2736 = vmatpush2.bf16.msra.mxu1 %v15366_v56  ;;  %v15422_v55 = vld [vmem:[%s19346_s1 + $0x164] ss:$8 sps:$4 sm:$0xff]  }
 0x275   : > { %2684 = vmatprep.subr.bf16.mxu0 %v15371_v57  ;;  %2737 = vmatprep.subr.bf16.mxu1 %v15374_v58 }
 0x278   : > { %2685 = vmatpush2.bf16.msra.mxu0 %v15369_v59  ;;  %2738 = vmatpush2.bf16.msra.mxu1 %v15372_v60 }
 0x279   : > { %2686 = vmatprep.subr.bf16.mxu0 %v15377_v61  ;;  %2739 = vmatprep.subr.bf16.mxu1 %v15380_v62  ;;  %v15417_v62 = vld [vmem:[%s19346_s1 + $0x60] ss:$8 sps:$4 sm:$0xff]  }
 0x27c   : > { %2687 = vmatpush2.bf16.msra.mxu0 %v15375_v63  ;;  %2740 = vmatpush2.bf16.msra.mxu1 %v15378_v1  ;;  %v15420_v63 = vld [vmem:[%s19346_s1 + $0x160] ss:$8 sps:$4 sm:$0xff]  }
 0x27d   : > { %2688 = vmatprep.subr.bf16.mxu0 %v15383_v2  ;;  %2741 = vmatprep.subr.bf16.mxu1 %v15386_v3  ;;  %v15425_v3 = vld [vmem:[%s19346_s1 + $0x54] ss:$8 sps:$4 sm:$0xff]  }
 0x280   : > { %2689 = vmatpush2.bf16.msra.mxu0 %v15381_v4  ;;  %2742 = vmatpush2.bf16.msra.mxu1 %v15384_v5  ;;  %v15428_v4 = vld [vmem:[%s19346_s1 + $0x154] ss:$8 sps:$4 sm:$0xff]  }
 0x281   : > { %2690 = vmatprep.subr.bf16.mxu0 %v15389_v6  ;;  %2743 = vmatprep.subr.bf16.mxu1 %v15392_v7  ;;  %v15423_v7 = vld [vmem:[%s19346_s1 + $0x50] ss:$8 sps:$4 sm:$0xff]  }
 0x284   : > { %2691 = vmatpush2.bf16.msra.mxu0 %v15387_v8  ;;  %2744 = vmatpush2.bf16.msra.mxu1 %v15390_v9  ;;  %v15426_v8 = vld [vmem:[%s19346_s1 + $0x150] ss:$8 sps:$4 sm:$0xff]  }
 0x285   : > { %2692 = vmatprep.subr.bf16.mxu0 %v15395_v10  ;;  %2745 = vmatprep.subr.bf16.mxu1 %v15398_v11 }
 0x288   : > { %2693 = vmatpush2.bf16.msra.mxu0 %v15393_v12  ;;  %2746 = vmatpush2.bf16.msra.mxu1 %v15396_v13 }
 0x289   : > { %2694 = vmatprep.subr.bf16.mxu0 %v15401_v14  ;;  %2747 = vmatprep.subr.bf16.mxu1 %v15404_v15  ;;  %v15431_v15 = vld [vmem:[%s19346_s1 + $0x44] ss:$8 sps:$4 sm:$0xff]  }
 0x28c   : > { %2695 = vmatpush2.bf16.msra.mxu0 %v15399_v16  ;;  %2748 = vmatpush2.bf16.msra.mxu1 %v15402_v17  ;;  %v15434_v16 = vld [vmem:[%s19346_s1 + $0x144] ss:$8 sps:$4 sm:$0xff]   ;;  %v15429_v17 = vld [vmem:[%s19346_s1 + $0x40] ss:$8 sps:$4 sm:$0xff]  }
 0x28d   : > { %2696 = vmatprep.subr.bf16.mxu0 %v15407_v18  ;;  %2749 = vmatprep.subr.bf16.mxu1 %v15410_v19  ;;  %v15432_v18 = vld [vmem:[%s19346_s1 + $0x140] ss:$8 sps:$4 sm:$0xff]  }
 0x290   : > { %2697 = vmatpush2.bf16.msra.mxu0 %v15405_v20  ;;  %2750 = vmatpush2.bf16.msra.mxu1 %v15408_v21  ;;  %v15437_v21 = vld [vmem:[%s19346_s1 + $0x34] ss:$8 sps:$4 sm:$0xff]  }
 0x291   : > { %3092 = vmatprep.subr.bf16.mxu0 %v15413_v22  ;;  %3145 = vmatprep.subr.bf16.mxu1 %v15416_v23  ;;  %v15440_v22 = vld [vmem:[%s19346_s1 + $0x134] ss:$8 sps:$4 sm:$0xff]   ;;  %v15435_v23 = vld [vmem:[%s19346_s1 + $0x30] ss:$8 sps:$4 sm:$0xff]  }
 0x302   : > { %v18368_v24 = vpop.f32.mrf.mxu0  ;;  %v18370_v25 = vpop.f32.mrf.mxu1 }
 0x304   : > { %v18372_v26 = vpop.f32.mrf.mxu0  ;;  %v18374_v27 = vpop.f32.mrf.mxu1 }
 0x306   : > { %v18376_v28 = vpop.f32.mrf.mxu0  ;;  %v18378_v29 = vpop.f32.mrf.mxu1 }
 0x307   : > { %v2074_v30 = vpack.c.bf16 %v18376_v28, %v18368_v24  ;;  %v2076_v31 = vpack.c.bf16 %v18378_v29, %v18370_v25  ;;  %v16706_v24 = vld [vmem:[%s18270_s28 + $0x40] ss:$16 sps:$4 sm:$0xff]   ;;  %v16707_v28 = vld [vmem:[%s18270_s28 + $0x48] ss:$16 sps:$4 sm:$0xff]   ;;  %v16708_v25 = vld [vmem:[%s18270_s28 + $0x24] ss:$16 sps:$4 sm:$0xff]  }
 0x308   : > { %v18384_v32 = vpop.f32.mrf.mxu0  ;;  %v18386_v33 = vpop.f32.mrf.mxu1  ;;  %v16709_v29 = vld [vmem:[%s18270_s28 + $0x2c] ss:$16 sps:$4 sm:$0xff]  }
 0x309   : > { %v2075_v19 = vpack.c.bf16 %v18384_v32, %v18372_v26  ;;  %v2077_v20 = vpack.c.bf16 %v18386_v33, %v18374_v27  ;;  %v15438_v26 = vld [vmem:[%s19346_s1 + $0x130] ss:$8 sps:$4 sm:$0xff]   ;;  %v15443_v32 = vld [vmem:[%s19346_s1 + $0x24] ss:$8 sps:$4 sm:$0xff]   ;;  %v15441_v33 = vld [vmem:[%s19346_s1 + $0x20] ss:$8 sps:$4 sm:$0xff]  }
 0x30a   : > { %v18388_v34 = vpop.f32.mrf.mxu0  ;;  %v18390_v35 = vpop.f32.mrf.mxu1  ;;  %v15446_v27 = vld [vmem:[%s19346_s1 + $0x124] ss:$8 sps:$4 sm:$0xff]  }
 0x30c   : > { %v18392_v36 = vpop.f32.mrf.mxu0  ;;  %v18394_v37 = vpop.f32.mrf.mxu1 }
 0x30e   : > { %v18396_v38 = vpop.f32.mrf.mxu0  ;;  %v18398_v39 = vpop.f32.mrf.mxu1 }
 0x30f   : > { %v2078_v40 = vpack.c.bf16 %v18396_v38, %v18388_v34  ;;  %v2080_v41 = vpack.c.bf16 %v18398_v39, %v18390_v35  ;;  %v16713_v34 = vld [vmem:[%s18270_s28 + $0xc] ss:$16 sps:$4 sm:$0xff]   ;;  %v15507_v39 = vld [vmem:[#allocation2 + $0x20] sm:$0xff]  }
 0x310   : > { %v18404_v42 = vpop.f32.mrf.mxu0  ;;  %v18406_v43 = vpop.f32.mrf.mxu1  ;;  %v15511_v38 = vld [vmem:[%s19346_s1 + $0x474] ss:$8 sps:$4 sm:$0xff]  }
 0x311   : > { %v15514_v35 = vld [vmem:[%s19346_s1 + $0x574] ss:$8 sps:$4 sm:$0xff]  }
 0x312   : > { %v2201_v44 = vpop.f32.mrf.mxu0  ;;  %v2254_v45 = vpop.f32.mrf.mxu1 }
 0x314   : > { %v2203_v46 = vpop.f32.mrf.mxu0  ;;  %v2256_v47 = vpop.f32.mrf.mxu1 }
 0x316   : > { %v2205_v48 = vpop.f32.mrf.mxu0  ;;  %v2258_v49 = vpop.f32.mrf.mxu1 }
 0x317   : > { %v2273_v58 = vpack.c.bf16 %v2205_v48, %v2201_v44  ;;  %v2275_v59 = vpack.c.bf16 %v2258_v49, %v2254_v45  ;;  %v15444_v44 = vld [vmem:[%s19346_s1 + $0x120] ss:$8 sps:$4 sm:$0xff]   ;;  %v15449_v45 = vld [vmem:[%s19346_s1 + $0x14] ss:$8 sps:$4 sm:$0xff]   ;;  %v15450_v48 = vld [vmem:[%s19346_s1 + $0x110] ss:$8 sps:$4 sm:$0xff]  }
 0x318   : > { %v2207_v52 = vpop.f32.mrf.mxu0  ;;  %v2260_v53 = vpop.f32.mrf.mxu1  ;;  %v15455_v49 = vld [vmem:[%s19346_s1 + $0x4] ss:$8 sps:$4 sm:$0xff]  }
 0x319   : > { %v2274_v56 = vpack.c.bf16 %v2207_v52, %v2203_v46  ;;  %v2276_v57 = vpack.c.bf16 %v2260_v53, %v2256_v47  ;;  %v15452_v46 = vld [vmem:[%s19346_s1 + $0x114] ss:$8 sps:$4 sm:$0xff]   ;;  %v15447_v47 = vld [vmem:[%s19346_s1 + $0x10] ss:$8 sps:$4 sm:$0xff]   ;;  %v15456_v52 = vld [vmem:[%s19346_s1 + $0x100] ss:$8 sps:$4 sm:$0xff]  }
 0x31a   : > { %v2211_v60 = vpop.f32.mrf.mxu0  ;;  %v2264_v61 = vpop.f32.mrf.mxu1  ;;  %v15461_v53 = vld [vmem:[%s19346_s1 + $0xf4] ss:$8 sps:$4 sm:$0xff]  }
 0x31b   : > { %2698 = vmatprep.mubr.bf16.mxu0 %v2274_v56  ;;  %2751 = vmatprep.mubr.bf16.mxu1 %v2276_v57  ;;  %v15462_v56 = vld [vmem:[%s19346_s1 + $0x1f0] ss:$8 sps:$4 sm:$0xff]   ;;  %v15467_v57 = vld [vmem:[%s19346_s1 + $0xe4] ss:$8 sps:$4 sm:$0xff]  }
 0x31c   : > { %v2213_v1 = vpop.f32.mrf.mxu0  ;;  %v2266_v2 = vpop.f32.mrf.mxu1  ;;  %2699 = vmatmul.mubr.bf16.vlgmr.msra.gmra.mxu0 %v2273_v58  ;;  %2752 = vmatmul.mubr.bf16.vlgmr.msra.gmra.mxu1 %v2275_v59  ;;  %v15470_v58 = vld [vmem:[%s19346_s1 + $0x1e4] ss:$8 sps:$4 sm:$0xff]   ;;  %v15465_v59 = vld [vmem:[%s19346_s1 + $0xe0] ss:$8 sps:$4 sm:$0xff]  }
 0x31d   : > { %3093 = vmatpush1.bf16.msra.mxu0 %v15411_v50  ;;  %3146 = vmatpush1.bf16.msra.mxu1 %v15414_v51  ;;  %v15458_v50 = vld [vmem:[%s19346_s1 + $0x104] ss:$8 sps:$4 sm:$0xff]   ;;  %v15453_v51 = vld [vmem:[%s19346_s1] ss:$8 sps:$4 sm:$0xff]  }
 0x31e   : > { %v2215_v5 = vpop.f32.mrf.mxu0  ;;  %v2268_v6 = vpop.f32.mrf.mxu1  ;;  %3094 = vmatprep.subr.bf16.mxu0 %v15419_v54  ;;  %3147 = vmatprep.subr.bf16.mxu1 %v15422_v55  ;;  %v15464_v54 = vld [vmem:[%s19346_s1 + $0x1f4] ss:$8 sps:$4 sm:$0xff]   ;;  %v15459_v55 = vld [vmem:[%s19346_s1 + $0xf0] ss:$8 sps:$4 sm:$0xff]  }
 0x31f   : > { %v2277_v9 = vpack.c.bf16 %v2215_v5, %v2211_v60  ;;  %v2279_v10 = vpack.c.bf16 %v2268_v6, %v2264_v61  ;;  %v15468_v60 = vld [vmem:[%s19346_s1 + $0x1e0] ss:$8 sps:$4 sm:$0xff]   ;;  %v15473_v61 = vld [vmem:[%s19346_s1 + $0xd4] ss:$8 sps:$4 sm:$0xff]  }
 0x320   : > { %v2217_v11 = vpop.f32.mrf.mxu0  ;;  %v2270_v12 = vpop.f32.mrf.mxu1  ;;  %v15480_v5 = vld [vmem:[%s19346_s1 + $0x1c0] ss:$8 sps:$4 sm:$0xff]   ;;  %v15485_v6 = vld [vmem:[%s19346_s1 + $0xb4] ss:$8 sps:$4 sm:$0xff]  }
 0x321   : > { %v2278_v13 = vpack.c.bf16 %v2217_v11, %v2213_v1  ;;  %v2280_v14 = vpack.c.bf16 %v2270_v12, %v2266_v2  ;;  %3095 = vmatpush1.bf16.msra.mxu0 %v15417_v62  ;;  %3148 = vmatpush1.bf16.msra.mxu1 %v15420_v63  ;;  %v15476_v62 = vld [vmem:[%s19346_s1 + $0x1d4] ss:$8 sps:$4 sm:$0xff]   ;;  %v15471_v63 = vld [vmem:[%s19346_s1 + $0xd0] ss:$8 sps:$4 sm:$0xff]   ;;  %v15479_v2 = vld [vmem:[%s19346_s1 + $0xc4] ss:$8 sps:$4 sm:$0xff]  }
 0x322   : > { %3096 = vmatprep.subr.bf16.mxu0 %v15425_v3  ;;  %3149 = vmatprep.subr.bf16.mxu1 %v15428_v4  ;;  %v15474_v1 = vld [vmem:[%s19346_s1 + $0x1d0] ss:$8 sps:$4 sm:$0xff]   ;;  %v15482_v3 = vld [vmem:[%s19346_s1 + $0x1c4] ss:$8 sps:$4 sm:$0xff]   ;;  %v15477_v4 = vld [vmem:[%s19346_s1 + $0xc0] ss:$8 sps:$4 sm:$0xff]  }
 0x323   : > { %2708 = vmatprep.mubr.bf16.mxu0 %v2278_v13  ;;  %2761 = vmatprep.mubr.bf16.mxu1 %v2280_v14  ;;  %v15494_v11 = vld [vmem:[%s19346_s1 + $0x1a4] ss:$8 sps:$4 sm:$0xff]   ;;  %v15489_v12 = vld [vmem:[%s19346_s1 + $0xa0] ss:$8 sps:$4 sm:$0xff]   ;;  %v15497_v14 = vld [vmem:[%s19346_s1 + $0x94] ss:$8 sps:$4 sm:$0xff]  }
 0x324   : > { %2709 = vmatmul.mubr.bf16.gmra.mxu0 %v2277_v9  ;;  %2762 = vmatmul.mubr.bf16.gmra.mxu1 %v2279_v10  ;;  %v15486_v9 = vld [vmem:[%s19346_s1 + $0x1b0] ss:$8 sps:$4 sm:$0xff]   ;;  %v15491_v10 = vld [vmem:[%s19346_s1 + $0xa4] ss:$8 sps:$4 sm:$0xff]   ;;  %v15492_v13 = vld [vmem:[%s19346_s1 + $0x1a0] ss:$8 sps:$4 sm:$0xff]  }
 0x325   : > { %3097 = vmatpush1.bf16.msra.mxu0 %v15423_v7  ;;  %3150 = vmatpush1.bf16.msra.mxu1 %v15426_v8  ;;  %v15488_v7 = vld [vmem:[%s19346_s1 + $0x1b4] ss:$8 sps:$4 sm:$0xff]   ;;  %v15483_v8 = vld [vmem:[%s19346_s1 + $0xb0] ss:$8 sps:$4 sm:$0xff]  }
 0x326   : > { %3124 = vmatprep.mubr.bf16.mxu0 %v2075_v19  ;;  %3177 = vmatprep.mubr.bf16.mxu1 %v2077_v20  ;;  %v15506_v19 = vld [vmem:[%s19346_s1 + $0x184] ss:$8 sps:$4 sm:$0xff]   ;;  %v15501_v20 = vld [vmem:[%s19346_s1 + $0x80] ss:$8 sps:$4 sm:$0xff]  }
 0x327   : > { %3098 = vmatprep.subr.bf16.mxu0 %v15431_v15  ;;  %3151 = vmatprep.subr.bf16.mxu1 %v15434_v16  ;;  %v15500_v15 = vld [vmem:[%s19346_s1 + $0x194] ss:$8 sps:$4 sm:$0xff]   ;;  %v15495_v16 = vld [vmem:[%s19346_s1 + $0x90] ss:$8 sps:$4 sm:$0xff]  }
 0x329   : > { %3099 = vmatpush1.bf16.msra.mxu0 %v15429_v17  ;;  %3152 = vmatpush1.bf16.msra.mxu1 %v15432_v18  ;;  %v15498_v17 = vld [vmem:[%s19346_s1 + $0x190] ss:$8 sps:$4 sm:$0xff]   ;;  %v15503_v18 = vld [vmem:[%s19346_s1 + $0x84] ss:$8 sps:$4 sm:$0xff]  }
 0x32a   : > { %3100 = vmatprep.subr.bf16.mxu0 %v15437_v21  ;;  %3153 = vmatprep.subr.bf16.mxu1 %v15440_v22  ;;  %v15504_v21 = vld [vmem:[%s19346_s1 + $0x180] ss:$8 sps:$4 sm:$0xff]   ;;  %v16700_v22 = vld [vmem:[%s18270_s28 + $0x64] ss:$16 sps:$4 sm:$0xff]  }
 0x32d   : > { %3101 = vmatpush1.bf16.msra.mxu0 %v15435_v23  ;;  %3154 = vmatpush1.bf16.msra.mxu1 %v15438_v26  ;;  %v16701_v23 = vld [vmem:[%s18270_s28 + $0x6c] ss:$16 sps:$4 sm:$0xff]   ;;  %v2079_v26 = vpack.c.bf16 %v18404_v42, %v18392_v36  ;;  %v16704_v36 = vld [vmem:[%s18270_s28 + $0x44] ss:$16 sps:$4 sm:$0xff]  }
 0x32e   : > { %3102 = vmatprep.subr.bf16.mxu0 %v15443_v32  ;;  %3155 = vmatprep.subr.bf16.mxu1 %v15446_v27  ;;  %v2081_v32 = vpack.c.bf16 %v18406_v43, %v18394_v37  ;;  %v16702_v27 = vld [vmem:[%s18270_s28 + $0x60] ss:$16 sps:$4 sm:$0xff]   ;;  %v16705_v37 = vld [vmem:[%s18270_s28 + $0x4c] ss:$16 sps:$4 sm:$0xff]   ;;  %v16712_v42 = vld [vmem:[%s18270_s28 + $0x4] ss:$16 sps:$4 sm:$0xff]  }
 0x32f   : > { %v15509_v43 = vld [vmem:[%s19346_s1 + $0x470] ss:$8 sps:$4 sm:$0xff]  }
 0x331   : > { %3103 = vmatpush1.bf16.msra.mxu0 %v15441_v33  ;;  %3156 = vmatpush1.bf16.msra.mxu1 %v15444_v44  ;;  %v16703_v33 = vld [vmem:[%s18270_s28 + $0x68] ss:$16 sps:$4 sm:$0xff]  }
 0x332   : > { %3104 = vmatprep.subr.bf16.mxu0 %v15449_v45  ;;  %3157 = vmatprep.subr.bf16.mxu1 %v15452_v46  ;;  %v15512_v44 = vld [vmem:[%s19346_s1 + $0x570] ss:$8 sps:$4 sm:$0xff]   ;;  %v15517_v45 = vld [vmem:[%s19346_s1 + $0x464] ss:$8 sps:$4 sm:$0xff]  }
 0x333   : > { %v15520_v46 = vld [vmem:[%s19346_s1 + $0x564] ss:$8 sps:$4 sm:$0xff]  }
 0x335   : > { %3105 = vmatpush1.bf16.msra.mxu0 %v15447_v47  ;;  %3158 = vmatpush1.bf16.msra.mxu1 %v15450_v48  ;;  %v15508_v47 = vld [vmem:[#allocation2 + $0x28] sm:$0xff]  }
 0x336   : > { %3106 = vmatprep.subr.bf16.mxu0 %v15455_v49  ;;  %3159 = vmatprep.subr.bf16.mxu1 %v15458_v50  ;;  %v15515_v48 = vld [vmem:[%s19346_s1 + $0x460] ss:$8 sps:$4 sm:$0xff]   ;;  %v15523_v50 = vld [vmem:[%s19346_s1 + $0x454] ss:$8 sps:$4 sm:$0xff]  }
 0x337   : > { %v15518_v49 = vld [vmem:[%s19346_s1 + $0x560] ss:$8 sps:$4 sm:$0xff]  }
 0x339   : > { %3107 = vmatpush1.bf16.msra.mxu0 %v15453_v51  ;;  %3160 = vmatpush1.bf16.msra.mxu1 %v15456_v52  ;;  %v15526_v51 = vld [vmem:[%s19346_s1 + $0x554] ss:$8 sps:$4 sm:$0xff]   ;;  %v15521_v52 = vld [vmem:[%s19346_s1 + $0x450] ss:$8 sps:$4 sm:$0xff]  }
 0x33a   : > { %3108 = vmatprep.subr.bf16.mxu0 %v15461_v53  ;;  %3161 = vmatprep.subr.bf16.mxu1 %v15464_v54  ;;  %v15524_v53 = vld [vmem:[%s19346_s1 + $0x550] ss:$8 sps:$4 sm:$0xff]   ;;  %v15529_v54 = vld [vmem:[%s19346_s1 + $0x444] ss:$8 sps:$4 sm:$0xff]  }
 0x33d   : > { %3109 = vmatpush2.bf16.msra.mxu0 %v15459_v55  ;;  %3162 = vmatpush2.bf16.msra.mxu1 %v15462_v56  ;;  %v15532_v55 = vld [vmem:[%s19346_s1 + $0x544] ss:$8 sps:$4 sm:$0xff]   ;;  %v15527_v56 = vld [vmem:[%s19346_s1 + $0x440] ss:$8 sps:$4 sm:$0xff]  }
 0x33e   : > { %3110 = vmatprep.subr.bf16.mxu0 %v15467_v57  ;;  %3163 = vmatprep.subr.bf16.mxu1 %v15470_v58  ;;  %v15530_v57 = vld [vmem:[%s19346_s1 + $0x540] ss:$8 sps:$4 sm:$0xff]   ;;  %v15535_v58 = vld [vmem:[%s19346_s1 + $0x434] ss:$8 sps:$4 sm:$0xff]  }
 0x341   : > { %3111 = vmatpush2.bf16.msra.mxu0 %v15465_v59  ;;  %3164 = vmatpush2.bf16.msra.mxu1 %v15468_v60  ;;  %v15538_v59 = vld [vmem:[%s19346_s1 + $0x534] ss:$8 sps:$4 sm:$0xff]   ;;  %v15533_v60 = vld [vmem:[%s19346_s1 + $0x430] ss:$8 sps:$4 sm:$0xff]  }
 0x342   : > { %3112 = vmatprep.subr.bf16.mxu0 %v15473_v61  ;;  %3165 = vmatprep.subr.bf16.mxu1 %v15476_v62  ;;  %v15536_v61 = vld [vmem:[%s19346_s1 + $0x530] ss:$8 sps:$4 sm:$0xff]   ;;  %v15541_v62 = vld [vmem:[%s19346_s1 + $0x424] ss:$8 sps:$4 sm:$0xff]  }
 0x345   : > { %3113 = vmatpush2.bf16.msra.mxu0 %v15471_v63  ;;  %3166 = vmatpush2.bf16.msra.mxu1 %v15474_v1  ;;  %v15544_v63 = vld [vmem:[%s19346_s1 + $0x524] ss:$8 sps:$4 sm:$0xff]   ;;  %v15539_v1 = vld [vmem:[%s19346_s1 + $0x420] ss:$8 sps:$4 sm:$0xff]  }
 0x346   : > { %3114 = vmatprep.subr.bf16.mxu0 %v15479_v2  ;;  %3167 = vmatprep.subr.bf16.mxu1 %v15482_v3  ;;  %v15542_v2 = vld [vmem:[%s19346_s1 + $0x520] ss:$8 sps:$4 sm:$0xff]   ;;  %v15547_v3 = vld [vmem:[%s19346_s1 + $0x414] ss:$8 sps:$4 sm:$0xff]  }
 0x349   : > { %3115 = vmatpush2.bf16.msra.mxu0 %v15477_v4  ;;  %3168 = vmatpush2.bf16.msra.mxu1 %v15480_v5  ;;  %v15550_v4 = vld [vmem:[%s19346_s1 + $0x514] ss:$8 sps:$4 sm:$0xff]   ;;  %v15545_v5 = vld [vmem:[%s19346_s1 + $0x410] ss:$8 sps:$4 sm:$0xff]  }
 0x34a   : > { %3116 = vmatprep.subr.bf16.mxu0 %v15485_v6  ;;  %3169 = vmatprep.subr.bf16.mxu1 %v15488_v7  ;;  %v15548_v6 = vld [vmem:[%s19346_s1 + $0x510] ss:$8 sps:$4 sm:$0xff]   ;;  %v15553_v7 = vld [vmem:[%s19346_s1 + $0x404] ss:$8 sps:$4 sm:$0xff]  }
 0x34d   : > { %3117 = vmatpush2.bf16.msra.mxu0 %v15483_v8  ;;  %3170 = vmatpush2.bf16.msra.mxu1 %v15486_v9  ;;  %v15556_v8 = vld [vmem:[%s19346_s1 + $0x504] ss:$8 sps:$4 sm:$0xff]   ;;  %v15551_v9 = vld [vmem:[%s19346_s1 + $0x400] ss:$8 sps:$4 sm:$0xff]  }
 0x34e   : > { %3118 = vmatprep.subr.bf16.mxu0 %v15491_v10  ;;  %3171 = vmatprep.subr.bf16.mxu1 %v15494_v11  ;;  %v15554_v10 = vld [vmem:[%s19346_s1 + $0x500] ss:$8 sps:$4 sm:$0xff]   ;;  %v15559_v11 = vld [vmem:[%s19346_s1 + $0x4f4] ss:$8 sps:$4 sm:$0xff]  }
 0x351   : > { %3119 = vmatpush2.bf16.msra.mxu0 %v15489_v12  ;;  %3172 = vmatpush2.bf16.msra.mxu1 %v15492_v13  ;;  %v15562_v12 = vld [vmem:[%s19346_s1 + $0x5f4] ss:$8 sps:$4 sm:$0xff]   ;;  %v15557_v13 = vld [vmem:[%s19346_s1 + $0x4f0] ss:$8 sps:$4 sm:$0xff]  }
 0x352   : > { %3120 = vmatprep.subr.bf16.mxu0 %v15497_v14  ;;  %3173 = vmatprep.subr.bf16.mxu1 %v15500_v15  ;;  %v15560_v14 = vld [vmem:[%s19346_s1 + $0x5f0] ss:$8 sps:$4 sm:$0xff]   ;;  %v15565_v15 = vld [vmem:[%s19346_s1 + $0x4e4] ss:$8 sps:$4 sm:$0xff]  }
 0x355   : > { %3121 = vmatpush2.bf16.msra.mxu0 %v15495_v16  ;;  %3174 = vmatpush2.bf16.msra.mxu1 %v15498_v17  ;;  %v15568_v16 = vld [vmem:[%s19346_s1 + $0x5e4] ss:$8 sps:$4 sm:$0xff]   ;;  %v15563_v17 = vld [vmem:[%s19346_s1 + $0x4e0] ss:$8 sps:$4 sm:$0xff]  }
 0x356   : > { %3122 = vmatprep.subr.bf16.mxu0 %v15503_v18  ;;  %3175 = vmatprep.subr.bf16.mxu1 %v15506_v19  ;;  %v15566_v18 = vld [vmem:[%s19346_s1 + $0x5e0] ss:$8 sps:$4 sm:$0xff]   ;;  %v15571_v19 = vld [vmem:[%s19346_s1 + $0x4d4] ss:$8 sps:$4 sm:$0xff]  }
 0x359   : > { %3123 = vmatpush2.bf16.msra.mxu0 %v15501_v20  ;;  %3176 = vmatpush2.bf16.msra.mxu1 %v15504_v21  ;;  %v15574_v20 = vld [vmem:[%s19346_s1 + $0x5d4] ss:$8 sps:$4 sm:$0xff]   ;;  %v15569_v21 = vld [vmem:[%s19346_s1 + $0x4d0] ss:$8 sps:$4 sm:$0xff]  }
 0x35a   : > { %3227 = vmatprep.subr.bf16.mxu0 %v16700_v22  ;;  %3280 = vmatprep.subr.bf16.mxu1 %v16701_v23  ;;  %v15572_v22 = vld [vmem:[%s19346_s1 + $0x5d0] ss:$8 sps:$4 sm:$0xff]   ;;  %v15577_v23 = vld [vmem:[%s19346_s1 + $0x4c4] ss:$8 sps:$4 sm:$0xff]  }
 0x35c   : > { %3125 = vmatmul.mubr.bf16.vlgmr.msra.gmra.mxu0 %v2074_v30  ;;  %3178 = vmatmul.mubr.bf16.vlgmr.msra.gmra.mxu1 %v2076_v31  ;;  %v16710_v30 = vld [vmem:[%s18270_s28 + $0x20] ss:$16 sps:$4 sm:$0xff]   ;;  %v16711_v31 = vld [vmem:[%s18270_s28 + $0x28] ss:$16 sps:$4 sm:$0xff]  }
 0x35d   : > { %3134 = vmatprep.mubr.bf16.mxu0 %v2079_v26  ;;  %3187 = vmatprep.mubr.bf16.mxu1 %v2081_v32  ;;  %v15580_v26 = vld [vmem:[%s19346_s1 + $0x5c4] ss:$8 sps:$4 sm:$0xff]   ;;  %v15575_v32 = vld [vmem:[%s19346_s1 + $0x4c0] ss:$8 sps:$4 sm:$0xff]  }
 0x35e   : > { %3228 = vmatpush1.bf16.msra.mxu0 %v16702_v27  ;;  %3281 = vmatpush1.bf16.msra.mxu1 %v16703_v33  ;;  %v15578_v27 = vld [vmem:[%s19346_s1 + $0x5c0] ss:$8 sps:$4 sm:$0xff]   ;;  %v15583_v33 = vld [vmem:[%s19346_s1 + $0x4b4] ss:$8 sps:$4 sm:$0xff]  }
 0x35f   : > { %3229 = vmatprep.subr.bf16.mxu0 %v16704_v36  ;;  %3282 = vmatprep.subr.bf16.mxu1 %v16705_v37  ;;  %v15586_v36 = vld [vmem:[%s19346_s1 + $0x5b4] ss:$8 sps:$4 sm:$0xff]   ;;  %v15581_v37 = vld [vmem:[%s19346_s1 + $0x4b0] ss:$8 sps:$4 sm:$0xff]  }
 0x362   : > { %3230 = vmatpush1.bf16.msra.mxu0 %v16706_v24  ;;  %3283 = vmatpush1.bf16.msra.mxu1 %v16707_v28  ;;  %v15584_v24 = vld [vmem:[%s19346_s1 + $0x5b0] ss:$8 sps:$4 sm:$0xff]   ;;  %v15589_v28 = vld [vmem:[%s19346_s1 + $0x4a4] ss:$8 sps:$4 sm:$0xff]  }
 0x363   : > { %3231 = vmatprep.subr.bf16.mxu0 %v16708_v25  ;;  %3284 = vmatprep.subr.bf16.mxu1 %v16709_v29  ;;  %v15592_v25 = vld [vmem:[%s19346_s1 + $0x5a4] ss:$8 sps:$4 sm:$0xff]   ;;  %v15587_v29 = vld [vmem:[%s19346_s1 + $0x4a0] ss:$8 sps:$4 sm:$0xff]  }
 0x364   : > { %3135 = vmatmul.mubr.bf16.gmra.mxu0 %v2078_v40  ;;  %3188 = vmatmul.mubr.bf16.gmra.mxu1 %v2080_v41  ;;  %v16714_v40 = vld [vmem:[%s18270_s28] ss:$16 sps:$4 sm:$0xff]   ;;  %v16715_v41 = vld [vmem:[%s18270_s28 + $0x8] ss:$16 sps:$4 sm:$0xff]   ;;  %s1846_s28 = scalar_lea.vmem %s17931_s27, %s13040_s18 }
 0x365   : > { %3251 = vmatprep.mubr.bf16.mxu0 %v17700_v0  ;;  %3304 = vmatprep.mubr.bf16.mxu1 %v17700_v0 }
 0x366   : > { %3232 = vmatpush1.bf16.msra.mxu0 %v16710_v30  ;;  %3285 = vmatpush1.bf16.msra.mxu1 %v16711_v31  ;;  %v15590_v30 = vld [vmem:[%s19346_s1 + $0x5a0] ss:$8 sps:$4 sm:$0xff]   ;;  %v15595_v31 = vld [vmem:[%s19346_s1 + $0x494] ss:$8 sps:$4 sm:$0xff]  }
 0x367   : > { %3233 = vmatprep.subr.bf16.mxu0 %v16712_v42  ;;  %3286 = vmatprep.subr.bf16.mxu1 %v16713_v34  ;;  %v15598_v42 = vld [vmem:[%s19346_s1 + $0x594] ss:$8 sps:$4 sm:$0xff]   ;;  %v15593_v34 = vld [vmem:[%s19346_s1 + $0x490] ss:$8 sps:$4 sm:$0xff]  }
 0x36a   : > { %3234 = vmatpush1.bf16.msra.mxu0 %v16714_v40  ;;  %3287 = vmatpush1.bf16.msra.mxu1 %v16715_v41  ;;  %v15599_v40 = vld [vmem:[%s19346_s1 + $0x480] ss:$8 sps:$4 sm:$0xff]  }
 0x36b   : > { %3718 = vmatprep.subr.bf16.mxu0 %v15511_v38  ;;  %3771 = vmatprep.subr.bf16.mxu1 %v15514_v35  ;;  %v15596_v38 = vld [vmem:[%s19346_s1 + $0x590] ss:$8 sps:$4 sm:$0xff]   ;;  %v15601_v35 = vld [vmem:[%s19346_s1 + $0x484] ss:$8 sps:$4 sm:$0xff]   ;;  %v15602_v41 = vld [vmem:[%s19346_s1 + $0x580] ss:$8 sps:$4 sm:$0xff]  }
 0x36d   : > { %13263 = vmatmul.mubr.msk.bf16.vlgmr.msra.gmra.mxu0 %vm1961_vm0, %v15507_v39  ;;  %13265 = vmatmul.mubr.msk.bf16.vlgmr.msra.gmra.mxu1 %vm1961_vm0, %v15507_v39  ;;  %v15604_v39 = vld [vmem:[%s19346_s1 + $0x584] ss:$8 sps:$4 sm:$0xff]  }
 0x36e   : > { %3261 = vmatprep.mubr.bf16.mxu0 %v17700_v0  ;;  %3314 = vmatprep.mubr.bf16.mxu1 %v17700_v0 }
 0x36f   : > { %3719 = vmatpush1.bf16.msra.mxu0 %v15509_v43  ;;  %3772 = vmatpush1.bf16.msra.mxu1 %v15512_v44 }
 0x370   : > { %3720 = vmatprep.subr.bf16.mxu0 %v15517_v45  ;;  %3773 = vmatprep.subr.bf16.mxu1 %v15520_v46 }
 0x373   : > { %3721 = vmatpush1.bf16.msra.mxu0 %v15515_v48  ;;  %3774 = vmatpush1.bf16.msra.mxu1 %v15518_v49 }
 0x374   : > { %3722 = vmatprep.subr.bf16.mxu0 %v15523_v50  ;;  %3775 = vmatprep.subr.bf16.mxu1 %v15526_v51 }
 0x375   : > { %13264 = vmatmul.mubr.msk.bf16.gmra.mxu0 %vm1961_vm0, %v15508_v47  ;;  %13266 = vmatmul.mubr.msk.bf16.gmra.mxu1 %vm1961_vm0, %v15508_v47 }
 0x377   : > { %3723 = vmatpush1.bf16.msra.mxu0 %v15521_v52  ;;  %3776 = vmatpush1.bf16.msra.mxu1 %v15524_v53 }
 0x378   : > { %3724 = vmatprep.subr.bf16.mxu0 %v15529_v54  ;;  %3777 = vmatprep.subr.bf16.mxu1 %v15532_v55 }
 0x37b   : > { %3725 = vmatpush1.bf16.msra.mxu0 %v15527_v56  ;;  %3778 = vmatpush1.bf16.msra.mxu1 %v15530_v57 }
 0x37c   : > { %3726 = vmatprep.subr.bf16.mxu0 %v15535_v58  ;;  %3779 = vmatprep.subr.bf16.mxu1 %v15538_v59 }
 0x37f   : > { %3727 = vmatpush1.bf16.msra.mxu0 %v15533_v60  ;;  %3780 = vmatpush1.bf16.msra.mxu1 %v15536_v61 }
 0x380   : > { %3728 = vmatprep.subr.bf16.mxu0 %v15541_v62  ;;  %3781 = vmatprep.subr.bf16.mxu1 %v15544_v63 }
 0x383   : > { %3729 = vmatpush1.bf16.msra.mxu0 %v15539_v1  ;;  %3782 = vmatpush1.bf16.msra.mxu1 %v15542_v2 }
 0x384   : > { %3730 = vmatprep.subr.bf16.mxu0 %v15547_v3  ;;  %3783 = vmatprep.subr.bf16.mxu1 %v15550_v4 }
 0x387   : > { %3731 = vmatpush1.bf16.msra.mxu0 %v15545_v5  ;;  %3784 = vmatpush1.bf16.msra.mxu1 %v15548_v6 }
 0x388   : > { %3732 = vmatprep.subr.bf16.mxu0 %v15553_v7  ;;  %3785 = vmatprep.subr.bf16.mxu1 %v15556_v8 }
 0x38b   : > { %3733 = vmatpush1.bf16.msra.mxu0 %v15551_v9  ;;  %3786 = vmatpush1.bf16.msra.mxu1 %v15554_v10 }
 0x38c   : > { %3734 = vmatprep.subr.bf16.mxu0 %v15559_v11  ;;  %3787 = vmatprep.subr.bf16.mxu1 %v15562_v12 }
 0x38f   : > { %3735 = vmatpush2.bf16.msra.mxu0 %v15557_v13  ;;  %3788 = vmatpush2.bf16.msra.mxu1 %v15560_v14 }
 0x390   : > { %3736 = vmatprep.subr.bf16.mxu0 %v15565_v15  ;;  %3789 = vmatprep.subr.bf16.mxu1 %v15568_v16 }
 0x393   : > { %3737 = vmatpush2.bf16.msra.mxu0 %v15563_v17  ;;  %3790 = vmatpush2.bf16.msra.mxu1 %v15566_v18 }
 0x394   : > { %3738 = vmatprep.subr.bf16.mxu0 %v15571_v19  ;;  %3791 = vmatprep.subr.bf16.mxu1 %v15574_v20 }
 0x397   : > { %3739 = vmatpush2.bf16.msra.mxu0 %v15569_v21  ;;  %3792 = vmatpush2.bf16.msra.mxu1 %v15572_v22 }
 0x398   : > { %3740 = vmatprep.subr.bf16.mxu0 %v15577_v23  ;;  %3793 = vmatprep.subr.bf16.mxu1 %v15580_v26 }
 0x39b   : > { %3741 = vmatpush2.bf16.msra.mxu0 %v15575_v32  ;;  %3794 = vmatpush2.bf16.msra.mxu1 %v15578_v27 }
 0x39c   : > { %3742 = vmatprep.subr.bf16.mxu0 %v15583_v33  ;;  %3795 = vmatprep.subr.bf16.mxu1 %v15586_v36 }
 0x39f   : > { %3743 = vmatpush2.bf16.msra.mxu0 %v15581_v37  ;;  %3796 = vmatpush2.bf16.msra.mxu1 %v15584_v24 }
 0x3a0   : > { %3744 = vmatprep.subr.bf16.mxu0 %v15589_v28  ;;  %3797 = vmatprep.subr.bf16.mxu1 %v15592_v25 }
 0x3a3   : > { %3745 = vmatpush2.bf16.msra.mxu0 %v15587_v29  ;;  %3798 = vmatpush2.bf16.msra.mxu1 %v15590_v30 }
 0x3a4   : > { %3746 = vmatprep.subr.bf16.mxu0 %v15595_v31  ;;  %3799 = vmatprep.subr.bf16.mxu1 %v15598_v42 }
 0x3a7   : > { %3747 = vmatpush2.bf16.msra.mxu0 %v15593_v34  ;;  %3800 = vmatpush2.bf16.msra.mxu1 %v15596_v38 }
 0x3a8   : > { %3748 = vmatprep.subr.bf16.mxu0 %v15601_v35  ;;  %3801 = vmatprep.subr.bf16.mxu1 %v15604_v39 }
 0x3ab   : > { %3749 = vmatpush2.bf16.msra.mxu0 %v15599_v40  ;;  %3802 = vmatpush2.bf16.msra.mxu1 %v15602_v41 }
 0x3dc   : > { %v2700_v43 = vpop.f32.mrf.mxu0  ;;  %v2753_v44 = vpop.f32.mrf.mxu1 }
 0x3dd   : > { %v2754_v45 = vadd.f32 %v2753_v44, %v2700_v43 }
 0x3de   : > { %v2702_v46 = vpop.f32.mrf.mxu0  ;;  %v2755_v47 = vpop.f32.mrf.mxu1 }
 0x3df   : > { %v2756_v48 = vadd.f32 %v2755_v47, %v2702_v46 }
 0x3e0   : > { %v2704_v49 = vpop.f32.mrf.mxu0  ;;  %v2757_v50 = vpop.f32.mrf.mxu1 }
 0x3e1   : > { %v2758_v51 = vadd.f32 %v2757_v50, %v2704_v49 }
 0x3e2   : > { %v18578_v52 = vpop.f32.mrf.mxu0  ;;  %v18580_v53 = vpop.f32.mrf.mxu1 }
 0x3e4   : > { %v2710_v54 = vpop.f32.mrf.mxu0  ;;  %v2763_v55 = vpop.f32.mrf.mxu1 }
 0x3e5   : > { %v2764_v56 = vadd.f32 %v2763_v55, %v2710_v54 }
 0x3e6   : > { %v2712_v57 = vpop.f32.mrf.mxu0  ;;  %v2765_v58 = vpop.f32.mrf.mxu1 }
 0x3e7   : > { %v2766_v59 = vadd.f32 %v2765_v58, %v2712_v57 }
 0x3e8   : > { %v2714_v60 = vpop.f32.mrf.mxu0  ;;  %v2767_v61 = vpop.f32.mrf.mxu1 }
 0x3e9   : > { %v2768_v62 = vadd.f32 %v2767_v61, %v2714_v60  ;;  %v3832_v61 = vld [vmem:[#allocation4] sm:$0x3] }
 0x3ea   : > { %v18582_v63 = vpop.f32.mrf.mxu0  ;;  %v18584_v1 = vpop.f32.mrf.mxu1 }
 0x41c   : > { %v3126_v2 = vpop.f32.mrf.mxu0  ;;  %v3179_v3 = vpop.f32.mrf.mxu1 }
 0x41d   : > { %v3127_v4 = vadd.f32 %v3126_v2, %v2754_v45 }
 0x41e   : > { %v3128_v5 = vpop.f32.mrf.mxu0  ;;  %v3181_v6 = vpop.f32.mrf.mxu1 }
 0x41f   : > { %v18586_v7 = vadd.f32 %v3179_v3, %v3127_v4  ;;  %v3129_v8 = vadd.f32 %v3128_v5, %v2756_v48 }
 0x420   : > { %v3130_v9 = vpop.f32.mrf.mxu0  ;;  %v3183_v10 = vpop.f32.mrf.mxu1 }
 0x421   : > { %v18588_v11 = vadd.f32 %v3181_v6, %v3129_v8  ;;  %v3131_v12 = vadd.f32 %v3130_v9, %v2758_v51  ;;  %v2760_v6 = vadd.f32 %v18580_v53, %v18578_v52 }
 0x422   : > { %v18590_v13 = vpop.f32.mrf.mxu0  ;;  %v18592_v14 = vpop.f32.mrf.mxu1 }
 0x423   : > { %v18594_v15 = vadd.f32 %v3183_v10, %v3131_v12  ;;  %v3133_v12 = vadd.f32 %v18590_v13, %v2760_v6  ;;  %v15625_v6 = vld [vmem:[#allocation7 + $0x70] sm:$0xff]  }
 0x424   : > { %v3136_v16 = vpop.f32.mrf.mxu0  ;;  %v3189_v17 = vpop.f32.mrf.mxu1 }
 0x425   : > { %v3137_v18 = vadd.f32 %v3136_v16, %v2764_v56  ;;  %v3834_v56 = vlaneseq  ;;  %v3186_v52 = vadd.f32 %v18592_v14, %v3133_v12  ;;  %v15627_v12 = vld [vmem:[#allocation7 + $0x68] sm:$0xff]  }
 0x426   : > { %v3138_v19 = vpop.f32.mrf.mxu0  ;;  %v3191_v20 = vpop.f32.mrf.mxu1 }
 0x427   : > { %v18596_v21 = vadd.f32 %v3189_v17, %v3137_v18  ;;  %v3139_v22 = vadd.f32 %v3138_v19, %v2766_v59  ;;  %v18608_v57 = vshrl.u32 %v3834_v56, 7 }
 0x428   : > { %v3140_v23 = vpop.f32.mrf.mxu0  ;;  %v3193_v26 = vpop.f32.mrf.mxu1 }
 0x429   : > { %v18598_v32 = vadd.f32 %v3191_v20, %v3139_v22  ;;  %v3141_v27 = vadd.f32 %v3140_v23, %v2768_v62  ;;  %v18611_v58 = vsub.s32 0, %v18608_v57  ;;  %v2770_v20 = vadd.f32 %v18584_v1, %v18582_v63 }
 0x42a   : > { %v18600_v33 = vpop.f32.mrf.mxu0  ;;  %v18602_v36 = vpop.f32.mrf.mxu1  ;;  %v18624_v13 = vsub.s32 1, %v18608_v57 }
 0x42b   : > { %v18604_v37 = vadd.f32 %v3193_v26, %v3141_v27  ;;  %v3837_v5 = vrot.slane %v3832_v61, %v18611_v58  ;;  %v3143_v53 = vadd.f32 %v18600_v33, %v2770_v20  ;;  %v15614_v20 = vld [vmem:[#allocation7 + $0xa0] sm:$0xff]  }
 0x42d   : > { %v3253_v24 = vpop.f32.mrf.mxu0  ;;  %v3306_v28 = vpop.f32.mrf.mxu1  ;;  %v3196_v33 = vadd.f32 %v18602_v36, %v3143_v53  ;;  %v15633_v53 = vld [vmem:[#allocation7 + $0x50] sm:$0xff]  }
 0x42f   : > { %v3255_v25 = vpop.f32.mrf.mxu0  ;;  %v3308_v29 = vpop.f32.mrf.mxu1 }
 0x431   : > { %v3257_v30 = vpop.f32.mrf.mxu0  ;;  %v3310_v31 = vpop.f32.mrf.mxu1 }
 0x432   : > { %v3325_v39 = vpack.c.bf16 %v3257_v30, %v3253_v24  ;;  %v3327_v40 = vpack.c.bf16 %v3310_v31, %v3306_v28 }
 0x433   : > { %v3259_v42 = vpop.f32.mrf.mxu0  ;;  %v3312_v34 = vpop.f32.mrf.mxu1 }
 0x434   : > { %v3326_v38 = vpack.c.bf16 %v3259_v42, %v3255_v25  ;;  %v3328_v35 = vpack.c.bf16 %v3312_v34, %v3308_v29 }
 0x435   : > { %v3263_v41 = vpop.f32.mrf.mxu0  ;;  %v3316_v43 = vpop.f32.mrf.mxu1 }
 0x436   : > { %3750 = vmatprep.mubr.bf16.mxu0 %v3326_v38  ;;  %3803 = vmatprep.mubr.bf16.mxu1 %v3328_v35  ;;  %v3841_v35 = vrot.slane %v3832_v61, %v18624_v13  ;;  %v15623_v61 = vld [vmem:[#allocation7 + $0x78] sm:$0xff]  }
 0x437   : > { %v3265_v44 = vpop.f32.mrf.mxu0  ;;  %v3318_v45 = vpop.f32.mrf.mxu1  ;;  %3751 = vmatmul.mubr.bf16.vlgmr.msra.gmra.mxu0 %v3325_v39  ;;  %3804 = vmatmul.mubr.bf16.vlgmr.msra.gmra.mxu1 %v3327_v40 }
 0x439   : > { %v3267_v46 = vpop.f32.mrf.mxu0  ;;  %v3320_v47 = vpop.f32.mrf.mxu1 }
 0x43a   : > { %v3329_v54 = vpack.c.bf16 %v3267_v46, %v3263_v41  ;;  %v3331_v55 = vpack.c.bf16 %v3320_v47, %v3316_v43 }
 0x43b   : > { %v3269_v48 = vpop.f32.mrf.mxu0  ;;  %v3322_v49 = vpop.f32.mrf.mxu1 }
 0x43c   : > { %v3330_v50 = vpack.c.bf16 %v3269_v48, %v3265_v44  ;;  %v3332_v51 = vpack.c.bf16 %v3322_v49, %v3318_v45 }
 0x43e   : > { %3760 = vmatprep.mubr.bf16.mxu0 %v3330_v50  ;;  %3813 = vmatprep.mubr.bf16.mxu1 %v3332_v51 }
 0x43f   : > { %3761 = vmatmul.mubr.bf16.gmra.mxu0 %v3329_v54  ;;  %3814 = vmatmul.mubr.bf16.gmra.mxu1 %v3331_v55 }
 0x440   : > { %3907 = vmatprep.mubr.bf16.mxu0 %v17700_v0  ;;  %3995 = vmatprep.mubr.bf16.mxu1 %v17700_v0 }
 0x4f7   : > { %v3752_v59 = vpop.f32.mrf.mxu0  ;;  %v3805_v60 = vpop.f32.mrf.mxu1 }
 0x4f8   : > { %v3806_v62 = vadd.f32 %v3805_v60, %v3752_v59 }
 0x4f9   : > { %v3754_v2 = vpop.f32.mrf.mxu0  ;;  %v3807_v3 = vpop.f32.mrf.mxu1 }
 0x4fa   : > { %v3824_v4 = vadd.f32 %v3806_v62, %v18586_v7  ;;  %v3808_v24 = vadd.f32 %v3807_v3, %v3754_v2  ;;  %v15605_v62 = vld [vmem:[#allocation6] sm:$0xff]   ;;  %v15606_v2 = vld [vmem:[#allocation6 + $0x8] sm:$0xff]   ;;  %v15608_v3 = vld [vmem:[#allocation7 + $0xb8] sm:$0xff]  }
 0x4fb   : > { %v3756_v8 = vpop.f32.mrf.mxu0  ;;  %v3809_v9 = vpop.f32.mrf.mxu1 }
 0x4fc   : > { %v3810_v10 = vadd.f32 %v3809_v9, %v3756_v8  ;;  %v3844_v18 = vadd.f32 %v3837_v5, %v3824_v4  ;;  %v3825_v41 = vadd.f32 %v3808_v24, %v18588_v11  ;;  %v15624_v4 = vld [vmem:[#allocation7 + $0x38] sm:$0xff]   ;;  %v15610_v8 = vld [vmem:[#allocation7 + $0xb0] sm:$0xff]  }
 0x4fd   : > { %v3758_v16 = vpop.f32.mrf.mxu0  ;;  %v3811_v17 = vpop.f32.mrf.mxu1  ;;  %v15626_v9 = vld [vmem:[#allocation7 + $0x30] sm:$0xff]  }
 0x4fe   : > { %v3826_v19 = vadd.f32 %v3810_v10, %v18594_v15  ;;  %v3812_v26 = vadd.f32 %v3811_v17, %v3758_v16  ;;  %v3852_v29 = vmax.f32 %v3844_v18, 0.0  ;;  %v3845_v49 = vadd.f32 %v3841_v35, %v3825_v41  ;;  %v15611_v10 = vld [vmem:[#allocation7 + $0xe8] sm:$0xff]   ;;  %v15613_v18 = vld [vmem:[#allocation7 + $0xe0] sm:$0xff]   ;;  %v15618_v24 = vld [vmem:[#allocation7 + $0x90] sm:$0xff]  }
 0x4ff   : > { %v3762_v22 = vpop.f32.mrf.mxu0  ;;  %v3815_v7 = vpop.f32.mrf.mxu1  ;;  %v15612_v16 = vld [vmem:[#allocation7 + $0xa8] sm:$0xff]  }
 0x500   : > { %v3846_v23 = vadd.f32 %v3837_v5, %v3826_v19  ;;  %v3816_v27 = vadd.f32 %v3815_v7, %v3762_v22  ;;  %v3827_v34 = vadd.f32 %v3812_v26, %v3186_v52  ;;  %v3853_v59 = vmax.f32 %v3845_v49, 0.0  ;;  %v15628_v17 = vld [vmem:[#allocation7 + $0x28] sm:$0xff]   ;;  %v15629_v19 = vld [vmem:[#allocation7 + $0x60] sm:$0xff]   ;;  %v15615_v7 = vld [vmem:[#allocation7 + $0xd8] sm:$0xff]  }
 0x501   : > { %v3764_v28 = vpop.f32.mrf.mxu0  ;;  %v3817_v25 = vpop.f32.mrf.mxu1  ;;  %v15630_v22 = vld [vmem:[#allocation7 + $0x20] sm:$0xff]   ;;  %v15616_v26 = vld [vmem:[#allocation7 + $0x98] sm:$0xff]   ;;  %v15617_v52 = vld [vmem:[#allocation7 + $0xd0] sm:$0xff]  }
 0x502   : > { %v3854_v15 = vmax.f32 %v3846_v23, 0.0  ;;  %v3828_v30 = vadd.f32 %v3816_v27, %v18596_v21  ;;  %v3818_v63 = vadd.f32 %v3817_v25, %v3764_v28  ;;  %v3847_v45 = vadd.f32 %v3841_v35, %v3827_v34  ;;  %v15631_v23 = vld [vmem:[#allocation7 + $0x58] sm:$0xff]   ;;  %v15634_v28 = vld [vmem:[#allocation7 + $0x10] sm:$0xff]   ;;  %v15619_v25 = vld [vmem:[#allocation7 + $0xc8] sm:$0xff]  }
 0x503   : > { %v3766_v1 = vpop.f32.mrf.mxu0  ;;  %v3819_v31 = vpop.f32.mrf.mxu1  ;;  %v15632_v27 = vld [vmem:[#allocation7 + $0x18] sm:$0xff]   ;;  %v15638_v34 = vld [vmem:[#allocation7] sm:$0xff]   ;;  %v15642_v49 = vld [vmem:[#allocation7 + $0x170] sm:$0xff]  }
 0x504   : > { %v18627_v42 = vpack.c.bf16 %v3854_v15, %v3852_v29  ;;  %v3829_v14 = vadd.f32 %v3818_v63, %v18598_v32  ;;  %v3820_v38 = vadd.f32 %v3819_v31, %v3766_v1  ;;  %v3848_v43 = vadd.f32 %v3837_v5, %v3828_v30  ;;  %v15620_v29 = vld [vmem:[#allocation7 + $0x88] sm:$0xff]   ;;  %v15621_v15 = vld [vmem:[#allocation7 + $0xc0] sm:$0xff]  }
 0x505   : > { %v3768_v39 = vpop.f32.mrf.mxu0  ;;  %v3821_v40 = vpop.f32.mrf.mxu1  ;;  %v3855_v56 = vmax.f32 %v3847_v45, 0.0  ;;  %v15622_v30 = vld [vmem:[#allocation7 + $0x80] sm:$0xff]   ;;  %v15635_v63 = vld [vmem:[#allocation7 + $0x48] sm:$0xff]  }
 0x506   : > { %v3830_v21 = vadd.f32 %v3820_v38, %v18604_v37  ;;  %v3822_v44 = vadd.f32 %v3821_v40, %v3768_v39  ;;  %v3849_v46 = vadd.f32 %v3841_v35, %v3829_v14  ;;  %v3856_v50 = vmax.f32 %v3848_v43, 0.0  ;;  %v15607_v37 = vld [vmem:[#allocation7 + $0xf8] sm:$0xff]   ;;  %v15636_v1 = vld [vmem:[#allocation7 + $0x8] sm:$0xff]   ;;  %v15637_v31 = vld [vmem:[#allocation7 + $0x40] sm:$0xff]  }
 0x507   : > { %v18640_v11 = vpack.c.bf16 %v3855_v56, %v3853_v59  ;;  %v15640_v14 = vld [vmem:[#allocation7 + $0x178] sm:$0xff]   ;;  %v15647_v56 = vld [vmem:[#allocation7 + $0x120] sm:$0xff]  }
 0x508   : > { %v3850_v47 = vadd.f32 %v3837_v5, %v3830_v21  ;;  %v3831_v48 = vadd.f32 %v3822_v44, %v3196_v33  ;;  %v3857_v54 = vmax.f32 %v3849_v46, 0.0  ;;  %v15609_v5 = vld [vmem:[#allocation7 + $0xf0] sm:$0xff]   ;;  %v15649_v59 = vld [vmem:[#allocation7 + $0x118] sm:$0xff]  }
 0x50a   : > { %v3858_v32 = vmax.f32 %v3850_v47, 0.0  ;;  %v3851_v51 = vadd.f32 %v3841_v35, %v3831_v48  ;;  %v15641_v48 = vld [vmem:[#allocation7 + $0x138] sm:$0xff]  }
 0x50c   : > { %v18634_v36 = vpack.c.bf16 %v3858_v32, %v3856_v50  ;;  %v3859_v55 = vmax.f32 %v3851_v51, 0.0  ;;  %v15643_v50 = vld [vmem:[#allocation7 + $0x130] sm:$0xff]   ;;  %v15644_v32 = vld [vmem:[#allocation7 + $0x168] sm:$0xff]   ;;  %v15639_v51 = vld [vmem:[#allocation6 + $0x10] sm:$0xff]  }
 0x50e   : > { %v18636_v60 = vpack.c.bf16 %v3859_v55, %v3857_v54  ;;  %v15645_v54 = vld [vmem:[#allocation7 + $0x128] sm:$0xff]   ;;  %v15646_v55 = vld [vmem:[#allocation7 + $0x160] sm:$0xff]  }
 0x510   : > { %3887 = vmatprep.subr.bf16.mxu0 %v18636_v60  ;;  %3975 = vmatprep.subr.bf16.mxu1 %v18636_v60 }
 0x511   : > { %3888 = vmatpush1.bf16.msra.mxu0 %v18634_v36  ;;  %3976 = vmatpush1.bf16.msra.mxu1 %v18634_v36 }
 0x512   : > { %3889 = vmatprep.subr.bf16.mxu0 %v18640_v11  ;;  %3977 = vmatprep.subr.bf16.mxu1 %v18640_v11 }
 0x515   : > { %3890 = vmatpush1.bf16.msra.mxu0 %v18627_v42  ;;  %3978 = vmatpush1.bf16.msra.mxu1 %v18627_v42 }
 0x516   : > { %14316 = vmatprep.subr.bf16.mxu0 %v15607_v37  ;;  %14338 = vmatprep.subr.bf16.mxu1 %v15623_v61  ;;  %v15652_v37 = vld [vmem:[#allocation7 + $0x148] sm:$0xff]   ;;  %v15654_v61 = vld [vmem:[#allocation7 + $0x140] sm:$0xff]  }
 0x518   : > { %13396 = vmatmul.mubr.msk.bf16.vlgmr.msra.gmra.mxu0 %vm3871_vm1, %v15605_v62  ;;  %13398 = vmatmul.mubr.msk.bf16.vlgmr.msra.gmra.mxu1 %vm3871_vm1, %v15606_v2  ;;  %v15655_v62 = vld [vmem:[#allocation7 + $0x100] sm:$0xff]  }
 0x519   : > { %14317 = vmatpush3.bf16.msra.mxu0 %v15608_v3  ;;  %14339 = vmatpush3.bf16.msra.mxu1 %v15624_v4 }
 0x51a   : > { %14318 = vmatprep.subr.bf16.mxu0 %v15609_v5  ;;  %14340 = vmatprep.subr.bf16.mxu1 %v15625_v6 }
 0x51d   : > { %14319 = vmatpush3.bf16.msra.mxu0 %v15610_v8  ;;  %14341 = vmatpush3.bf16.msra.mxu1 %v15626_v9 }
 0x51e   : > { %14320 = vmatprep.subr.bf16.mxu0 %v15611_v10  ;;  %14342 = vmatprep.subr.bf16.mxu1 %v15627_v12 }
 0x521   : > { %14321 = vmatpush3.bf16.msra.mxu0 %v15612_v16  ;;  %14343 = vmatpush3.bf16.msra.mxu1 %v15628_v17 }
 0x522   : > { %14322 = vmatprep.subr.bf16.mxu0 %v15613_v18  ;;  %14344 = vmatprep.subr.bf16.mxu1 %v15629_v19  ;;  %v17701_v18 = vmov 0.0   ;;  %v15656_v19 = vld [vmem:[#allocation12 + $0x38] sm:$0xff]  }
 0x525   : > { %14323 = vmatpush3.bf16.msra.mxu0 %v15614_v20  ;;  %14345 = vmatpush3.bf16.msra.mxu1 %v15630_v22  ;;  %v15657_v20 = vld [vmem:[#allocation12 + $0x30] sm:$0xff]   ;;  %v15659_v22 = vld [vmem:[#allocation12 + $0x28] sm:$0xff]  }
 0x526   : > { %14324 = vmatprep.subr.bf16.mxu0 %v15615_v7  ;;  %14346 = vmatprep.subr.bf16.mxu1 %v15631_v23  ;;  %v15661_v7 = vld [vmem:[#allocation12 + $0x20] sm:$0xff]   ;;  %v15663_v23 = vld [vmem:[#allocation12 + $0x18] sm:$0xff]  }
 0x529   : > { %14325 = vmatpush3.bf16.msra.mxu0 %v15616_v26  ;;  %14347 = vmatpush3.bf16.msra.mxu1 %v15632_v27  ;;  %v15665_v26 = vld [vmem:[#allocation12 + $0x10] sm:$0xff]   ;;  %v15667_v27 = vld [vmem:[#allocation12 + $0x8] sm:$0xff]  }
 0x52a   : > { %14326 = vmatprep.subr.bf16.mxu0 %v15617_v52  ;;  %14348 = vmatprep.subr.bf16.mxu1 %v15633_v53 }
 0x52d   : > { %14327 = vmatpush3.bf16.msra.mxu0 %v15618_v24  ;;  %14349 = vmatpush3.bf16.msra.mxu1 %v15634_v28 }
 0x52e   : > { %14328 = vmatprep.subr.bf16.mxu0 %v15619_v25  ;;  %14350 = vmatprep.subr.bf16.mxu1 %v15635_v63 }
 0x531   : > { %14329 = vmatpush3.bf16.msra.mxu0 %v15620_v29  ;;  %14351 = vmatpush3.bf16.msra.mxu1 %v15636_v1 }
 0x532   : > { %14330 = vmatprep.subr.bf16.mxu0 %v15621_v15  ;;  %14352 = vmatprep.subr.bf16.mxu1 %v15637_v31 }
 0x535   : > { %14331 = vmatpush3.bf16.msra.mxu0 %v15622_v30  ;;  %14353 = vmatpush3.bf16.msra.mxu1 %v15638_v34 }
 0x536   : > { %4338 = vmatprep.subr.bf16.mxu0 %v18636_v60  ;;  %14360 = vmatprep.subr.bf16.mxu1 %v15640_v14  ;;  %v15650_v60 = vld [vmem:[#allocation7 + $0x150] sm:$0xff]  }
 0x5d8   : > { %v3909_v38 = vpop.f32.mrf.mxu0  ;;  %v3997_v33 = vpop.f32.mrf.mxu1 }
 0x5da   : > { %v3911_v35 = vpop.f32.mrf.mxu0  ;;  %v3999_v39 = vpop.f32.mrf.mxu1 }
 0x5dc   : > { %v3913_v40 = vpop.f32.mrf.mxu0  ;;  %v4001_v41 = vpop.f32.mrf.mxu1 }
 0x5dd   : > { %v3918_v43 = vpack.c.bf16 %v3913_v40, %v3909_v38  ;;  %v4006_v47 = vpack.c.bf16 %v4001_v41, %v3997_v33  ;;  %v13449_v38 = vld [vmem:[#allocation9] ss:$0 sm:$0xff] }
 0x5de   : > { %v3915_v21 = vpop.f32.mrf.mxu0  ;;  %v4003_v44 = vpop.f32.mrf.mxu1 }
 0x5df   : > { %v3919_v45 = vpack.c.bf16 %v3915_v21, %v3911_v35  ;;  %v4007_v46 = vpack.c.bf16 %v4003_v44, %v3999_v39 }
 0x5e1   : > { %4169 = vmatprep.mubr.bf16.mxu0 %v4007_v46  ;;  %4306 = vmatprep.mubr.bf16.mxu1 %v3919_v45  ;;  %v4555_v46 = vld [vmem:[#allocation10] sm:$0xf] }
 0x5e2   : > { %4170 = vmatmul.mubr.bf16.vlgmr.msra.gmra.mxu0 %v4006_v47  ;;  %4307 = vmatmul.mubr.bf16.vlgmr.msra.gmra.mxu1 %v3918_v43  ;;  %v4618_v47 = vld [vmem:[#allocation10 + $0x4] sm:$0xf] }
 0x5e3   : > { %4339 = vmatpush1.bf16.msra.mxu0 %v18634_v36  ;;  %4358 = vmatprep.mubr.bf16.mxu0 %v17700_v0  ;;  %v15648_v36 = vld [vmem:[#allocation7 + $0x158] sm:$0xff]  }
 0x5e4   : > { %4340 = vmatprep.subr.bf16.mxu0 %v18640_v11  ;;  %14361 = vmatpush3.bf16.msra.mxu1 %v15641_v48  ;;  %v15651_v11 = vld [vmem:[#allocation7 + $0x110] sm:$0xff]   ;;  %v15658_v48 = vld [vmem:[#allocation12 + $0x78] sm:$0xff]  }
 0x5e5   : > { %14362 = vmatprep.subr.bf16.mxu1 %v15642_v49  ;;  %v15660_v49 = vld [vmem:[#allocation12 + $0x70] sm:$0xff]  }
 0x5e7   : > { %4341 = vmatpush1.bf16.msra.mxu0 %v18627_v42  ;;  %v15653_v42 = vld [vmem:[#allocation7 + $0x108] sm:$0xff]  }
 0x5e8   : > { %14363 = vmatpush3.bf16.msra.mxu1 %v15643_v50  ;;  %14560 = vmatprep.subr.bf16.mxu0 %v17701_v18  ;;  %v15662_v50 = vld [vmem:[#allocation12 + $0x68] sm:$0xff]  }
 0x5e9   : > { %14364 = vmatprep.subr.bf16.mxu1 %v15644_v32  ;;  %v15664_v32 = vld [vmem:[#allocation12 + $0x60] sm:$0xff]  }
 0x5ea   : > { %13432 = vmatmul.mubr.msk.bf16.vlgmr.msra.gmra.mxu0 %vm3871_vm1, %v15639_v51  ;;  %v15666_v51 = vld [vmem:[#allocation12 + $0x58] sm:$0xff]  }
 0x5eb   : > { %14562 = vmatprep.mubr.msk.bf16.mxu0 %vm17702_vm2, %v17701_v18 }
 0x5ec   : > { %14365 = vmatpush3.bf16.msra.mxu1 %v15645_v54  ;;  %v15668_v54 = vld [vmem:[#allocation12 + $0x50] sm:$0xff]  }
 0x5ed   : > { %14366 = vmatprep.subr.bf16.mxu1 %v15646_v55  ;;  %v15669_v55 = vld [vmem:[#allocation12] sm:$0xff]  }
 0x5f0   : > { %14367 = vmatpush3.bf16.msra.mxu1 %v15647_v56  ;;  %v15670_v56 = vld [vmem:[#allocation12 + $0x48] sm:$0xff]  }
 0x5f1   : > { %14368 = vmatprep.subr.bf16.mxu1 %v15648_v36  ;;  %v15671_v36 = vld [vmem:[#allocation12 + $0x40] sm:$0xff]  }
 0x5f4   : > { %14369 = vmatpush3.bf16.msra.mxu1 %v15649_v59 }
 0x5f5   : > { %14370 = vmatprep.subr.bf16.mxu1 %v15650_v60 }
 0x5f8   : > { %14371 = vmatpush3.bf16.msra.mxu1 %v15651_v11 }
 0x5f9   : > { %14372 = vmatprep.subr.bf16.mxu1 %v15652_v37 }
 0x5fc   : > { %14373 = vmatpush3.bf16.msra.mxu1 %v15653_v42 }
 0x5fd   : > { %14374 = vmatprep.subr.bf16.mxu1 %v15654_v61 }
 0x600   : > { %14375 = vmatpush3.bf16.msra.mxu1 %v15655_v62 }
 0x601   : > { %14592 = vmatprep.subr.bf16.mxu1 %v17701_v18 }
 0x6a2   : > { %v14332_v2 = vpop.f32.mrf.mxu0  ;;  %v14354_v52 = vpop.f32.mrf.mxu1 }
 0x6a4   : > { %v14333_v3 = vpop.f32.mrf.mxu0  ;;  %v14355_v53 = vpop.f32.mrf.mxu1 }
 0x6a5   : > { %v14334_v4 = vadd.f32 %v14333_v3, %v14332_v2  ;;  %v14356_v25 = vadd.f32 %v14355_v53, %v14354_v52 }
 0x6a6   : > { %v14335_v5 = vpop.f32.mrf.mxu0  ;;  %v14357_v24 = vpop.f32.mrf.mxu1 }
 0x6a7   : > { %v4309_v30 = vadd.f32 %v14356_v25, %v14334_v4 }
 0x6a8   : > { %v14336_v6 = vpop.f32.mrf.mxu0  ;;  %v14358_v28 = vpop.f32.mrf.mxu1 }
 0x6a9   : > { %v14337_v63 = vadd.f32 %v14336_v6, %v14335_v5  ;;  %v14359_v1 = vadd.f32 %v14358_v28, %v14357_v24  ;;  %v4857_v5 = vld [vmem:[#allocation10 + $0x8] sm:$0xf] }
 0x6aa   : > { %v4360_v8 = vpop.f32.mrf.mxu0  ;;  %v15672_v6 = vld [vmem:[#allocation12 + $0xb8] sm:$0xff]  }
 0x6ab   : > { %v4312_v35 = vadd.f32 %v14359_v1, %v14337_v63  ;;  %v15680_v63 = vld [vmem:[#allocation16 + $0x38] sm:$0xff]   ;;  %v15681_v1 = vld [vmem:[#allocation16 + $0x30] sm:$0xff]  }
 0x6ac   : > { %v4362_v9 = vpop.f32.mrf.mxu0 }
 0x6ae   : > { %v4364_v10 = vpop.f32.mrf.mxu0 }
 0x6af   : > { %v4369_v17 = vpack.c.bf16 %v4364_v10, %v4360_v8  ;;  %v15673_v8 = vld [vmem:[#allocation12 + $0xb0] sm:$0xff]   ;;  %v15675_v10 = vld [vmem:[#allocation12 + $0xa0] sm:$0xff]  }
 0x6b0   : > { %v4366_v12 = vpop.f32.mrf.mxu0 }
 0x6b1   : > { %v4370_v16 = vpack.c.bf16 %v4366_v12, %v4362_v9  ;;  %v15674_v9 = vld [vmem:[#allocation12 + $0xa8] sm:$0xff]   ;;  %v15676_v12 = vld [vmem:[#allocation12 + $0x98] sm:$0xff]  }
 0x6b3   : > { %4532 = vmatprep.mubr.bf16.mxu1 %v4370_v16  ;;  %v15677_v16 = vld [vmem:[#allocation12 + $0x90] sm:$0xff]  }
 0x6b4   : > { %4533 = vmatmul.mubr.bf16.vlgmr.msra.gmra.mxu1 %v4369_v17  ;;  %v15678_v17 = vld [vmem:[#allocation12 + $0x88] sm:$0xff]  }
 0x6b5   : > { %14608 = vmatprep.mubr.msk.bf16.mxu1 %vm17702_vm2, %v17701_v18  ;;  %14593 = vmatpush3.bf16.msra.mxu1 %v15656_v19  ;;  %v15679_v19 = vld [vmem:[#allocation12 + $0x80] sm:$0xff]  }
 0x6b6   : > { %14594 = vmatprep.subr.bf16.mxu1 %v17701_v18 }
 0x6b9   : > { %14595 = vmatpush3.bf16.msra.mxu1 %v15657_v20 }
 0x6ba   : > { %14596 = vmatprep.subr.bf16.mxu1 %v17701_v18 }
 0x6bd   : > { %14597 = vmatpush3.bf16.msra.mxu1 %v15659_v22 }
 0x6be   : > { %14598 = vmatprep.subr.bf16.mxu1 %v17701_v18 }
 0x6c1   : > { %14599 = vmatpush3.bf16.msra.mxu1 %v15661_v7 }
 0x6c2   : > { %14600 = vmatprep.subr.bf16.mxu1 %v17701_v18 }
 0x6c5   : > { %14601 = vmatpush3.bf16.msra.mxu1 %v15663_v23 }
 0x6c6   : > { %14602 = vmatprep.subr.bf16.mxu1 %v17701_v18 }
 0x6c9   : > { %14603 = vmatpush3.bf16.msra.mxu1 %v15665_v26 }
 0x6ca   : > { %14604 = vmatprep.subr.bf16.mxu1 %v17701_v18 }
 0x6cd   : > { %14605 = vmatpush3.bf16.msra.mxu1 %v15667_v27 }
 0x6ce   : > { %14606 = vmatprep.subr.bf16.mxu1 %v17701_v18 }
 0x6d1   : > { %14607 = vmatpush3.bf16.msra.mxu1 %v15669_v55  ;;  %v15688_v55 = vld [vmem:[#allocation16 + $0x60] sm:$0xff]  }
 0x6d2   : > { %14638 = vmatprep.subr.bf16.mxu1 %v17701_v18 }
 0x774   : > { %v14376_v29 = vpop.f32.mrf.mxu1 }
 0x776   : > { %v14377_v15 = vpop.f32.mrf.mxu1 }
 0x777   : > { %v14378_v31 = vadd.f32 %v14377_v15, %v14376_v29 }
 0x778   : > { %v14379_v34 = vpop.f32.mrf.mxu1 }
 0x779   : > { %v4541_v14 = vadd.f32 %v14378_v31, %v4309_v30  ;;  %v15683_v31 = vld [vmem:[#allocation16 + $0x28] sm:$0xff]  }
 0x77a   : > { %v14380_v33 = vpop.f32.mrf.mxu1 }
 0x77b   : > { %v14381_v39 = vadd.f32 %v14380_v33, %v14379_v34  ;;  %v4550_v40 = vadd.f32 %v13449_v38, %v4541_v14  ;;  %v15685_v34 = vld [vmem:[#allocation16 + $0x20] sm:$0xff]   ;;  %v15687_v14 = vld [vmem:[#allocation16 + $0x18] sm:$0xff]   ;;  %v15691_v33 = vld [vmem:[#allocation16 + $0x8] sm:$0xff]  }
 0x77d   : > { %v4542_v41 = vadd.f32 %v14381_v39, %v4312_v35  ;;  %v4552_v21 = vmax.f32 %v4550_v40, 0.0  ;;  %v13477_v39 = vld [vmem:[#allocation13] ss:$0 sm:$0xff] }
 0x77f   : > { %v4551_v43 = vadd.f32 %v13449_v38, %v4542_v41  ;;  %v15689_v38 = vld [vmem:[#allocation16 + $0x10] sm:$0xff]  }
 0x781   : > { %v4553_v44 = vmax.f32 %v4551_v43, 0.0 }
 0x783   : > { %v18669_v45 = vpack.c.bf16 %v4553_v44, %v4552_v21 }
 0x785   : > { %14561 = vmatpush3.bf16.msra.mxu0 %v18669_v45 }
 0x786   : > { %14566 = vmatprep.subr.bf16.mxu0 %v17701_v18 }
 0x788   : > { %14563 = vmatmul.mubr.msk.bf16.vlgmr.msra.gmra.mxu0 %vm4556_vm3, %v4555_v46 }
 0x789   : > { %14567 = vmatpush3.bf16.msra.mxu0 %v18669_v45  ;;  %14568 = vmatprep.mubr.msk.bf16.mxu0 %vm17702_vm2, %v17701_v18 }
 0x78a   : > { %14572 = vmatprep.subr.bf16.mxu0 %v17701_v18 }
 0x790   : > { %14569 = vmatmul.mubr.msk.bf16.vlgmr.msra.gmra.mxu0 %vm4556_vm3, %v4618_v47 }
 0x791   : > { %14573 = vmatpush3.bf16.msra.mxu0 %v15658_v48  ;;  %14588 = vmatprep.mubr.msk.bf16.mxu0 %vm17702_vm2, %v17701_v18 }
 0x792   : > { %14574 = vmatprep.subr.bf16.mxu0 %v17701_v18 }
 0x795   : > { %14575 = vmatpush3.bf16.msra.mxu0 %v15660_v49  ;;  %v5018_v49 = vld [vmem:[#allocation15] sm:$0x3] }
 0x796   : > { %14576 = vmatprep.subr.bf16.mxu0 %v17701_v18 }
 0x799   : > { %14577 = vmatpush3.bf16.msra.mxu0 %v15662_v50  ;;  %v5085_v50 = vld [vmem:[#allocation15 + $0x2] sm:$0x3] }
 0x79a   : > { %14578 = vmatprep.subr.bf16.mxu0 %v17701_v18 }
 0x79d   : > { %14579 = vmatpush3.bf16.msra.mxu0 %v15664_v32  ;;  %v15682_v32 = vld [vmem:[#allocation16 + $0x78] sm:$0xff]  }
 0x79e   : > { %14580 = vmatprep.subr.bf16.mxu0 %v17701_v18 }
 0x7a1   : > { %14581 = vmatpush3.bf16.msra.mxu0 %v15666_v51  ;;  %v15684_v51 = vld [vmem:[#allocation16 + $0x70] sm:$0xff]  }
 0x7a2   : > { %14582 = vmatprep.subr.bf16.mxu0 %v17701_v18 }
 0x7a5   : > { %14583 = vmatpush3.bf16.msra.mxu0 %v15668_v54  ;;  %v15686_v54 = vld [vmem:[#allocation16 + $0x68] sm:$0xff]  }
 0x7a6   : > { %14584 = vmatprep.subr.bf16.mxu0 %v17701_v18 }
 0x7a9   : > { %14585 = vmatpush3.bf16.msra.mxu0 %v15670_v56  ;;  %v15690_v56 = vld [vmem:[#allocation16 + $0x58] sm:$0xff]  }
 0x7aa   : > { %14586 = vmatprep.subr.bf16.mxu0 %v17701_v18 }
 0x7ad   : > { %14587 = vmatpush3.bf16.msra.mxu0 %v15671_v36  ;;  %v15692_v36 = vld [vmem:[#allocation16 + $0x50] sm:$0xff]  }
 0x7ae   : > { %14612 = vmatprep.subr.bf16.mxu0 %v17701_v18 }
 0x848   : > { %v4594_v59 = vpop.f32.mrf.mxu0 }
 0x849   : > { %v4600_v60 = vpack.c.bf16 %v4594_v59, %v4594_v59  ;;  %v15693_v59 = vld [vmem:[#allocation16] sm:$0xff]  }
 0x84a   : > { %v14564_v11 = vpop.f32.mrf.mxu0 }
 0x84b   : > { %14609 = vmatmul.mubr.bf16.vlgmr.msra.gmra.mxu1 %v4600_v60  ;;  %v15694_v60 = vld [vmem:[#allocation16 + $0x48] sm:$0xff]   ;;  %v15695_v11 = vld [vmem:[#allocation16 + $0x40] sm:$0xff]  }
 0x84c   : > { %v4597_v37 = vpop.f32.mrf.mxu0  ;;  %14640 = vmatprep.mubr.msk.bf16.mxu1 %vm17702_vm2, %v17701_v18 }
 0x84e   : > { %v14565_v42 = vpop.f32.mrf.mxu0 }
 0x850   : > { %v4656_v61 = vpop.f32.mrf.mxu0 }
 0x851   : > { %v4662_v62 = vpack.c.bf16 %v4656_v61, %v4656_v61 }
 0x852   : > { %v14570_v2 = vpop.f32.mrf.mxu0 }
 0x853   : > { %14589 = vmatmul.mubr.bf16.vlgmr.msra.gmra.mxu0 %v4662_v62 }
 0x854   : > { %14613 = vmatpush3.bf16.msra.mxu0 %v18669_v45  ;;  %v4659_v3 = vpop.f32.mrf.mxu0  ;;  %14614 = vmatprep.mubr.msk.bf16.mxu0 %vm17702_vm2, %v17701_v18 }
 0x855   : > { %14618 = vmatprep.subr.bf16.mxu0 %v17701_v18 }
 0x856   : > { %v14571_v4 = vpop.f32.mrf.mxu0 }
 0x85b   : > { %14615 = vmatmul.mubr.msk.bf16.vlgmr.msra.gmra.mxu0 %vm4556_vm3, %v4857_v5 }
 0x85c   : > { %14619 = vmatpush3.bf16.msra.mxu0 %v15672_v6  ;;  %14634 = vmatprep.mubr.msk.bf16.mxu0 %vm17702_vm2, %v17701_v18 }
 0x85d   : > { %14620 = vmatprep.subr.bf16.mxu0 %v17701_v18 }
 0x860   : > { %14621 = vmatpush3.bf16.msra.mxu0 %v15673_v8 }
 0x861   : > { %14622 = vmatprep.subr.bf16.mxu0 %v17701_v18 }
 0x864   : > { %14623 = vmatpush3.bf16.msra.mxu0 %v15674_v9  ;;  %v5324_v9 = vld [vmem:[#allocation15 + $0x4] sm:$0x3] }
 0x865   : > { %14624 = vmatprep.subr.bf16.mxu0 %v17701_v18 }
 0x868   : > { %14625 = vmatpush3.bf16.msra.mxu0 %v15675_v10  ;;  %v15696_v10 = vld [vmem:[#allocation16 + $0xb8] sm:$0xff]  }
 0x869   : > { %14626 = vmatprep.subr.bf16.mxu0 %v17701_v18 }
 0x86c   : > { %14627 = vmatpush3.bf16.msra.mxu0 %v15676_v12  ;;  %v15697_v12 = vld [vmem:[#allocation16 + $0xb0] sm:$0xff]  }
 0x86d   : > { %14628 = vmatprep.subr.bf16.mxu0 %v17701_v18 }
 0x870   : > { %14629 = vmatpush3.bf16.msra.mxu0 %v15677_v16  ;;  %v15698_v16 = vld [vmem:[#allocation16 + $0xa8] sm:$0xff]  }
 0x871   : > { %14630 = vmatprep.subr.bf16.mxu0 %v17701_v18 }
 0x874   : > { %14631 = vmatpush3.bf16.msra.mxu0 %v15678_v17  ;;  %v15699_v17 = vld [vmem:[#allocation16 + $0xa0] sm:$0xff]  }
 0x875   : > { %14632 = vmatprep.subr.bf16.mxu0 %v17701_v18 }
 0x878   : > { %14633 = vmatpush3.bf16.msra.mxu0 %v15679_v19  ;;  %v15700_v19 = vld [vmem:[#allocation16 + $0x98] sm:$0xff]  }
 0x879   : > { %14670 = vmatprep.subr.bf16.mxu0 %v17701_v18 }
 0x90b   : > { %v4850_v20 = vpop.f32.mrf.mxu1 }
 0x90d   : > { %v14610_v22 = vpop.f32.mrf.mxu1 }
 0x90e   : > { %v15702_v22 = vld [vmem:[#allocation16 + $0x88] sm:$0xff]  }
 0x90f   : > { %v4853_v7 = vpop.f32.mrf.mxu1 }
 0x910   : > { %v15703_v7 = vld [vmem:[#allocation16 + $0x80] sm:$0xff]  }
 0x911   : > { %v14611_v23 = vpop.f32.mrf.mxu1 }
 0x913   : > { %v4762_v26 = vpop.f32.mrf.mxu0 }
 0x914   : > { %v4851_v27 = vadd.f32 %v4850_v20, %v4762_v26  ;;  %v15701_v20 = vld [vmem:[#allocation16 + $0x90] sm:$0xff]  }
 0x915   : > { %v14590_v52 = vpop.f32.mrf.mxu0 }
 0x917   : > { %v4765_v53 = vpop.f32.mrf.mxu0 }
 0x919   : > { %v14591_v24 = vpop.f32.mrf.mxu0 }
 0x91b   : > { %v4895_v28 = vpop.f32.mrf.mxu0 }
 0x91c   : > { %v4901_v25 = vpack.c.bf16 %v4895_v28, %v4895_v28 }
 0x91d   : > { %v14616_v29 = vpop.f32.mrf.mxu0 }
 0x91e   : > { %14635 = vmatmul.mubr.bf16.vlgmr.msra.gmra.mxu0 %v4901_v25 }
 0x91f   : > { %v4898_v15 = vpop.f32.mrf.mxu0  ;;  %14686 = vmatprep.mubr.msk.bf16.mxu0 %vm17702_vm2, %v17701_v18  ;;  %14671 = vmatpush3.bf16.msra.mxu0 %v15680_v63 }
 0x920   : > { %14672 = vmatprep.subr.bf16.mxu0 %v17701_v18 }
 0x921   : > { %v14617_v30 = vpop.f32.mrf.mxu0 }
 0x923   : > { %14673 = vmatpush3.bf16.msra.mxu0 %v15681_v1 }
 0x924   : > { %14674 = vmatprep.subr.bf16.mxu0 %v17701_v18 }
 0x927   : > { %14675 = vmatpush3.bf16.msra.mxu0 %v15683_v31 }
 0x928   : > { %14676 = vmatprep.subr.bf16.mxu0 %v17701_v18 }
 0x92b   : > { %14677 = vmatpush3.bf16.msra.mxu0 %v15685_v34  ;;  %v15704_v34 = vld [vmem:[#allocation21 + $0x38] sm:$0xff]  }
 0x92c   : > { %14678 = vmatprep.subr.bf16.mxu0 %v17701_v18 }
 0x92f   : > { %14679 = vmatpush3.bf16.msra.mxu0 %v15687_v14  ;;  %v15705_v14 = vld [vmem:[#allocation21 + $0x30] sm:$0xff]  }
 0x930   : > { %14680 = vmatprep.subr.bf16.mxu0 %v17701_v18 }
 0x933   : > { %14681 = vmatpush3.bf16.msra.mxu0 %v15689_v38  ;;  %v15707_v38 = vld [vmem:[#allocation21 + $0x28] sm:$0xff]  }
 0x934   : > { %14682 = vmatprep.subr.bf16.mxu0 %v17701_v18 }
 0x937   : > { %14683 = vmatpush3.bf16.msra.mxu0 %v15691_v33  ;;  %v15709_v33 = vld [vmem:[#allocation21 + $0x20] sm:$0xff]  }
 0x938   : > { %14684 = vmatprep.subr.bf16.mxu0 %v17701_v18 }
 0x93b   : > { %14685 = vmatpush3.bf16.msra.mxu0 %v15693_v59  ;;  %v15708_v59 = vld [vmem:[#allocation21 + $0x70] sm:$0xff]  }
 0x93c   : > { %14716 = vmatprep.subr.bf16.mxu0 %v17701_v18 }
 0x9de   : > { %v5001_v35 = vpop.f32.mrf.mxu0 }
 0x9df   : > { %v5007_v40 = vadd.f32 %v5001_v35, %v4851_v27  ;;  %v15711_v35 = vld [vmem:[#allocation21 + $0x18] sm:$0xff]  }
 0x9e0   : > { %v14636_v41 = vpop.f32.mrf.mxu0 }
 0x9e1   : > { %v5015_v43 = vadd.f32 %v13477_v39, %v5007_v40  ;;  %v15713_v39 = vld [vmem:[#allocation21 + $0x10] sm:$0xff]   ;;  %v15715_v40 = vld [vmem:[#allocation21 + $0x8] sm:$0xff]   ;;  %v15717_v41 = vld [vmem:[#allocation21] sm:$0xff]  }
 0x9e2   : > { %v5004_v21 = vpop.f32.mrf.mxu0 }
 0x9e3   : > { %v5016_v44 = vmax.f32 %v5015_v43, 0.0  ;;  %v13505_v21 = vld [vmem:[#allocation18] ss:$0 sm:$0xff] }
 0x9e4   : > { %v14637_v46 = vpop.f32.mrf.mxu0 }
 0x9e5   : > { %v18716_v47 = vpack.c.bf16 %v5016_v44, %v5016_v44 }
 0x9e7   : > { %v5025_v48 = vsel %vm5023_vm4, %v18716_v47, 0 }
 0x9e8   : > { %14639 = vmatpush3.bf16.msra.mxu1 %v5025_v48 }
 0x9e9   : > { %14644 = vmatprep.subr.bf16.mxu1 %v17701_v18 }
 0x9eb   : > { %14641 = vmatmul.mubr.msk.bf16.vlgmr.msra.gmra.mxu1 %vm5019_vm5, %v5018_v49 }
 0x9ec   : > { %14645 = vmatpush3.bf16.msra.mxu1 %v5025_v48  ;;  %14646 = vmatprep.mubr.msk.bf16.mxu1 %vm17702_vm2, %v17701_v18 }
 0x9ed   : > { %14650 = vmatprep.subr.bf16.mxu1 %v17701_v18 }
 0x9f3   : > { %14647 = vmatmul.mubr.msk.bf16.vlgmr.msra.gmra.mxu1 %vm5019_vm5, %v5085_v50 }
 0x9f4   : > { %14651 = vmatpush3.bf16.msra.mxu1 %v15682_v32  ;;  %14666 = vmatprep.mubr.msk.bf16.mxu1 %vm17702_vm2, %v17701_v18 }
 0x9f5   : > { %14652 = vmatprep.subr.bf16.mxu1 %v17701_v18 }
 0x9f8   : > { %14653 = vmatpush3.bf16.msra.mxu1 %v15684_v51 }
 0x9f9   : > { %14654 = vmatprep.subr.bf16.mxu1 %v17701_v18 }
 0x9fc   : > { %14655 = vmatpush3.bf16.msra.mxu1 %v15686_v54 }
 0x9fd   : > { %14656 = vmatprep.subr.bf16.mxu1 %v17701_v18 }
 0xa00   : > { %14657 = vmatpush3.bf16.msra.mxu1 %v15688_v55  ;;  %v5485_v55 = vld [vmem:[#allocation19] sm:$0x1] }
 0xa01   : > { %14658 = vmatprep.subr.bf16.mxu1 %v17701_v18 }
 0xa04   : > { %14659 = vmatpush3.bf16.msra.mxu1 %v15690_v56  ;;  %v5552_v56 = vld [vmem:[#allocation19 + $0x1] sm:$0x1] }
 0xa05   : > { %14660 = vmatprep.subr.bf16.mxu1 %v17701_v18 }
 0xa08   : > { %14661 = vmatpush3.bf16.msra.mxu1 %v15692_v36  ;;  %v15706_v36 = vld [vmem:[#allocation21 + $0x78] sm:$0xff]  }
 0xa09   : > { %14662 = vmatprep.subr.bf16.mxu1 %v17701_v18 }
 0xa0c   : > { %14663 = vmatpush3.bf16.msra.mxu1 %v15694_v60  ;;  %v15710_v60 = vld [vmem:[#allocation21 + $0x68] sm:$0xff]  }
 0xa0d   : > { %14664 = vmatprep.subr.bf16.mxu1 %v17701_v18 }
 0xa10   : > { %14665 = vmatpush3.bf16.msra.mxu1 %v15695_v11  ;;  %v15712_v11 = vld [vmem:[#allocation21 + $0x60] sm:$0xff]  }
 0xa11   : > { %14690 = vmatprep.subr.bf16.mxu1 %v17701_v18 }
 0xaab   : > { %v5061_v37 = vpop.f32.mrf.mxu1 }
 0xaac   : > { %v5067_v42 = vpack.c.bf16 %v5061_v37, %v5061_v37  ;;  %v15714_v37 = vld [vmem:[#allocation21 + $0x58] sm:$0xff]  }
 0xaad   : > { %v14642_v61 = vpop.f32.mrf.mxu1 }
 0xaae   : > { %14687 = vmatmul.mubr.bf16.vlgmr.msra.gmra.mxu0 %v5067_v42  ;;  %v15716_v42 = vld [vmem:[#allocation21 + $0x50] sm:$0xff]  }
 0xaaf   : > { %v5064_v62 = vpop.f32.mrf.mxu1  ;;  %14718 = vmatprep.mubr.msk.bf16.mxu0 %vm17702_vm2, %v17701_v18  ;;  %v15720_v61 = vld [vmem:[#allocation24 + $0xe4] ss:$16 sps:$4 sm:$0xff]  }
 0xab0   : > { %v15721_v62 = vld [vmem:[#allocation21 + $0x48] sm:$0xff]  }
 0xab1   : > { %v14643_v2 = vpop.f32.mrf.mxu1 }
 0xab2   : > { %v15725_v2 = vld [vmem:[#allocation21 + $0x40] sm:$0xff]  }
 0xab3   : > { %v5123_v3 = vpop.f32.mrf.mxu1 }
 0xab4   : > { %v5129_v4 = vpack.c.bf16 %v5123_v3, %v5123_v3 }
 0xab5   : > { %v14648_v5 = vpop.f32.mrf.mxu1 }
 0xab6   : > { %14667 = vmatmul.mubr.bf16.vlgmr.msra.gmra.mxu1 %v5129_v4  ;;  %v15718_v4 = vld [vmem:[#allocation24 + $0xe0] ss:$16 sps:$4 sm:$0xff]  }
 0xab7   : > { %14691 = vmatpush3.bf16.msra.mxu1 %v5025_v48  ;;  %v5126_v6 = vpop.f32.mrf.mxu1  ;;  %14692 = vmatprep.mubr.msk.bf16.mxu1 %vm17702_vm2, %v17701_v18 }
 0xab8   : > { %14696 = vmatprep.subr.bf16.mxu1 %v17701_v18  ;;  %v15724_v6 = vld [vmem:[#allocation24 + $0xc4] ss:$16 sps:$4 sm:$0xff]  }
 0xab9   : > { %v14649_v8 = vpop.f32.mrf.mxu1 }
 0xabe   : > { %14693 = vmatmul.mubr.msk.bf16.vlgmr.msra.gmra.mxu1 %vm5019_vm5, %v5324_v9 }
 0xabf   : > { %14697 = vmatpush3.bf16.msra.mxu1 %v15696_v10  ;;  %14712 = vmatprep.mubr.msk.bf16.mxu1 %vm17702_vm2, %v17701_v18  ;;  %v15722_v10 = vld [vmem:[#allocation24 + $0xc0] ss:$16 sps:$4 sm:$0xff]  }
 0xac0   : > { %14698 = vmatprep.subr.bf16.mxu1 %v17701_v18 }
 0xac3   : > { %14699 = vmatpush3.bf16.msra.mxu1 %v15697_v12  ;;  %v15728_v12 = vld [vmem:[#allocation24 + $0xa4] ss:$16 sps:$4 sm:$0xff]  }
 0xac4   : > { %14700 = vmatprep.subr.bf16.mxu1 %v17701_v18 }
 0xac7   : > { %14701 = vmatpush3.bf16.msra.mxu1 %v15698_v16 }
 0xac8   : > { %14702 = vmatprep.subr.bf16.mxu1 %v17701_v18 }
 0xacb   : > { %14703 = vmatpush3.bf16.msra.mxu1 %v15699_v17 }
 0xacc   : > { %14704 = vmatprep.subr.bf16.mxu1 %v17701_v18 }
 0xacf   : > { %14705 = vmatpush3.bf16.msra.mxu1 %v15700_v19  ;;  %v15726_v19 = vld [vmem:[#allocation24 + $0xa0] ss:$16 sps:$4 sm:$0xff]  }
 0xad0   : > { %14706 = vmatprep.subr.bf16.mxu1 %v17701_v18 }
 0xad3   : > { %14707 = vmatpush3.bf16.msra.mxu1 %v15701_v20 }
 0xad4   : > { %14708 = vmatprep.subr.bf16.mxu1 %v17701_v18 }
 0xad7   : > { %14709 = vmatpush3.bf16.msra.mxu1 %v15702_v22  ;;  %v15731_v22 = vld [vmem:[#allocation24 + $0x84] ss:$16 sps:$4 sm:$0xff]  }
 0xad8   : > { %14710 = vmatprep.subr.bf16.mxu1 %v17701_v18 }
 0xadb   : > { %14711 = vmatpush3.bf16.msra.mxu1 %v15703_v7 }
 0xadc   : > { %14748 = vmatprep.subr.bf16.mxu1 %v17701_v18 }
 0xb6e   : > { %v5317_v23 = vpop.f32.mrf.mxu0 }
 0xb70   : > { %v14688_v26 = vpop.f32.mrf.mxu0 }
 0xb71   : > { %v15729_v26 = vld [vmem:[#allocation24 + $0x80] ss:$16 sps:$4 sm:$0xff]  }
 0xb72   : > { %v5320_v27 = vpop.f32.mrf.mxu0 }
 0xb73   : > { %v15734_v27 = vld [vmem:[#allocation24 + $0x64] ss:$16 sps:$4 sm:$0xff]  }
 0xb74   : > { %v14689_v52 = vpop.f32.mrf.mxu0 }
 0xb76   : > { %v5229_v53 = vpop.f32.mrf.mxu1 }
 0xb77   : > { %v5318_v24 = vadd.f32 %v5317_v23, %v5229_v53  ;;  %v15732_v53 = vld [vmem:[#allocation24 + $0x60] ss:$16 sps:$4 sm:$0xff]  }
 0xb78   : > { %v14668_v28 = vpop.f32.mrf.mxu1 }
 0xb79   : > { %v15768_v28 = vld [vmem:[#allocation21 + $0xb8] sm:$0xff]  }
 0xb7a   : > { %v5232_v25 = vpop.f32.mrf.mxu1 }
 0xb7b   : > { %v15737_v25 = vld [vmem:[#allocation24 + $0x44] ss:$16 sps:$4 sm:$0xff]  }
 0xb7c   : > { %v14669_v29 = vpop.f32.mrf.mxu1 }
 0xb7d   : > { %v15735_v29 = vld [vmem:[#allocation24 + $0x40] ss:$16 sps:$4 sm:$0xff]  }
 0xb7e   : > { %v5362_v15 = vpop.f32.mrf.mxu1 }
 0xb7f   : > { %v5368_v30 = vpack.c.bf16 %v5362_v15, %v5362_v15  ;;  %v15769_v15 = vld [vmem:[#allocation21 + $0xb0] sm:$0xff]  }
 0xb80   : > { %v14694_v63 = vpop.f32.mrf.mxu1 }
 0xb81   : > { %14713 = vmatmul.mubr.bf16.vlgmr.msra.gmra.mxu1 %v5368_v30  ;;  %v15740_v30 = vld [vmem:[#allocation24 + $0x24] ss:$16 sps:$4 sm:$0xff]   ;;  %v15738_v63 = vld [vmem:[#allocation24 + $0x20] ss:$16 sps:$4 sm:$0xff]  }
 0xb82   : > { %v5365_v1 = vpop.f32.mrf.mxu1  ;;  %14764 = vmatprep.mubr.msk.bf16.mxu1 %vm17702_vm2, %v17701_v18  ;;  %14749 = vmatpush3.bf16.msra.mxu1 %v15704_v34  ;;  %v15741_v34 = vld [vmem:[#allocation24] ss:$16 sps:$4 sm:$0xff]  }
 0xb83   : > { %14750 = vmatprep.subr.bf16.mxu1 %v17701_v18  ;;  %v15770_v1 = vld [vmem:[#allocation21 + $0xa8] sm:$0xff]  }
 0xb84   : > { %v14695_v31 = vpop.f32.mrf.mxu1 }
 0xb85   : > { %v15743_v31 = vld [vmem:[#allocation24 + $0x4] ss:$16 sps:$4 sm:$0xff]  }
 0xb86   : > { %14751 = vmatpush3.bf16.msra.mxu1 %v15705_v14  ;;  %v15771_v14 = vld [vmem:[#allocation21 + $0xa0] sm:$0xff]  }
 0xb87   : > { %14752 = vmatprep.subr.bf16.mxu1 %v17701_v18 }
 0xb8a   : > { %14753 = vmatpush3.bf16.msra.mxu1 %v15707_v38  ;;  %v15746_v38 = vld [vmem:[#allocation27 + $0x74] ss:$8 sps:$4 sm:$0xff]  }
 0xb8b   : > { %14754 = vmatprep.subr.bf16.mxu1 %v17701_v18 }
 0xb8e   : > { %14755 = vmatpush3.bf16.msra.mxu1 %v15709_v33  ;;  %v15744_v33 = vld [vmem:[#allocation27 + $0x70] ss:$8 sps:$4 sm:$0xff]  }
 0xb8f   : > { %14756 = vmatprep.subr.bf16.mxu1 %v17701_v18 }
 0xb92   : > { %14757 = vmatpush3.bf16.msra.mxu1 %v15711_v35  ;;  %v15749_v35 = vld [vmem:[#allocation27 + $0x64] ss:$8 sps:$4 sm:$0xff]  }
 0xb93   : > { %14758 = vmatprep.subr.bf16.mxu1 %v17701_v18 }
 0xb96   : > { %14759 = vmatpush3.bf16.msra.mxu1 %v15713_v39  ;;  %v15747_v39 = vld [vmem:[#allocation27 + $0x60] ss:$8 sps:$4 sm:$0xff]  }
 0xb97   : > { %14760 = vmatprep.subr.bf16.mxu1 %v17701_v18 }
 0xb9a   : > { %14761 = vmatpush3.bf16.msra.mxu1 %v15715_v40  ;;  %v15752_v40 = vld [vmem:[#allocation27 + $0x54] ss:$8 sps:$4 sm:$0xff]  }
 0xb9b   : > { %14762 = vmatprep.subr.bf16.mxu1 %v17701_v18 }
 0xb9e   : > { %14763 = vmatpush3.bf16.msra.mxu1 %v15717_v41  ;;  %v15750_v41 = vld [vmem:[#allocation27 + $0x50] ss:$8 sps:$4 sm:$0xff]  }
 0xb9f   : > { %6166 = vmatprep.subr.bf16.mxu1 %v15720_v61  ;;  %v15811_v61 = vld [vmem:[%s19347_s2 + $0x20] sm:$0xff]  }
 0xc41   : > { %v5468_v43 = vpop.f32.mrf.mxu1 }
 0xc42   : > { %v5474_v44 = vadd.f32 %v5468_v43, %v5318_v24  ;;  %v5791_v24 = vld [vmem:[#allocation19 + $0x2] sm:$0x1]  ;;  %v15755_v43 = vld [vmem:[#allocation27 + $0x44] ss:$8 sps:$4 sm:$0xff]  }
 0xc43   : > { %v14714_v46 = vpop.f32.mrf.mxu1 }
 0xc44   : > { %v5482_v48 = vadd.f32 %v13505_v21, %v5474_v44  ;;  %v15753_v21 = vld [vmem:[#allocation27 + $0x40] ss:$8 sps:$4 sm:$0xff]   ;;  %v15758_v44 = vld [vmem:[#allocation27 + $0x34] ss:$8 sps:$4 sm:$0xff]   ;;  %v15756_v46 = vld [vmem:[#allocation27 + $0x30] ss:$8 sps:$4 sm:$0xff]  }
 0xc45   : > { %v5471_v49 = vpop.f32.mrf.mxu1 }
 0xc46   : > { %v5483_v50 = vmax.f32 %v5482_v48, 0.0  ;;  %v15761_v48 = vld [vmem:[#allocation27 + $0x24] ss:$8 sps:$4 sm:$0xff]   ;;  %v15759_v49 = vld [vmem:[#allocation27 + $0x20] ss:$8 sps:$4 sm:$0xff]  }
 0xc47   : > { %v14715_v32 = vpop.f32.mrf.mxu1 }
 0xc48   : > { %v18762_v51 = vpack.c.bf16 %v5483_v50, %v5483_v50  ;;  %v15764_v50 = vld [vmem:[#allocation27 + $0x14] ss:$8 sps:$4 sm:$0xff]   ;;  %v15762_v32 = vld [vmem:[#allocation27 + $0x10] ss:$8 sps:$4 sm:$0xff]  }
 0xc4a   : > { %v5492_v54 = vsel %vm5490_vm6, %v18762_v51, 0 }
 0xc4b   : > { %14717 = vmatpush3.bf16.msra.mxu0 %v5492_v54 }
 0xc4c   : > { %14722 = vmatprep.subr.bf16.mxu0 %v17701_v18 }
 0xc4e   : > { %14719 = vmatmul.mubr.msk.bf16.vlgmr.msra.gmra.mxu0 %vm5486_vm7, %v5485_v55  ;;  %v15765_v55 = vld [vmem:[#allocation27] ss:$8 sps:$4 sm:$0xff]  }
 0xc4f   : > { %14723 = vmatpush3.bf16.msra.mxu0 %v5492_v54  ;;  %14724 = vmatprep.mubr.msk.bf16.mxu0 %vm17702_vm2, %v17701_v18 }
 0xc50   : > { %14728 = vmatprep.subr.bf16.mxu0 %v17701_v18 }
 0xc56   : > { %14725 = vmatmul.mubr.msk.bf16.vlgmr.msra.gmra.mxu0 %vm5486_vm7, %v5552_v56  ;;  %v15772_v56 = vld [vmem:[#allocation21 + $0x98] sm:$0xff]  }
 0xc57   : > { %14729 = vmatpush3.bf16.msra.mxu0 %v15706_v36  ;;  %14744 = vmatprep.mubr.msk.bf16.mxu0 %vm17702_vm2, %v17701_v18  ;;  %v15773_v36 = vld [vmem:[#allocation21 + $0x90] sm:$0xff]  }
 0xc58   : > { %14730 = vmatprep.subr.bf16.mxu0 %v17701_v18 }
 0xc5b   : > { %14731 = vmatpush3.bf16.msra.mxu0 %v15708_v59  ;;  %v15774_v59 = vld [vmem:[#allocation21 + $0x88] sm:$0xff]  }
 0xc5c   : > { %14732 = vmatprep.subr.bf16.mxu0 %v17701_v18 }
 0xc5f   : > { %14733 = vmatpush3.bf16.msra.mxu0 %v15710_v60  ;;  %v15778_v60 = vld [vmem:[#allocation24 + $0xec] ss:$16 sps:$4 sm:$0xff]  }
 0xc60   : > { %14734 = vmatprep.subr.bf16.mxu0 %v17701_v18 }
 0xc63   : > { %14735 = vmatpush3.bf16.msra.mxu0 %v15712_v11  ;;  %v15808_v11 = vld [vmem:[%s19347_s2 + $0x38] sm:$0xff]  }
 0xc64   : > { %14736 = vmatprep.subr.bf16.mxu0 %v17701_v18 }
 0xc67   : > { %14737 = vmatpush3.bf16.msra.mxu0 %v15714_v37  ;;  %v15809_v37 = vld [vmem:[%s19347_s2 + $0x30] sm:$0xff]  }
 0xc68   : > { %14738 = vmatprep.subr.bf16.mxu0 %v17701_v18 }
 0xc6b   : > { %14739 = vmatpush3.bf16.msra.mxu0 %v15716_v42  ;;  %v15810_v42 = vld [vmem:[%s19347_s2 + $0x28] sm:$0xff]  }
 0xc6c   : > { %14740 = vmatprep.subr.bf16.mxu0 %v17701_v18 }
 0xc6f   : > { %14741 = vmatpush3.bf16.msra.mxu0 %v15721_v62  ;;  %v15812_v62 = vld [vmem:[%s19347_s2 + $0x18] sm:$0xff]  }
 0xc70   : > { %14742 = vmatprep.subr.bf16.mxu0 %v17701_v18 }
 0xc73   : > { %14743 = vmatpush3.bf16.msra.mxu0 %v15725_v2  ;;  %v15813_v2 = vld [vmem:[%s19347_s2 + $0x10] sm:$0xff]  }
 0xc74   : > { %14768 = vmatprep.subr.bf16.mxu0 %v17701_v18 }
 0xd0e   : > { %v5528_v3 = vpop.f32.mrf.mxu0 }
 0xd0f   : > { %v5534_v5 = vpack.c.bf16 %v5528_v3, %v5528_v3 }
 0xd10   : > { %v14720_v8 = vpop.f32.mrf.mxu0 }
 0xd11   : > { %14765 = vmatmul.mubr.bf16.vlgmr.msra.gmra.mxu1 %v5534_v5 }
 0xd12   : > { %6167 = vmatpush1.bf16.msra.mxu1 %v15718_v4  ;;  %v5531_v9 = vpop.f32.mrf.mxu0  ;;  %6198 = vmatprep.mubr.bf16.mxu1 %v17700_v0 }
 0xd13   : > { %6168 = vmatprep.subr.bf16.mxu1 %v15724_v6 }
 0xd14   : > { %v14721_v16 = vpop.f32.mrf.mxu0 }
 0xd16   : > { %6169 = vmatpush1.bf16.msra.mxu1 %v15722_v10  ;;  %v5590_v17 = vpop.f32.mrf.mxu0 }
 0xd17   : > { %v5596_v20 = vpack.c.bf16 %v5590_v17, %v5590_v17  ;;  %6170 = vmatprep.subr.bf16.mxu1 %v15728_v12 }
 0xd18   : > { %v14726_v7 = vpop.f32.mrf.mxu0 }
 0xd19   : > { %14745 = vmatmul.mubr.bf16.vlgmr.msra.gmra.mxu0 %v5596_v20 }
 0xd1a   : > { %14769 = vmatpush3.bf16.msra.mxu0 %v5492_v54  ;;  %6171 = vmatpush1.bf16.msra.mxu1 %v15726_v19  ;;  %v5593_v23 = vpop.f32.mrf.mxu0  ;;  %v15767_v54 = vld [vmem:[#allocation27 + $0x4] ss:$8 sps:$4 sm:$0xff]  }
 0xd1b   : > { %6172 = vmatprep.subr.bf16.mxu1 %v15731_v22  ;;  %14770 = vmatprep.mubr.msk.bf16.mxu0 %vm17702_vm2, %v17701_v18  ;;  %v15776_v19 = vld [vmem:[#allocation24 + $0xe8] ss:$16 sps:$4 sm:$0xff]   ;;  %v15781_v22 = vld [vmem:[#allocation24 + $0xcc] ss:$16 sps:$4 sm:$0xff]  }
 0xd1c   : > { %v14727_v52 = vpop.f32.mrf.mxu0  ;;  %14774 = vmatprep.subr.bf16.mxu0 %v17701_v18 }
 0xd1e   : > { %6173 = vmatpush1.bf16.msra.mxu1 %v15729_v26  ;;  %v15779_v26 = vld [vmem:[#allocation24 + $0xc8] ss:$16 sps:$4 sm:$0xff]  }
 0xd1f   : > { %6174 = vmatprep.subr.bf16.mxu1 %v15734_v27  ;;  %v15784_v27 = vld [vmem:[#allocation24 + $0xac] ss:$16 sps:$4 sm:$0xff]  }
 0xd21   : > { %14771 = vmatmul.mubr.msk.bf16.vlgmr.msra.gmra.mxu0 %vm5486_vm7, %v5791_v24  ;;  %v15787_v24 = vld [vmem:[#allocation24 + $0x8c] ss:$16 sps:$4 sm:$0xff]  }
 0xd22   : > { %6175 = vmatpush1.bf16.msra.mxu1 %v15732_v53  ;;  %14775 = vmatpush3.bf16.msra.mxu0 %v15768_v28  ;;  %v15782_v53 = vld [vmem:[#allocation24 + $0xa8] ss:$16 sps:$4 sm:$0xff]  }
 0xd23   : > { %6176 = vmatprep.subr.bf16.mxu1 %v15737_v25  ;;  %14776 = vmatprep.subr.bf16.mxu0 %v17701_v18  ;;  %v15785_v28 = vld [vmem:[#allocation24 + $0x88] ss:$16 sps:$4 sm:$0xff]   ;;  %v15790_v25 = vld [vmem:[#allocation24 + $0x6c] ss:$16 sps:$4 sm:$0xff]  }
 0xd24   : > { %14790 = vmatprep.mubr.msk.bf16.mxu0 %vm17702_vm2, %v17701_v18 }
 0xd26   : > { %6177 = vmatpush1.bf16.msra.mxu1 %v15735_v29  ;;  %14777 = vmatpush3.bf16.msra.mxu0 %v15769_v15  ;;  %v18817_v29 = vld [vmem:[#allocation25] sm:$0xf] }
 0xd27   : > { %6178 = vmatprep.subr.bf16.mxu1 %v15740_v30  ;;  %14778 = vmatprep.subr.bf16.mxu0 %v17701_v18  ;;  %v15788_v30 = vld [vmem:[#allocation24 + $0x68] ss:$16 sps:$4 sm:$0xff]  }
 0xd2a   : > { %6179 = vmatpush1.bf16.msra.mxu1 %v15738_v63  ;;  %14779 = vmatpush3.bf16.msra.mxu0 %v15770_v1  ;;  %v5989_v63 = vrot.slane %v18817_v29, %v18611_v58  ;;  %v15793_v1 = vld [vmem:[#allocation24 + $0x4c] ss:$16 sps:$4 sm:$0xff]  }
 0xd2b   : > { %6180 = vmatprep.subr.bf16.mxu1 %v15743_v31  ;;  %14780 = vmatprep.subr.bf16.mxu0 %v17701_v18 }
 0xd2e   : > { %6181 = vmatpush1.bf16.msra.mxu1 %v15741_v34  ;;  %14781 = vmatpush3.bf16.msra.mxu0 %v15771_v14  ;;  %v5993_v34 = vrot.slane %v18817_v29, %v18624_v13 }
 0xd2f   : > { %6364 = vmatprep.subr.bf16.mxu1 %v15746_v38  ;;  %14782 = vmatprep.subr.bf16.mxu0 %v17701_v18  ;;  %v15791_v38 = vld [vmem:[#allocation24 + $0x48] ss:$16 sps:$4 sm:$0xff]  }
 0xd31   : > { %6199 = vmatmul.mubr.bf16.vlgmr.msra.gmra.mxu1 %v18669_v45 }
 0xd32   : > { %6365 = vmatpush1.bf16.msra.mxu1 %v15744_v33  ;;  %6396 = vmatprep.mubr.bf16.mxu1 %v17700_v0 }
 0xd33   : > { %6366 = vmatprep.subr.bf16.mxu1 %v15749_v35  ;;  %14783 = vmatpush3.bf16.msra.mxu0 %v15772_v56 }
 0xd34   : > { %14784 = vmatprep.subr.bf16.mxu0 %v17701_v18 }
 0xd36   : > { %6367 = vmatpush1.bf16.msra.mxu1 %v15747_v39  ;;  %v15796_v39 = vld [vmem:[#allocation24 + $0x2c] ss:$16 sps:$4 sm:$0xff]  }
 0xd37   : > { %6368 = vmatprep.subr.bf16.mxu1 %v15752_v40  ;;  %14785 = vmatpush3.bf16.msra.mxu0 %v15773_v36  ;;  %v15804_v36 = vld [vmem:[#allocation30 + $0x18] sm:$0xff]  }
 0xd38   : > { %14786 = vmatprep.subr.bf16.mxu0 %v17701_v18 }
 0xd3a   : > { %6369 = vmatpush1.bf16.msra.mxu1 %v15750_v41 }
 0xd3b   : > { %6370 = vmatprep.subr.bf16.mxu1 %v15755_v43  ;;  %14787 = vmatpush3.bf16.msra.mxu0 %v15774_v59 }
 0xd3c   : > { %14788 = vmatprep.subr.bf16.mxu0 %v17701_v18 }
 0xd3e   : > { %6371 = vmatpush1.bf16.msra.mxu1 %v15753_v21 }
 0xd3f   : > { %6372 = vmatprep.subr.bf16.mxu1 %v15758_v44  ;;  %v15794_v44 = vld [vmem:[#allocation24 + $0x28] ss:$16 sps:$4 sm:$0xff]  }
 0xd42   : > { %6373 = vmatpush1.bf16.msra.mxu1 %v15756_v46 }
 0xd43   : > { %6374 = vmatprep.subr.bf16.mxu1 %v15761_v48  ;;  %v15799_v48 = vld [vmem:[#allocation24 + $0xc] ss:$16 sps:$4 sm:$0xff]  }
 0xd46   : > { %6375 = vmatpush1.bf16.msra.mxu1 %v15759_v49  ;;  %v15797_v49 = vld [vmem:[#allocation24 + $0x8] ss:$16 sps:$4 sm:$0xff]  }
 0xd47   : > { %6376 = vmatprep.subr.bf16.mxu1 %v15764_v50  ;;  %v15800_v50 = vld [vmem:[#allocation30 + $0x38] sm:$0xff]  }
 0xd4a   : > { %6377 = vmatpush1.bf16.msra.mxu1 %v15762_v32  ;;  %v15801_v32 = vld [vmem:[#allocation30 + $0x30] sm:$0xff]  }
 0xd4b   : > { %6378 = vmatprep.subr.bf16.mxu1 %v15767_v54  ;;  %v15802_v54 = vld [vmem:[#allocation30 + $0x28] sm:$0xff]  }
 0xd4e   : > { %6379 = vmatpush1.bf16.msra.mxu1 %v15765_v55  ;;  %v15803_v55 = vld [vmem:[#allocation30 + $0x20] sm:$0xff]  }
 0xd4f   : > { %14814 = vmatprep.subr.bf16.mxu1 %v17701_v18 }
 0xd51   : > { %6397 = vmatmul.mubr.bf16.vlgmr.msra.gmra.mxu1 %v18716_v47  ;;  %v15775_v47 = vld [vmem:[#allocation21 + $0x80] sm:$0xff]  }
 0xd52   : > { %14830 = vmatprep.mubr.msk.bf16.mxu1 %vm17702_vm2, %v17701_v18  ;;  %14789 = vmatpush3.bf16.msra.mxu0 %v15775_v47  ;;  %v15805_v47 = vld [vmem:[#allocation30 + $0x10] sm:$0xff]  }
 0xd53   : > { %6209 = vmatprep.subr.bf16.mxu0 %v15778_v60  ;;  %14815 = vmatpush3.bf16.msra.mxu1 %v15808_v11  ;;  %v15806_v11 = vld [vmem:[#allocation30 + $0x8] sm:$0xff]  }
 0xd54   : > { %14816 = vmatprep.subr.bf16.mxu1 %v17701_v18 }
 0xd57   : > { %14817 = vmatpush3.bf16.msra.mxu1 %v15809_v37  ;;  %v15807_v37 = vld [vmem:[#allocation30] sm:$0xff]  }
 0xd58   : > { %14818 = vmatprep.subr.bf16.mxu1 %v17701_v18 }
 0xd5b   : > { %14819 = vmatpush3.bf16.msra.mxu1 %v15810_v42  ;;  %v15814_v42 = vld [vmem:[%s19347_s2 + $0x8] sm:$0xff]  }
 0xd5c   : > { %14820 = vmatprep.subr.bf16.mxu1 %v17701_v18 }
 0xd5f   : > { %14821 = vmatpush3.bf16.msra.mxu1 %v15811_v61  ;;  %v15815_v61 = vld [vmem:[%s19347_s2] sm:$0xff]  }
 0xd60   : > { %14822 = vmatprep.subr.bf16.mxu1 %v17701_v18 }
 0xd63   : > { %14823 = vmatpush3.bf16.msra.mxu1 %v15812_v62  ;;  %v15816_v62 = vld [vmem:[#allocation34 + $0x18] sm:$0xff]  }
 0xd64   : > { %14824 = vmatprep.subr.bf16.mxu1 %v17701_v18 }
 0xd67   : > { %14825 = vmatpush3.bf16.msra.mxu1 %v15813_v2  ;;  %v15817_v2 = vld [vmem:[#allocation34 + $0x10] sm:$0xff]  }
 0xd68   : > { %14826 = vmatprep.subr.bf16.mxu1 %v17701_v18 }
 0xd6b   : > { %14827 = vmatpush3.bf16.msra.mxu1 %v15814_v42  ;;  %v15828_v42 = vld [vmem:[#allocation36 + $0x54] ss:$8 sps:$4 sm:$0xff]  }
 0xd6c   : > { %14828 = vmatprep.subr.bf16.mxu1 %v17701_v18 }
 0xd6f   : > { %14829 = vmatpush3.bf16.msra.mxu1 %v15815_v61  ;;  %v15826_v61 = vld [vmem:[#allocation36 + $0x50] ss:$8 sps:$4 sm:$0xff]  }
 0xd70   : > { %14846 = vmatprep.subr.bf16.mxu1 %v17701_v18 }
 0xdd1   : > { %v5784_v3 = vpop.f32.mrf.mxu1 }
 0xdd3   : > { %v14766_v4 = vpop.f32.mrf.mxu1 }
 0xdd4   : > { %v13533_v4 = vld [vmem:[#allocation22] ss:$0 sm:$0xff] }
 0xdd5   : > { %v5787_v5 = vpop.f32.mrf.mxu1 }
 0xdd7   : > { %v14767_v6 = vpop.f32.mrf.mxu1 }
 0xdd9   : > { %v5696_v8 = vpop.f32.mrf.mxu0 }
 0xdda   : > { %v18814_v9 = vadd.f32 %v5784_v3, %v5696_v8  ;;  %v15818_v3 = vld [vmem:[#allocation34 + $0x8] sm:$0xff]  }
 0xddb   : > { %v14746_v10 = vpop.f32.mrf.mxu0 }
 0xddd   : > { %v5699_v12 = vpop.f32.mrf.mxu0 }
 0xddf   : > { %v14747_v16 = vpop.f32.mrf.mxu0 }
 0xde1   : > { %v5829_v17 = vpop.f32.mrf.mxu0 }
 0xde2   : > { %v5835_v20 = vpack.c.bf16 %v5829_v17, %v5829_v17 }
 0xde3   : > { %v14772_v7 = vpop.f32.mrf.mxu0 }
 0xde4   : > { %14791 = vmatmul.mubr.bf16.vlgmr.msra.gmra.mxu0 %v5835_v20  ;;  %v6000_v20 = vsub.s32 3, %v18608_v57 }
 0xde5   : > { %6210 = vmatpush1.bf16.msra.mxu0 %v15776_v19  ;;  %v5832_v23 = vpop.f32.mrf.mxu0  ;;  %6241 = vmatprep.mubr.bf16.mxu0 %v17700_v0  ;;  %v5996_v19 = vsub.s32 2, %v18608_v57 }
 0xde6   : > { %6211 = vmatprep.subr.bf16.mxu0 %v15781_v22  ;;  %v6001_v23 = vrot.slane %v18817_v29, %v6000_v20 }
 0xde7   : > { %v14773_v52 = vpop.f32.mrf.mxu0  ;;  %v5997_v7 = vrot.slane %v18817_v29, %v5996_v19 }
 0xde9   : > { %6212 = vmatpush1.bf16.msra.mxu0 %v15779_v26 }
 0xdea   : > { %6213 = vmatprep.subr.bf16.mxu0 %v15784_v27 }
 0xded   : > { %6214 = vmatpush1.bf16.msra.mxu0 %v15782_v53 }
 0xdee   : > { %6215 = vmatprep.subr.bf16.mxu0 %v15787_v24 }
 0xdf1   : > { %v6200_v15 = vpop.f32.mrf.mxu1  ;;  %6216 = vmatpush1.bf16.msra.mxu0 %v15785_v28 }
 0xdf2   : > { %6217 = vmatprep.subr.bf16.mxu0 %v15790_v25  ;;  %v18823_v33 = vadd.f32 %v6200_v15, %v5989_v63 }
 0xdf3   : > { %v6202_v31 = vpop.f32.mrf.mxu1 }
 0xdf4   : > { %v18827_v41 = vadd.f32 %v6202_v31, %v5993_v34  ;;  %v15819_v31 = vld [vmem:[#allocation34] sm:$0xff]  }
 0xdf5   : > { %v6204_v14 = vpop.f32.mrf.mxu1  ;;  %6218 = vmatpush1.bf16.msra.mxu0 %v15788_v30 }
 0xdf6   : > { %v18825_v35 = vadd.f32 %v6204_v14, %v5989_v63  ;;  %6219 = vmatprep.subr.bf16.mxu0 %v15793_v1 }
 0xdf7   : > { %v6206_v40 = vpop.f32.mrf.mxu1 }
 0xdf8   : > { %v6252_v43 = vpack.c.bf16 %v18825_v35, %v18823_v33  ;;  %v18831_v21 = vadd.f32 %v6206_v40, %v5993_v34  ;;  %v13591_v34 = vld [vmem:[#allocation33] ss:$0 sm:$0xff] }
 0xdf9   : > { %6220 = vmatpush1.bf16.msra.mxu0 %v15791_v38 }
 0xdfa   : > { %v6253_v46 = vpack.c.bf16 %v18831_v21, %v18827_v41  ;;  %6221 = vmatprep.subr.bf16.mxu0 %v15796_v39  ;;  %v15943_v21 = vld [vmem:[#allocation40 + $0x4e0] ss:$16 sps:$4 sm:$0xff]  }
 0xdfd   : > { %6222 = vmatpush1.bf16.msra.mxu0 %v15794_v44 }
 0xdfe   : > { %6223 = vmatprep.subr.bf16.mxu0 %v15799_v48 }
 0xe01   : > { %6224 = vmatpush1.bf16.msra.mxu0 %v15797_v49 }
 0xe02   : > { %14794 = vmatprep.subr.bf16.mxu0 %v17701_v18 }
 0xe04   : > { %6242 = vmatmul.mubr.bf16.vlgmr.msra.gmra.mxu0 %v18669_v45 }
 0xe05   : > { %14795 = vmatpush3.bf16.msra.mxu0 %v15800_v50  ;;  %14810 = vmatprep.mubr.msk.bf16.mxu0 %vm17702_vm2, %v17701_v18 }
 0xe06   : > { %14796 = vmatprep.subr.bf16.mxu0 %v17701_v18 }
 0xe09   : > { %14797 = vmatpush3.bf16.msra.mxu0 %v15801_v32  ;;  %v15822_v32 = vld [vmem:[#allocation36 + $0x74] ss:$8 sps:$4 sm:$0xff]  }
 0xe0a   : > { %14798 = vmatprep.subr.bf16.mxu0 %v17701_v18 }
 0xe0d   : > { %14799 = vmatpush3.bf16.msra.mxu0 %v15802_v54 }
 0xe0e   : > { %14800 = vmatprep.subr.bf16.mxu0 %v17701_v18 }
 0xe11   : > { %v18842_v56 = vpop.f32.mrf.mxu1  ;;  %14801 = vmatpush3.bf16.msra.mxu0 %v15803_v55 }
 0xe12   : > { %14802 = vmatprep.subr.bf16.mxu0 %v17701_v18 }
 0xe13   : > { %v18845_v45 = vpop.f32.mrf.mxu1 }
 0xe15   : > { %v6402_v59 = vpop.f32.mrf.mxu1  ;;  %14803 = vmatpush3.bf16.msra.mxu0 %v15804_v36 }
 0xe16   : > { %14804 = vmatprep.subr.bf16.mxu0 %v17701_v18  ;;  %v6707_v59 = vld [vmem:[%s19348_s15] sm:$0x3]  ;;  %s1849_s15 = scalar_lea.vmem %s17936_s9, %s19354_s7 }
 0xe17   : > { %v6403_v60 = vpop.f32.mrf.mxu1 }
 0xe18   : > { %v15825_v60 = vld [vmem:[#allocation36 + $0x64] ss:$8 sps:$4 sm:$0xff]  }
 0xe19   : > { %14805 = vmatpush3.bf16.msra.mxu0 %v15805_v47  ;;  %v15820_v47 = vld [vmem:[#allocation36 + $0x70] ss:$8 sps:$4 sm:$0xff]  }
 0xe1a   : > { %14806 = vmatprep.subr.bf16.mxu0 %v17701_v18 }
 0xe1d   : > { %14807 = vmatpush3.bf16.msra.mxu0 %v15806_v11 }
 0xe1e   : > { %14808 = vmatprep.subr.bf16.mxu0 %v17701_v18 }
 0xe21   : > { %14809 = vmatpush3.bf16.msra.mxu0 %v15807_v37  ;;  %v15823_v37 = vld [vmem:[#allocation36 + $0x60] ss:$8 sps:$4 sm:$0xff]  }
 0xe22   : > { %14834 = vmatprep.subr.bf16.mxu0 %v17701_v18 }
 0xe24   : > { %14811 = vmatmul.mubr.bf16.vlgmr.msra.gmra.mxu0 %v18762_v51 }
 0xe25   : > { %14842 = vmatprep.mubr.msk.bf16.mxu0 %vm17702_vm2, %v17701_v18  ;;  %14835 = vmatpush3.bf16.msra.mxu0 %v15816_v62  ;;  %v15831_v62 = vld [vmem:[#allocation36 + $0x44] ss:$8 sps:$4 sm:$0xff]  }
 0xe26   : > { %14836 = vmatprep.subr.bf16.mxu0 %v17701_v18 }
 0xe29   : > { %14837 = vmatpush3.bf16.msra.mxu0 %v15817_v2  ;;  %v15829_v2 = vld [vmem:[#allocation36 + $0x40] ss:$8 sps:$4 sm:$0xff]  }
 0xe2a   : > { %14838 = vmatprep.subr.bf16.mxu0 %v17701_v18 }
 0xe2d   : > { %14839 = vmatpush3.bf16.msra.mxu0 %v15818_v3  ;;  %v15834_v3 = vld [vmem:[#allocation36 + $0x34] ss:$8 sps:$4 sm:$0xff]  }
 0xe2e   : > { %14840 = vmatprep.subr.bf16.mxu0 %v17701_v18 }
 0xe31   : > { %14841 = vmatpush3.bf16.msra.mxu0 %v15819_v31  ;;  %v15855_v31 = vld [vmem:[#allocation37 + $0xcc] ss:$16 sps:$4 sm:$0xff]  }
 0xea4   : > { %v5935_v51 = vpop.f32.mrf.mxu0 }
 0xea5   : > { %v5941_v5 = vadd.f32 %v5935_v51, %v18814_v9  ;;  %v15832_v51 = vld [vmem:[#allocation36 + $0x30] ss:$8 sps:$4 sm:$0xff]  }
 0xea6   : > { %v14792_v6 = vpop.f32.mrf.mxu0 }
 0xea7   : > { %v5949_v8 = vadd.f32 %v13533_v4, %v5941_v5  ;;  %v15837_v4 = vld [vmem:[#allocation36 + $0x24] ss:$8 sps:$4 sm:$0xff]   ;;  %v15835_v5 = vld [vmem:[#allocation36 + $0x20] ss:$8 sps:$4 sm:$0xff]   ;;  %v15840_v6 = vld [vmem:[#allocation36 + $0x14] ss:$8 sps:$4 sm:$0xff]  }
 0xea8   : > { %v5938_v10 = vpop.f32.mrf.mxu0 }
 0xea9   : > { %v5950_v12 = vmax.f32 %v5949_v8, 0.0  ;;  %v15838_v8 = vld [vmem:[#allocation36 + $0x10] ss:$8 sps:$4 sm:$0xff]   ;;  %v15843_v10 = vld [vmem:[#allocation36 + $0x4] ss:$8 sps:$4 sm:$0xff]  }
 0xeaa   : > { %v14793_v16 = vpop.f32.mrf.mxu0 }
 0xeab   : > { %v5951_v17 = vpack.c.bf16 %v5950_v12, %v5950_v12  ;;  %v15841_v12 = vld [vmem:[#allocation36] ss:$8 sps:$4 sm:$0xff]   ;;  %v13582_v16 = vld [vmem:[#allocation31] ss:$0 sm:$0xff] }
 0xead   : > { %14831 = vmatmul.mubr.bf16.vlgmr.msra.gmra.mxu1 %v5951_v17 }
 0xeae   : > { %14848 = vmatprep.mubr.msk.bf16.mxu1 %vm17702_vm2, %v17701_v18 }
 0xec4   : > { %v6243_v22 = vpop.f32.mrf.mxu0 }
 0xec5   : > { %v18872_v27 = vadd.f32 %v6243_v22, %v5997_v7 }
 0xec6   : > { %v6245_v9 = vpop.f32.mrf.mxu0 }
 0xec7   : > { %v18876_v24 = vadd.f32 %v6245_v9, %v6001_v23 }
 0xec8   : > { %v6247_v26 = vpop.f32.mrf.mxu0 }
 0xec9   : > { %v18874_v52 = vadd.f32 %v6247_v26, %v5997_v7 }
 0xeca   : > { %v6249_v53 = vpop.f32.mrf.mxu0 }
 0xecb   : > { %v6254_v28 = vpack.c.bf16 %v18874_v52, %v18872_v27  ;;  %v18880_v25 = vadd.f32 %v6249_v53, %v6001_v23  ;;  %v15946_v27 = vld [vmem:[#allocation40 + $0x4c0] ss:$16 sps:$4 sm:$0xff]   ;;  %v15951_v52 = vld [vmem:[#allocation40 + $0x4a4] ss:$16 sps:$4 sm:$0xff]  }
 0xecd   : > { %v6255_v15 = vpack.c.bf16 %v18880_v25, %v18876_v24  ;;  %v15952_v24 = vld [vmem:[#allocation40 + $0x6e0] ss:$16 sps:$4 sm:$0xff]   ;;  %v15960_v25 = vld [vmem:[#allocation40 + $0x6c4] ss:$16 sps:$4 sm:$0xff]  }
 0xee4   : > { %v6512_v30 = vpop.f32.mrf.mxu0 }
 0xee5   : > { %v6513_v17 = vadd.f32 %v13582_v16, %v6512_v30  ;;  %v15859_v30 = vld [vmem:[#allocation37 + $0xa8] ss:$16 sps:$4 sm:$0xff]  }
 0xee6   : > { %v14812_v63 = vpop.f32.mrf.mxu0 }
 0xee7   : > { %v6518_v7 = vpack.c.bf16 %v6513_v17, %v6513_v17 }
 0xee8   : > { %v6515_v1 = vpop.f32.mrf.mxu0 }
 0xee9   : > { %v15847_v1 = vld [vmem:[#allocation37 + $0xe8] ss:$16 sps:$4 sm:$0xff]  }
 0xeea   : > { %v14813_v29 = vpop.f32.mrf.mxu0 }
 0xeeb   : > { %v15849_v29 = vld [vmem:[#allocation37 + $0xec] ss:$16 sps:$4 sm:$0xff]  }
 0xf6d   : > { %v6624_v14 = vpop.f32.mrf.mxu1 }
 0xf6e   : > { %v6625_v38 = vadd.f32 %v13591_v34, %v6624_v14  ;;  %v15853_v34 = vld [vmem:[#allocation37 + $0xc8] ss:$16 sps:$4 sm:$0xff]   ;;  %v15861_v14 = vld [vmem:[#allocation37 + $0xac] ss:$16 sps:$4 sm:$0xff]  }
 0xf6f   : > { %v14832_v39 = vpop.f32.mrf.mxu1 }
 0xf70   : > { %v18884_v40 = vpack.c.bf16 %v6625_v38, %v6625_v38  ;;  %v15867_v38 = vld [vmem:[#allocation37 + $0x8c] ss:$16 sps:$4 sm:$0xff]   ;;  %v15865_v39 = vld [vmem:[#allocation37 + $0x88] ss:$16 sps:$4 sm:$0xff]  }
 0xf71   : > { %v6627_v44 = vpop.f32.mrf.mxu1 }
 0xf72   : > { %14843 = vmatmul.mubr.msk.bf16.vlgmr.msra.gmra.mxu0 %vm1961_vm0, %v18884_v40  ;;  %v15873_v44 = vld [vmem:[#allocation37 + $0x6c] ss:$16 sps:$4 sm:$0xff]  }
 0xf73   : > { %v14833_v48 = vpop.f32.mrf.mxu1  ;;  %6939 = vmatprep.mubr.bf16.mxu0 %v17700_v0 }
 0xf74   : > { %v15871_v48 = vld [vmem:[#allocation37 + $0x68] ss:$16 sps:$4 sm:$0xff]  }
0x1032   : > { %v6700_v49 = vpop.f32.mrf.mxu0 }
0x1033   : > { %v6706_v50 = vpack.c.bf16 %v6700_v49, %v6700_v49  ;;  %v15879_v49 = vld [vmem:[#allocation37 + $0x4c] ss:$16 sps:$4 sm:$0xff]  }
0x1034   : > { %v14844_v54 = vpop.f32.mrf.mxu0 }
0x1035   : > { %v6714_v55 = vsel %vm6712_vm8, %v6706_v50, 0  ;;  %v15877_v50 = vld [vmem:[#allocation37 + $0x48] ss:$16 sps:$4 sm:$0xff]  }
0x1036   : > { %v6703_v36 = vpop.f32.mrf.mxu0  ;;  %14847 = vmatpush3.bf16.msra.mxu1 %v6714_v55  ;;  %v15883_v54 = vld [vmem:[#allocation37 + $0x28] ss:$16 sps:$4 sm:$0xff]   ;;  %v15891_v55 = vld [vmem:[#allocation37 + $0xc] ss:$16 sps:$4 sm:$0xff]  }
0x1037   : > { %6854 = vmatprep.subr.bf16.mxu1 %v15822_v32  ;;  %v15885_v32 = vld [vmem:[#allocation37 + $0x2c] ss:$16 sps:$4 sm:$0xff]   ;;  %v15889_v36 = vld [vmem:[#allocation37 + $0x8] ss:$16 sps:$4 sm:$0xff]  }
0x1038   : > { %v14845_v11 = vpop.f32.mrf.mxu0 }
0x1039   : > { %14849 = vmatmul.mubr.msk.bf16.vlgmr.msra.gmra.mxu1 %vm6708_vm9, %v6707_v59  ;;  %v15897_v59 = vld [vmem:[#allocation37 + $0x1ec] ss:$16 sps:$4 sm:$0xff]   ;;  %v15901_v11 = vld [vmem:[#allocation37 + $0x1c8] ss:$16 sps:$4 sm:$0xff]  }
0x103a   : > { %6855 = vmatpush1.bf16.msra.mxu1 %v15820_v47  ;;  %6886 = vmatprep.mubr.bf16.mxu1 %v17700_v0  ;;  %v15895_v47 = vld [vmem:[#allocation37 + $0x1e8] ss:$16 sps:$4 sm:$0xff]  }
0x103b   : > { %6856 = vmatprep.subr.bf16.mxu1 %v15825_v60  ;;  %v15903_v60 = vld [vmem:[#allocation37 + $0x1cc] ss:$16 sps:$4 sm:$0xff]  }
0x103e   : > { %6857 = vmatpush1.bf16.msra.mxu1 %v15823_v37  ;;  %v15909_v37 = vld [vmem:[#allocation37 + $0x1ac] ss:$16 sps:$4 sm:$0xff]  }
0x103f   : > { %6858 = vmatprep.subr.bf16.mxu1 %v15828_v42  ;;  %v15907_v42 = vld [vmem:[#allocation37 + $0x1a8] ss:$16 sps:$4 sm:$0xff]  }
0x1042   : > { %6859 = vmatpush1.bf16.msra.mxu1 %v15826_v61  ;;  %v15915_v61 = vld [vmem:[#allocation37 + $0x18c] ss:$16 sps:$4 sm:$0xff]  }
0x1043   : > { %6860 = vmatprep.subr.bf16.mxu1 %v15831_v62  ;;  %v15913_v62 = vld [vmem:[#allocation37 + $0x188] ss:$16 sps:$4 sm:$0xff]  }
0x1046   : > { %6861 = vmatpush1.bf16.msra.mxu1 %v15829_v2  ;;  %v15921_v2 = vld [vmem:[#allocation37 + $0x16c] ss:$16 sps:$4 sm:$0xff]  }
0x1047   : > { %6862 = vmatprep.subr.bf16.mxu1 %v15834_v3  ;;  %v15919_v3 = vld [vmem:[#allocation37 + $0x168] ss:$16 sps:$4 sm:$0xff]  }
0x104a   : > { %6863 = vmatpush1.bf16.msra.mxu1 %v15832_v51  ;;  %v15927_v51 = vld [vmem:[#allocation37 + $0x14c] ss:$16 sps:$4 sm:$0xff]  }
0x104b   : > { %6864 = vmatprep.subr.bf16.mxu1 %v15837_v4  ;;  %v15925_v4 = vld [vmem:[#allocation37 + $0x148] ss:$16 sps:$4 sm:$0xff]  }
0x104e   : > { %6865 = vmatpush1.bf16.msra.mxu1 %v15835_v5 }
0x104f   : > { %6866 = vmatprep.subr.bf16.mxu1 %v15840_v6 }
0x1052   : > { %6867 = vmatpush1.bf16.msra.mxu1 %v15838_v8 }
0x1053   : > { %6868 = vmatprep.subr.bf16.mxu1 %v15843_v10 }
0x1056   : > { %6869 = vmatpush1.bf16.msra.mxu1 %v15841_v12  ;;  %v15846_v12 = vld [vmem:[#allocation37 + $0xe4] ss:$16 sps:$4 sm:$0xff]  }
0x1057   : > { %7377 = vmatprep.subr.bf16.mxu1 %v15849_v29  ;;  %v15864_v29 = vld [vmem:[#allocation37 + $0x84] ss:$16 sps:$4 sm:$0xff]  }
0x10f9   : > { %v6750_v22 = vpop.f32.mrf.mxu1 }
0x10fa   : > { %v6756_v9 = vpack.c.bf16 %v6750_v22, %v6750_v22 }
0x10fb   : > { %v14850_v23 = vpop.f32.mrf.mxu1 }
0x10fc   : > { %v18893_v26 = vadd.bf16 %v6756_v9, %v6518_v7  ;;  %v6897_v7 = vld [vmem:[%s19349_s22] sm:$0xf]  ;;  %v15852_v23 = vld [vmem:[#allocation37 + $0xc4] ss:$16 sps:$4 sm:$0xff]  }
0x10fd   : > { %v6753_v53 = vpop.f32.mrf.mxu1  ;;  %v15844_v9 = vld [vmem:[#allocation37 + $0xe0] ss:$16 sps:$4 sm:$0xff]  }
0x10fe   : > { %6887 = vmatmul.mubr.bf16.vlgmr.msra.gmra.mxu1 %v18893_v26  ;;  %v15850_v53 = vld [vmem:[#allocation37 + $0xc0] ss:$16 sps:$4 sm:$0xff]  }
0x10ff   : > { %v14851_v63 = vpop.f32.mrf.mxu1  ;;  %7378 = vmatpush1.bf16.msra.mxu1 %v15847_v1  ;;  %v15856_v1 = vld [vmem:[#allocation37 + $0xa0] ss:$16 sps:$4 sm:$0xff]  }
0x1100   : > { %7379 = vmatprep.subr.bf16.mxu1 %v15855_v31  ;;  %v15858_v63 = vld [vmem:[#allocation37 + $0xa4] ss:$16 sps:$4 sm:$0xff]   ;;  %v15862_v31 = vld [vmem:[#allocation37 + $0x80] ss:$16 sps:$4 sm:$0xff]  }
0x1103   : > { %7380 = vmatpush1.bf16.msra.mxu1 %v15853_v34  ;;  %v15870_v34 = vld [vmem:[#allocation37 + $0x64] ss:$16 sps:$4 sm:$0xff]  }
0x1104   : > { %7381 = vmatprep.subr.bf16.mxu1 %v15861_v14  ;;  %v15868_v14 = vld [vmem:[#allocation37 + $0x60] ss:$16 sps:$4 sm:$0xff]  }
0x1107   : > { %7382 = vmatpush1.bf16.msra.mxu1 %v15859_v30  ;;  %v15876_v30 = vld [vmem:[#allocation37 + $0x44] ss:$16 sps:$4 sm:$0xff]  }
0x1108   : > { %7383 = vmatprep.subr.bf16.mxu1 %v15867_v38  ;;  %v15874_v38 = vld [vmem:[#allocation37 + $0x40] ss:$16 sps:$4 sm:$0xff]  }
0x110b   : > { %7384 = vmatpush1.bf16.msra.mxu1 %v15865_v39  ;;  %v15882_v39 = vld [vmem:[#allocation37 + $0x24] ss:$16 sps:$4 sm:$0xff]  }
0x110c   : > { %7385 = vmatprep.subr.bf16.mxu1 %v15873_v44  ;;  %v15880_v44 = vld [vmem:[#allocation37 + $0x20] ss:$16 sps:$4 sm:$0xff]  }
0x110f   : > { %7386 = vmatpush1.bf16.msra.mxu1 %v15871_v48  ;;  %v15888_v48 = vld [vmem:[#allocation37 + $0x4] ss:$16 sps:$4 sm:$0xff]  }
0x1110   : > { %7387 = vmatprep.subr.bf16.mxu1 %v15879_v49  ;;  %v15886_v49 = vld [vmem:[#allocation37] ss:$16 sps:$4 sm:$0xff]  }
0x1113   : > { %7388 = vmatpush1.bf16.msra.mxu1 %v15877_v50  ;;  %v15894_v50 = vld [vmem:[#allocation37 + $0x1e4] ss:$16 sps:$4 sm:$0xff]  }
0x1114   : > { %7389 = vmatprep.subr.bf16.mxu1 %v15885_v32  ;;  %v15892_v32 = vld [vmem:[#allocation37 + $0x1e0] ss:$16 sps:$4 sm:$0xff]  }
0x1117   : > { %7390 = vmatpush1.bf16.msra.mxu1 %v15883_v54  ;;  %v15900_v54 = vld [vmem:[#allocation37 + $0x1c4] ss:$16 sps:$4 sm:$0xff]  }
0x1118   : > { %7391 = vmatprep.subr.bf16.mxu1 %v15891_v55  ;;  %v15898_v55 = vld [vmem:[#allocation37 + $0x1c0] ss:$16 sps:$4 sm:$0xff]  }
0x111b   : > { %7392 = vmatpush1.bf16.msra.mxu1 %v15889_v36  ;;  %v15906_v36 = vld [vmem:[#allocation37 + $0x1a4] ss:$16 sps:$4 sm:$0xff]  }
0x111c   : > { %7393 = vmatprep.subr.bf16.mxu1 %v15897_v59  ;;  %v15904_v59 = vld [vmem:[#allocation37 + $0x1a0] ss:$16 sps:$4 sm:$0xff]  }
0x111f   : > { %7394 = vmatpush2.bf16.msra.mxu1 %v15895_v47  ;;  %v15912_v47 = vld [vmem:[#allocation37 + $0x184] ss:$16 sps:$4 sm:$0xff]  }
0x1120   : > { %7395 = vmatprep.subr.bf16.mxu1 %v15903_v60  ;;  %v15910_v60 = vld [vmem:[#allocation37 + $0x180] ss:$16 sps:$4 sm:$0xff]  }
0x1123   : > { %7396 = vmatpush2.bf16.msra.mxu1 %v15901_v11  ;;  %v15918_v11 = vld [vmem:[#allocation37 + $0x164] ss:$16 sps:$4 sm:$0xff]  }
0x1124   : > { %7397 = vmatprep.subr.bf16.mxu1 %v15909_v37  ;;  %v15916_v37 = vld [vmem:[#allocation37 + $0x160] ss:$16 sps:$4 sm:$0xff]  }
0x1127   : > { %7398 = vmatpush2.bf16.msra.mxu1 %v15907_v42  ;;  %v15924_v42 = vld [vmem:[#allocation37 + $0x144] ss:$16 sps:$4 sm:$0xff]  }
0x1128   : > { %7399 = vmatprep.subr.bf16.mxu1 %v15915_v61  ;;  %v15922_v61 = vld [vmem:[#allocation37 + $0x140] ss:$16 sps:$4 sm:$0xff]  }
0x112b   : > { %7400 = vmatpush2.bf16.msra.mxu1 %v15913_v62  ;;  %v15930_v62 = vld [vmem:[#allocation37 + $0x124] ss:$16 sps:$4 sm:$0xff]  }
0x112c   : > { %7401 = vmatprep.subr.bf16.mxu1 %v15921_v2  ;;  %v15933_v2 = vld [vmem:[#allocation37 + $0x12c] ss:$16 sps:$4 sm:$0xff]  }
0x112f   : > { %7402 = vmatpush2.bf16.msra.mxu1 %v15919_v3  ;;  %v15928_v3 = vld [vmem:[#allocation37 + $0x120] ss:$16 sps:$4 sm:$0xff]  }
0x1130   : > { %7403 = vmatprep.subr.bf16.mxu1 %v15927_v51  ;;  %v15931_v51 = vld [vmem:[#allocation37 + $0x128] ss:$16 sps:$4 sm:$0xff]  }
0x1133   : > { %7404 = vmatpush2.bf16.msra.mxu1 %v15925_v4  ;;  %v15936_v4 = vld [vmem:[#allocation37 + $0x104] ss:$16 sps:$4 sm:$0xff]  }
0x1134   : > { %7405 = vmatprep.subr.bf16.mxu1 %v15933_v2 }
0x1137   : > { %7406 = vmatpush2.bf16.msra.mxu1 %v15931_v51 }
0x11be   : > { %v6888_v5 = vpop.f32.mrf.mxu1 }
0x11bf   : > { %v6895_v6 = vpack.c.bf16 %v6888_v5, %v6888_v5  ;;  %v15939_v5 = vld [vmem:[#allocation37 + $0x10c] ss:$16 sps:$4 sm:$0xff]  }
0x11c0   : > { %v6890_v8 = vpop.f32.mrf.mxu1  ;;  %7407 = vmatprep.subr.bf16.mxu1 %v15939_v5  ;;  %v15941_v5 = vld [vmem:[#allocation39] sm:$0xff]  }
0x11c1   : > { %v6896_v10 = vpack.c.bf16 %v6890_v8, %v6890_v8  ;;  %v6902_v17 = vsel %vm5490_vm6, %v6895_v6, 0  ;;  %v15934_v6 = vld [vmem:[#allocation37 + $0x100] ss:$16 sps:$4 sm:$0xff]   ;;  %v15937_v8 = vld [vmem:[#allocation37 + $0x108] ss:$16 sps:$4 sm:$0xff]  }
0x11c2   : > { %v6892_v16 = vpop.f32.mrf.mxu1  ;;  %7408 = vmatpush2.bf16.msra.mxu1 %v15937_v8  ;;  %v15945_v8 = vld [vmem:[#allocation40 + $0x4e4] ss:$16 sps:$4 sm:$0xff]  }
0x11c3   : > { %13622 = vmatprep.subr.msk.bf16.mxu0 %vm5490_vm6, %v6896_v10  ;;  %v6272_v10 = vld [vmem:[#allocation28] sm:$0x3] }
0x11c4   : > { %v6893_v22 = vpop.f32.mrf.mxu1  ;;  %6922 = vmatpush1.bf16.msra.mxu0 %v6902_v17  ;;  %v6277_v16 = vrot.slane %v6272_v10, %v18611_v58 }
0x11c5   : > { %7336 = vmatprep.subr.bf16.mxu0 %v15846_v12  ;;  %v6281_v12 = vrot.slane %v6272_v10, %v18624_v13 }
0x11c6   : > { %v6399_v22 = vadd.f32 %v18842_v56, %v6277_v16  ;;  %v15948_v16 = vld [vmem:[#allocation40 + $0x4c4] ss:$16 sps:$4 sm:$0xff]  }
0x11c7   : > { %13623 = vmatmul.mubr.msk.bf16.vlgmr.msra.gmra.mxu0 %vm5486_vm7, %v6897_v7  ;;  %v6401_v17 = vadd.f32 %v18845_v45, %v6281_v12 }
0x11c8   : > { %7337 = vmatpush1.bf16.msra.mxu0 %v15844_v9 }
0x11c9   : > { %7338 = vmatprep.subr.bf16.mxu0 %v15852_v23 }
0x11cc   : > { %7339 = vmatpush1.bf16.msra.mxu0 %v15850_v53  ;;  %v6406_v53 = vpack.c.bf16 %v6401_v17, %v6401_v17  ;;  %v15958_v17 = vld [vmem:[#allocation40 + $0x6c0] ss:$16 sps:$4 sm:$0xff]  }
0x11cd   : > { %7340 = vmatprep.subr.bf16.mxu0 %v15858_v63 }
0x11d0   : > { %7341 = vmatpush1.bf16.msra.mxu0 %v15856_v1  ;;  %v6405_v1 = vpack.c.bf16 %v6399_v22, %v6399_v22  ;;  %v15955_v22 = vld [vmem:[#allocation40 + $0x480] ss:$16 sps:$4 sm:$0xff]  }
0x11d1   : > { %7342 = vmatprep.subr.bf16.mxu0 %v15864_v29 }
0x11d4   : > { %7343 = vmatpush1.bf16.msra.mxu0 %v15862_v31 }
0x11d5   : > { %7344 = vmatprep.subr.bf16.mxu0 %v15870_v34 }
0x11d8   : > { %7345 = vmatpush1.bf16.msra.mxu0 %v15868_v14 }
0x11d9   : > { %7346 = vmatprep.subr.bf16.mxu0 %v15876_v30 }
0x11dc   : > { %7347 = vmatpush1.bf16.msra.mxu0 %v15874_v38 }
0x11dd   : > { %7348 = vmatprep.subr.bf16.mxu0 %v15882_v39 }
0x11e0   : > { %7349 = vmatpush1.bf16.msra.mxu0 %v15880_v44 }
0x11e1   : > { %7350 = vmatprep.subr.bf16.mxu0 %v15888_v48 }
0x11e4   : > { %7351 = vmatpush1.bf16.msra.mxu0 %v15886_v49 }
0x11e5   : > { %7352 = vmatprep.subr.bf16.mxu0 %v15894_v50 }
0x11e8   : > { %7353 = vmatpush2.bf16.msra.mxu0 %v15892_v32 }
0x11e9   : > { %7354 = vmatprep.subr.bf16.mxu0 %v15900_v54 }
0x11ec   : > { %7355 = vmatpush2.bf16.msra.mxu0 %v15898_v55  ;;  %v15940_v55 = vld [vmem:[%s19350_s4] sm:$0xff]  }
0x11ed   : > { %7356 = vmatprep.subr.bf16.mxu0 %v15906_v36 }
0x11f0   : > { %7357 = vmatpush2.bf16.msra.mxu0 %v15904_v59 }
0x11f1   : > { %7358 = vmatprep.subr.bf16.mxu0 %v15912_v47 }
0x11f4   : > { %7359 = vmatpush2.bf16.msra.mxu0 %v15910_v60 }
0x11f5   : > { %7360 = vmatprep.subr.bf16.mxu0 %v15918_v11 }
0x11f8   : > { %7361 = vmatpush2.bf16.msra.mxu0 %v15916_v37 }
0x11f9   : > { %7362 = vmatprep.subr.bf16.mxu0 %v15924_v42 }
0x11fc   : > { %7363 = vmatpush2.bf16.msra.mxu0 %v15922_v61 }
0x11fd   : > { %7364 = vmatprep.subr.bf16.mxu0 %v15930_v62 }
0x1200   : > { %7365 = vmatpush2.bf16.msra.mxu0 %v15928_v3 }
0x1201   : > { %7366 = vmatprep.subr.bf16.mxu0 %v15936_v4 }
0x1204   : > { %7367 = vmatpush2.bf16.msra.mxu0 %v15934_v6 }
0x1287   : > { %v6941_v7 = vpop.f32.mrf.mxu0 }
0x1288   : > { %v6948_v9 = vpack.c.bf16 %v6941_v7, %v6941_v7  ;;  %v15966_v7 = vld [vmem:[#allocation40 + $0x6a4] ss:$16 sps:$4 sm:$0xff]  }
0x1289   : > { %v6943_v23 = vpop.f32.mrf.mxu0 }
0x128a   : > { %v6949_v63 = vpack.c.bf16 %v6943_v23, %v6943_v23  ;;  %v18906_v34 = vadd.bf16 %v6948_v9, %v6405_v1  ;;  %v15963_v9 = vld [vmem:[#allocation40 + $0x464] ss:$16 sps:$4 sm:$0xff]   ;;  %v15964_v23 = vld [vmem:[#allocation40 + $0x6a0] ss:$16 sps:$4 sm:$0xff]  }
0x128b   : > { %v6945_v29 = vpop.f32.mrf.mxu0  ;;  %v15969_v1 = vld [vmem:[#allocation40 + $0x444] ss:$16 sps:$4 sm:$0xff]  }
0x128c   : > { %v18904_v31 = vadd.bf16 %v6949_v63, %v6406_v53  ;;  %v15961_v53 = vld [vmem:[#allocation40 + $0x460] ss:$16 sps:$4 sm:$0xff]   ;;  %v15972_v63 = vld [vmem:[#allocation40 + $0x684] ss:$16 sps:$4 sm:$0xff]  }
0x128d   : > { %v6946_v14 = vpop.f32.mrf.mxu0  ;;  %v15970_v29 = vld [vmem:[#allocation40 + $0x680] ss:$16 sps:$4 sm:$0xff]  }
0x128e   : > { %7368 = vmatprep.mubr.bf16.mxu0 %v18904_v31  ;;  %7409 = vmatprep.mubr.bf16.mxu1 %v18904_v31  ;;  %v15967_v14 = vld [vmem:[#allocation40 + $0x440] ss:$16 sps:$4 sm:$0xff]  }
0x128f   : > { %7369 = vmatmul.mubr.bf16.vlgmr.msra.gmra.mxu0 %v18906_v34  ;;  %7410 = vmatmul.mubr.bf16.vlgmr.msra.gmra.mxu1 %v18906_v34 }
0x1290   : > { %7476 = vmatprep.mubr.bf16.mxu0 %v17700_v0  ;;  %7623 = vmatprep.mubr.bf16.mxu1 %v17700_v0 }
0x134f   : > { %v7370_v56 = vpop.f32.mrf.mxu0  ;;  %v7411_v45 = vpop.f32.mrf.mxu1 }
0x1350   : > { %v7418_v30 = vpack.c.bf16 %v7370_v56, %v7370_v56  ;;  %v7420_v32 = vpack.c.bf16 %v7411_v45, %v7411_v45  ;;  %v15978_v56 = vld [vmem:[#allocation40 + $0x664] ss:$16 sps:$4 sm:$0xff]  }
0x1351   : > { %v7372_v38 = vpop.f32.mrf.mxu0  ;;  %v7413_v39 = vpop.f32.mrf.mxu1  ;;  %v15975_v45 = vld [vmem:[#allocation40 + $0x424] ss:$16 sps:$4 sm:$0xff]  }
0x1352   : > { %v7419_v44 = vpack.c.bf16 %v7372_v38, %v7372_v38  ;;  %v7433_v50 = vsel %vm5023_vm4, %v7418_v30, 0  ;;  %v7421_v54 = vpack.c.bf16 %v7413_v39, %v7413_v39  ;;  %v7439_v47 = vsel %vm5023_vm4, %v7420_v32, 0  ;;  %v15976_v30 = vld [vmem:[#allocation40 + $0x660] ss:$16 sps:$4 sm:$0xff]   ;;  %v15984_v39 = vld [vmem:[#allocation40 + $0x644] ss:$16 sps:$4 sm:$0xff]  }
0x1353   : > { %v7374_v48 = vpop.f32.mrf.mxu0  ;;  %v7415_v49 = vpop.f32.mrf.mxu1  ;;  %v15973_v38 = vld [vmem:[#allocation40 + $0x420] ss:$16 sps:$4 sm:$0xff]   ;;  %v15987_v32 = vld [vmem:[#allocation40 + $0x5e4] ss:$16 sps:$4 sm:$0xff]  }
0x1354   : > { %13689 = vmatprep.subr.msk.bf16.mxu0 %vm5023_vm4, %v7419_v44  ;;  %v15981_v44 = vld [vmem:[#allocation40 + $0x404] ss:$16 sps:$4 sm:$0xff]   ;;  %v15982_v48 = vld [vmem:[#allocation40 + $0x640] ss:$16 sps:$4 sm:$0xff]  }
0x1355   : > { %v7375_v36 = vpop.f32.mrf.mxu0  ;;  %v7416_v59 = vpop.f32.mrf.mxu1  ;;  %7459 = vmatpush1.bf16.msra.mxu0 %v7433_v50  ;;  %v15979_v49 = vld [vmem:[#allocation40 + $0x400] ss:$16 sps:$4 sm:$0xff]   ;;  %v15990_v50 = vld [vmem:[#allocation40 + $0x624] ss:$16 sps:$4 sm:$0xff]  }
0x1356   : > { %13691 = vmatprep.subr.msk.bf16.mxu0 %vm5023_vm4, %v7421_v54  ;;  %v15988_v54 = vld [vmem:[#allocation40 + $0x620] ss:$16 sps:$4 sm:$0xff]   ;;  %v15996_v36 = vld [vmem:[#allocation40 + $0x604] ss:$16 sps:$4 sm:$0xff]  }
0x1357   : > { %v15993_v59 = vld [vmem:[#allocation40 + $0x5c4] ss:$16 sps:$4 sm:$0xff]  }
0x1358   : > { %13690 = vmatmul.mubr.msk.bf16.vlgmr.msra.gmra.mxu0 %vm5019_vm5, %v15940_v55 }
0x1359   : > { %7502 = vmatpush1.bf16.msra.mxu0 %v7439_v47  ;;  %7519 = vmatprep.mubr.bf16.mxu0 %v17700_v0  ;;  %v15994_v47 = vld [vmem:[#allocation40 + $0x600] ss:$16 sps:$4 sm:$0xff]  }
0x1360   : > { %13692 = vmatmul.mubr.msk.bf16.vlgmr.msra.gmra.mxu0 %vm5019_vm5, %v15940_v55  ;;  %v15985_v55 = vld [vmem:[#allocation40 + $0x5e0] ss:$16 sps:$4 sm:$0xff]  }
0x1361   : > { %7580 = vmatprep.mubr.bf16.mxu0 %v17700_v0 }
0x1418   : > { %v7478_v60 = vpop.f32.mrf.mxu0 }
0x141a   : > { %v7480_v11 = vpop.f32.mrf.mxu0 }
0x141c   : > { %v7482_v37 = vpop.f32.mrf.mxu0 }
0x141d   : > { %v7530_v42 = vpack.c.bf16 %v7482_v37, %v7478_v60  ;;  %v15991_v60 = vld [vmem:[#allocation40 + $0x5c0] ss:$16 sps:$4 sm:$0xff]   ;;  %v15999_v37 = vld [vmem:[#allocation40 + $0x5a4] ss:$16 sps:$4 sm:$0xff]  }
0x141e   : > { %v7484_v61 = vpop.f32.mrf.mxu0 }
0x141f   : > { %v7531_v62 = vpack.c.bf16 %v7484_v61, %v7480_v11  ;;  %v18931_v51 = vadd.bf16 %v7530_v42, %v6252_v43  ;;  %v15942_v43 = vld [vmem:[#allocation39 + $0x8] sm:$0xff]  }
0x1420   : > { %v7521_v2 = vpop.f32.mrf.mxu0  ;;  %v16002_v11 = vld [vmem:[#allocation40 + $0x7e4] ss:$16 sps:$4 sm:$0xff]   ;;  %v16000_v42 = vld [vmem:[#allocation40 + $0x7e0] ss:$16 sps:$4 sm:$0xff]  }
0x1421   : > { %v18926_v3 = vadd.bf16 %v7531_v62, %v6253_v46  ;;  %v15954_v46 = vld [vmem:[#allocation40 + $0x6e4] ss:$16 sps:$4 sm:$0xff]   ;;  %v15997_v61 = vld [vmem:[#allocation40 + $0x5a0] ss:$16 sps:$4 sm:$0xff]  }
0x1422   : > { %v7523_v4 = vpop.f32.mrf.mxu0  ;;  %v16008_v62 = vld [vmem:[#allocation40 + $0x7c4] ss:$16 sps:$4 sm:$0xff]  }
0x1423   : > { %7562 = vmatprep.subr.bf16.mxu0 %v18926_v3 }
0x1424   : > { %v7525_v6 = vpop.f32.mrf.mxu0  ;;  %7563 = vmatpush1.bf16.msra.mxu0 %v18931_v51 }
0x1425   : > { %7791 = vmatprep.subr.bf16.mxu0 %v18926_v3  ;;  %v7532_v10 = vpack.c.bf16 %v7525_v6, %v7521_v2  ;;  %v16005_v2 = vld [vmem:[#allocation40 + $0x584] ss:$16 sps:$4 sm:$0xff]   ;;  %v16009_v6 = vld [vmem:[#allocation40 + $0x560] ss:$16 sps:$4 sm:$0xff]  }
0x1426   : > { %v7527_v12 = vpop.f32.mrf.mxu0 }
0x1427   : > { %v7533_v41 = vpack.c.bf16 %v7527_v12, %v7523_v4  ;;  %13694 = vmatmul.mubr.msk.bf16.vlgmr.msra.gmra.mxu0 %vm4556_vm3, %v15941_v5  ;;  %v18947_v35 = vadd.bf16 %v7532_v10, %v6254_v28  ;;  %v15949_v28 = vld [vmem:[#allocation40 + $0x4a0] ss:$16 sps:$4 sm:$0xff]   ;;  %v16014_v12 = vld [vmem:[#allocation40 + $0x7a4] ss:$16 sps:$4 sm:$0xff]  }
0x1428   : > { %7792 = vmatpush1.bf16.msra.mxu0 %v18931_v51  ;;  %7809 = vmatprep.mubr.bf16.mxu0 %v17700_v0  ;;  %v16006_v4 = vld [vmem:[#allocation40 + $0x7c0] ss:$16 sps:$4 sm:$0xff]  }
0x1429   : > { %v18942_v33 = vadd.bf16 %v7533_v41, %v6255_v15  ;;  %8636 = vmatprep.subr.bf16.mxu0 %v15945_v8  ;;  %v15957_v15 = vld [vmem:[#allocation40 + $0x484] ss:$16 sps:$4 sm:$0xff]   ;;  %v16012_v10 = vld [vmem:[#allocation40 + $0x7a0] ss:$16 sps:$4 sm:$0xff]  }
0x142a   : > { %v16011_v8 = vld [vmem:[#allocation40 + $0x564] ss:$16 sps:$4 sm:$0xff]  }
0x142b   : > { %7605 = vmatprep.subr.bf16.mxu1 %v18942_v33  ;;  %v16017_v41 = vld [vmem:[#allocation40 + $0x544] ss:$16 sps:$4 sm:$0xff]  }
0x142c   : > { %7606 = vmatpush1.bf16.msra.mxu1 %v18947_v35 }
0x142d   : > { %7834 = vmatprep.subr.bf16.mxu1 %v18942_v33 }
0x142f   : > { %13695 = vmatmul.mubr.msk.bf16.vlgmr.msra.gmra.mxu1 %vm4556_vm3, %v15941_v5  ;;  %13697 = vmatmul.mubr.msk.bf16.vlgmr.msra.gmra.mxu0 %vm4556_vm3, %v15942_v43  ;;  %v16003_v5 = vld [vmem:[#allocation40 + $0x580] ss:$16 sps:$4 sm:$0xff]  }
0x1430   : > { %7835 = vmatpush1.bf16.msra.mxu1 %v18947_v35  ;;  %7852 = vmatprep.mubr.bf16.mxu1 %v17700_v0 }
0x1431   : > { %8637 = vmatpush1.bf16.msra.mxu0 %v15943_v21  ;;  %8679 = vmatprep.subr.bf16.mxu1 %v15954_v46  ;;  %v16015_v21 = vld [vmem:[#allocation40 + $0x540] ss:$16 sps:$4 sm:$0xff]  }
0x1432   : > { %8638 = vmatprep.subr.bf16.mxu0 %v15948_v16  ;;  %v16018_v46 = vld [vmem:[#allocation40 + $0x780] ss:$16 sps:$4 sm:$0xff]  }
0x1433   : > { %v16021_v16 = vld [vmem:[#allocation40 + $0x520] ss:$16 sps:$4 sm:$0xff]  }
0x1435   : > { %8639 = vmatpush1.bf16.msra.mxu0 %v15946_v27  ;;  %v16023_v27 = vld [vmem:[#allocation40 + $0x524] ss:$16 sps:$4 sm:$0xff]  }
0x1436   : > { %8640 = vmatprep.subr.bf16.mxu0 %v15951_v52  ;;  %v16024_v52 = vld [vmem:[#allocation40 + $0x760] ss:$16 sps:$4 sm:$0xff]  }
0x1437   : > { %13698 = vmatmul.mubr.msk.bf16.vlgmr.msra.gmra.mxu1 %vm4556_vm3, %v15942_v43  ;;  %v16020_v43 = vld [vmem:[#allocation40 + $0x784] ss:$16 sps:$4 sm:$0xff]  }
0x1438   : > { %8680 = vmatpush1.bf16.msra.mxu1 %v15952_v24  ;;  %v16026_v24 = vld [vmem:[#allocation40 + $0x764] ss:$16 sps:$4 sm:$0xff]  }
0x1439   : > { %8641 = vmatpush1.bf16.msra.mxu0 %v15949_v28  ;;  %8681 = vmatprep.subr.bf16.mxu1 %v15960_v25  ;;  %v16029_v28 = vld [vmem:[#allocation40 + $0x504] ss:$16 sps:$4 sm:$0xff]  }
0x143a   : > { %8642 = vmatprep.subr.bf16.mxu0 %v15957_v15  ;;  %v16032_v25 = vld [vmem:[#allocation40 + $0x744] ss:$16 sps:$4 sm:$0xff]   ;;  %v16027_v15 = vld [vmem:[#allocation40 + $0x500] ss:$16 sps:$4 sm:$0xff]  }
0x143c   : > { %8682 = vmatpush1.bf16.msra.mxu1 %v15958_v17  ;;  %v16030_v17 = vld [vmem:[#allocation40 + $0x740] ss:$16 sps:$4 sm:$0xff]  }
0x143d   : > { %8643 = vmatpush1.bf16.msra.mxu0 %v15955_v22  ;;  %8683 = vmatprep.subr.bf16.mxu1 %v15966_v7  ;;  %v16035_v22 = vld [vmem:[#allocation40 + $0x724] ss:$16 sps:$4 sm:$0xff]   ;;  %v16038_v7 = vld [vmem:[#allocation40 + $0x4ec] ss:$16 sps:$4 sm:$0xff]  }
0x143e   : > { %8644 = vmatprep.subr.bf16.mxu0 %v15963_v9  ;;  %v16033_v9 = vld [vmem:[#allocation40 + $0x720] ss:$16 sps:$4 sm:$0xff]  }
0x1440   : > { %8684 = vmatpush1.bf16.msra.mxu1 %v15964_v23  ;;  %v16041_v23 = vld [vmem:[#allocation40 + $0x704] ss:$16 sps:$4 sm:$0xff]  }
0x1441   : > { %8645 = vmatpush1.bf16.msra.mxu0 %v15961_v53  ;;  %8685 = vmatprep.subr.bf16.mxu1 %v15972_v63  ;;  %v16039_v53 = vld [vmem:[#allocation40 + $0x700] ss:$16 sps:$4 sm:$0xff]   ;;  %v16050_v63 = vld [vmem:[#allocation40 + $0x6ec] ss:$16 sps:$4 sm:$0xff]  }
0x1442   : > { %8646 = vmatprep.subr.bf16.mxu0 %v15969_v1 }
0x1444   : > { %8686 = vmatpush1.bf16.msra.mxu1 %v15970_v29 }
0x1445   : > { %8647 = vmatpush1.bf16.msra.mxu0 %v15967_v14  ;;  %8687 = vmatprep.subr.bf16.mxu1 %v15978_v56 }
0x1446   : > { %8648 = vmatprep.subr.bf16.mxu0 %v15975_v45 }
0x1448   : > { %8688 = vmatpush1.bf16.msra.mxu1 %v15976_v30 }
0x1449   : > { %8649 = vmatpush1.bf16.msra.mxu0 %v15973_v38  ;;  %8689 = vmatprep.subr.bf16.mxu1 %v15984_v39 }
0x144a   : > { %8650 = vmatprep.subr.bf16.mxu0 %v15981_v44 }
0x144c   : > { %8690 = vmatpush1.bf16.msra.mxu1 %v15982_v48 }
0x144d   : > { %8651 = vmatpush1.bf16.msra.mxu0 %v15979_v49  ;;  %8691 = vmatprep.subr.bf16.mxu1 %v15990_v50 }
0x144e   : > { %8652 = vmatprep.subr.bf16.mxu0 %v15987_v32 }
0x1450   : > { %8692 = vmatpush1.bf16.msra.mxu1 %v15988_v54 }
0x1451   : > { %8653 = vmatpush2.bf16.msra.mxu0 %v15985_v55  ;;  %8693 = vmatprep.subr.bf16.mxu1 %v15996_v36 }
0x1452   : > { %8654 = vmatprep.subr.bf16.mxu0 %v15993_v59 }
0x1454   : > { %8694 = vmatpush1.bf16.msra.mxu1 %v15994_v47 }
0x1455   : > { %8655 = vmatpush2.bf16.msra.mxu0 %v15991_v60  ;;  %8695 = vmatprep.subr.bf16.mxu1 %v16002_v11  ;;  %v16036_v60 = vld [vmem:[#allocation40 + $0x4e8] ss:$16 sps:$4 sm:$0xff]  }
0x1456   : > { %8656 = vmatprep.subr.bf16.mxu0 %v15999_v37  ;;  %v16044_v37 = vld [vmem:[#allocation40 + $0x4cc] ss:$16 sps:$4 sm:$0xff]  }
0x1458   : > { %8696 = vmatpush2.bf16.msra.mxu1 %v16000_v42 }
0x1459   : > { %8657 = vmatpush2.bf16.msra.mxu0 %v15997_v61  ;;  %8697 = vmatprep.subr.bf16.mxu1 %v16008_v62  ;;  %v16042_v61 = vld [vmem:[#allocation40 + $0x4c8] ss:$16 sps:$4 sm:$0xff]  }
0x145a   : > { %8658 = vmatprep.subr.bf16.mxu0 %v16005_v2  ;;  %v16047_v2 = vld [vmem:[#allocation40 + $0x4ac] ss:$16 sps:$4 sm:$0xff]  }
0x145c   : > { %8698 = vmatpush2.bf16.msra.mxu1 %v16006_v4 }
0x145d   : > { %8659 = vmatpush2.bf16.msra.mxu0 %v16003_v5  ;;  %8699 = vmatprep.subr.bf16.mxu1 %v16014_v12  ;;  %v16053_v12 = vld [vmem:[#allocation40 + $0x48c] ss:$16 sps:$4 sm:$0xff]  }
0x145e   : > { %8660 = vmatprep.subr.bf16.mxu0 %v16011_v8  ;;  %v16048_v8 = vld [vmem:[#allocation40 + $0x6e8] ss:$16 sps:$4 sm:$0xff]  }
0x1460   : > { %8700 = vmatpush2.bf16.msra.mxu1 %v16012_v10 }
0x1461   : > { %8661 = vmatpush2.bf16.msra.mxu0 %v16009_v6  ;;  %8701 = vmatprep.subr.bf16.mxu1 %v16020_v43  ;;  %v16045_v6 = vld [vmem:[#allocation40 + $0x4a8] ss:$16 sps:$4 sm:$0xff]  }
0x1462   : > { %8662 = vmatprep.subr.bf16.mxu0 %v16017_v41  ;;  %v16056_v41 = vld [vmem:[#allocation40 + $0x6cc] ss:$16 sps:$4 sm:$0xff]   ;;  %v16051_v43 = vld [vmem:[#allocation40 + $0x488] ss:$16 sps:$4 sm:$0xff]  }
0x1464   : > { %8702 = vmatpush2.bf16.msra.mxu1 %v16018_v46  ;;  %v16059_v46 = vld [vmem:[#allocation40 + $0x46c] ss:$16 sps:$4 sm:$0xff]  }
0x1465   : > { %8663 = vmatpush2.bf16.msra.mxu0 %v16015_v21  ;;  %8703 = vmatprep.subr.bf16.mxu1 %v16026_v24  ;;  %v16054_v21 = vld [vmem:[#allocation40 + $0x6c8] ss:$16 sps:$4 sm:$0xff]   ;;  %v16065_v24 = vld [vmem:[#allocation40 + $0x44c] ss:$16 sps:$4 sm:$0xff]  }
0x1466   : > { %8664 = vmatprep.subr.bf16.mxu0 %v16023_v27  ;;  %v16057_v27 = vld [vmem:[#allocation40 + $0x468] ss:$16 sps:$4 sm:$0xff]  }
0x1468   : > { %8704 = vmatpush2.bf16.msra.mxu1 %v16024_v52  ;;  %v16060_v52 = vld [vmem:[#allocation40 + $0x6a8] ss:$16 sps:$4 sm:$0xff]  }
0x1469   : > { %8665 = vmatpush2.bf16.msra.mxu0 %v16021_v16  ;;  %8705 = vmatprep.subr.bf16.mxu1 %v16032_v25  ;;  %v16062_v16 = vld [vmem:[#allocation40 + $0x6ac] ss:$16 sps:$4 sm:$0xff]   ;;  %v16063_v25 = vld [vmem:[#allocation40 + $0x448] ss:$16 sps:$4 sm:$0xff]  }
0x146a   : > { %8666 = vmatprep.subr.bf16.mxu0 %v16029_v28  ;;  %v16068_v28 = vld [vmem:[#allocation40 + $0x68c] ss:$16 sps:$4 sm:$0xff]  }
0x146c   : > { %8706 = vmatpush2.bf16.msra.mxu1 %v16030_v17  ;;  %v16071_v17 = vld [vmem:[#allocation40 + $0x42c] ss:$16 sps:$4 sm:$0xff]  }
0x146d   : > { %8667 = vmatpush2.bf16.msra.mxu0 %v16027_v15  ;;  %8707 = vmatprep.subr.bf16.mxu1 %v16035_v22  ;;  %v16066_v15 = vld [vmem:[#allocation40 + $0x688] ss:$16 sps:$4 sm:$0xff]   ;;  %v16074_v22 = vld [vmem:[#allocation40 + $0x66c] ss:$16 sps:$4 sm:$0xff]  }
0x146e   : > { %8722 = vmatprep.subr.bf16.mxu0 %v16038_v7  ;;  %v16069_v7 = vld [vmem:[#allocation40 + $0x428] ss:$16 sps:$4 sm:$0xff]  }
0x1470   : > { %8708 = vmatpush2.bf16.msra.mxu1 %v16033_v9  ;;  %v16072_v9 = vld [vmem:[#allocation40 + $0x668] ss:$16 sps:$4 sm:$0xff]  }
0x1471   : > { %8709 = vmatprep.subr.bf16.mxu1 %v16041_v23  ;;  %v16077_v23 = vld [vmem:[#allocation40 + $0x40c] ss:$16 sps:$4 sm:$0xff]  }
0x1474   : > { %8710 = vmatpush2.bf16.msra.mxu1 %v16039_v53  ;;  %v16080_v53 = vld [vmem:[#allocation40 + $0x64c] ss:$16 sps:$4 sm:$0xff]  }
0x1475   : > { %8765 = vmatprep.subr.bf16.mxu1 %v16050_v63  ;;  %v16075_v63 = vld [vmem:[#allocation40 + $0x408] ss:$16 sps:$4 sm:$0xff]  }
0x14e7   : > { %v7582_v1 = vpop.f32.mrf.mxu0 }
0x14e9   : > { %v7584_v29 = vpop.f32.mrf.mxu0 }
0x14eb   : > { %v7586_v14 = vpop.f32.mrf.mxu0 }
0x14ec   : > { %v18957_v56 = vpack.c.bf16 %v7586_v14, %v7582_v1  ;;  %v16078_v1 = vld [vmem:[#allocation40 + $0x648] ss:$16 sps:$4 sm:$0xff]   ;;  %v16086_v14 = vld [vmem:[#allocation40 + $0x62c] ss:$16 sps:$4 sm:$0xff]  }
0x14ed   : > { %v7588_v45 = vpop.f32.mrf.mxu0 }
0x14ee   : > { %v18959_v30 = vpack.c.bf16 %v7588_v45, %v7584_v29  ;;  %v16083_v29 = vld [vmem:[#allocation40 + $0x5ec] ss:$16 sps:$4 sm:$0xff]   ;;  %v16081_v45 = vld [vmem:[#allocation40 + $0x5e8] ss:$16 sps:$4 sm:$0xff]  }
0x14ef   : > { %v7625_v38 = vpop.f32.mrf.mxu1  ;;  %v7811_v39 = vpop.f32.mrf.mxu0 }
0x14f1   : > { %v7627_v44 = vpop.f32.mrf.mxu1  ;;  %v7813_v48 = vpop.f32.mrf.mxu0 }
0x14f3   : > { %v7629_v49 = vpop.f32.mrf.mxu1  ;;  %v7815_v50 = vpop.f32.mrf.mxu0 }
0x14f4   : > { %v18961_v32 = vpack.c.bf16 %v7629_v49, %v7625_v38  ;;  %v18963_v54 = vpack.c.bf16 %v7815_v50, %v7811_v39  ;;  %v16084_v38 = vld [vmem:[#allocation40 + $0x628] ss:$16 sps:$4 sm:$0xff]   ;;  %v16089_v39 = vld [vmem:[#allocation40 + $0x5cc] ss:$16 sps:$4 sm:$0xff]  }
0x14f5   : > { %v7631_v55 = vpop.f32.mrf.mxu1  ;;  %v7817_v36 = vpop.f32.mrf.mxu0  ;;  %v16090_v49 = vld [vmem:[#allocation40 + $0x608] ss:$16 sps:$4 sm:$0xff]   ;;  %v16095_v50 = vld [vmem:[#allocation40 + $0x5ac] ss:$16 sps:$4 sm:$0xff]  }
0x14f6   : > { %v18965_v59 = vpack.c.bf16 %v7631_v55, %v7627_v44  ;;  %v7864_v47 = vpack.c.bf16 %v7817_v36, %v7813_v48  ;;  %v16092_v44 = vld [vmem:[#allocation40 + $0x60c] ss:$16 sps:$4 sm:$0xff]   ;;  %v16087_v48 = vld [vmem:[#allocation40 + $0x5c8] ss:$16 sps:$4 sm:$0xff]  }
0x14f7   : > { %v7854_v11 = vpop.f32.mrf.mxu1  ;;  %v16098_v55 = vld [vmem:[#allocation40 + $0x7ec] ss:$16 sps:$4 sm:$0xff]   ;;  %v16093_v36 = vld [vmem:[#allocation40 + $0x5a8] ss:$16 sps:$4 sm:$0xff]  }
0x14f8   : > { %8668 = vmatprep.mubr.bf16.mxu0 %v7864_v47 }
0x14f9   : > { %v7856_v42 = vpop.f32.mrf.mxu1  ;;  %8669 = vmatmul.mubr.bf16.vlgmr.msra.gmra.mxu0 %v18963_v54 }
0x14fa   : > { %8723 = vmatpush1.bf16.msra.mxu0 %v16036_v60  ;;  %8754 = vmatprep.mubr.bf16.mxu0 %v7864_v47  ;;  %v16096_v47 = vld [vmem:[#allocation40 + $0x7e8] ss:$16 sps:$4 sm:$0xff]   ;;  %v16101_v60 = vld [vmem:[#allocation40 + $0x58c] ss:$16 sps:$4 sm:$0xff]  }
0x14fb   : > { %v7858_v62 = vpop.f32.mrf.mxu1  ;;  %8724 = vmatprep.subr.bf16.mxu0 %v16044_v37  ;;  %v16099_v37 = vld [vmem:[#allocation40 + $0x588] ss:$16 sps:$4 sm:$0xff]  }
0x14fc   : > { %v18968_v10 = vpack.c.bf16 %v7858_v62, %v7854_v11  ;;  %v16104_v11 = vld [vmem:[#allocation40 + $0x7cc] ss:$16 sps:$4 sm:$0xff]  }
0x14fd   : > { %v7860_v4 = vpop.f32.mrf.mxu1  ;;  %v16110_v62 = vld [vmem:[#allocation40 + $0x7ac] ss:$16 sps:$4 sm:$0xff]  }
0x14fe   : > { %v7866_v5 = vpack.c.bf16 %v7860_v4, %v7856_v42  ;;  %8725 = vmatpush1.bf16.msra.mxu0 %v16042_v61  ;;  %v16102_v42 = vld [vmem:[#allocation40 + $0x7c8] ss:$16 sps:$4 sm:$0xff]   ;;  %v16107_v61 = vld [vmem:[#allocation40 + $0x56c] ss:$16 sps:$4 sm:$0xff]  }
0x14ff   : > { %8726 = vmatprep.subr.bf16.mxu0 %v16047_v2  ;;  %v16105_v2 = vld [vmem:[#allocation40 + $0x568] ss:$16 sps:$4 sm:$0xff]  }
0x1500   : > { %8711 = vmatprep.mubr.bf16.mxu1 %v7866_v5  ;;  %v16108_v4 = vld [vmem:[#allocation40 + $0x7a8] ss:$16 sps:$4 sm:$0xff]  }
0x1501   : > { %8712 = vmatmul.mubr.bf16.vlgmr.msra.gmra.mxu1 %v18968_v10 }
0x1502   : > { %8727 = vmatpush1.bf16.msra.mxu0 %v16045_v6  ;;  %8766 = vmatpush1.bf16.msra.mxu1 %v16048_v8  ;;  %v16116_v6 = vld [vmem:[#allocation40 + $0x78c] ss:$16 sps:$4 sm:$0xff]   ;;  %v16111_v8 = vld [vmem:[#allocation40 + $0x548] ss:$16 sps:$4 sm:$0xff]  }
0x1503   : > { %8797 = vmatprep.mubr.bf16.mxu1 %v7866_v5  ;;  %8728 = vmatprep.subr.bf16.mxu0 %v16053_v12  ;;  %v16113_v5 = vld [vmem:[#allocation40 + $0x54c] ss:$16 sps:$4 sm:$0xff]   ;;  %v16114_v12 = vld [vmem:[#allocation40 + $0x788] ss:$16 sps:$4 sm:$0xff]  }
0x1504   : > { %8767 = vmatprep.subr.bf16.mxu1 %v16056_v41  ;;  %v16119_v41 = vld [vmem:[#allocation40 + $0x52c] ss:$16 sps:$4 sm:$0xff]  }
0x1506   : > { %8729 = vmatpush1.bf16.msra.mxu0 %v16051_v43  ;;  %8768 = vmatpush1.bf16.msra.mxu1 %v16054_v21  ;;  %v16122_v43 = vld [vmem:[#allocation40 + $0x76c] ss:$16 sps:$4 sm:$0xff]   ;;  %v16117_v21 = vld [vmem:[#allocation40 + $0x528] ss:$16 sps:$4 sm:$0xff]  }
0x1507   : > { %8730 = vmatprep.subr.bf16.mxu0 %v16059_v46  ;;  %8769 = vmatprep.subr.bf16.mxu1 %v16062_v16  ;;  %v16120_v46 = vld [vmem:[#allocation40 + $0x768] ss:$16 sps:$4 sm:$0xff]   ;;  %v16125_v16 = vld [vmem:[#allocation40 + $0x50c] ss:$16 sps:$4 sm:$0xff]  }
0x150a   : > { %8731 = vmatpush1.bf16.msra.mxu0 %v16057_v27  ;;  %8770 = vmatpush1.bf16.msra.mxu1 %v16060_v52  ;;  %v16128_v27 = vld [vmem:[#allocation40 + $0x74c] ss:$16 sps:$4 sm:$0xff]   ;;  %v16123_v52 = vld [vmem:[#allocation40 + $0x508] ss:$16 sps:$4 sm:$0xff]  }
0x150b   : > { %8732 = vmatprep.subr.bf16.mxu0 %v16065_v24  ;;  %8771 = vmatprep.subr.bf16.mxu1 %v16068_v28  ;;  %v16126_v24 = vld [vmem:[#allocation40 + $0x748] ss:$16 sps:$4 sm:$0xff]   ;;  %v16131_v28 = vld [vmem:[#allocation40 + $0x72c] ss:$16 sps:$4 sm:$0xff]  }
0x150e   : > { %8733 = vmatpush1.bf16.msra.mxu0 %v16063_v25  ;;  %8772 = vmatpush1.bf16.msra.mxu1 %v16066_v15  ;;  %v16134_v25 = vld [vmem:[#allocation40 + $0xe4] ss:$16 sps:$4 sm:$0xff]   ;;  %v16129_v15 = vld [vmem:[#allocation40 + $0x728] ss:$16 sps:$4 sm:$0xff]  }
0x150f   : > { %8734 = vmatprep.subr.bf16.mxu0 %v16071_v17  ;;  %8773 = vmatprep.subr.bf16.mxu1 %v16074_v22  ;;  %v16132_v17 = vld [vmem:[#allocation40 + $0xe0] ss:$16 sps:$4 sm:$0xff]   ;;  %v16137_v22 = vld [vmem:[#allocation40 + $0x70c] ss:$16 sps:$4 sm:$0xff]  }
0x1512   : > { %8735 = vmatpush1.bf16.msra.mxu0 %v16069_v7  ;;  %8774 = vmatpush1.bf16.msra.mxu1 %v16072_v9  ;;  %v16140_v7 = vld [vmem:[#allocation40 + $0xc4] ss:$16 sps:$4 sm:$0xff]   ;;  %v16135_v9 = vld [vmem:[#allocation40 + $0x708] ss:$16 sps:$4 sm:$0xff]  }
0x1513   : > { %8736 = vmatprep.subr.bf16.mxu0 %v16077_v23  ;;  %8775 = vmatprep.subr.bf16.mxu1 %v16080_v53  ;;  %v16138_v23 = vld [vmem:[#allocation40 + $0xc0] ss:$16 sps:$4 sm:$0xff]   ;;  %v16143_v53 = vld [vmem:[#allocation40 + $0xa4] ss:$16 sps:$4 sm:$0xff]  }
0x1516   : > { %8737 = vmatpush1.bf16.msra.mxu0 %v16075_v63  ;;  %8776 = vmatpush1.bf16.msra.mxu1 %v16078_v1  ;;  %v16146_v63 = vld [vmem:[#allocation40 + $0x2e4] ss:$16 sps:$4 sm:$0xff]   ;;  %v16141_v1 = vld [vmem:[#allocation40 + $0xa0] ss:$16 sps:$4 sm:$0xff]  }
0x1517   : > { %8738 = vmatprep.subr.bf16.mxu0 %v16083_v29  ;;  %8777 = vmatprep.subr.bf16.mxu1 %v16086_v14  ;;  %v16144_v29 = vld [vmem:[#allocation40 + $0x2e0] ss:$16 sps:$4 sm:$0xff]   ;;  %v16149_v14 = vld [vmem:[#allocation40 + $0x84] ss:$16 sps:$4 sm:$0xff]  }
0x151a   : > { %8739 = vmatpush2.bf16.msra.mxu0 %v16081_v45  ;;  %8778 = vmatpush1.bf16.msra.mxu1 %v16084_v38  ;;  %v16152_v45 = vld [vmem:[#allocation40 + $0x2c4] ss:$16 sps:$4 sm:$0xff]   ;;  %v16150_v38 = vld [vmem:[#allocation40 + $0x2c0] ss:$16 sps:$4 sm:$0xff]  }
0x151b   : > { %8740 = vmatprep.subr.bf16.mxu0 %v16089_v39  ;;  %8779 = vmatprep.subr.bf16.mxu1 %v16092_v44  ;;  %v16155_v39 = vld [vmem:[#allocation40 + $0x64] ss:$16 sps:$4 sm:$0xff]  }
0x151c   : > { %v16158_v44 = vld [vmem:[#allocation40 + $0x2a4] ss:$16 sps:$4 sm:$0xff]  }
0x151e   : > { %8741 = vmatpush2.bf16.msra.mxu0 %v16087_v48  ;;  %8780 = vmatpush1.bf16.msra.mxu1 %v16090_v49  ;;  %v16153_v48 = vld [vmem:[#allocation40 + $0x60] ss:$16 sps:$4 sm:$0xff]  }
0x151f   : > { %8742 = vmatprep.subr.bf16.mxu0 %v16095_v50  ;;  %8781 = vmatprep.subr.bf16.mxu1 %v16098_v55  ;;  %v16156_v49 = vld [vmem:[#allocation40 + $0x2a0] ss:$16 sps:$4 sm:$0xff]   ;;  %v16161_v50 = vld [vmem:[#allocation40 + $0x44] ss:$16 sps:$4 sm:$0xff]  }
0x1520   : > { %v16164_v55 = vld [vmem:[#allocation40 + $0x284] ss:$16 sps:$4 sm:$0xff]  }
0x1522   : > { %8743 = vmatpush2.bf16.msra.mxu0 %v16093_v36  ;;  %8782 = vmatpush2.bf16.msra.mxu1 %v16096_v47  ;;  %v16162_v36 = vld [vmem:[#allocation40 + $0x280] ss:$16 sps:$4 sm:$0xff]   ;;  %v16167_v47 = vld [vmem:[#allocation40 + $0x24] ss:$16 sps:$4 sm:$0xff]  }
0x1523   : > { %8744 = vmatprep.subr.bf16.mxu0 %v16101_v60  ;;  %8783 = vmatprep.subr.bf16.mxu1 %v16104_v11  ;;  %v16170_v60 = vld [vmem:[#allocation40 + $0x264] ss:$16 sps:$4 sm:$0xff]   ;;  %v16165_v11 = vld [vmem:[#allocation40 + $0x20] ss:$16 sps:$4 sm:$0xff]  }
0x1526   : > { %8745 = vmatpush2.bf16.msra.mxu0 %v16099_v37  ;;  %8784 = vmatpush2.bf16.msra.mxu1 %v16102_v42  ;;  %v16168_v37 = vld [vmem:[#allocation40 + $0x260] ss:$16 sps:$4 sm:$0xff]   ;;  %v16173_v42 = vld [vmem:[#allocation40 + $0x4] ss:$16 sps:$4 sm:$0xff]  }
0x1527   : > { %8746 = vmatprep.subr.bf16.mxu0 %v16107_v61  ;;  %8785 = vmatprep.subr.bf16.mxu1 %v16110_v62  ;;  %v16176_v61 = vld [vmem:[#allocation40 + $0x244] ss:$16 sps:$4 sm:$0xff]   ;;  %v16171_v62 = vld [vmem:[#allocation40] ss:$16 sps:$4 sm:$0xff]  }
0x152a   : > { %8747 = vmatpush2.bf16.msra.mxu0 %v16105_v2  ;;  %8786 = vmatpush2.bf16.msra.mxu1 %v16108_v4  ;;  %v16174_v2 = vld [vmem:[#allocation40 + $0x240] ss:$16 sps:$4 sm:$0xff]   ;;  %v16179_v4 = vld [vmem:[#allocation40 + $0x1e4] ss:$16 sps:$4 sm:$0xff]  }
0x152b   : > { %8748 = vmatprep.subr.bf16.mxu0 %v16113_v5  ;;  %8787 = vmatprep.subr.bf16.mxu1 %v16116_v6  ;;  %v16182_v5 = vld [vmem:[#allocation40 + $0x224] ss:$16 sps:$4 sm:$0xff]   ;;  %v16177_v6 = vld [vmem:[#allocation40 + $0x1e0] ss:$16 sps:$4 sm:$0xff]  }
0x152e   : > { %8749 = vmatpush2.bf16.msra.mxu0 %v16111_v8  ;;  %8788 = vmatpush2.bf16.msra.mxu1 %v16114_v12  ;;  %v16180_v8 = vld [vmem:[#allocation40 + $0x220] ss:$16 sps:$4 sm:$0xff]   ;;  %v16185_v12 = vld [vmem:[#allocation40 + $0x1c4] ss:$16 sps:$4 sm:$0xff]  }
0x152f   : > { %8750 = vmatprep.subr.bf16.mxu0 %v16119_v41  ;;  %8789 = vmatprep.subr.bf16.mxu1 %v16122_v43  ;;  %v16188_v41 = vld [vmem:[#allocation40 + $0x204] ss:$16 sps:$4 sm:$0xff]   ;;  %v16183_v43 = vld [vmem:[#allocation40 + $0x1c0] ss:$16 sps:$4 sm:$0xff]  }
0x1532   : > { %8751 = vmatpush2.bf16.msra.mxu0 %v16117_v21  ;;  %8790 = vmatpush2.bf16.msra.mxu1 %v16120_v46  ;;  %v16186_v21 = vld [vmem:[#allocation40 + $0x200] ss:$16 sps:$4 sm:$0xff]   ;;  %v16191_v46 = vld [vmem:[#allocation40 + $0x1a4] ss:$16 sps:$4 sm:$0xff]  }
0x1533   : > { %8752 = vmatprep.subr.bf16.mxu0 %v16125_v16  ;;  %8791 = vmatprep.subr.bf16.mxu1 %v16128_v27  ;;  %v16194_v16 = vld [vmem:[#allocation40 + $0x3e4] ss:$16 sps:$4 sm:$0xff]   ;;  %v16189_v27 = vld [vmem:[#allocation40 + $0x1a0] ss:$16 sps:$4 sm:$0xff]  }
0x1536   : > { %8753 = vmatpush2.bf16.msra.mxu0 %v16123_v52  ;;  %8792 = vmatpush2.bf16.msra.mxu1 %v16126_v24  ;;  %v16192_v52 = vld [vmem:[#allocation40 + $0x3e0] ss:$16 sps:$4 sm:$0xff]   ;;  %v16197_v24 = vld [vmem:[#allocation40 + $0x184] ss:$16 sps:$4 sm:$0xff]  }
0x1537   : > { %8793 = vmatprep.subr.bf16.mxu1 %v16131_v28  ;;  %9448 = vmatprep.subr.bf16.mxu0 %v16134_v25  ;;  %v16200_v28 = vld [vmem:[#allocation40 + $0x3c4] ss:$16 sps:$4 sm:$0xff]   ;;  %v16195_v25 = vld [vmem:[#allocation40 + $0x180] ss:$16 sps:$4 sm:$0xff]  }
0x1539   : > { %8755 = vmatmul.mubr.bf16.vlgmr.msra.gmra.mxu0 %v18963_v54  ;;  %v16147_v54 = vld [vmem:[#allocation40 + $0x80] ss:$16 sps:$4 sm:$0xff]  }
0x153a   : > { %8794 = vmatpush2.bf16.msra.mxu1 %v16129_v15  ;;  %9449 = vmatpush1.bf16.msra.mxu0 %v16132_v17  ;;  %v16198_v15 = vld [vmem:[#allocation40 + $0x3c0] ss:$16 sps:$4 sm:$0xff]   ;;  %v16203_v17 = vld [vmem:[#allocation40 + $0x164] ss:$16 sps:$4 sm:$0xff]  }
0x153b   : > { %8795 = vmatprep.subr.bf16.mxu1 %v16137_v22  ;;  %9450 = vmatprep.subr.bf16.mxu0 %v16140_v7  ;;  %v16206_v22 = vld [vmem:[#allocation40 + $0x3a4] ss:$16 sps:$4 sm:$0xff]   ;;  %v16201_v7 = vld [vmem:[#allocation40 + $0x160] ss:$16 sps:$4 sm:$0xff]  }
0x153c   : > { %9480 = vmatprep.mubr.bf16.mxu0 %v18959_v30 }
0x153e   : > { %8796 = vmatpush2.bf16.msra.mxu1 %v16135_v9  ;;  %9451 = vmatpush1.bf16.msra.mxu0 %v16138_v23  ;;  %v16204_v9 = vld [vmem:[#allocation40 + $0x3a0] ss:$16 sps:$4 sm:$0xff]   ;;  %v16209_v23 = vld [vmem:[#allocation40 + $0x144] ss:$16 sps:$4 sm:$0xff]  }
0x153f   : > { %9452 = vmatprep.subr.bf16.mxu0 %v16143_v53  ;;  %9491 = vmatprep.subr.bf16.mxu1 %v16146_v63  ;;  %v16212_v53 = vld [vmem:[#allocation40 + $0x384] ss:$16 sps:$4 sm:$0xff]   ;;  %v16207_v63 = vld [vmem:[#allocation40 + $0x140] ss:$16 sps:$4 sm:$0xff]  }
0x1541   : > { %8798 = vmatmul.mubr.bf16.vlgmr.msra.gmra.mxu1 %v18968_v10  ;;  %v16159_v10 = vld [vmem:[#allocation40 + $0x40] ss:$16 sps:$4 sm:$0xff]  }
0x1542   : > { %9453 = vmatpush1.bf16.msra.mxu0 %v16141_v1  ;;  %9492 = vmatpush1.bf16.msra.mxu1 %v16144_v29  ;;  %v16210_v1 = vld [vmem:[#allocation40 + $0x380] ss:$16 sps:$4 sm:$0xff]   ;;  %v16215_v29 = vld [vmem:[#allocation40 + $0x124] ss:$16 sps:$4 sm:$0xff]  }
0x1543   : > { %9523 = vmatprep.mubr.bf16.mxu1 %v18965_v59  ;;  %9454 = vmatprep.subr.bf16.mxu0 %v16149_v14  ;;  %v16218_v14 = vld [vmem:[#allocation40 + $0x364] ss:$16 sps:$4 sm:$0xff]  }
0x1544   : > { %9493 = vmatprep.subr.bf16.mxu1 %v16152_v45  ;;  %v16213_v45 = vld [vmem:[#allocation40 + $0x120] ss:$16 sps:$4 sm:$0xff]  }
0x1546   : > { %9455 = vmatpush1.bf16.msra.mxu0 %v16147_v54  ;;  %9494 = vmatpush1.bf16.msra.mxu1 %v16150_v38  ;;  %v16216_v54 = vld [vmem:[#allocation40 + $0x360] ss:$16 sps:$4 sm:$0xff]   ;;  %v16221_v38 = vld [vmem:[#allocation40 + $0x104] ss:$16 sps:$4 sm:$0xff]  }
0x1547   : > { %9456 = vmatprep.subr.bf16.mxu0 %v16155_v39  ;;  %9495 = vmatprep.subr.bf16.mxu1 %v16158_v44  ;;  %v16224_v39 = vld [vmem:[#allocation40 + $0x344] ss:$16 sps:$4 sm:$0xff]   ;;  %v16219_v44 = vld [vmem:[#allocation40 + $0x100] ss:$16 sps:$4 sm:$0xff]  }
0x154a   : > { %9457 = vmatpush1.bf16.msra.mxu0 %v16153_v48  ;;  %9496 = vmatpush1.bf16.msra.mxu1 %v16156_v49  ;;  %v16222_v48 = vld [vmem:[#allocation40 + $0x340] ss:$16 sps:$4 sm:$0xff]   ;;  %v16227_v49 = vld [vmem:[#allocation40 + $0x324] ss:$16 sps:$4 sm:$0xff]  }
0x154b   : > { %9458 = vmatprep.subr.bf16.mxu0 %v16161_v50  ;;  %9497 = vmatprep.subr.bf16.mxu1 %v16164_v55  ;;  %v16230_v50 = vld [vmem:[#allocation40 + $0xec] ss:$16 sps:$4 sm:$0xff]   ;;  %v16225_v55 = vld [vmem:[#allocation40 + $0x320] ss:$16 sps:$4 sm:$0xff]  }
0x154e   : > { %9459 = vmatpush1.bf16.msra.mxu0 %v16159_v10  ;;  %9498 = vmatpush1.bf16.msra.mxu1 %v16162_v36  ;;  %v16228_v10 = vld [vmem:[#allocation40 + $0xe8] ss:$16 sps:$4 sm:$0xff]   ;;  %v16233_v36 = vld [vmem:[#allocation40 + $0x304] ss:$16 sps:$4 sm:$0xff]  }
0x154f   : > { %9460 = vmatprep.subr.bf16.mxu0 %v16167_v47  ;;  %9499 = vmatprep.subr.bf16.mxu1 %v16170_v60  ;;  %v16236_v47 = vld [vmem:[#allocation40 + $0xcc] ss:$16 sps:$4 sm:$0xff]   ;;  %v16231_v60 = vld [vmem:[#allocation40 + $0x300] ss:$16 sps:$4 sm:$0xff]  }
0x1552   : > { %9461 = vmatpush1.bf16.msra.mxu0 %v16165_v11  ;;  %9500 = vmatpush1.bf16.msra.mxu1 %v16168_v37  ;;  %v16234_v11 = vld [vmem:[#allocation40 + $0xc8] ss:$16 sps:$4 sm:$0xff]   ;;  %v16239_v37 = vld [vmem:[#allocation40 + $0xac] ss:$16 sps:$4 sm:$0xff]  }
0x1553   : > { %9462 = vmatprep.subr.bf16.mxu0 %v16173_v42  ;;  %9501 = vmatprep.subr.bf16.mxu1 %v16176_v61  ;;  %v16242_v42 = vld [vmem:[#allocation40 + $0x2ec] ss:$16 sps:$4 sm:$0xff]   ;;  %v16237_v61 = vld [vmem:[#allocation40 + $0xa8] ss:$16 sps:$4 sm:$0xff]  }
0x1556   : > { %9463 = vmatpush1.bf16.msra.mxu0 %v16171_v62  ;;  %9502 = vmatpush1.bf16.msra.mxu1 %v16174_v2  ;;  %v16240_v62 = vld [vmem:[#allocation40 + $0x2e8] ss:$16 sps:$4 sm:$0xff]   ;;  %v16245_v2 = vld [vmem:[#allocation40 + $0x8c] ss:$16 sps:$4 sm:$0xff]  }
0x1557   : > { %9464 = vmatprep.subr.bf16.mxu0 %v16179_v4  ;;  %9503 = vmatprep.subr.bf16.mxu1 %v16182_v5  ;;  %v16248_v4 = vld [vmem:[#allocation40 + $0x2cc] ss:$16 sps:$4 sm:$0xff]   ;;  %v16243_v5 = vld [vmem:[#allocation40 + $0x88] ss:$16 sps:$4 sm:$0xff]  }
0x155a   : > { %9465 = vmatpush2.bf16.msra.mxu0 %v16177_v6  ;;  %9504 = vmatpush1.bf16.msra.mxu1 %v16180_v8  ;;  %v16246_v6 = vld [vmem:[#allocation40 + $0x2c8] ss:$16 sps:$4 sm:$0xff]   ;;  %v16251_v8 = vld [vmem:[#allocation40 + $0x6c] ss:$16 sps:$4 sm:$0xff]  }
0x155b   : > { %9466 = vmatprep.subr.bf16.mxu0 %v16185_v12  ;;  %9505 = vmatprep.subr.bf16.mxu1 %v16188_v41  ;;  %v16254_v12 = vld [vmem:[#allocation40 + $0x2ac] ss:$16 sps:$4 sm:$0xff]   ;;  %v16252_v41 = vld [vmem:[#allocation40 + $0x2a8] ss:$16 sps:$4 sm:$0xff]  }
0x155e   : > { %9467 = vmatpush2.bf16.msra.mxu0 %v16183_v43  ;;  %9506 = vmatpush1.bf16.msra.mxu1 %v16186_v21  ;;  %v16257_v43 = vld [vmem:[#allocation40 + $0x4c] ss:$16 sps:$4 sm:$0xff]  }
0x155f   : > { %9468 = vmatprep.subr.bf16.mxu0 %v16191_v46  ;;  %9507 = vmatprep.subr.bf16.mxu1 %v16194_v16  ;;  %v16260_v21 = vld [vmem:[#allocation40 + $0x28c] ss:$16 sps:$4 sm:$0xff]   ;;  %v16255_v46 = vld [vmem:[#allocation40 + $0x48] ss:$16 sps:$4 sm:$0xff]  }
0x1560   : > { %v16258_v16 = vld [vmem:[#allocation40 + $0x288] ss:$16 sps:$4 sm:$0xff]  }
0x1562   : > { %9469 = vmatpush2.bf16.msra.mxu0 %v16189_v27  ;;  %9508 = vmatpush2.bf16.msra.mxu1 %v16192_v52  ;;  %v16263_v27 = vld [vmem:[#allocation40 + $0x2c] ss:$16 sps:$4 sm:$0xff]   ;;  %v16261_v52 = vld [vmem:[#allocation40 + $0x28] ss:$16 sps:$4 sm:$0xff]  }
0x1563   : > { %9470 = vmatprep.subr.bf16.mxu0 %v16197_v24  ;;  %9509 = vmatprep.subr.bf16.mxu1 %v16200_v28  ;;  %v16264_v24 = vld [vmem:[#allocation40 + $0x268] ss:$16 sps:$4 sm:$0xff]   ;;  %v16269_v28 = vld [vmem:[#allocation40 + $0xc] ss:$16 sps:$4 sm:$0xff]  }
0x1566   : > { %9471 = vmatpush2.bf16.msra.mxu0 %v16195_v25  ;;  %9510 = vmatpush2.bf16.msra.mxu1 %v16198_v15  ;;  %v16272_v25 = vld [vmem:[#allocation40 + $0x24c] ss:$16 sps:$4 sm:$0xff]   ;;  %v16267_v15 = vld [vmem:[#allocation40 + $0x8] ss:$16 sps:$4 sm:$0xff]  }
0x1567   : > { %9472 = vmatprep.subr.bf16.mxu0 %v16203_v17  ;;  %9511 = vmatprep.subr.bf16.mxu1 %v16206_v22  ;;  %v16270_v17 = vld [vmem:[#allocation40 + $0x248] ss:$16 sps:$4 sm:$0xff]   ;;  %v16275_v22 = vld [vmem:[#allocation40 + $0x1ec] ss:$16 sps:$4 sm:$0xff]  }
0x156a   : > { %9473 = vmatpush2.bf16.msra.mxu0 %v16201_v7  ;;  %9512 = vmatpush2.bf16.msra.mxu1 %v16204_v9  ;;  %v16278_v7 = vld [vmem:[#allocation40 + $0x22c] ss:$16 sps:$4 sm:$0xff]   ;;  %v16273_v9 = vld [vmem:[#allocation40 + $0x1e8] ss:$16 sps:$4 sm:$0xff]  }
0x156b   : > { %9474 = vmatprep.subr.bf16.mxu0 %v16209_v23  ;;  %9513 = vmatprep.subr.bf16.mxu1 %v16212_v53  ;;  %v16276_v23 = vld [vmem:[#allocation40 + $0x228] ss:$16 sps:$4 sm:$0xff]   ;;  %v16281_v53 = vld [vmem:[#allocation40 + $0x1cc] ss:$16 sps:$4 sm:$0xff]  }
0x156e   : > { %9475 = vmatpush2.bf16.msra.mxu0 %v16207_v63  ;;  %9514 = vmatpush2.bf16.msra.mxu1 %v16210_v1  ;;  %v16284_v63 = vld [vmem:[#allocation40 + $0x20c] ss:$16 sps:$4 sm:$0xff]   ;;  %v16279_v1 = vld [vmem:[#allocation40 + $0x1c8] ss:$16 sps:$4 sm:$0xff]  }
0x156f   : > { %9476 = vmatprep.subr.bf16.mxu0 %v16215_v29  ;;  %9515 = vmatprep.subr.bf16.mxu1 %v16218_v14  ;;  %v16282_v29 = vld [vmem:[#allocation40 + $0x208] ss:$16 sps:$4 sm:$0xff]   ;;  %v16287_v14 = vld [vmem:[#allocation40 + $0x1ac] ss:$16 sps:$4 sm:$0xff]  }
0x1572   : > { %9477 = vmatpush2.bf16.msra.mxu0 %v16213_v45  ;;  %9516 = vmatpush2.bf16.msra.mxu1 %v16216_v54  ;;  %v16290_v45 = vld [vmem:[#allocation40 + $0x3ec] ss:$16 sps:$4 sm:$0xff]   ;;  %v16285_v54 = vld [vmem:[#allocation40 + $0x1a8] ss:$16 sps:$4 sm:$0xff]  }
0x1573   : > { %9478 = vmatprep.subr.bf16.mxu0 %v16221_v38  ;;  %9517 = vmatprep.subr.bf16.mxu1 %v16224_v39  ;;  %v16288_v38 = vld [vmem:[#allocation40 + $0x3e8] ss:$16 sps:$4 sm:$0xff]   ;;  %v16293_v39 = vld [vmem:[#allocation40 + $0x18c] ss:$16 sps:$4 sm:$0xff]  }
0x1576   : > { %9479 = vmatpush2.bf16.msra.mxu0 %v16219_v44  ;;  %9518 = vmatpush2.bf16.msra.mxu1 %v16222_v48  ;;  %v16296_v44 = vld [vmem:[#allocation40 + $0x3cc] ss:$16 sps:$4 sm:$0xff]   ;;  %v16291_v48 = vld [vmem:[#allocation40 + $0x188] ss:$16 sps:$4 sm:$0xff]  }
0x1577   : > { %9519 = vmatprep.subr.bf16.mxu1 %v16227_v49  ;;  %9534 = vmatprep.subr.bf16.mxu0 %v16230_v50  ;;  %v16294_v49 = vld [vmem:[#allocation40 + $0x3c8] ss:$16 sps:$4 sm:$0xff]   ;;  %v16299_v50 = vld [vmem:[#allocation40 + $0x16c] ss:$16 sps:$4 sm:$0xff]  }
0x1579   : > { %9481 = vmatmul.mubr.bf16.vlgmr.msra.gmra.mxu0 %v18957_v56 }
0x157a   : > { %9520 = vmatpush2.bf16.msra.mxu1 %v16225_v55  ;;  %9535 = vmatpush1.bf16.msra.mxu0 %v16228_v10  ;;  %v16302_v55 = vld [vmem:[#allocation40 + $0x3ac] ss:$16 sps:$4 sm:$0xff]   ;;  %v16297_v10 = vld [vmem:[#allocation40 + $0x168] ss:$16 sps:$4 sm:$0xff]  }
0x157b   : > { %9521 = vmatprep.subr.bf16.mxu1 %v16233_v36  ;;  %9536 = vmatprep.subr.bf16.mxu0 %v16236_v47  ;;  %v16300_v36 = vld [vmem:[#allocation40 + $0x3a8] ss:$16 sps:$4 sm:$0xff]   ;;  %v16305_v47 = vld [vmem:[#allocation40 + $0x14c] ss:$16 sps:$4 sm:$0xff]  }
0x157c   : > { %9566 = vmatprep.mubr.bf16.mxu0 %v18959_v30  ;;  %v16249_v30 = vld [vmem:[#allocation40 + $0x68] ss:$16 sps:$4 sm:$0xff]  }
0x157e   : > { %9522 = vmatpush2.bf16.msra.mxu1 %v16231_v60  ;;  %9537 = vmatpush1.bf16.msra.mxu0 %v16234_v11  ;;  %v16308_v60 = vld [vmem:[#allocation40 + $0x38c] ss:$16 sps:$4 sm:$0xff]   ;;  %v16303_v11 = vld [vmem:[#allocation40 + $0x148] ss:$16 sps:$4 sm:$0xff]  }
0x157f   : > { %9538 = vmatprep.subr.bf16.mxu0 %v16239_v37  ;;  %9577 = vmatprep.subr.bf16.mxu1 %v16242_v42  ;;  %v16306_v37 = vld [vmem:[#allocation40 + $0x388] ss:$16 sps:$4 sm:$0xff]   ;;  %v16311_v42 = vld [vmem:[#allocation40 + $0x12c] ss:$16 sps:$4 sm:$0xff]  }
0x1581   : > { %9524 = vmatmul.mubr.bf16.vlgmr.msra.gmra.mxu1 %v18961_v32 }
0x1582   : > { %9539 = vmatpush1.bf16.msra.mxu0 %v16237_v61  ;;  %9578 = vmatpush1.bf16.msra.mxu1 %v16240_v62  ;;  %v16314_v61 = vld [vmem:[#allocation40 + $0x36c] ss:$16 sps:$4 sm:$0xff]   ;;  %v16309_v62 = vld [vmem:[#allocation40 + $0x128] ss:$16 sps:$4 sm:$0xff]  }
0x1583   : > { %9609 = vmatprep.mubr.bf16.mxu1 %v18965_v59  ;;  %9540 = vmatprep.subr.bf16.mxu0 %v16245_v2  ;;  %v16266_v59 = vld [vmem:[#allocation40 + $0x26c] ss:$16 sps:$4 sm:$0xff]   ;;  %v16312_v2 = vld [vmem:[#allocation40 + $0x368] ss:$16 sps:$4 sm:$0xff]  }
0x1584   : > { %9579 = vmatprep.subr.bf16.mxu1 %v16248_v4  ;;  %v16317_v4 = vld [vmem:[#allocation40 + $0x10c] ss:$16 sps:$4 sm:$0xff]  }
0x1586   : > { %9541 = vmatpush1.bf16.msra.mxu0 %v16243_v5  ;;  %9580 = vmatpush1.bf16.msra.mxu1 %v16246_v6  ;;  %v16320_v5 = vld [vmem:[#allocation40 + $0x34c] ss:$16 sps:$4 sm:$0xff]   ;;  %v16315_v6 = vld [vmem:[#allocation40 + $0x108] ss:$16 sps:$4 sm:$0xff]  }
0x1587   : > { %9542 = vmatprep.subr.bf16.mxu0 %v16251_v8  ;;  %9581 = vmatprep.subr.bf16.mxu1 %v16254_v12  ;;  %v16318_v8 = vld [vmem:[#allocation40 + $0x348] ss:$16 sps:$4 sm:$0xff]   ;;  %v16323_v12 = vld [vmem:[#allocation40 + $0x32c] ss:$16 sps:$4 sm:$0xff]  }
0x158a   : > { %9543 = vmatpush1.bf16.msra.mxu0 %v16249_v30  ;;  %9582 = vmatpush1.bf16.msra.mxu1 %v16252_v41  ;;  %v16321_v30 = vld [vmem:[#allocation40 + $0x328] ss:$16 sps:$4 sm:$0xff]   ;;  %v16326_v41 = vld [vmem:[#allocation40 + $0x30c] ss:$16 sps:$4 sm:$0xff]  }
0x158b   : > { %9544 = vmatprep.subr.bf16.mxu0 %v16257_v43  ;;  %9583 = vmatprep.subr.bf16.mxu1 %v16260_v21  ;;  %v16324_v21 = vld [vmem:[#allocation40 + $0x308] ss:$16 sps:$4 sm:$0xff]  }
0x158e   : > { %9545 = vmatpush1.bf16.msra.mxu0 %v16255_v46  ;;  %9584 = vmatpush1.bf16.msra.mxu1 %v16258_v16  ;;  %v16327_v46 = vld [vmem:[#allocation39 + $0x10] sm:$0xff]  }
0x158f   : > { %9546 = vmatprep.subr.bf16.mxu0 %v16263_v27  ;;  %9585 = vmatprep.subr.bf16.mxu1 %v16266_v59 }
0x1592   : > { %9547 = vmatpush1.bf16.msra.mxu0 %v16261_v52  ;;  %9586 = vmatpush1.bf16.msra.mxu1 %v16264_v24 }
0x1593   : > { %9548 = vmatprep.subr.bf16.mxu0 %v16269_v28  ;;  %9587 = vmatprep.subr.bf16.mxu1 %v16272_v25 }
0x1596   : > { %9549 = vmatpush1.bf16.msra.mxu0 %v16267_v15  ;;  %9588 = vmatpush1.bf16.msra.mxu1 %v16270_v17  ;;  %v16330_v15 = vld [vmem:[#allocation40 + $0x8e4] ss:$16 sps:$4 sm:$0xff]  }
0x1597   : > { %9550 = vmatprep.subr.bf16.mxu0 %v16275_v22  ;;  %9589 = vmatprep.subr.bf16.mxu1 %v16278_v7  ;;  %v16333_v17 = vld [vmem:[#allocation40 + $0x8c4] ss:$16 sps:$4 sm:$0xff]   ;;  %v16337_v22 = vld [vmem:[#allocation40 + $0xae0] ss:$16 sps:$4 sm:$0xff]  }
0x1598   : > { %v16331_v7 = vld [vmem:[#allocation40 + $0x8c0] ss:$16 sps:$4 sm:$0xff]  }
0x159a   : > { %9551 = vmatpush2.bf16.msra.mxu0 %v16273_v9  ;;  %9590 = vmatpush1.bf16.msra.mxu1 %v16276_v23  ;;  %v16345_v9 = vld [vmem:[#allocation40 + $0xac4] ss:$16 sps:$4 sm:$0xff]  }
0x159b   : > { %9552 = vmatprep.subr.bf16.mxu0 %v16281_v53  ;;  %9591 = vmatprep.subr.bf16.mxu1 %v16284_v63  ;;  %v16336_v23 = vld [vmem:[#allocation40 + $0x8a4] ss:$16 sps:$4 sm:$0xff]   ;;  %v16343_v53 = vld [vmem:[#allocation40 + $0xac0] ss:$16 sps:$4 sm:$0xff]  }
0x159c   : > { %v16351_v63 = vld [vmem:[#allocation40 + $0xaa4] ss:$16 sps:$4 sm:$0xff]  }
0x159e   : > { %9553 = vmatpush2.bf16.msra.mxu0 %v16279_v1  ;;  %9592 = vmatpush1.bf16.msra.mxu1 %v16282_v29  ;;  %v16334_v1 = vld [vmem:[#allocation40 + $0x8a0] ss:$16 sps:$4 sm:$0xff]   ;;  %v16342_v29 = vld [vmem:[#allocation40 + $0x884] ss:$16 sps:$4 sm:$0xff]  }
0x159f   : > { %9554 = vmatprep.subr.bf16.mxu0 %v16287_v14  ;;  %9593 = vmatprep.subr.bf16.mxu1 %v16290_v45  ;;  %v16349_v14 = vld [vmem:[#allocation40 + $0xaa0] ss:$16 sps:$4 sm:$0xff]   ;;  %v16357_v45 = vld [vmem:[#allocation40 + $0xa84] ss:$16 sps:$4 sm:$0xff]  }
0x15a2   : > { %9555 = vmatpush2.bf16.msra.mxu0 %v16285_v54  ;;  %9594 = vmatpush2.bf16.msra.mxu1 %v16288_v38  ;;  %v16340_v54 = vld [vmem:[#allocation40 + $0x880] ss:$16 sps:$4 sm:$0xff]   ;;  %v16348_v38 = vld [vmem:[#allocation40 + $0x864] ss:$16 sps:$4 sm:$0xff]  }
0x15a3   : > { %9556 = vmatprep.subr.bf16.mxu0 %v16293_v39  ;;  %9595 = vmatprep.subr.bf16.mxu1 %v16296_v44  ;;  %v16355_v39 = vld [vmem:[#allocation40 + $0xa80] ss:$16 sps:$4 sm:$0xff]   ;;  %v16363_v44 = vld [vmem:[#allocation40 + $0xa64] ss:$16 sps:$4 sm:$0xff]  }
0x15a6   : > { %9557 = vmatpush2.bf16.msra.mxu0 %v16291_v48  ;;  %9596 = vmatpush2.bf16.msra.mxu1 %v16294_v49  ;;  %v16346_v48 = vld [vmem:[#allocation40 + $0x860] ss:$16 sps:$4 sm:$0xff]   ;;  %v16354_v49 = vld [vmem:[#allocation40 + $0x844] ss:$16 sps:$4 sm:$0xff]  }
0x15a7   : > { %9558 = vmatprep.subr.bf16.mxu0 %v16299_v50  ;;  %9597 = vmatprep.subr.bf16.mxu1 %v16302_v55  ;;  %v16361_v50 = vld [vmem:[#allocation40 + $0xa60] ss:$16 sps:$4 sm:$0xff]   ;;  %v16369_v55 = vld [vmem:[#allocation40 + $0xa44] ss:$16 sps:$4 sm:$0xff]  }
0x15aa   : > { %9559 = vmatpush2.bf16.msra.mxu0 %v16297_v10  ;;  %9598 = vmatpush2.bf16.msra.mxu1 %v16300_v36  ;;  %v16352_v10 = vld [vmem:[#allocation40 + $0x840] ss:$16 sps:$4 sm:$0xff]   ;;  %v16360_v36 = vld [vmem:[#allocation40 + $0x824] ss:$16 sps:$4 sm:$0xff]  }
0x15ab   : > { %9560 = vmatprep.subr.bf16.mxu0 %v16305_v47  ;;  %9599 = vmatprep.subr.bf16.mxu1 %v16308_v60  ;;  %v16367_v47 = vld [vmem:[#allocation40 + $0xa40] ss:$16 sps:$4 sm:$0xff]   ;;  %v16375_v60 = vld [vmem:[#allocation40 + $0xa24] ss:$16 sps:$4 sm:$0xff]  }
0x15ae   : > { %9561 = vmatpush2.bf16.msra.mxu0 %v16303_v11  ;;  %9600 = vmatpush2.bf16.msra.mxu1 %v16306_v37  ;;  %v16358_v11 = vld [vmem:[#allocation40 + $0x820] ss:$16 sps:$4 sm:$0xff]   ;;  %v16366_v37 = vld [vmem:[#allocation40 + $0x804] ss:$16 sps:$4 sm:$0xff]  }
0x15af   : > { %9562 = vmatprep.subr.bf16.mxu0 %v16311_v42  ;;  %9601 = vmatprep.subr.bf16.mxu1 %v16314_v61  ;;  %v16373_v42 = vld [vmem:[#allocation40 + $0xa20] ss:$16 sps:$4 sm:$0xff]   ;;  %v16381_v61 = vld [vmem:[#allocation40 + $0xa04] ss:$16 sps:$4 sm:$0xff]  }
0x15b2   : > { %9563 = vmatpush2.bf16.msra.mxu0 %v16309_v62  ;;  %9602 = vmatpush2.bf16.msra.mxu1 %v16312_v2  ;;  %v16364_v62 = vld [vmem:[#allocation40 + $0x800] ss:$16 sps:$4 sm:$0xff]   ;;  %v16372_v2 = vld [vmem:[#allocation40 + $0x9e4] ss:$16 sps:$4 sm:$0xff]  }
0x15b3   : > { %9564 = vmatprep.subr.bf16.mxu0 %v16317_v4  ;;  %9603 = vmatprep.subr.bf16.mxu1 %v16320_v5  ;;  %v16379_v4 = vld [vmem:[#allocation40 + $0xa00] ss:$16 sps:$4 sm:$0xff]   ;;  %v16387_v5 = vld [vmem:[#allocation40 + $0xbe4] ss:$16 sps:$4 sm:$0xff]  }
0x15b6   : > { %9565 = vmatpush2.bf16.msra.mxu0 %v16315_v6  ;;  %9604 = vmatpush2.bf16.msra.mxu1 %v16318_v8  ;;  %v16370_v6 = vld [vmem:[#allocation40 + $0x9e0] ss:$16 sps:$4 sm:$0xff]   ;;  %v16378_v8 = vld [vmem:[#allocation40 + $0x9c4] ss:$16 sps:$4 sm:$0xff]  }
0x15b7   : > { %9645 = vmatprep.subr.bf16.mxu0 %v18926_v3  ;;  %9605 = vmatprep.subr.bf16.mxu1 %v16323_v12  ;;  %v16385_v12 = vld [vmem:[#allocation40 + $0xbe0] ss:$16 sps:$4 sm:$0xff]  }
0x15b9   : > { %9567 = vmatmul.mubr.bf16.vlgmr.msra.gmra.mxu0 %v18957_v56  ;;  %v8670_v43 = vpop.f32.mrf.mxu0 }
0x15ba   : > { %9606 = vmatpush2.bf16.msra.mxu1 %v16321_v30  ;;  %9646 = vmatpush1.bf16.msra.mxu0 %v18931_v51  ;;  %v16393_v30 = vld [vmem:[#allocation40 + $0xbc4] ss:$16 sps:$4 sm:$0xff]  }
0x15bb   : > { %9607 = vmatprep.subr.bf16.mxu1 %v16326_v41  ;;  %9663 = vmatprep.mubr.bf16.mxu0 %v17700_v0  ;;  %v8672_v16 = vpop.f32.mrf.mxu0  ;;  %v16376_v41 = vld [vmem:[#allocation40 + $0x9c0] ss:$16 sps:$4 sm:$0xff]  }
0x15bc   : > { %10490 = vmatprep.subr.bf16.mxu0 %v16330_v15  ;;  %v16400_v15 = vld [vmem:[#allocation40 + $0x940] ss:$16 sps:$4 sm:$0xff]  }
0x15bd   : > { %v8674_v27 = vpop.f32.mrf.mxu0 }
0x15be   : > { %9608 = vmatpush2.bf16.msra.mxu1 %v16324_v21  ;;  %v16391_v21 = vld [vmem:[#allocation40 + $0xbc0] ss:$16 sps:$4 sm:$0xff]  }
0x15bf   : > { %9688 = vmatprep.subr.bf16.mxu1 %v18942_v33  ;;  %v8676_v24 = vpop.f32.mrf.mxu0 }
0x15c1   : > { %9610 = vmatmul.mubr.bf16.vlgmr.msra.gmra.mxu1 %v18961_v32  ;;  %13956 = vmatmul.mubr.msk.bf16.vlgmr.msra.gmra.mxu0 %vm4556_vm3, %v16327_v46  ;;  %v8713_v3 = vpop.f32.mrf.mxu1  ;;  %v16328_v32 = vld [vmem:[#allocation40 + $0x8e0] ss:$16 sps:$4 sm:$0xff]  }
0x15c2   : > { %v18986_v56 = vadd.f32 %v8713_v3, %v8670_v43  ;;  %9689 = vmatpush1.bf16.msra.mxu1 %v18947_v35  ;;  %9706 = vmatprep.mubr.bf16.mxu1 %v17700_v0  ;;  %v16339_v35 = vld [vmem:[#allocation40 + $0xae4] ss:$16 sps:$4 sm:$0xff]   ;;  %v16388_v3 = vld [vmem:[#allocation40 + $0x980] ss:$16 sps:$4 sm:$0xff]  }
0x15c3   : > { %v8715_v51 = vpop.f32.mrf.mxu1  ;;  %10491 = vmatpush1.bf16.msra.mxu0 %v16328_v32  ;;  %10533 = vmatprep.subr.bf16.mxu1 %v16339_v35  ;;  %v16384_v43 = vld [vmem:[#allocation40 + $0x9a4] ss:$16 sps:$4 sm:$0xff]  }
0x15c4   : > { %v18990_v59 = vadd.f32 %v8715_v51, %v8672_v16  ;;  %10492 = vmatprep.subr.bf16.mxu0 %v16333_v17  ;;  %v16390_v16 = vld [vmem:[#allocation40 + $0x984] ss:$16 sps:$4 sm:$0xff]   ;;  %v16394_v51 = vld [vmem:[#allocation40 + $0x960] ss:$16 sps:$4 sm:$0xff]  }
0x15c5   : > { %v8717_v52 = vpop.f32.mrf.mxu1  ;;  %v16402_v17 = vld [vmem:[#allocation40 + $0x944] ss:$16 sps:$4 sm:$0xff]  }
0x15c6   : > { %v18992_v28 = vadd.f32 %v8717_v52, %v8674_v27  ;;  %v16396_v52 = vld [vmem:[#allocation40 + $0x964] ss:$16 sps:$4 sm:$0xff]  }
0x15c7   : > { %v8719_v33 = vpop.f32.mrf.mxu1  ;;  %10493 = vmatpush1.bf16.msra.mxu0 %v16331_v7  ;;  %v16405_v35 = vld [vmem:[#allocation40 + $0xb84] ss:$16 sps:$4 sm:$0xff]  }
0x15c8   : > { %v18994_v25 = vadd.f32 %v8719_v33, %v8676_v24  ;;  %10494 = vmatprep.subr.bf16.mxu0 %v16336_v23  ;;  %v16397_v24 = vld [vmem:[#allocation40 + $0xba0] ss:$16 sps:$4 sm:$0xff]   ;;  %v16399_v33 = vld [vmem:[#allocation40 + $0xba4] ss:$16 sps:$4 sm:$0xff]  }
0x15c9   : > { %13957 = vmatmul.mubr.msk.bf16.vlgmr.msra.gmra.mxu1 %vm4556_vm3, %v16327_v46  ;;  %v16382_v46 = vld [vmem:[#allocation40 + $0x9a0] ss:$16 sps:$4 sm:$0xff]  }
0x15ca   : > { %10534 = vmatpush1.bf16.msra.mxu1 %v16337_v22  ;;  %v16403_v22 = vld [vmem:[#allocation40 + $0xb80] ss:$16 sps:$4 sm:$0xff]  }
0x15cb   : > { %10535 = vmatprep.subr.bf16.mxu1 %v16345_v9  ;;  %10495 = vmatpush1.bf16.msra.mxu0 %v16334_v1  ;;  %v16409_v1 = vld [vmem:[#allocation40 + $0xb60] ss:$16 sps:$4 sm:$0xff]  }
0x15cc   : > { %10496 = vmatprep.subr.bf16.mxu0 %v16342_v29 }
0x15ce   : > { %10536 = vmatpush1.bf16.msra.mxu1 %v16343_v53  ;;  %v16406_v53 = vld [vmem:[#allocation40 + $0x920] ss:$16 sps:$4 sm:$0xff]  }
0x15cf   : > { %10537 = vmatprep.subr.bf16.mxu1 %v16351_v63  ;;  %10497 = vmatpush1.bf16.msra.mxu0 %v16340_v54  ;;  %v16408_v63 = vld [vmem:[#allocation40 + $0x924] ss:$16 sps:$4 sm:$0xff]  }
0x15d0   : > { %10498 = vmatprep.subr.bf16.mxu0 %v16348_v38 }
0x15d2   : > { %10538 = vmatpush1.bf16.msra.mxu1 %v16349_v14  ;;  %v16411_v14 = vld [vmem:[#allocation40 + $0xb64] ss:$16 sps:$4 sm:$0xff]  }
0x15d3   : > { %10539 = vmatprep.subr.bf16.mxu1 %v16357_v45  ;;  %10499 = vmatpush1.bf16.msra.mxu0 %v16346_v48  ;;  %v16414_v48 = vld [vmem:[#allocation40 + $0x904] ss:$16 sps:$4 sm:$0xff]  }
0x15d4   : > { %10500 = vmatprep.subr.bf16.mxu0 %v16354_v49  ;;  %v16415_v49 = vld [vmem:[#allocation40 + $0xb40] ss:$16 sps:$4 sm:$0xff]  }
0x15d6   : > { %10540 = vmatpush1.bf16.msra.mxu1 %v16355_v39 }
0x15d7   : > { %10541 = vmatprep.subr.bf16.mxu1 %v16363_v44  ;;  %10501 = vmatpush1.bf16.msra.mxu0 %v16352_v10  ;;  %v16412_v44 = vld [vmem:[#allocation40 + $0x900] ss:$16 sps:$4 sm:$0xff]  }
0x15d8   : > { %10502 = vmatprep.subr.bf16.mxu0 %v16360_v36  ;;  %v16418_v36 = vld [vmem:[#allocation40 + $0xb20] ss:$16 sps:$4 sm:$0xff]  }
0x15da   : > { %10542 = vmatpush1.bf16.msra.mxu1 %v16361_v50 }
0x15db   : > { %10543 = vmatprep.subr.bf16.mxu1 %v16369_v55  ;;  %10503 = vmatpush1.bf16.msra.mxu0 %v16358_v11  ;;  %v16417_v55 = vld [vmem:[#allocation40 + $0xb44] ss:$16 sps:$4 sm:$0xff]   ;;  %v16424_v11 = vld [vmem:[#allocation40 + $0xb00] ss:$16 sps:$4 sm:$0xff]  }
0x15dc   : > { %10504 = vmatprep.subr.bf16.mxu0 %v16366_v37  ;;  %v16426_v37 = vld [vmem:[#allocation40 + $0xb04] ss:$16 sps:$4 sm:$0xff]  }
0x15de   : > { %10544 = vmatpush1.bf16.msra.mxu1 %v16367_v47  ;;  %v16420_v47 = vld [vmem:[#allocation40 + $0xb24] ss:$16 sps:$4 sm:$0xff]  }
0x15df   : > { %10545 = vmatprep.subr.bf16.mxu1 %v16375_v60  ;;  %10505 = vmatpush1.bf16.msra.mxu0 %v16364_v62  ;;  %v16423_v60 = vld [vmem:[#allocation40 + $0x8ec] ss:$16 sps:$4 sm:$0xff]  }
0x15e0   : > { %10506 = vmatprep.subr.bf16.mxu0 %v16372_v2 }
0x15e2   : > { %10546 = vmatpush1.bf16.msra.mxu1 %v16373_v42  ;;  %v16435_v42 = vld [vmem:[#allocation40 + $0xaec] ss:$16 sps:$4 sm:$0xff]  }
0x15e3   : > { %10547 = vmatprep.subr.bf16.mxu1 %v16381_v61  ;;  %10507 = vmatpush2.bf16.msra.mxu0 %v16370_v6 }
0x15e4   : > { %10508 = vmatprep.subr.bf16.mxu0 %v16378_v8 }
0x15e6   : > { %10548 = vmatpush1.bf16.msra.mxu1 %v16379_v4 }
0x15e7   : > { %10549 = vmatprep.subr.bf16.mxu1 %v16387_v5  ;;  %10509 = vmatpush2.bf16.msra.mxu0 %v16376_v41 }
0x15e8   : > { %10510 = vmatprep.subr.bf16.mxu0 %v16384_v43 }
0x15ea   : > { %10550 = vmatpush2.bf16.msra.mxu1 %v16385_v12 }
0x15eb   : > { %10551 = vmatprep.subr.bf16.mxu1 %v16393_v30  ;;  %10511 = vmatpush2.bf16.msra.mxu0 %v16382_v46 }
0x15ec   : > { %10512 = vmatprep.subr.bf16.mxu0 %v16390_v16 }
0x15ee   : > { %10552 = vmatpush2.bf16.msra.mxu1 %v16391_v21 }
0x15ef   : > { %10513 = vmatpush2.bf16.msra.mxu0 %v16388_v3  ;;  %10553 = vmatprep.subr.bf16.mxu1 %v16399_v33 }
0x15f0   : > { %10514 = vmatprep.subr.bf16.mxu0 %v16396_v52 }
0x15f2   : > { %10554 = vmatpush2.bf16.msra.mxu1 %v16397_v24 }
0x15f3   : > { %10515 = vmatpush2.bf16.msra.mxu0 %v16394_v51  ;;  %10555 = vmatprep.subr.bf16.mxu1 %v16405_v35 }
0x15f4   : > { %10516 = vmatprep.subr.bf16.mxu0 %v16402_v17 }
0x15f6   : > { %10556 = vmatpush2.bf16.msra.mxu1 %v16403_v22 }
0x15f7   : > { %10517 = vmatpush2.bf16.msra.mxu0 %v16400_v15  ;;  %10557 = vmatprep.subr.bf16.mxu1 %v16411_v14 }
0x15f8   : > { %10518 = vmatprep.subr.bf16.mxu0 %v16408_v63 }
0x15f9   : > { %v8756_v27 = vpop.f32.mrf.mxu0 }
0x15fa   : > { %10558 = vmatpush2.bf16.msra.mxu1 %v16409_v1 }
0x15fb   : > { %v8758_v32 = vpop.f32.mrf.mxu0  ;;  %10519 = vmatpush2.bf16.msra.mxu0 %v16406_v53  ;;  %10559 = vmatprep.subr.bf16.mxu1 %v16417_v55 }
0x15fc   : > { %10520 = vmatprep.subr.bf16.mxu0 %v16414_v48  ;;  %v16427_v48 = vld [vmem:[#allocation40 + $0x8c8] ss:$16 sps:$4 sm:$0xff]  }
0x15fd   : > { %v8760_v9 = vpop.f32.mrf.mxu0 }
0x15fe   : > { %10560 = vmatpush2.bf16.msra.mxu1 %v16415_v49 }
0x15ff   : > { %v8762_v38 = vpop.f32.mrf.mxu0  ;;  %10521 = vmatpush2.bf16.msra.mxu0 %v16412_v44  ;;  %10561 = vmatprep.subr.bf16.mxu1 %v16420_v47  ;;  %v16433_v47 = vld [vmem:[#allocation40 + $0xae8] ss:$16 sps:$4 sm:$0xff]  }
0x1600   : > { %10576 = vmatprep.subr.bf16.mxu0 %v16423_v60 }
0x1601   : > { %v8799_v7 = vpop.f32.mrf.mxu1 }
0x1602   : > { %v8800_v23 = vadd.f32 %v8799_v7, %v8756_v27  ;;  %10562 = vmatpush2.bf16.msra.mxu1 %v16418_v36  ;;  %v16430_v36 = vld [vmem:[#allocation40 + $0x8a8] ss:$16 sps:$4 sm:$0xff]  }
0x1603   : > { %v8801_v29 = vpop.f32.mrf.mxu1  ;;  %10563 = vmatprep.subr.bf16.mxu1 %v16426_v37  ;;  %v16441_v37 = vld [vmem:[#allocation40 + $0xacc] ss:$16 sps:$4 sm:$0xff]  }
0x1604   : > { %v8802_v45 = vadd.f32 %v8801_v29, %v8758_v32 }
0x1605   : > { %v8803_v54 = vpop.f32.mrf.mxu1 }
0x1606   : > { %v8804_v39 = vadd.f32 %v8803_v54, %v8760_v9  ;;  %10564 = vmatpush2.bf16.msra.mxu1 %v16424_v11  ;;  %v16421_v54 = vld [vmem:[#allocation40 + $0x8e8] ss:$16 sps:$4 sm:$0xff]   ;;  %v16438_v11 = vld [vmem:[#allocation40 + $0x88c] ss:$16 sps:$4 sm:$0xff]  }
0x1607   : > { %v8805_v50 = vpop.f32.mrf.mxu1  ;;  %10619 = vmatprep.subr.bf16.mxu1 %v16435_v42  ;;  %v16436_v42 = vld [vmem:[#allocation40 + $0x888] ss:$16 sps:$4 sm:$0xff]  }
0x1608   : > { %v8806_v10 = vadd.f32 %v8805_v50, %v8762_v38  ;;  %v16432_v50 = vld [vmem:[#allocation40 + $0x8ac] ss:$16 sps:$4 sm:$0xff]  }
0x1639   : > { %v9482_v61 = vpop.f32.mrf.mxu0 }
0x163a   : > { %v9483_v62 = vadd.f32 %v9482_v61, %v18986_v56  ;;  %v16439_v61 = vld [vmem:[#allocation40 + $0xac8] ss:$16 sps:$4 sm:$0xff]  }
0x163b   : > { %v9484_v2 = vpop.f32.mrf.mxu0 }
0x163c   : > { %v9485_v4 = vadd.f32 %v9484_v2, %v18990_v59  ;;  %v16447_v2 = vld [vmem:[#allocation40 + $0xaac] ss:$16 sps:$4 sm:$0xff]  }
0x163d   : > { %v9486_v5 = vpop.f32.mrf.mxu0 }
0x163e   : > { %v9487_v6 = vadd.f32 %v9486_v5, %v18992_v28  ;;  %v16445_v5 = vld [vmem:[#allocation40 + $0xaa8] ss:$16 sps:$4 sm:$0xff]  }
0x163f   : > { %v9488_v8 = vpop.f32.mrf.mxu0 }
0x1640   : > { %v9489_v12 = vadd.f32 %v9488_v8, %v18994_v25  ;;  %v16453_v8 = vld [vmem:[#allocation40 + $0xa8c] ss:$16 sps:$4 sm:$0xff]  }
0x1641   : > { %v9525_v30 = vpop.f32.mrf.mxu1 }
0x1642   : > { %v19001_v41 = vadd.f32 %v9525_v30, %v9483_v62  ;;  %v16444_v62 = vld [vmem:[#allocation40 + $0x86c] ss:$16 sps:$4 sm:$0xff]   ;;  %v16451_v30 = vld [vmem:[#allocation40 + $0xa88] ss:$16 sps:$4 sm:$0xff]  }
0x1643   : > { %v9527_v43 = vpop.f32.mrf.mxu1 }
0x1644   : > { %v19003_v21 = vadd.f32 %v9527_v43, %v9485_v4  ;;  %v16442_v4 = vld [vmem:[#allocation40 + $0x868] ss:$16 sps:$4 sm:$0xff]   ;;  %v16456_v43 = vld [vmem:[#allocation40 + $0x82c] ss:$16 sps:$4 sm:$0xff]  }
0x1645   : > { %v9529_v46 = vpop.f32.mrf.mxu1 }
0x1646   : > { %v19005_v16 = vadd.f32 %v9529_v46, %v9487_v6  ;;  %v16450_v6 = vld [vmem:[#allocation40 + $0x84c] ss:$16 sps:$4 sm:$0xff]  }
0x1647   : > { %v9531_v3 = vpop.f32.mrf.mxu1  ;;  %v16459_v46 = vld [vmem:[#allocation40 + $0xa6c] ss:$16 sps:$4 sm:$0xff]  }
0x1648   : > { %v19007_v56 = vadd.f32 %v9531_v3, %v9489_v12  ;;  %v16448_v12 = vld [vmem:[#allocation40 + $0x848] ss:$16 sps:$4 sm:$0xff]  }
0x1649   : > { %v16454_v3 = vld [vmem:[#allocation40 + $0x828] ss:$16 sps:$4 sm:$0xff]  }
0x1679   : > { %v9568_v27 = vpop.f32.mrf.mxu0 }
0x167a   : > { %v9569_v59 = vadd.f32 %v9568_v27, %v8800_v23  ;;  %v16457_v27 = vld [vmem:[#allocation40 + $0xa68] ss:$16 sps:$4 sm:$0xff]  }
0x167b   : > { %v9570_v51 = vpop.f32.mrf.mxu0 }
0x167c   : > { %v9571_v52 = vadd.f32 %v9570_v51, %v8802_v45  ;;  %v16465_v51 = vld [vmem:[#allocation40 + $0xa4c] ss:$16 sps:$4 sm:$0xff]  }
0x167d   : > { %v9572_v28 = vpop.f32.mrf.mxu0 }
0x167e   : > { %v9573_v24 = vadd.f32 %v9572_v28, %v8804_v39  ;;  %v16429_v39 = vld [vmem:[#allocation40 + $0x8cc] ss:$16 sps:$4 sm:$0xff]   ;;  %v16463_v28 = vld [vmem:[#allocation40 + $0xa48] ss:$16 sps:$4 sm:$0xff]  }
0x167f   : > { %v9574_v33 = vpop.f32.mrf.mxu0 }
0x1680   : > { %v9575_v25 = vadd.f32 %v9574_v33, %v8806_v10  ;;  %v16471_v33 = vld [vmem:[#allocation40 + $0xa2c] ss:$16 sps:$4 sm:$0xff]  }
0x1681   : > { %v9611_v32 = vpop.f32.mrf.mxu1  ;;  %v9665_v15 = vpop.f32.mrf.mxu0 }
0x1682   : > { %v19009_v17 = vadd.f32 %v9611_v32, %v9569_v59  ;;  %v16462_v59 = vld [vmem:[#allocation40 + $0x80c] ss:$16 sps:$4 sm:$0xff]   ;;  %v16469_v32 = vld [vmem:[#allocation40 + $0xa28] ss:$16 sps:$4 sm:$0xff]  }
0x1683   : > { %v9613_v22 = vpop.f32.mrf.mxu1  ;;  %v9667_v35 = vpop.f32.mrf.mxu0 }
0x1684   : > { %v19011_v7 = vadd.f32 %v9613_v22, %v9571_v52  ;;  %v16460_v52 = vld [vmem:[#allocation40 + $0x808] ss:$16 sps:$4 sm:$0xff]   ;;  %v16477_v22 = vld [vmem:[#allocation40 + $0xa0c] ss:$16 sps:$4 sm:$0xff]  }
0x1685   : > { %v9615_v9 = vpop.f32.mrf.mxu1  ;;  %v9669_v53 = vpop.f32.mrf.mxu0 }
0x1686   : > { %v19013_v63 = vadd.f32 %v9615_v9, %v9573_v24  ;;  %v19015_v1 = vpack.c.bf16 %v9669_v53, %v9665_v15  ;;  %v16468_v24 = vld [vmem:[#allocation40 + $0x9ec] ss:$16 sps:$4 sm:$0xff]   ;;  %v16475_v9 = vld [vmem:[#allocation40 + $0xa08] ss:$16 sps:$4 sm:$0xff]  }
0x1687   : > { %v9617_v23 = vpop.f32.mrf.mxu1  ;;  %v9671_v29 = vpop.f32.mrf.mxu0  ;;  %v16474_v15 = vld [vmem:[#allocation40 + $0x9cc] ss:$16 sps:$4 sm:$0xff]  }
0x1688   : > { %v19017_v14 = vadd.f32 %v9617_v23, %v9575_v25  ;;  %v9718_v45 = vpack.c.bf16 %v9671_v29, %v9667_v35  ;;  %v16466_v25 = vld [vmem:[#allocation40 + $0x9e8] ss:$16 sps:$4 sm:$0xff]   ;;  %v16480_v53 = vld [vmem:[#allocation40 + $0x9ac] ss:$16 sps:$4 sm:$0xff]  }
0x1689   : > { %v9708_v38 = vpop.f32.mrf.mxu1  ;;  %v16472_v35 = vld [vmem:[#allocation40 + $0x9c8] ss:$16 sps:$4 sm:$0xff]   ;;  %v16483_v23 = vld [vmem:[#allocation40 + $0xbec] ss:$16 sps:$4 sm:$0xff]  }
0x168a   : > { %10522 = vmatprep.mubr.bf16.mxu0 %v9718_v45  ;;  %v16478_v29 = vld [vmem:[#allocation40 + $0x9a8] ss:$16 sps:$4 sm:$0xff]  }
0x168b   : > { %v9710_v44 = vpop.f32.mrf.mxu1  ;;  %10523 = vmatmul.mubr.bf16.vlgmr.msra.gmra.mxu0 %v19015_v1 }
0x168c   : > { %10577 = vmatpush1.bf16.msra.mxu0 %v16421_v54  ;;  %10608 = vmatprep.mubr.bf16.mxu0 %v9718_v45  ;;  %v16481_v45 = vld [vmem:[#allocation40 + $0xbe8] ss:$16 sps:$4 sm:$0xff]   ;;  %v16486_v54 = vld [vmem:[#allocation40 + $0x98c] ss:$16 sps:$4 sm:$0xff]  }
0x168d   : > { %v9712_v49 = vpop.f32.mrf.mxu1  ;;  %10578 = vmatprep.subr.bf16.mxu0 %v16429_v39  ;;  %v16484_v39 = vld [vmem:[#allocation40 + $0x988] ss:$16 sps:$4 sm:$0xff]  }
0x168e   : > { %v19020_v60 = vpack.c.bf16 %v9712_v49, %v9708_v38  ;;  %v16489_v38 = vld [vmem:[#allocation40 + $0xbcc] ss:$16 sps:$4 sm:$0xff]  }
0x168f   : > { %v9714_v55 = vpop.f32.mrf.mxu1  ;;  %v16495_v49 = vld [vmem:[#allocation40 + $0xbac] ss:$16 sps:$4 sm:$0xff]  }
0x1690   : > { %v9720_v10 = vpack.c.bf16 %v9714_v55, %v9710_v44  ;;  %10579 = vmatpush1.bf16.msra.mxu0 %v16427_v48  ;;  %v16487_v44 = vld [vmem:[#allocation40 + $0xbc8] ss:$16 sps:$4 sm:$0xff]   ;;  %v16492_v48 = vld [vmem:[#allocation40 + $0x96c] ss:$16 sps:$4 sm:$0xff]  }
0x1691   : > { %10580 = vmatprep.subr.bf16.mxu0 %v16432_v50  ;;  %v16490_v50 = vld [vmem:[#allocation40 + $0x968] ss:$16 sps:$4 sm:$0xff]  }
0x1692   : > { %10565 = vmatprep.mubr.bf16.mxu1 %v9720_v10  ;;  %v16493_v55 = vld [vmem:[#allocation40 + $0xba8] ss:$16 sps:$4 sm:$0xff]  }
0x1693   : > { %10566 = vmatmul.mubr.bf16.vlgmr.msra.gmra.mxu1 %v19020_v60 }
0x1694   : > { %10581 = vmatpush1.bf16.msra.mxu0 %v16430_v36  ;;  %10620 = vmatpush1.bf16.msra.mxu1 %v16433_v47  ;;  %v16501_v36 = vld [vmem:[#allocation40 + $0xb8c] ss:$16 sps:$4 sm:$0xff]   ;;  %v16496_v47 = vld [vmem:[#allocation40 + $0x948] ss:$16 sps:$4 sm:$0xff]  }
0x1695   : > { %10651 = vmatprep.mubr.bf16.mxu1 %v9720_v10  ;;  %10582 = vmatprep.subr.bf16.mxu0 %v16438_v11  ;;  %v16498_v10 = vld [vmem:[#allocation40 + $0x94c] ss:$16 sps:$4 sm:$0xff]   ;;  %v16499_v11 = vld [vmem:[#allocation40 + $0xb88] ss:$16 sps:$4 sm:$0xff]  }
0x1696   : > { %10621 = vmatprep.subr.bf16.mxu1 %v16441_v37  ;;  %v16504_v37 = vld [vmem:[#allocation40 + $0x92c] ss:$16 sps:$4 sm:$0xff]  }
0x1698   : > { %10583 = vmatpush1.bf16.msra.mxu0 %v16436_v42  ;;  %10622 = vmatpush1.bf16.msra.mxu1 %v16439_v61  ;;  %v16507_v42 = vld [vmem:[#allocation40 + $0xb6c] ss:$16 sps:$4 sm:$0xff]   ;;  %v16502_v61 = vld [vmem:[#allocation40 + $0x928] ss:$16 sps:$4 sm:$0xff]  }
0x1699   : > { %10584 = vmatprep.subr.bf16.mxu0 %v16444_v62  ;;  %10623 = vmatprep.subr.bf16.mxu1 %v16447_v2  ;;  %v16505_v62 = vld [vmem:[#allocation40 + $0xb68] ss:$16 sps:$4 sm:$0xff]   ;;  %v16510_v2 = vld [vmem:[#allocation40 + $0x90c] ss:$16 sps:$4 sm:$0xff]  }
0x169c   : > { %10585 = vmatpush1.bf16.msra.mxu0 %v16442_v4  ;;  %10624 = vmatpush1.bf16.msra.mxu1 %v16445_v5  ;;  %v16513_v4 = vld [vmem:[#allocation40 + $0xb4c] ss:$16 sps:$4 sm:$0xff]   ;;  %v16508_v5 = vld [vmem:[#allocation40 + $0x908] ss:$16 sps:$4 sm:$0xff]  }
0x169d   : > { %10586 = vmatprep.subr.bf16.mxu0 %v16450_v6  ;;  %10625 = vmatprep.subr.bf16.mxu1 %v16453_v8  ;;  %v16511_v6 = vld [vmem:[#allocation40 + $0xb48] ss:$16 sps:$4 sm:$0xff]   ;;  %v16516_v8 = vld [vmem:[#allocation40 + $0xb2c] ss:$16 sps:$4 sm:$0xff]  }
0x16a0   : > { %10587 = vmatpush1.bf16.msra.mxu0 %v16448_v12  ;;  %10626 = vmatpush1.bf16.msra.mxu1 %v16451_v30  ;;  %v16514_v12 = vld [vmem:[#allocation40 + $0xb28] ss:$16 sps:$4 sm:$0xff]   ;;  %v16519_v30 = vld [vmem:[#allocation40 + $0xb0c] ss:$16 sps:$4 sm:$0xff]  }
0x16a1   : > { %10588 = vmatprep.subr.bf16.mxu0 %v16456_v43  ;;  %10627 = vmatprep.subr.bf16.mxu1 %v16459_v46  ;;  %v16522_v43 = vld [vmem:[%s19351_s16 + $0x174] ss:$8 sps:$4 sm:$0xff]   ;;  %v19029_v46 = vsel %vm5023_vm4, %v18906_v34, 0  ;;  %v16525_v34 = vld [vmem:[%s19351_s16 + $0x164] ss:$8 sps:$4 sm:$0xff]  }
0x16a4   : > { %10589 = vmatpush1.bf16.msra.mxu0 %v16454_v3  ;;  %10628 = vmatpush1.bf16.msra.mxu1 %v16457_v27  ;;  %v16517_v3 = vld [vmem:[#allocation40 + $0xb08] ss:$16 sps:$4 sm:$0xff]  }
0x16a5   : > { %10590 = vmatprep.subr.bf16.mxu0 %v16462_v59  ;;  %10629 = vmatprep.subr.bf16.mxu1 %v16465_v51  ;;  %v16520_v27 = vld [vmem:[%s19351_s16 + $0x170] ss:$8 sps:$4 sm:$0xff]   ;;  %v16528_v51 = vld [vmem:[%s19351_s16 + $0x154] ss:$8 sps:$4 sm:$0xff]  }
0x16a6   : > { %v10704_v59 = vld [vmem:[#allocation43] sm:$0xf] }
0x16a8   : > { %10591 = vmatpush1.bf16.msra.mxu0 %v16460_v52  ;;  %10630 = vmatpush1.bf16.msra.mxu1 %v16463_v28  ;;  %v16526_v52 = vld [vmem:[%s19351_s16 + $0x150] ss:$8 sps:$4 sm:$0xff]  }
0x16a9   : > { %10592 = vmatprep.subr.bf16.mxu0 %v16468_v24  ;;  %10631 = vmatprep.subr.bf16.mxu1 %v16471_v33  ;;  %v10790_v28 = vld [vmem:[#allocation43 + $0x4] sm:$0xf]  ;;  %v16529_v24 = vld [vmem:[%s19351_s16 + $0x140] ss:$8 sps:$4 sm:$0xff]  }
0x16aa   : > { %v16534_v33 = vld [vmem:[%s19351_s16 + $0x134] ss:$8 sps:$4 sm:$0xff]  }
0x16ac   : > { %10593 = vmatpush2.bf16.msra.mxu0 %v16466_v25  ;;  %10632 = vmatpush1.bf16.msra.mxu1 %v16469_v32  ;;  %v16532_v25 = vld [vmem:[%s19351_s16 + $0x130] ss:$8 sps:$4 sm:$0xff]   ;;  %v16570_v32 = vld [vmem:[%s19351_s16 + $0x74] ss:$8 sps:$4 sm:$0xff]  }
0x16ad   : > { %10594 = vmatprep.subr.bf16.mxu0 %v16474_v15  ;;  %10633 = vmatprep.subr.bf16.mxu1 %v16477_v22  ;;  %v16537_v15 = vld [vmem:[%s19351_s16 + $0x124] ss:$8 sps:$4 sm:$0xff]   ;;  %v16568_v22 = vld [vmem:[%s19351_s16 + $0x70] ss:$8 sps:$4 sm:$0xff]  }
0x16b0   : > { %10595 = vmatpush2.bf16.msra.mxu0 %v16472_v35  ;;  %10634 = vmatpush1.bf16.msra.mxu1 %v16475_v9  ;;  %v16573_v35 = vld [vmem:[%s19351_s16 + $0x64] ss:$8 sps:$4 sm:$0xff]   ;;  %v16571_v9 = vld [vmem:[%s19351_s16 + $0x60] ss:$8 sps:$4 sm:$0xff]  }
0x16b1   : > { %10596 = vmatprep.subr.bf16.mxu0 %v16480_v53  ;;  %10635 = vmatprep.subr.bf16.mxu1 %v16483_v23  ;;  %v16535_v53 = vld [vmem:[%s19351_s16 + $0x120] ss:$8 sps:$4 sm:$0xff]   ;;  %v16576_v23 = vld [vmem:[%s19351_s16 + $0x54] ss:$8 sps:$4 sm:$0xff]  }
0x16b4   : > { %10597 = vmatpush2.bf16.msra.mxu0 %v16478_v29  ;;  %10636 = vmatpush2.bf16.msra.mxu1 %v16481_v45  ;;  %v16540_v29 = vld [vmem:[%s19351_s16 + $0x114] ss:$8 sps:$4 sm:$0xff]   ;;  %v16574_v45 = vld [vmem:[%s19351_s16 + $0x50] ss:$8 sps:$4 sm:$0xff]  }
0x16b5   : > { %10598 = vmatprep.subr.bf16.mxu0 %v16486_v54  ;;  %10637 = vmatprep.subr.bf16.mxu1 %v16489_v38  ;;  %v16538_v54 = vld [vmem:[%s19351_s16 + $0x110] ss:$8 sps:$4 sm:$0xff]   ;;  %v16579_v38 = vld [vmem:[%s19351_s16 + $0x44] ss:$8 sps:$4 sm:$0xff]  }
0x16b8   : > { %10599 = vmatpush2.bf16.msra.mxu0 %v16484_v39  ;;  %10638 = vmatpush2.bf16.msra.mxu1 %v16487_v44  ;;  %v16543_v39 = vld [vmem:[%s19351_s16 + $0x104] ss:$8 sps:$4 sm:$0xff]   ;;  %v16577_v44 = vld [vmem:[%s19351_s16 + $0x40] ss:$8 sps:$4 sm:$0xff]  }
0x16b9   : > { %10600 = vmatprep.subr.bf16.mxu0 %v16492_v48  ;;  %10639 = vmatprep.subr.bf16.mxu1 %v16495_v49  ;;  %v16541_v48 = vld [vmem:[%s19351_s16 + $0x100] ss:$8 sps:$4 sm:$0xff]   ;;  %v16582_v49 = vld [vmem:[%s19351_s16 + $0x34] ss:$8 sps:$4 sm:$0xff]  }
0x16bc   : > { %10601 = vmatpush2.bf16.msra.mxu0 %v16490_v50  ;;  %10640 = vmatpush2.bf16.msra.mxu1 %v16493_v55  ;;  %v16546_v50 = vld [vmem:[%s19351_s16 + $0x1f4] ss:$8 sps:$4 sm:$0xff]   ;;  %v16580_v55 = vld [vmem:[%s19351_s16 + $0x30] ss:$8 sps:$4 sm:$0xff]  }
0x16bd   : > { %10602 = vmatprep.subr.bf16.mxu0 %v16498_v10  ;;  %10641 = vmatprep.subr.bf16.mxu1 %v16501_v36  ;;  %v16544_v10 = vld [vmem:[%s19351_s16 + $0x1f0] ss:$8 sps:$4 sm:$0xff]   ;;  %v16585_v36 = vld [vmem:[%s19351_s16 + $0x24] ss:$8 sps:$4 sm:$0xff]  }
0x16c0   : > { %10603 = vmatpush2.bf16.msra.mxu0 %v16496_v47  ;;  %10642 = vmatpush2.bf16.msra.mxu1 %v16499_v11  ;;  %v16549_v47 = vld [vmem:[%s19351_s16 + $0x1e4] ss:$8 sps:$4 sm:$0xff]   ;;  %v16583_v11 = vld [vmem:[%s19351_s16 + $0x20] ss:$8 sps:$4 sm:$0xff]  }
0x16c1   : > { %10604 = vmatprep.subr.bf16.mxu0 %v16504_v37  ;;  %10643 = vmatprep.subr.bf16.mxu1 %v16507_v42  ;;  %v16547_v37 = vld [vmem:[%s19351_s16 + $0x1e0] ss:$8 sps:$4 sm:$0xff]   ;;  %v16588_v42 = vld [vmem:[%s19351_s16 + $0x14] ss:$8 sps:$4 sm:$0xff]  }
0x16c4   : > { %10605 = vmatpush2.bf16.msra.mxu0 %v16502_v61  ;;  %10644 = vmatpush2.bf16.msra.mxu1 %v16505_v62  ;;  %v16552_v61 = vld [vmem:[%s19351_s16 + $0x1d4] ss:$8 sps:$4 sm:$0xff]   ;;  %v16586_v62 = vld [vmem:[%s19351_s16 + $0x10] ss:$8 sps:$4 sm:$0xff]  }
0x16c5   : > { %10606 = vmatprep.subr.bf16.mxu0 %v16510_v2  ;;  %10645 = vmatprep.subr.bf16.mxu1 %v16513_v4  ;;  %v16550_v2 = vld [vmem:[%s19351_s16 + $0x1d0] ss:$8 sps:$4 sm:$0xff]   ;;  %v16591_v4 = vld [vmem:[%s19351_s16 + $0x4] ss:$8 sps:$4 sm:$0xff]  }
0x16c8   : > { %10607 = vmatpush2.bf16.msra.mxu0 %v16508_v5  ;;  %10646 = vmatpush2.bf16.msra.mxu1 %v16511_v6  ;;  %v16555_v5 = vld [vmem:[%s19351_s16 + $0x1c4] ss:$8 sps:$4 sm:$0xff]   ;;  %v16589_v6 = vld [vmem:[%s19351_s16] ss:$8 sps:$4 sm:$0xff]  }
0x16c9   : > { %14086 = vmatprep.subr.msk.bf16.mxu0 %vm5023_vm4, %v18904_v31  ;;  %10647 = vmatprep.subr.bf16.mxu1 %v16516_v8  ;;  %v16553_v8 = vld [vmem:[%s19351_s16 + $0x1c0] ss:$8 sps:$4 sm:$0xff]  }
0x16cb   : > { %10609 = vmatmul.mubr.bf16.vlgmr.msra.gmra.mxu0 %v19015_v1  ;;  %v16523_v1 = vld [vmem:[%s19351_s16 + $0x160] ss:$8 sps:$4 sm:$0xff]  }
0x16cc   : > { %10648 = vmatpush2.bf16.msra.mxu1 %v16514_v12  ;;  %10729 = vmatpush1.bf16.msra.mxu0 %v19029_v46  ;;  %v16594_v12 = vld [vmem:[%s19351_s16 + $0xf4] ss:$8 sps:$4 sm:$0xff]  }
0x16cd   : > { %10649 = vmatprep.subr.bf16.mxu1 %v16519_v30  ;;  %10746 = vmatprep.mubr.bf16.mxu0 %v17700_v0  ;;  %v16558_v30 = vld [vmem:[%s19351_s16 + $0x1b4] ss:$8 sps:$4 sm:$0xff]  }
0x16ce   : > { %11030 = vmatprep.subr.bf16.mxu0 %v16522_v43  ;;  %v16592_v43 = vld [vmem:[%s19351_s16 + $0xf0] ss:$8 sps:$4 sm:$0xff]  }
0x16d0   : > { %10650 = vmatpush2.bf16.msra.mxu1 %v16517_v3  ;;  %v16556_v3 = vld [vmem:[%s19351_s16 + $0x1b0] ss:$8 sps:$4 sm:$0xff]  }
0x16d1   : > { %14088 = vmatprep.subr.msk.bf16.mxu1 %vm5023_vm4, %v18904_v31 }
0x16d3   : > { %10652 = vmatmul.mubr.bf16.vlgmr.msra.gmra.mxu1 %v19020_v60  ;;  %14087 = vmatmul.mubr.msk.bf16.vlgmr.msra.gmra.mxu0 %vm5019_vm5, %v10704_v59  ;;  %v16531_v60 = vld [vmem:[%s19351_s16 + $0x144] ss:$8 sps:$4 sm:$0xff]  }
0x16d4   : > { %11031 = vmatpush1.bf16.msra.mxu0 %v16520_v27  ;;  %10809 = vmatpush1.bf16.msra.mxu1 %v19029_v46  ;;  %v16597_v27 = vld [vmem:[%s19351_s16 + $0xe4] ss:$8 sps:$4 sm:$0xff]  }
0x16d5   : > { %11032 = vmatprep.subr.bf16.mxu0 %v16525_v34  ;;  %10826 = vmatprep.mubr.bf16.mxu1 %v17700_v0  ;;  %v16561_v59 = vld [vmem:[%s19351_s16 + $0x1a4] ss:$8 sps:$4 sm:$0xff]   ;;  %v16595_v34 = vld [vmem:[%s19351_s16 + $0xe0] ss:$8 sps:$4 sm:$0xff]  }
0x16d6   : > { %11231 = vmatprep.subr.bf16.mxu1 %v16570_v32  ;;  %v16565_v32 = vld [vmem:[%s19351_s16 + $0x180] ss:$8 sps:$4 sm:$0xff]  }
0x16d8   : > { %11033 = vmatpush1.bf16.msra.mxu0 %v16523_v1  ;;  %v16559_v1 = vld [vmem:[%s19351_s16 + $0x1a0] ss:$8 sps:$4 sm:$0xff]  }
0x16d9   : > { %11034 = vmatprep.subr.bf16.mxu0 %v16528_v51  ;;  %v16600_v51 = vld [vmem:[%s19351_s16 + $0xd4] ss:$8 sps:$4 sm:$0xff]  }
0x16db   : > { %14089 = vmatmul.mubr.msk.bf16.vlgmr.msra.gmra.mxu1 %vm5019_vm5, %v10790_v28  ;;  %v16598_v28 = vld [vmem:[%s19351_s16 + $0xd0] ss:$8 sps:$4 sm:$0xff]  }
0x16dc   : > { %11035 = vmatpush1.bf16.msra.mxu0 %v16526_v52  ;;  %11232 = vmatpush1.bf16.msra.mxu1 %v16568_v22  ;;  %v16564_v52 = vld [vmem:[%s19351_s16 + $0x194] ss:$8 sps:$4 sm:$0xff]   ;;  %v16604_v22 = vld [vmem:[%s19351_s16 + $0xb0] ss:$8 sps:$4 sm:$0xff]  }
0x16dd   : > { %11036 = vmatprep.subr.bf16.mxu0 %v16531_v60  ;;  %11233 = vmatprep.subr.bf16.mxu1 %v16573_v35  ;;  %v16562_v60 = vld [vmem:[%s19351_s16 + $0x190] ss:$8 sps:$4 sm:$0xff]   ;;  %v16609_v35 = vld [vmem:[%s19351_s16 + $0xa4] ss:$8 sps:$4 sm:$0xff]  }
0x16e0   : > { %11037 = vmatpush1.bf16.msra.mxu0 %v16529_v24  ;;  %11234 = vmatpush1.bf16.msra.mxu1 %v16571_v9  ;;  %v16603_v24 = vld [vmem:[%s19351_s16 + $0xc4] ss:$8 sps:$4 sm:$0xff]   ;;  %v16607_v9 = vld [vmem:[%s19351_s16 + $0xa0] ss:$8 sps:$4 sm:$0xff]  }
0x16e1   : > { %11038 = vmatprep.subr.bf16.mxu0 %v16534_v33  ;;  %11235 = vmatprep.subr.bf16.mxu1 %v16576_v23  ;;  %v16567_v33 = vld [vmem:[%s19351_s16 + $0x184] ss:$8 sps:$4 sm:$0xff]   ;;  %v16610_v23 = vld [vmem:[%s19351_s16 + $0x90] ss:$8 sps:$4 sm:$0xff]  }
0x16e4   : > { %11039 = vmatpush1.bf16.msra.mxu0 %v16532_v25  ;;  %11236 = vmatpush1.bf16.msra.mxu1 %v16574_v45  ;;  %v16601_v25 = vld [vmem:[%s19351_s16 + $0xc0] ss:$8 sps:$4 sm:$0xff]  }
0x16e5   : > { %11040 = vmatprep.subr.bf16.mxu0 %v16537_v15  ;;  %11237 = vmatprep.subr.bf16.mxu1 %v16579_v38  ;;  %v16606_v15 = vld [vmem:[%s19351_s16 + $0xb4] ss:$8 sps:$4 sm:$0xff]   ;;  %v16613_v45 = vld [vmem:[%s19351_s16 + $0x80] ss:$8 sps:$4 sm:$0xff]  }
0x16e8   : > { %11041 = vmatpush1.bf16.msra.mxu0 %v16535_v53  ;;  %11238 = vmatpush1.bf16.msra.mxu1 %v16577_v44  ;;  %v16612_v53 = vld [vmem:[%s19351_s16 + $0x94] ss:$8 sps:$4 sm:$0xff]   ;;  %v10670_v44 = vld [vmem:[#allocation42] sm:$0xf] }
0x16e9   : > { %11042 = vmatprep.subr.bf16.mxu0 %v16540_v29  ;;  %11239 = vmatprep.subr.bf16.mxu1 %v16582_v49  ;;  %v16615_v29 = vld [vmem:[%s19351_s16 + $0x84] ss:$8 sps:$4 sm:$0xff]  }
0x16ec   : > { %11043 = vmatpush1.bf16.msra.mxu0 %v16538_v54  ;;  %11240 = vmatpush1.bf16.msra.mxu1 %v16580_v55  ;;  %v16618_v54 = vld [vmem:[%s19351_s16 + $0x274] ss:$8 sps:$4 sm:$0xff]  }
0x16ed   : > { %11044 = vmatprep.subr.bf16.mxu0 %v16543_v39  ;;  %11241 = vmatprep.subr.bf16.mxu1 %v16585_v36 }
0x16f0   : > { %11045 = vmatpush1.bf16.msra.mxu0 %v16541_v48  ;;  %11242 = vmatpush1.bf16.msra.mxu1 %v16583_v11 }
0x16f1   : > { %11046 = vmatprep.subr.bf16.mxu0 %v16546_v50  ;;  %11243 = vmatprep.subr.bf16.mxu1 %v16588_v42 }
0x16f4   : > { %11047 = vmatpush2.bf16.msra.mxu0 %v16544_v10  ;;  %11244 = vmatpush1.bf16.msra.mxu1 %v16586_v62  ;;  %v10675_v10 = vrot.slane %v10670_v44, %v18611_v58 }
0x16f5   : > { %11048 = vmatprep.subr.bf16.mxu0 %v16549_v47  ;;  %11245 = vmatprep.subr.bf16.mxu1 %v16591_v4  ;;  %v10679_v47 = vrot.slane %v10670_v44, %v18624_v13 }
0x16f8   : > { %11049 = vmatpush2.bf16.msra.mxu0 %v16547_v37  ;;  %11246 = vmatpush1.bf16.msra.mxu1 %v16589_v6 }
0x16f9   : > { %11050 = vmatprep.subr.bf16.mxu0 %v16552_v61  ;;  %11247 = vmatprep.subr.bf16.mxu1 %v16594_v12 }
0x16fc   : > { %11051 = vmatpush2.bf16.msra.mxu0 %v16550_v2  ;;  %11248 = vmatpush2.bf16.msra.mxu1 %v16592_v43 }
0x16fd   : > { %11052 = vmatprep.subr.bf16.mxu0 %v16555_v5  ;;  %11249 = vmatprep.subr.bf16.mxu1 %v16597_v27 }
0x1700   : > { %11053 = vmatpush2.bf16.msra.mxu0 %v16553_v8  ;;  %11250 = vmatpush2.bf16.msra.mxu1 %v16595_v34 }
0x1701   : > { %11054 = vmatprep.subr.bf16.mxu0 %v16558_v30  ;;  %11251 = vmatprep.subr.bf16.mxu1 %v16600_v51  ;;  %v10683_v51 = vrot.slane %v10670_v44, %v5996_v19 }
0x1704   : > { %11055 = vmatpush2.bf16.msra.mxu0 %v16556_v3  ;;  %11252 = vmatpush2.bf16.msra.mxu1 %v16598_v28 }
0x1705   : > { %11056 = vmatprep.subr.bf16.mxu0 %v16561_v59  ;;  %11253 = vmatprep.subr.bf16.mxu1 %v16603_v24 }
0x1708   : > { %11057 = vmatpush2.bf16.msra.mxu0 %v16559_v1  ;;  %11254 = vmatpush2.bf16.msra.mxu1 %v16601_v25 }
0x1709   : > { %11058 = vmatprep.subr.bf16.mxu0 %v16564_v52  ;;  %11255 = vmatprep.subr.bf16.mxu1 %v16606_v15 }
0x170c   : > { %11059 = vmatpush2.bf16.msra.mxu0 %v16562_v60  ;;  %11256 = vmatpush2.bf16.msra.mxu1 %v16604_v22 }
0x170d   : > { %11060 = vmatprep.subr.bf16.mxu0 %v16567_v33  ;;  %11257 = vmatprep.subr.bf16.mxu1 %v16609_v35  ;;  %v10687_v33 = vrot.slane %v10670_v44, %v6000_v20  ;;  %v16621_v35 = vld [vmem:[%s19351_s16 + $0x264] ss:$8 sps:$4 sm:$0xff]  }
0x1710   : > { %11061 = vmatpush2.bf16.msra.mxu0 %v16565_v32  ;;  %11258 = vmatpush2.bf16.msra.mxu1 %v16607_v9  ;;  %v16616_v32 = vld [vmem:[%s19351_s16 + $0x270] ss:$8 sps:$4 sm:$0xff]  }
0x1711   : > { %14186 = vmatprep.subr.msk.bf16.mxu0 %vm5023_vm4, %v18904_v31  ;;  %11259 = vmatprep.subr.bf16.mxu1 %v16612_v53 }
0x1714   : > { %11260 = vmatpush2.bf16.msra.mxu1 %v16610_v23 }
0x1715   : > { %11261 = vmatprep.subr.bf16.mxu1 %v16615_v29 }
0x1718   : > { %11262 = vmatpush2.bf16.msra.mxu1 %v16613_v45  ;;  %v16619_v45 = vld [vmem:[%s19351_s16 + $0x260] ss:$8 sps:$4 sm:$0xff]  }
0x1719   : > { %11513 = vmatprep.subr.bf16.mxu1 %v16618_v54 }
0x174b   : > { %v10524_v31 = vpop.f32.mrf.mxu0 }
0x174d   : > { %v10526_v38 = vpop.f32.mrf.mxu0 }
0x174f   : > { %v10528_v48 = vpop.f32.mrf.mxu0 }
0x1751   : > { %v10530_v37 = vpop.f32.mrf.mxu0 }
0x1753   : > { %v10567_v39 = vpop.f32.mrf.mxu1 }
0x1754   : > { %v10568_v49 = vadd.f32 %v10567_v39, %v10524_v31  ;;  %v16624_v31 = vld [vmem:[%s19351_s16 + $0x254] ss:$8 sps:$4 sm:$0xff]  }
0x1755   : > { %v10569_v50 = vpop.f32.mrf.mxu1 }
0x1756   : > { %v10662_v55 = vadd.f32 %v10568_v49, %v19001_v41  ;;  %v10570_v36 = vadd.f32 %v10569_v50, %v10526_v38 }
0x1757   : > { %v10571_v11 = vpop.f32.mrf.mxu1 }
0x1758   : > { %v10663_v42 = vadd.f32 %v10570_v36, %v19003_v21  ;;  %v10572_v61 = vadd.f32 %v10571_v11, %v10528_v48  ;;  %v10692_v2 = vadd.f32 %v10675_v10, %v10662_v55  ;;  %v16622_v55 = vld [vmem:[%s19351_s16 + $0x250] ss:$8 sps:$4 sm:$0xff]   ;;  %v16627_v36 = vld [vmem:[%s19351_s16 + $0x244] ss:$8 sps:$4 sm:$0xff]   ;;  %v16630_v11 = vld [vmem:[%s19351_s16 + $0x234] ss:$8 sps:$4 sm:$0xff]  }
0x1759   : > { %v10573_v62 = vpop.f32.mrf.mxu1 }
0x175a   : > { %v10693_v4 = vadd.f32 %v10679_v47, %v10663_v42  ;;  %v10666_v5 = vadd.f32 %v10572_v61, %v19005_v16  ;;  %v10574_v6 = vadd.f32 %v10573_v62, %v10530_v37  ;;  %v11273_v37 = vld [vmem:[#allocation43 + $0x8] sm:$0xf]  ;;  %v16633_v61 = vld [vmem:[%s19351_s16 + $0x224] ss:$8 sps:$4 sm:$0xff]  }
0x175b   : > { %v16628_v42 = vld [vmem:[%s19351_s16 + $0x230] ss:$8 sps:$4 sm:$0xff]   ;;  %v16636_v62 = vld [vmem:[%s19351_s16 + $0x214] ss:$8 sps:$4 sm:$0xff]  }
0x175c   : > { %v14311_v41 = vpack.c.bf16 %v10693_v4, %v10692_v2  ;;  %v10667_v8 = vadd.f32 %v10574_v6, %v19007_v56  ;;  %v10696_v12 = vadd.f32 %v10675_v10, %v10666_v5  ;;  %v11572_v2 = vld [vmem:[#allocation46] sm:$0x3]  ;;  %v16634_v4 = vld [vmem:[%s19351_s16 + $0x210] ss:$8 sps:$4 sm:$0xff]   ;;  %v16637_v5 = vld [vmem:[%s19351_s16 + $0x200] ss:$8 sps:$4 sm:$0xff]  }
0x175d   : > { %v16642_v6 = vld [vmem:[%s19351_s16 + $0x2f4] ss:$8 sps:$4 sm:$0xff]  }
0x175e   : > { %12432 = vst [vmem:[%s19113_s3] sm:$0xff] %v14311_v41  ;;  %v10697_v30 = vadd.f32 %v10679_v47, %v10667_v8  ;;  %v11637_v41 = vld [vmem:[#allocation46 + $0x2] sm:$0x3] }
0x175f   : > { %v16652_v8 = vld [vmem:[#allocation48 + $0x78] sm:$0xff]  }
0x1760   : > { %v14313_v43 = vpack.c.bf16 %v10697_v30, %v10696_v12  ;;  %v16640_v12 = vld [vmem:[%s19351_s16 + $0x2f0] ss:$8 sps:$4 sm:$0xff]   ;;  %v16645_v30 = vld [vmem:[%s19351_s16 + $0x2e4] ss:$8 sps:$4 sm:$0xff]  }
0x1762   : > { %12434 = vst [vmem:[%s19113_s3 + $0x10] sm:$0xff] %v14313_v43  ;;  %v16656_v43 = vld [vmem:[#allocation48 + $0x70] sm:$0xff]  }
0x178b   : > { %v10610_v21 = vpop.f32.mrf.mxu0 }
0x178d   : > { %v10612_v3 = vpop.f32.mrf.mxu0 }
0x178f   : > { %v10614_v27 = vpop.f32.mrf.mxu0 }
0x1791   : > { %v10616_v59 = vpop.f32.mrf.mxu0 }
0x1793   : > { %v10653_v16 = vpop.f32.mrf.mxu1  ;;  %v10748_v34 = vpop.f32.mrf.mxu0 }
0x1794   : > { %v10654_v1 = vadd.f32 %v10653_v16, %v10610_v21  ;;  %v10755_v28 = vpack.c.bf16 %v10748_v34, %v10748_v34  ;;  %v16643_v21 = vld [vmem:[%s19351_s16 + $0x2e0] ss:$8 sps:$4 sm:$0xff]   ;;  %v16655_v34 = vld [vmem:[%s19351_s16 + $0x2b4] ss:$8 sps:$4 sm:$0xff]  }
0x1795   : > { %v10655_v52 = vpop.f32.mrf.mxu1  ;;  %v10750_v56 = vpop.f32.mrf.mxu0  ;;  %v16649_v16 = vld [vmem:[%s19351_s16 + $0x2c0] ss:$8 sps:$4 sm:$0xff]  }
0x1796   : > { %v10664_v60 = vadd.f32 %v10654_v1, %v19009_v17  ;;  %v10656_v24 = vadd.f32 %v10655_v52, %v10612_v3  ;;  %v10756_v25 = vpack.c.bf16 %v10750_v56, %v10750_v56  ;;  %v16648_v3 = vld [vmem:[%s19351_s16 + $0x2d4] ss:$8 sps:$4 sm:$0xff]   ;;  %v16653_v1 = vld [vmem:[%s19351_s16 + $0x2b0] ss:$8 sps:$4 sm:$0xff]   ;;  %v16659_v52 = vld [vmem:[%s19351_s16 + $0x2a4] ss:$8 sps:$4 sm:$0xff]  }
0x1797   : > { %v10657_v15 = vpop.f32.mrf.mxu1  ;;  %v10752_v22 = vpop.f32.mrf.mxu0  ;;  %v16661_v56 = vld [vmem:[%s19351_s16 + $0x290] ss:$8 sps:$4 sm:$0xff]  }
0x1798   : > { %v10694_v9 = vadd.f32 %v10683_v51, %v10664_v60  ;;  %v10665_v53 = vadd.f32 %v10656_v24, %v19011_v7  ;;  %v10658_v19 = vadd.f32 %v10657_v15, %v10614_v27  ;;  %11263 = vmatprep.mubr.bf16.mxu1 %v10756_v25  ;;  %v16646_v27 = vld [vmem:[%s19351_s16 + $0x2d0] ss:$8 sps:$4 sm:$0xff]   ;;  %v16663_v60 = vld [vmem:[%s19351_s16 + $0x294] ss:$8 sps:$4 sm:$0xff]   ;;  %v16664_v24 = vld [vmem:[#allocation48 + $0x60] sm:$0xff]  }
0x1799   : > { %v10659_v23 = vpop.f32.mrf.mxu1  ;;  %11264 = vmatmul.mubr.bf16.vlgmr.msra.gmra.mxu1 %v10755_v28  ;;  %v10753_v17 = vpop.f32.mrf.mxu0  ;;  %v16660_v28 = vld [vmem:[#allocation48 + $0x68] sm:$0xff]   ;;  %v16669_v15 = vld [vmem:[#allocation48 + $0x50] sm:$0xff]  }
0x179a   : > { %v10695_v29 = vadd.f32 %v10687_v33, %v10665_v53  ;;  %v10668_v57 = vadd.f32 %v10658_v19, %v19013_v63  ;;  %v10660_v20 = vadd.f32 %v10659_v23, %v10616_v59  ;;  %11514 = vmatpush1.bf16.msra.mxu1 %v16616_v32  ;;  %v16651_v59 = vld [vmem:[%s19351_s16 + $0x2c4] ss:$8 sps:$4 sm:$0xff]   ;;  %v16665_v25 = vld [vmem:[%s19351_s16 + $0x280] ss:$8 sps:$4 sm:$0xff]  }
0x179b   : > { %v10828_v54 = vpop.f32.mrf.mxu1  ;;  %11515 = vmatprep.subr.bf16.mxu1 %v16621_v35  ;;  %v16668_v32 = vld [vmem:[#allocation48 + $0x58] sm:$0xff]   ;;  %v16670_v22 = vld [vmem:[#allocation48 + $0x48] sm:$0xff]   ;;  %v16671_v35 = vld [vmem:[#allocation48 + $0x40] sm:$0xff]  }
0x179c   : > { %v14312_v38 = vpack.c.bf16 %v10695_v29, %v10694_v9  ;;  %v10698_v39 = vadd.f32 %v10683_v51, %v10668_v57  ;;  %v10669_v7 = vadd.f32 %v10660_v20, %v19017_v14  ;;  %v10835_v63 = vpack.c.bf16 %v10828_v54, %v10828_v54  ;;  %v16625_v14 = vld [vmem:[%s19351_s16 + $0x240] ss:$8 sps:$4 sm:$0xff]  }
0x179d   : > { %v10830_v44 = vpop.f32.mrf.mxu1  ;;  %v16657_v51 = vld [vmem:[%s19351_s16 + $0x2a0] ss:$8 sps:$4 sm:$0xff]  }
0x179e   : > { %12433 = vst [vmem:[%s19113_s3 + $0x8] sm:$0xff] %v14312_v38  ;;  %v10699_v48 = vadd.f32 %v10687_v33, %v10669_v7  ;;  %v10836_v49 = vpack.c.bf16 %v10830_v44, %v10830_v44  ;;  %11516 = vmatpush1.bf16.msra.mxu1 %v16619_v45  ;;  %v16667_v33 = vld [vmem:[%s19351_s16 + $0x284] ss:$8 sps:$4 sm:$0xff]  }
0x179f   : > { %v10832_v50 = vpop.f32.mrf.mxu1  ;;  %11517 = vmatprep.subr.bf16.mxu1 %v16624_v31 }
0x17a0   : > { %v14314_v10 = vpack.c.bf16 %v10699_v48, %v10698_v39  ;;  %11062 = vmatprep.mubr.bf16.mxu0 %v10836_v49  ;;  %v11876_v50 = vld [vmem:[#allocation46 + $0x4] sm:$0x3] }
0x17a1   : > { %11063 = vmatmul.mubr.bf16.vlgmr.msra.gmra.mxu0 %v10835_v63  ;;  %v10833_v47 = vpop.f32.mrf.mxu1 }
0x17a2   : > { %12435 = vst [vmem:[%s19113_s3 + $0x18] sm:$0xff] %v14314_v10  ;;  %11292 = vmatpush1.bf16.msra.mxu0 %v19029_v46  ;;  %11309 = vmatprep.mubr.bf16.mxu0 %v17700_v0  ;;  %v19144_v0 = vsel %vm5490_vm6, %v18893_v26, 0  ;;  %v16631_v46 = vld [vmem:[%s19351_s16 + $0x220] ss:$8 sps:$4 sm:$0xff]   ;;  %v16639_v26 = vld [vmem:[%s19351_s16 + $0x204] ss:$8 sps:$4 sm:$0xff]  }
0x17a3   : > { %14852 = vmatprep.subr.bf16.mxu0 %v17701_v18  ;;  %11518 = vmatpush1.bf16.msra.mxu1 %v16622_v55  ;;  %v16680_v55 = vld [vmem:[#allocation48 + $0xb8] sm:$0xff]   ;;  %v16681_v47 = vld [vmem:[#allocation48 + $0xb0] sm:$0xff]  }
0x17a4   : > { %11519 = vmatprep.subr.bf16.mxu1 %v16627_v36 }
0x17a7   : > { %11520 = vmatpush1.bf16.msra.mxu1 %v16625_v14 }
0x17a8   : > { %11521 = vmatprep.subr.bf16.mxu1 %v16630_v11  ;;  %v16672_v11 = vld [vmem:[#allocation48 + $0x38] sm:$0xff]  }
0x17a9   : > { %14187 = vmatmul.mubr.msk.bf16.vlgmr.msra.gmra.mxu0 %vm5019_vm5, %v11273_v37 }
0x17aa   : > { %14853 = vmatpush3.bf16.msra.mxu0 %v19144_v0  ;;  %14854 = vmatprep.mubr.msk.bf16.mxu0 %vm17702_vm2, %v17701_v18 }
0x17ab   : > { %14858 = vmatprep.subr.bf16.mxu0 %v17701_v18  ;;  %11522 = vmatpush1.bf16.msra.mxu1 %v16628_v42 }
0x17ac   : > { %11523 = vmatprep.subr.bf16.mxu1 %v16633_v61  ;;  %v16682_v61 = vld [vmem:[#allocation48 + $0xa8] sm:$0xff]  }
0x17af   : > { %11524 = vmatpush1.bf16.msra.mxu1 %v16631_v46  ;;  %v16673_v46 = vld [vmem:[#allocation48 + $0x30] sm:$0xff]  }
0x17b0   : > { %11525 = vmatprep.subr.bf16.mxu1 %v16636_v62 }
0x17b1   : > { %14855 = vmatmul.mubr.msk.bf16.vlgmr.msra.gmra.mxu0 %vm5486_vm7, %v11572_v2  ;;  %v16683_v2 = vld [vmem:[#allocation48 + $0xa0] sm:$0xff]  }
0x17b2   : > { %14859 = vmatpush3.bf16.msra.mxu0 %v19144_v0  ;;  %14860 = vmatprep.mubr.msk.bf16.mxu0 %vm17702_vm2, %v17701_v18 }
0x17b3   : > { %11526 = vmatpush1.bf16.msra.mxu1 %v16634_v4  ;;  %14864 = vmatprep.subr.bf16.mxu0 %v17701_v18  ;;  %v16674_v4 = vld [vmem:[#allocation48 + $0x28] sm:$0xff]  }
0x17b4   : > { %11527 = vmatprep.subr.bf16.mxu1 %v16639_v26  ;;  %v16684_v26 = vld [vmem:[#allocation48 + $0x98] sm:$0xff]  }
0x17b7   : > { %11528 = vmatpush1.bf16.msra.mxu1 %v16637_v5  ;;  %v16675_v5 = vld [vmem:[#allocation48 + $0x20] sm:$0xff]  }
0x17b8   : > { %11529 = vmatprep.subr.bf16.mxu1 %v16642_v6  ;;  %v16676_v6 = vld [vmem:[#allocation48 + $0x18] sm:$0xff]  }
0x17b9   : > { %14861 = vmatmul.mubr.msk.bf16.vlgmr.msra.gmra.mxu0 %vm5486_vm7, %v11637_v41  ;;  %v16677_v41 = vld [vmem:[#allocation48 + $0x10] sm:$0xff]  }
0x17ba   : > { %14865 = vmatpush3.bf16.msra.mxu0 %v16652_v8  ;;  %14880 = vmatprep.mubr.msk.bf16.mxu0 %vm17702_vm2, %v17701_v18  ;;  %v16678_v8 = vld [vmem:[#allocation48 + $0x8] sm:$0xff]  }
0x17bb   : > { %11530 = vmatpush2.bf16.msra.mxu1 %v16640_v12  ;;  %14866 = vmatprep.subr.bf16.mxu0 %v17701_v18  ;;  %v16679_v12 = vld [vmem:[#allocation48] sm:$0xff]  }
0x17bc   : > { %11531 = vmatprep.subr.bf16.mxu1 %v16645_v30 }
0x17be   : > { %14867 = vmatpush3.bf16.msra.mxu0 %v16656_v43  ;;  %v19216_v43 = vsel %vm6712_vm8, %v18884_v40, 0  ;;  %v14281_v40 = vld [vmem:[%s19352_s23 + $0x1] sm:$0x1] }
0x17bf   : > { %11532 = vmatpush2.bf16.msra.mxu1 %v16643_v21  ;;  %14868 = vmatprep.subr.bf16.mxu0 %v17701_v18  ;;  %v12036_v21 = vld [vmem:[%s19352_s23] sm:$0x1] }
0x17c0   : > { %11533 = vmatprep.subr.bf16.mxu1 %v16648_v3  ;;  %v16685_v3 = vld [vmem:[#allocation48 + $0x90] sm:$0xff]  }
0x17c2   : > { %14869 = vmatpush3.bf16.msra.mxu0 %v16660_v28 }
0x17c3   : > { %11534 = vmatpush2.bf16.msra.mxu1 %v16646_v27  ;;  %14870 = vmatprep.subr.bf16.mxu0 %v17701_v18  ;;  %v16686_v27 = vld [vmem:[#allocation48 + $0x88] sm:$0xff]  }
0x17c4   : > { %11535 = vmatprep.subr.bf16.mxu1 %v16651_v59  ;;  %v16687_v59 = vld [vmem:[#allocation48 + $0x80] sm:$0xff]  }
0x17c6   : > { %14871 = vmatpush3.bf16.msra.mxu0 %v16664_v24 }
0x17c7   : > { %11536 = vmatpush2.bf16.msra.mxu1 %v16649_v16  ;;  %14872 = vmatprep.subr.bf16.mxu0 %v17701_v18  ;;  %v16689_v16 = vld [vmem:[#allocation51 + $0x38] sm:$0xff]  }
0x17c8   : > { %11537 = vmatprep.subr.bf16.mxu1 %v16655_v34  ;;  %v16691_v34 = vld [vmem:[#allocation51 + $0x30] sm:$0xff]  }
0x17ca   : > { %14873 = vmatpush3.bf16.msra.mxu0 %v16668_v32 }
0x17cb   : > { %11538 = vmatpush2.bf16.msra.mxu1 %v16653_v1  ;;  %14874 = vmatprep.subr.bf16.mxu0 %v17701_v18  ;;  %v16693_v1 = vld [vmem:[#allocation51 + $0x28] sm:$0xff]  }
0x17cc   : > { %11539 = vmatprep.subr.bf16.mxu1 %v16659_v52  ;;  %v11556_v52 = vld [vmem:[#allocation45] sm:$0x3] }
0x17cd   : > { %v11565_v24 = vrot.slane %v11556_v52, %v18624_v13 }
0x17ce   : > { %14875 = vmatpush3.bf16.msra.mxu0 %v16669_v15 }
0x17cf   : > { %11540 = vmatpush2.bf16.msra.mxu1 %v16657_v51  ;;  %14876 = vmatprep.subr.bf16.mxu0 %v17701_v18  ;;  %v16695_v51 = vld [vmem:[#allocation51 + $0x20] sm:$0xff]  }
0x17d0   : > { %11541 = vmatprep.subr.bf16.mxu1 %v16663_v60  ;;  %v11561_v60 = vrot.slane %v11556_v52, %v18611_v58  ;;  %v16690_v58 = vld [vmem:[#allocation51 + $0x10] sm:$0xff]  }
0x17d2   : > { %14877 = vmatpush3.bf16.msra.mxu0 %v16670_v22 }
0x17d3   : > { %11542 = vmatpush2.bf16.msra.mxu1 %v16661_v56  ;;  %14878 = vmatprep.subr.bf16.mxu0 %v17701_v18 }
0x17d4   : > { %11543 = vmatprep.subr.bf16.mxu1 %v16667_v33 }
0x17d6   : > { %14879 = vmatpush3.bf16.msra.mxu0 %v16671_v35 }
0x17d7   : > { %11544 = vmatpush2.bf16.msra.mxu1 %v16665_v25  ;;  %14884 = vmatprep.subr.bf16.mxu0 %v17701_v18 }
0x17d8   : > { %14904 = vmatprep.subr.bf16.mxu1 %v17701_v18 }
0x1859   : > { %v11265_v9 = vpop.f32.mrf.mxu1 }
0x185b   : > { %v11267_v53 = vpop.f32.mrf.mxu1 }
0x185d   : > { %v11269_v19 = vpop.f32.mrf.mxu1 }
0x185e   : > { %v16688_v19 = vld [vmem:[#allocation51 + $0x18] sm:$0xff]  }
0x185f   : > { %v11270_v23 = vpop.f32.mrf.mxu1 }
0x1861   : > { %v11064_v17 = vpop.f32.mrf.mxu0 }
0x1862   : > { %v19188_v29 = vadd.f32 %v11265_v9, %v11064_v17 }
0x1863   : > { %v11066_v57 = vpop.f32.mrf.mxu0 }
0x1864   : > { %v19190_v20 = vadd.f32 %v11267_v53, %v11066_v57 }
0x1865   : > { %v11068_v45 = vpop.f32.mrf.mxu0 }
0x1866   : > { %v16692_v45 = vld [vmem:[#allocation51 + $0x8] sm:$0xff]  }
0x1867   : > { %v11069_v54 = vpop.f32.mrf.mxu0 }
0x1869   : > { %v11311_v31 = vpop.f32.mrf.mxu0 }
0x186a   : > { %v11318_v7 = vpack.c.bf16 %v11311_v31, %v11311_v31 }
0x186b   : > { %v11313_v38 = vpop.f32.mrf.mxu0 }
0x186c   : > { %v11319_v39 = vpack.c.bf16 %v11313_v38, %v11313_v38  ;;  %v16694_v38 = vld [vmem:[#allocation51] sm:$0xff]  }
0x186d   : > { %v11315_v44 = vpop.f32.mrf.mxu0 }
0x186e   : > { %11545 = vmatprep.mubr.bf16.mxu1 %v11319_v39 }
0x186f   : > { %v11316_v48 = vpop.f32.mrf.mxu0  ;;  %11546 = vmatmul.mubr.bf16.vlgmr.msra.gmra.mxu1 %v11318_v7 }
0x1870   : > { %14905 = vmatpush3.bf16.msra.mxu1 %v19144_v0  ;;  %14906 = vmatprep.mubr.msk.bf16.mxu1 %vm17702_vm2, %v17701_v18 }
0x1871   : > { %v11613_v49 = vpop.f32.mrf.mxu0  ;;  %14910 = vmatprep.subr.bf16.mxu1 %v17701_v18 }
0x1872   : > { %v11619_v30 = vpack.c.bf16 %v11613_v49, %v11613_v49 }
0x1873   : > { %v14856_v63 = vpop.f32.mrf.mxu0 }
0x1875   : > { %v11616_v10 = vpop.f32.mrf.mxu0 }
0x1877   : > { %v14857_v36 = vpop.f32.mrf.mxu0  ;;  %14907 = vmatmul.mubr.msk.bf16.vlgmr.msra.gmra.mxu1 %vm5486_vm7, %v11876_v50 }
0x1878   : > { %14911 = vmatpush3.bf16.msra.mxu1 %v16680_v55  ;;  %14926 = vmatprep.mubr.msk.bf16.mxu1 %vm17702_vm2, %v17701_v18 }
0x1879   : > { %v11675_v14 = vpop.f32.mrf.mxu0  ;;  %14912 = vmatprep.subr.bf16.mxu1 %v17701_v18 }
0x187a   : > { %v11681_v37 = vpack.c.bf16 %v11675_v14, %v11675_v14 }
0x187b   : > { %v14862_v42 = vpop.f32.mrf.mxu0 }
0x187c   : > { %14881 = vmatmul.mubr.bf16.vlgmr.msra.gmra.mxu0 %v11681_v37  ;;  %14913 = vmatpush3.bf16.msra.mxu1 %v16681_v47 }
0x187d   : > { %14885 = vmatpush3.bf16.msra.mxu0 %v16672_v11  ;;  %v11678_v0 = vpop.f32.mrf.mxu0  ;;  %14900 = vmatprep.mubr.msk.bf16.mxu0 %vm17702_vm2, %v17701_v18 }
0x187e   : > { %14886 = vmatprep.subr.bf16.mxu0 %v17701_v18  ;;  %14914 = vmatprep.subr.bf16.mxu1 %v17701_v18  ;;  %v16696_v0 = vld [vmem:[#allocation51 + $0x58] sm:$0xff]  }
0x187f   : > { %v14863_v62 = vpop.f32.mrf.mxu0 }
0x1880   : > { %14915 = vmatpush3.bf16.msra.mxu1 %v16682_v61  ;;  %v14293_v61 = vld [vmem:[%s19352_s23 + $0x2] sm:$0x1]  ;;  %v16698_v62 = vld [vmem:[#allocation51 + $0x48] sm:$0xff]  }
0x1881   : > { %14887 = vmatpush3.bf16.msra.mxu0 %v16673_v46  ;;  %14916 = vmatprep.subr.bf16.mxu1 %v17701_v18  ;;  %v16697_v46 = vld [vmem:[#allocation51 + $0x50] sm:$0xff]  }
0x1882   : > { %14888 = vmatprep.subr.bf16.mxu0 %v17701_v18 }
0x1884   : > { %14917 = vmatpush3.bf16.msra.mxu1 %v16683_v2  ;;  %v16699_v2 = vld [vmem:[#allocation51 + $0x40] sm:$0xff]  }
0x1885   : > { %14889 = vmatpush3.bf16.msra.mxu0 %v16674_v4  ;;  %14918 = vmatprep.subr.bf16.mxu1 %v17701_v18 }
0x1886   : > { %14890 = vmatprep.subr.bf16.mxu0 %v17701_v18 }
0x1888   : > { %14919 = vmatpush3.bf16.msra.mxu1 %v16684_v26  ;;  %v14279_v26 = vld [vmem:[#allocation49] ss:$0 sm:$0xff] }
0x1889   : > { %14891 = vmatpush3.bf16.msra.mxu0 %v16675_v5  ;;  %14920 = vmatprep.subr.bf16.mxu1 %v17701_v18 }
0x188a   : > { %14892 = vmatprep.subr.bf16.mxu0 %v17701_v18 }
0x188c   : > { %14921 = vmatpush3.bf16.msra.mxu1 %v16685_v3 }
0x188d   : > { %14893 = vmatpush3.bf16.msra.mxu0 %v16676_v6  ;;  %14922 = vmatprep.subr.bf16.mxu1 %v17701_v18 }
0x188e   : > { %14894 = vmatprep.subr.bf16.mxu0 %v17701_v18 }
0x1890   : > { %14923 = vmatpush3.bf16.msra.mxu1 %v16686_v27 }
0x1891   : > { %14895 = vmatpush3.bf16.msra.mxu0 %v16677_v41  ;;  %14924 = vmatprep.subr.bf16.mxu1 %v17701_v18 }
0x1892   : > { %14896 = vmatprep.subr.bf16.mxu0 %v17701_v18 }
0x1894   : > { %14925 = vmatpush3.bf16.msra.mxu1 %v16687_v59 }
0x1895   : > { %14897 = vmatpush3.bf16.msra.mxu0 %v16678_v8  ;;  %14954 = vmatprep.subr.bf16.mxu1 %v17701_v18 }
0x1896   : > { %14898 = vmatprep.subr.bf16.mxu0 %v17701_v18 }
0x1899   : > { %14899 = vmatpush3.bf16.msra.mxu0 %v16679_v12 }
0x189a   : > { %14930 = vmatprep.subr.bf16.mxu0 %v17701_v18 }
0x189c   : > { %14901 = vmatmul.mubr.bf16.vlgmr.msra.gmra.mxu0 %v11619_v30 }
0x189d   : > { %14931 = vmatpush3.bf16.msra.mxu0 %v19216_v43  ;;  %14932 = vmatprep.mubr.msk.bf16.mxu0 %vm17702_vm2, %v17701_v18 }
0x189e   : > { %14936 = vmatprep.subr.bf16.mxu0 %v17701_v18 }
0x18a4   : > { %14933 = vmatmul.mubr.msk.bf16.vlgmr.msra.gmra.mxu0 %vm6708_vm9, %v12036_v21 }
0x18a5   : > { %14937 = vmatpush3.bf16.msra.mxu0 %v19216_v43  ;;  %14938 = vmatprep.mubr.msk.bf16.mxu0 %vm17702_vm2, %v17701_v18 }
0x18a6   : > { %14942 = vmatprep.subr.bf16.mxu0 %v17701_v18 }
0x18ac   : > { %14939 = vmatmul.mubr.msk.bf16.vlgmr.msra.gmra.mxu0 %vm6708_vm9, %v14281_v40 }
0x18ad   : > { %14950 = vmatprep.mubr.msk.bf16.mxu0 %vm17702_vm2, %v17701_v18  ;;  %14943 = vmatpush3.bf16.msra.mxu0 %v16689_v16 }
0x18ae   : > { %14944 = vmatprep.subr.bf16.mxu0 %v17701_v18 }
0x18b1   : > { %14945 = vmatpush3.bf16.msra.mxu0 %v16691_v34 }
0x18b2   : > { %14946 = vmatprep.subr.bf16.mxu0 %v17701_v18 }
0x18b5   : > { %14947 = vmatpush3.bf16.msra.mxu0 %v16693_v1 }
0x18b6   : > { %14948 = vmatprep.subr.bf16.mxu0 %v17701_v18 }
0x18b9   : > { %14949 = vmatpush3.bf16.msra.mxu0 %v16695_v51 }
0x18ba   : > { %14966 = vmatprep.subr.bf16.mxu0 %v17701_v18 }
0x192f   : > { %v11547_v28 = vpop.f32.mrf.mxu1 }
0x1930   : > { %v11554_v56 = vadd.f32 %v11547_v28, %v19188_v29 }
0x1931   : > { %v11549_v33 = vpop.f32.mrf.mxu1 }
0x1932   : > { %v11555_v25 = vadd.f32 %v11549_v33, %v19190_v20  ;;  %v11568_v15 = vadd.f32 %v11561_v60, %v11554_v56 }
0x1933   : > { %v11551_v32 = vpop.f32.mrf.mxu1 }
0x1934   : > { %v11569_v22 = vadd.f32 %v11565_v24, %v11555_v25  ;;  %v14300_v24 = vld [vmem:[#allocation52] ss:$0 sm:$0xff] }
0x1935   : > { %v11552_v35 = vpop.f32.mrf.mxu1 }
0x1936   : > { %v14315_v9 = vpack.c.bf16 %v11569_v22, %v11568_v15 }
0x1937   : > { %v11914_v53 = vpop.f32.mrf.mxu1 }
0x1938   : > { %12442 = vst [vmem:[%s1842_s10] sm:$0xff] %v14315_v9  ;;  %v11920_v23 = vpack.c.bf16 %v11914_v53, %v11914_v53 }
0x1939   : > { %v14908_v17 = vpop.f32.mrf.mxu1 }
0x193a   : > { %14927 = vmatmul.mubr.bf16.vlgmr.msra.gmra.mxu1 %v11920_v23 }
0x193b   : > { %14955 = vmatpush3.bf16.msra.mxu1 %v16688_v19  ;;  %14962 = vmatprep.mubr.msk.bf16.mxu1 %vm17702_vm2, %v17701_v18  ;;  %v11917_v13 = vpop.f32.mrf.mxu1 }
0x193c   : > { %v11781_v29 = vpop.f32.mrf.mxu0  ;;  %14956 = vmatprep.subr.bf16.mxu1 %v17701_v18 }
0x193d   : > { %v14909_v57 = vpop.f32.mrf.mxu1 }
0x193e   : > { %v14882_v20 = vpop.f32.mrf.mxu0 }
0x193f   : > { %14957 = vmatpush3.bf16.msra.mxu1 %v16690_v58 }
0x1940   : > { %v11784_v54 = vpop.f32.mrf.mxu0  ;;  %14958 = vmatprep.subr.bf16.mxu1 %v17701_v18 }
0x1942   : > { %v14883_v31 = vpop.f32.mrf.mxu0 }
0x1943   : > { %14959 = vmatpush3.bf16.msra.mxu1 %v16692_v45 }
0x1944   : > { %14960 = vmatprep.subr.bf16.mxu1 %v17701_v18 }
0x1947   : > { %14961 = vmatpush3.bf16.msra.mxu1 %v16694_v38 }
0x1948   : > { %14972 = vmatprep.subr.bf16.mxu1 %v17701_v18 }
0x195c   : > { %v11869_v39 = vpop.f32.mrf.mxu0 }
0x195d   : > { %v11870_v7 = vadd.f32 %v11869_v39, %v11781_v29 }
0x195e   : > { %v14902_v44 = vpop.f32.mrf.mxu0 }
0x1960   : > { %v11872_v48 = vpop.f32.mrf.mxu0 }
0x1962   : > { %v14903_v49 = vpop.f32.mrf.mxu0 }
0x1964   : > { %v12076_v63 = vpop.f32.mrf.mxu0 }
0x1965   : > { %v12082_v50 = vpack.c.bf16 %v12076_v63, %v12076_v63 }
0x1966   : > { %v14934_v55 = vpop.f32.mrf.mxu0 }
0x1967   : > { %14963 = vmatmul.mubr.msk.bf16.vlgmr.msra.gmra.mxu1 %vm1961_vm0, %v12082_v50 }
0x1968   : > { %v12079_v10 = vpop.f32.mrf.mxu0  ;;  %14980 = vmatprep.mubr.msk.bf16.mxu1 %vm17702_vm2, %v17701_v18  ;;  %14973 = vmatpush3.bf16.msra.mxu1 %v16696_v0 }
0x1969   : > { %14974 = vmatprep.subr.bf16.mxu1 %v17701_v18 }
0x196a   : > { %v14935_v36 = vpop.f32.mrf.mxu0 }
0x196c   : > { %v12130_v47 = vpop.f32.mrf.mxu0  ;;  %14975 = vmatpush3.bf16.msra.mxu1 %v16697_v46 }
0x196d   : > { %v12136_v14 = vpack.c.bf16 %v12130_v47, %v12130_v47  ;;  %14976 = vmatprep.subr.bf16.mxu1 %v17701_v18 }
0x196e   : > { %v14940_v11 = vpop.f32.mrf.mxu0 }
0x196f   : > { %14951 = vmatmul.mubr.msk.bf16.vlgmr.msra.gmra.mxu0 %vm1961_vm0, %v12136_v14 }
0x1970   : > { %14967 = vmatpush3.bf16.msra.mxu0 %v19216_v43  ;;  %v12133_v37 = vpop.f32.mrf.mxu0  ;;  %14968 = vmatprep.mubr.msk.bf16.mxu0 %vm17702_vm2, %v17701_v18 }
0x1971   : > { %14977 = vmatpush3.bf16.msra.mxu1 %v16698_v62 }
0x1972   : > { %v14941_v42 = vpop.f32.mrf.mxu0  ;;  %14978 = vmatprep.subr.bf16.mxu1 %v17701_v18 }
0x1975   : > { %14979 = vmatpush3.bf16.msra.mxu1 %v16699_v2 }
0x1977   : > { %14969 = vmatmul.mubr.msk.bf16.vlgmr.msra.gmra.mxu0 %vm6708_vm9, %v14293_v61 }
0x19fa   : > { %v12020_v4 = vpop.f32.mrf.mxu1 }
0x19fb   : > { %v12026_v5 = vadd.f32 %v12020_v4, %v11870_v7 }
0x19fc   : > { %v14928_v6 = vpop.f32.mrf.mxu1 }
0x19fd   : > { %v12034_v41 = vadd.f32 %v14279_v26, %v12026_v5 }
0x19fe   : > { %v12023_v8 = vpop.f32.mrf.mxu1 }
0x19ff   : > { %v12035_v12 = vpack.c.bf16 %v12034_v41, %v12034_v41 }
0x1a00   : > { %v14929_v30 = vpop.f32.mrf.mxu1 }
0x1a01   : > { %12443 = vst [vmem:[%s1846_s28] sm:$0x3] %v12035_v12 }
0x1a27   : > { %v12274_v43 = vpop.f32.mrf.mxu1 }
0x1a29   : > { %v14964_v21 = vpop.f32.mrf.mxu1 }
0x1a2b   : > { %v12277_v40 = vpop.f32.mrf.mxu1 }
0x1a2d   : > { %v14965_v3 = vpop.f32.mrf.mxu1 }
0x1a2f   : > { %v12207_v27 = vpop.f32.mrf.mxu0 }
0x1a30   : > { %v12275_v18 = vadd.f32 %v12274_v43, %v12207_v27 }
0x1a31   : > { %v14952_v59 = vpop.f32.mrf.mxu0 }
0x1a33   : > { %v12210_v16 = vpop.f32.mrf.mxu0 }
0x1a35   : > { %v14953_v34 = vpop.f32.mrf.mxu0 }
0x1a37   : > { %v12319_v1 = vpop.f32.mrf.mxu0 }
0x1a38   : > { %v12325_v51 = vpack.c.bf16 %v12319_v1, %v12319_v1 }
0x1a39   : > { %v14970_v52 = vpop.f32.mrf.mxu0 }
0x1a3a   : > { %14981 = vmatmul.mubr.msk.bf16.vlgmr.msra.gmra.mxu1 %vm1961_vm0, %v12325_v51 }
0x1a3b   : > { %v12322_v28 = vpop.f32.mrf.mxu0 }
0x1a3d   : > { %v14971_v56 = vpop.f32.mrf.mxu0 }
0x1afa   : > { %v12396_v60 = vpop.f32.mrf.mxu1 }
0x1afb   : > { %v12402_v33 = vadd.f32 %v12396_v60, %v12275_v18 }
0x1afc   : > { %v14982_v25 = vpop.f32.mrf.mxu1 }
0x1afd   : > { %v12410_v32 = vadd.f32 %v14300_v24, %v12402_v33 }
0x1afe   : > { %v12399_v15 = vpop.f32.mrf.mxu1 }
0x1aff   : > { %v12411_v22 = vpack.c.bf16 %v12410_v32, %v12410_v32 }
0x1b00   : > { %v14983_v35 = vpop.f32.mrf.mxu1 }
0x1b01   : > { %12445 = vst.msk [vmem:[%s1849_s15] sm:$0x1] %vm12444_vm10, %v12411_v22 }
0x1b02 PF: > { %s120_s0 = sadd.s32 1, %s17610_s0  }
0x1b03   : > { %p117_p13 = scmp.ge.s32.totalorder %s120_s0, 4  }
0x1b05   :  { %119 = sbr.rel (!%p117_p13) target bundleno = 96 (0x60), region = 472 }
0x1b0a   :  { %12509 = vsyncpa [#allocation3], 1 }
0x1b0b   :  { %12511 = vsyncpa [#allocation3 + $0x1], 1 }
0x1b0c   :  { %12512 = vsyncpa [#allocation5], 1 }
0x1b0d   :  { %12513 = vsyncpa [#allocation8], 1 }
0x1b0e   :  { %12514 = vsyncpa [#allocation11], 1 }
0x1b0f   :  { %12515 = vsyncpa [#allocation14], 1 }
0x1b10   :  { %12516 = vsyncpa [#allocation17], 1 }
0x1b11   :  { %12517 = vsyncpa [#allocation20], 1 }
0x1b12   :  { %12518 = vsyncpa [#allocation23], 1 }
0x1b13   :  { %12519 = vsyncpa [#allocation26], 1 }
0x1b14   :  { %12520 = vsyncpa [#allocation29], 1 }
0x1b15   :  { %12521 = vsyncpa [#allocation32], 1 }
0x1b16   :  { %12522 = vsyncpa [#allocation35], 1 }
0x1b17   :  { %12523 = vsyncpa [#allocation38], 1 }
0x1b18   :  { %12524 = vsyncpa [#allocation41], 1 }
0x1b19   :  { %12525 = vsyncpa [#allocation44], 1 }
0x1b1a   :  { %12526 = vsyncpa [#allocation47], 1 }
0x1b1b   :  { %12527 = vsyncpa [#allocation50], 1 }
0x1b1c   :  { %12528 = vsyncpa [#allocation53], 1 }

</bundles_post_ra>
